<compile_context>
chip_gen: v6e
topology: v6e:2x2x1
jax: 0.10.0
libtpu: 0.0.40
codegen_flags: <defaults>
</compile_context>

<pallas_src>
import math
import numpy as np
import jax
import jax.numpy as jnp
from jax import lax
from jax.experimental import pallas as pl
from jax.experimental.pallas import tpu as pltpu

LANE = 128
SUBLANE = 8
_T_UNROLL_MAX = 16          # fully unroll the time loop up to this T
_GATE_ORDER = (0, 1, 3, 2)  # dst slab -> src PyTorch gate: [i, f, o, g]


def _round_up(x, m):
    return ((x + m - 1) // m) * m


def _pick_b_blk(batch, target=256):
    """Batch rows per grid step (multiple of 16: two 8-row streams).

    target=256 fills the v6e/v7x MXU; use 128 on v5e.  Mid-sized batches are
    split into >=2 blocks so dimension_semantics=("parallel",) can use both
    v7x TensorCores.
    """
    min_blk = 2 * SUBLANE
    target = max(min_blk, _round_up(target, min_blk))
    b = _round_up(max(batch, 1), min_blk)
    if b <= target:
        if b >= 4 * min_blk:
            return _round_up((b + 1) // 2, min_blk)   # 2 blocks -> 2 TCs
        return b
    return target


# -----------------------------------------------------------------------------
# Fused Pallas kernel: stacked LSTM + Linear + LogSoftmax
# -----------------------------------------------------------------------------
def _make_fused_kernel(num_layer, T, b_blk, Hh):
    """Ref layout per batch block:
      x_ref                : (T, b_blk, Din)
      per layer l: wih_l   : (Din_l, 4*Hh)   W_ih^T, gate-reordered/padded
                   whh_l   : (Hh,    4*Hh)   W_hh^T, gate-reordered/padded
                   b_l     : (1,     4*Hh)   b_ih + b_hh (f32)
      wc_ref               : (Hh, Cp)        classifier W^T (zero-padded)
      bc_ref               : (1,  Cp)        bias, -1e30 on padded classes (f32)
      out_ref              : (b_blk, Cp)     log-probabilities
      gx_ref  (scratch)    : (T, b_blk, 4*Hh) hoisted input projection (f32)
      seq_ref (scratch)    : (T, b_blk, Hh)   previous layer's hidden sequence
    """
    assert b_blk % (2 * SUBLANE) == 0, "batch block must hold two 8-row streams"
    G = 4 * Hh
    bs = b_blk // 2  # rows per independent stream

    def kernel(*refs):
        x_ref = refs[0]
        lstm_refs = refs[1:1 + 3 * num_layer]
        wc_ref = refs[1 + 3 * num_layer]
        bc_ref = refs[2 + 3 * num_layer]
        out_ref = refs[3 + 3 * num_layer]
        gx_ref = refs[4 + 3 * num_layer]
        seq_ref = refs[5 + 3 * num_layer]

        h_final = None
        for layer in range(num_layer):
            wih_ref = lstm_refs[3 * layer]
            whh_ref = lstm_refs[3 * layer + 1]
            b_ref = lstm_refs[3 * layer + 2]
            last_layer = layer == num_layer - 1

            # ---- hoisted input projection: ONE big matmul per layer ----------
            inp = x_ref[...] if layer == 0 else seq_ref[...]
            d_in = inp.shape[-1]
            gx = jnp.dot(
                inp.reshape(T * b_blk, d_in).astype(wih_ref.dtype),
                wih_ref[...],                      # point-of-use weight load
                preferred_element_type=jnp.float32,
            ) + b_ref[...]
            gx_ref[...] = gx.reshape(T, b_blk, G)

            # ---- serial recurrence: only h @ W_hh on the critical path --------
            def cell(pre, h, c):
                # Point-of-use W_hh load: vld scheduled next to the vmatmul,
                # no weight pinned in vregs across the unrolled steps.
                gates = pre + jnp.dot(
                    h.astype(whh_ref.dtype), whh_ref[...],
                    preferred_element_type=jnp.float32)
                # Gate slabs are [i | f | o | g]: one fused sigmoid + one tanh,
                # all slices at 128-lane-aligned offsets (Hh multiple of 128).
                sig = jax.nn.sigmoid(gates[:, :3 * Hh])
                g_g = jnp.tanh(gates[:, 3 * Hh:])
                i_g = sig[:, 0 * Hh:1 * Hh]
                f_g = sig[:, 1 * Hh:2 * Hh]
                o_g = sig[:, 2 * Hh:3 * Hh]
                c_n = f_g * c + i_g * g_g
                h_n = o_g * jnp.tanh(c_n)
                return h_n, c_n

            def step(t, carry):
                # Two independent batch streams: stream 1 fills the MXU/EUP/VPU
                # slots exposed by stream 0's h_t -> gates_{t+1} latency chain.
                h0, c0, h1, c1 = carry
                pre = gx_ref[t]
                h0, c0 = cell(pre[:bs], h0, c0)
                h1, c1 = cell(pre[bs:], h1, c1)
                if not last_layer:
                    seq_ref[t] = jnp.concatenate([h0, h1], axis=0).astype(seq_ref.dtype)
                return h0, c0, h1, c1

            z = jnp.zeros((bs, Hh), jnp.float32)
            carry = (z, z, z, z)
            if T <= _T_UNROLL_MAX:
                for t in range(T):                 # fully unrolled: T is small
                    carry = step(t, carry)
            else:
                # Large T: bounded live ranges, LLO keeps scheduling visibility.
                carry = lax.fori_loop(0, T, step, carry, unroll=4)
            h_final = (carry[0], carry[2])

        # ---- classifier + stable log_softmax on the final hidden state -------
        h_last = jnp.concatenate(h_final, axis=0)              # (b_blk, Hh)
        scores = jnp.dot(
            h_last.astype(wc_ref.dtype), wc_ref[...],
            preferred_element_type=jnp.float32,
        ) + bc_ref[...]
        m = jnp.max(scores, axis=1, keepdims=True)
        s = scores - m
        lse = jnp.log(jnp.sum(jnp.exp(s), axis=1, keepdims=True))
        out_ref[...] = s - lse                                  # lane-dense store

    return kernel


def _fused_forward(x_tbd, prep, b_blk):
    """x_tbd: (T, Bp, Din) float32, Bp a multiple of b_blk."""
    T, Bp, Din = x_tbd.shape
    num_layer = len(prep["lstm"])
    Hh, Cp = prep["Hh"], prep["Cp"]
    seq_dtype = prep["mm_dtype"]
    single_buf = bool(prep.get("single_buffer_weights", False))
    grid = (Bp // b_blk,)

    def weight_spec(shape):
        if single_buf:
            # v7x VMEM saver: weights never change across batch blocks, so a
            # single VMEM copy (no double-buffering) is enough.
            return pl.BlockSpec(shape, lambda i: (0, 0), pipeline_mode=pl.Buffered(1))
        return pl.BlockSpec(shape, lambda i: (0, 0))

    args = [x_tbd]
    in_specs = [pl.BlockSpec((T, b_blk, Din), lambda i: (0, i, 0))]
    for (wih_p, whh_p, b_p) in prep["lstm"]:
        args += [wih_p, whh_p, b_p]
        in_specs += [weight_spec(wih_p.shape), weight_spec(whh_p.shape),
                     weight_spec(b_p.shape)]
    wc_p, bc_p = prep["classifier"]
    args += [wc_p, bc_p]
    in_specs += [weight_spec(wc_p.shape), weight_spec(bc_p.shape)]

    kernel = _make_fused_kernel(num_layer, T, b_blk, Hh)

    # VMEM budget: block inputs/outputs are double-buffered, scratch is not.
    nbytes = lambda a: int(a.size) * a.dtype.itemsize
    w_bytes = sum(nbytes(a) for a in args[1:])
    x_blk_bytes = T * b_blk * _round_up(Din, LANE) * 4
    gx_bytes = T * b_blk * 4 * Hh * 4
    seq_bytes = T * b_blk * Hh * np.dtype(seq_dtype).itemsize
    out_bytes = b_blk * Cp * 4
    est = 2 * (x_blk_bytes + w_bytes + out_bytes) + gx_bytes + seq_bytes
    vmem_limit = int(min(64 << 20, max(32 << 20, 2 * est)))

    return pl.pallas_call(
        kernel,
        out_shape=jax.ShapeDtypeStruct((Bp, Cp), jnp.float32),
        grid=grid,
        in_specs=in_specs,
        out_specs=pl.BlockSpec((b_blk, Cp), lambda i: (i, 0)),
        scratch_shapes=[
            pltpu.VMEM((T, b_blk, 4 * Hh), jnp.float32),  # hoisted gate proj.
            pltpu.VMEM((T, b_blk, Hh), seq_dtype),        # inter-layer hidden seq
        ],
        compiler_params=pltpu.CompilerParams(
            dimension_semantics=("parallel",),            # batch blocks -> TCs
            vmem_limit_bytes=vmem_limit,
        ),
    )(*args)


# -----------------------------------------------------------------------------
# One-time parameter preparation (transpose + gate reorder/pad + bias fusion)
# -----------------------------------------------------------------------------
def prepare_params(params, hidden_dim, num_class, matmul_dtype=jnp.float32,
                   single_buffer_weights=False):
    H = hidden_dim
    Hh = _round_up(H, LANE)   # per-gate slab width == stored hidden width
    C = num_class
    Cp = _round_up(C, LANE)
    prep = {"H": H, "Hh": Hh, "C": C, "Cp": Cp,
            "mm_dtype": matmul_dtype,
            "single_buffer_weights": single_buffer_weights,
            "lstm": []}

    for li, (w_ih, w_hh, b_ih, b_hh) in enumerate(params["lstm"]):
        d_in = w_ih.shape[1]
        d_in_p = d_in if li == 0 else Hh  # layer>0 input is the padded hidden seq
        wih_t = jnp.transpose(w_ih)       # (d_in, 4H)
        whh_t = jnp.transpose(w_hh)       # (H,    4H)
        b = b_ih + b_hh                   # (4H,)
        wih_p = jnp.zeros((d_in_p, 4 * Hh), jnp.float32)
        whh_p = jnp.zeros((Hh, 4 * Hh), jnp.float32)
        b_p = jnp.zeros((1, 4 * Hh), jnp.float32)
        # Scatter gates into 128-aligned slabs, reordered to [i, f, o, g] so the
        # kernel runs one sigmoid over the first 3*Hh lanes and one tanh after.
        for dst, src in enumerate(_GATE_ORDER):
            wih_p = wih_p.at[:d_in, dst * Hh:dst * Hh + H].set(wih_t[:, src * H:(src + 1) * H])
            whh_p = whh_p.at[:H, dst * Hh:dst * Hh + H].set(whh_t[:, src * H:(src + 1) * H])
            b_p = b_p.at[0, dst * Hh:dst * Hh + H].set(b[src * H:(src + 1) * H])
        prep["lstm"].append(
            (wih_p.astype(matmul_dtype), whh_p.astype(matmul_dtype), b_p))  # biases stay f32

    wc, bc = params["classifier"]
    wc_p = jnp.zeros((Hh, Cp), jnp.float32).at[:H, :C].set(jnp.transpose(wc))
    # Padded class columns get a huge negative bias so they vanish in softmax.
    # bc_p must stay f32 (never cast to fp16/fp8: -1e30 would overflow).
    bc_p = jnp.full((1, Cp), -1e30, jnp.float32).at[0, :C].set(bc)
    prep["classifier"] = (wc_p.astype(matmul_dtype), bc_p)
    return prep


# -----------------------------------------------------------------------------
# Forward pass (matches LSTM_classify.forward)
# -----------------------------------------------------------------------------
def lstm_classify_forward(x, prep, b_blk=None):
    if x.ndim == 4 and x.shape[1] == 1:
        x = x[:, 0]                              # squeeze(1)
    x = x.astype(jnp.float32)
    B, T, _ = x.shape
    if b_blk is None:
        b_blk = _pick_b_blk(B)
    Bp = _round_up(B, b_blk)
    if Bp != B:
        x = jnp.pad(x, ((0, Bp - B), (0, 0), (0, 0)))
    x_tbd = jnp.transpose(x, (1, 0, 2))          # (T, Bp, Din), time-major
    out = _fused_forward(x_tbd, prep, b_blk)     # (Bp, Cp)
    return out[:B, :prep["C"]]


# -----------------------------------------------------------------------------
# Deterministic parameter init (PyTorch default U(-1/sqrt(H), 1/sqrt(H)))
# -----------------------------------------------------------------------------
def init_params(key, input_dim, hidden_dim, num_class, num_layer):
    k = 1.0 / math.sqrt(hidden_dim)
    params = {"lstm": []}
    for layer in range(num_layer):
        d_in = input_dim if layer == 0 else hidden_dim
        key, k1, k2, k3, k4 = jax.random.split(key, 5)
        w_ih = jax.random.uniform(k1, (4 * hidden_dim, d_in), jnp.float32, -k, k)
        w_hh = jax.random.uniform(k2, (4 * hidden_dim, hidden_dim), jnp.float32, -k, k)
        b_ih = jax.random.uniform(k3, (4 * hidden_dim,), jnp.float32, -k, k)
        b_hh = jax.random.uniform(k4, (4 * hidden_dim,), jnp.float32, -k, k)
        params["lstm"].append((w_ih, w_hh, b_ih, b_hh))
    key, k1, k2 = jax.random.split(key, 3)
    wc = jax.random.uniform(k1, (num_class, hidden_dim), jnp.float32, -k, k)
    bc = jax.random.uniform(k2, (num_class,), jnp.float32, -k, k)
    params["classifier"] = (wc, bc)
    return params


# -----------------------------------------------------------------------------
# Pure-JAX reference (for correctness check)
# -----------------------------------------------------------------------------
def reference_forward(x, params):
    if x.ndim == 4 and x.shape[1] == 1:
        x = x[:, 0]
    x = x.astype(jnp.float32)
    B, T, _ = x.shape
    seq = x
    for (w_ih, w_hh, b_ih, b_hh) in params["lstm"]:
        H = w_hh.shape[1]
        h = jnp.zeros((B, H), jnp.float32)
        c = jnp.zeros((B, H), jnp.float32)
        outs = []
        for t in range(T):
            gates = seq[:, t, :] @ w_ih.T + b_ih + h @ w_hh.T + b_hh
            i_g = jax.nn.sigmoid(gates[:, 0 * H:1 * H])
            f_g = jax.nn.sigmoid(gates[:, 1 * H:2 * H])
            g_g = jnp.tanh(gates[:, 2 * H:3 * H])
            o_g = jax.nn.sigmoid(gates[:, 3 * H:4 * H])
            c = f_g * c + i_g * g_g
            h = o_g * jnp.tanh(c)
            outs.append(h)
        seq = jnp.stack(outs, axis=1)
    h_last = seq[:, -1, :]
    wc, bc = params["classifier"]
    scores = h_last @ wc.T + bc
    return jax.nn.log_softmax(scores, axis=1)


# -----------------------------------------------------------------------------
if __name__ == "__main__":
    B, T = 2, 8
    input_dim, hidden_dim, num_class, num_layer = 16, 32, 4, 2

    key = jax.random.PRNGKey(0)
    key, xk, pk = jax.random.split(key, 3)
    # 4-D input with a singleton channel dim, exercising the squeeze(1) branch.
    x = jax.random.normal(xk, (B, 1, T, input_dim), jnp.float32)
    params = init_params(pk, input_dim, hidden_dim, num_class, num_layer)

    # f32 matmul path: used for the bit-level parity check vs. the reference.
    prep32 = prepare_params(params, hidden_dim, num_class, matmul_dtype=jnp.float32)
    fwd32 = jax.jit(lambda inp: lstm_classify_forward(inp, prep32))
    out32 = jax.block_until_ready(fwd32(x))

    ref = jax.block_until_ready(reference_forward(x, params))
    np.testing.assert_allclose(np.asarray(out32), np.asarray(ref), rtol=1e-3, atol=1e-3)

    # bf16 matmul-operand path (production default on v5e/v6e/v7x): 2x MXU rate
    # and half the weight bytes; gates/cell state stay f32, so only a sanity
    # check here (parity tolerance vs. the f32 reference is looser by design).
    prep16 = prepare_params(params, hidden_dim, num_class, matmul_dtype=jnp.bfloat16)
    fwd16 = jax.jit(lambda inp: lstm_classify_forward(inp, prep16))
    out16 = jax.block_until_ready(fwd16(x))
    assert np.all(np.isfinite(np.asarray(out16)))

    print("KERNEL_OK")
</pallas_src>

<mosaic_0001>
module attributes {stable_mosaic.version = 11 : i64} {
  func.func @kernel(%arg0: i32, %arg1: memref<8x16x16xf32, #tpu.memory_space<vmem>>, %arg2: memref<16x512xf32, #tpu.memory_space<vmem>>, %arg3: memref<128x512xf32, #tpu.memory_space<vmem>>, %arg4: memref<1x512xf32, #tpu.memory_space<vmem>>, %arg5: memref<128x512xf32, #tpu.memory_space<vmem>>, %arg6: memref<128x512xf32, #tpu.memory_space<vmem>>, %arg7: memref<1x512xf32, #tpu.memory_space<vmem>>, %arg8: memref<128x128xf32, #tpu.memory_space<vmem>>, %arg9: memref<1x128xf32, #tpu.memory_space<vmem>>, %arg10: memref<16x128xf32, #tpu.memory_space<vmem>>, %arg11: memref<8x16x512xf32, #tpu.memory_space<vmem>>, %arg12: memref<8x16x128xf32, #tpu.memory_space<vmem>>) attributes {dimension_semantics = [#tpu.dimension_semantics<parallel>], iteration_bounds = array<i64: 1>, scalar_prefetch = 0 : i64, scratch_operands = 2 : i64, tpu.core_type = #tpu.core_type<tc>, window_params = [{transform_indices = @transform_0, window_bounds = array<i64: 8, 16, 16>}, {pipeline_mode = #tpu.pipeline_mode<synchronous>, transform_indices = @transform_1, window_bounds = array<i64: 16, 512>}, {pipeline_mode = #tpu.pipeline_mode<synchronous>, transform_indices = @transform_2, window_bounds = array<i64: 128, 512>}, {pipeline_mode = #tpu.pipeline_mode<synchronous>, transform_indices = @transform_3, window_bounds = array<i64: 1, 512>}, {pipeline_mode = #tpu.pipeline_mode<synchronous>, transform_indices = @transform_4, window_bounds = array<i64: 128, 512>}, {pipeline_mode = #tpu.pipeline_mode<synchronous>, transform_indices = @transform_5, window_bounds = array<i64: 128, 512>}, {pipeline_mode = #tpu.pipeline_mode<synchronous>, transform_indices = @transform_6, window_bounds = array<i64: 1, 512>}, {pipeline_mode = #tpu.pipeline_mode<synchronous>, transform_indices = @transform_7, window_bounds = array<i64: 128, 128>}, {pipeline_mode = #tpu.pipeline_mode<synchronous>, transform_indices = @transform_8, window_bounds = array<i64: 1, 128>}, {transform_indices = @transform_9, window_bounds = array<i64: 16, 128>}]} {
    %c0 = arith.constant 0 : index
    %c0_0 = arith.constant 0 : index
    %c0_1 = arith.constant 0 : index
    %0 = vector.load %arg1[%c0, %c0_0, %c0_1] : memref<8x16x16xf32, #tpu.memory_space<vmem>>, vector<8x16x16xf32>
    %1 = vector.shape_cast %0 : vector<8x16x16xf32> to vector<128x16xf32>
    %c0_2 = arith.constant 0 : index
    %c0_3 = arith.constant 0 : index
    %2 = vector.load %arg2[%c0_2, %c0_3] : memref<16x512xf32, #tpu.memory_space<vmem>>, vector<16x512xf32>
    %cst = arith.constant dense<0.000000e+00> : vector<128x512xf32>
    %3 = tpu.matmul %1, %2, %cst {dimension_numbers = #tpu.dot_dimension_numbers<[1], [0], [0], [1], [0, 0, 1, 1], [], []>} : vector<128x16xf32>, vector<16x512xf32>, vector<128x512xf32> -> vector<128x512xf32>
    %c0_4 = arith.constant 0 : index
    %c0_5 = arith.constant 0 : index
    %4 = vector.load %arg4[%c0_4, %c0_5] : memref<1x512xf32, #tpu.memory_space<vmem>>, vector<1x512xf32>
    %5 = vector.broadcast %4 : vector<1x512xf32> to vector<128x512xf32>
    %6 = arith.addf %3, %5 : vector<128x512xf32>
    %7 = vector.shape_cast %6 : vector<128x512xf32> to vector<8x16x512xf32>
    %c0_6 = arith.constant 0 : index
    %c0_7 = arith.constant 0 : index
    %c0_8 = arith.constant 0 : index
    %8 = vector.load %arg11[%c0_6, %c0_7, %c0_8] : memref<8x16x512xf32, #tpu.memory_space<vmem>>, vector<8x16x512xf32>
    tpu.vector_store %arg11[%c0_6, %c0_7, %c0_8], %7 {strides = array<i32>} : memref<8x16x512xf32, #tpu.memory_space<vmem>>, vector<8x16x512xf32>,
    %cst_9 = arith.constant 0.000000e+00 : f32
    %9 = vector.broadcast %cst_9 : f32 to vector<8x128xf32>
    %c0_10 = arith.constant 0 : index
    %c0_11 = arith.constant 0 : index
    %c0_12 = arith.constant 0 : index
    %10 = vector.load %arg11[%c0_10, %c0_11, %c0_12] : memref<8x16x512xf32, #tpu.memory_space<vmem>>, vector<1x16x512xf32>
    %11 = vector.shape_cast %10 : vector<1x16x512xf32> to vector<16x512xf32>
    %12 = vector.extract_strided_slice %11 {offsets = [0, 0], sizes = [8, 512], strides = [1, 1]} : vector<16x512xf32> to vector<8x512xf32>
    %c0_13 = arith.constant 0 : index
    %c0_14 = arith.constant 0 : index
    %13 = vector.load %arg3[%c0_13, %c0_14] : memref<128x512xf32, #tpu.memory_space<vmem>>, vector<128x512xf32>
    %cst_15 = arith.constant dense<0.000000e+00> : vector<8x512xf32>
    %14 = tpu.matmul %9, %13, %cst_15 {dimension_numbers = #tpu.dot_dimension_numbers<[1], [0], [0], [1], [0, 0, 1, 1], [], []>} : vector<8x128xf32>, vector<128x512xf32>, vector<8x512xf32> -> vector<8x512xf32>
    %15 = arith.addf %12, %14 : vector<8x512xf32>
    %16 = vector.extract_strided_slice %15 {offsets = [0, 0], sizes = [8, 384], strides = [1, 1]} : vector<8x512xf32> to vector<8x384xf32>
    %17 = arith.negf %16 : vector<8x384xf32>
    %18 = math.exp %17 : vector<8x384xf32>
    %cst_16 = arith.constant 1.000000e+00 : f32
    %19 = vector.broadcast %cst_16 : f32 to vector<8x384xf32>
    %20 = arith.addf %19, %18 : vector<8x384xf32>
    %21 = arith.divf %19, %20 : vector<8x384xf32>
    %22 = vector.extract_strided_slice %15 {offsets = [0, 384], sizes = [8, 128], strides = [1, 1]} : vector<8x512xf32> to vector<8x128xf32>
    %23 = math.tanh %22 : vector<8x128xf32>
    %24 = vector.extract_strided_slice %21 {offsets = [0, 0], sizes = [8, 128], strides = [1, 1]} : vector<8x384xf32> to vector<8x128xf32>
    %25 = vector.extract_strided_slice %21 {offsets = [0, 128], sizes = [8, 128], strides = [1, 1]} : vector<8x384xf32> to vector<8x128xf32>
    %26 = vector.extract_strided_slice %21 {offsets = [0, 256], sizes = [8, 128], strides = [1, 1]} : vector<8x384xf32> to vector<8x128xf32>
    %27 = arith.mulf %25, %9 : vector<8x128xf32>
    %28 = arith.mulf %24, %23 : vector<8x128xf32>
    %29 = arith.addf %27, %28 : vector<8x128xf32>
    %30 = math.tanh %29 : vector<8x128xf32>
    %31 = arith.mulf %26, %30 : vector<8x128xf32>
    %32 = vector.extract_strided_slice %11 {offsets = [8, 0], sizes = [8, 512], strides = [1, 1]} : vector<16x512xf32> to vector<8x512xf32>
    %c0_17 = arith.constant 0 : index
    %c0_18 = arith.constant 0 : index
    %33 = vector.load %arg3[%c0_17, %c0_18] : memref<128x512xf32, #tpu.memory_space<vmem>>, vector<128x512xf32>
    %cst_19 = arith.constant dense<0.000000e+00> : vector<8x512xf32>
    %34 = tpu.matmul %9, %33, %cst_19 {dimension_numbers = #tpu.dot_dimension_numbers<[1], [0], [0], [1], [0, 0, 1, 1], [], []>} : vector<8x128xf32>, vector<128x512xf32>, vector<8x512xf32> -> vector<8x512xf32>
    %35 = arith.addf %32, %34 : vector<8x512xf32>
    %36 = vector.extract_strided_slice %35 {offsets = [0, 0], sizes = [8, 384], strides = [1, 1]} : vector<8x512xf32> to vector<8x384xf32>
    %37 = arith.negf %36 : vector<8x384xf32>
    %38 = math.exp %37 : vector<8x384xf32>
    %cst_20 = arith.constant 1.000000e+00 : f32
    %39 = vector.broadcast %cst_20 : f32 to vector<8x384xf32>
    %40 = arith.addf %39, %38 : vector<8x384xf32>
    %41 = arith.divf %39, %40 : vector<8x384xf32>
    %42 = vector.extract_strided_slice %35 {offsets = [0, 384], sizes = [8, 128], strides = [1, 1]} : vector<8x512xf32> to vector<8x128xf32>
    %43 = math.tanh %42 : vector<8x128xf32>
    %44 = vector.extract_strided_slice %41 {offsets = [0, 0], sizes = [8, 128], strides = [1, 1]} : vector<8x384xf32> to vector<8x128xf32>
    %45 = vector.extract_strided_slice %41 {offsets = [0, 128], sizes = [8, 128], strides = [1, 1]} : vector<8x384xf32> to vector<8x128xf32>
    %46 = vector.extract_strided_slice %41 {offsets = [0, 256], sizes = [8, 128], strides = [1, 1]} : vector<8x384xf32> to vector<8x128xf32>
    %47 = arith.mulf %45, %9 : vector<8x128xf32>
    %48 = arith.mulf %44, %43 : vector<8x128xf32>
    %49 = arith.addf %47, %48 : vector<8x128xf32>
    %50 = math.tanh %49 : vector<8x128xf32>
    %51 = arith.mulf %46, %50 : vector<8x128xf32>
    %52 = tpu.concatenate %31, %51 in 0 : vector<8x128xf32>, vector<8x128xf32> -> vector<16x128xf32>
    %c0_21 = arith.constant 0 : index
    %c0_22 = arith.constant 0 : index
    %c0_23 = arith.constant 0 : index
    %53 = vector.load %arg12[%c0_21, %c0_22, %c0_23] : memref<8x16x128xf32, #tpu.memory_space<vmem>>, vector<1x16x128xf32>
    %54 = vector.shape_cast %53 : vector<1x16x128xf32> to vector<16x128xf32>
    %55 = vector.shape_cast %52 : vector<16x128xf32> to vector<1x16x128xf32>
    tpu.vector_store %arg12[%c0_21, %c0_22, %c0_23], %55 {strides = array<i32>} : memref<8x16x128xf32, #tpu.memory_space<vmem>>, vector<1x16x128xf32>,
    %c1 = arith.constant 1 : index
    %c0_24 = arith.constant 0 : index
    %c0_25 = arith.constant 0 : index
    %56 = vector.load %arg11[%c1, %c0_24, %c0_25] : memref<8x16x512xf32, #tpu.memory_space<vmem>>, vector<1x16x512xf32>
    %57 = vector.shape_cast %56 : vector<1x16x512xf32> to vector<16x512xf32>
    %58 = vector.extract_strided_slice %57 {offsets = [0, 0], sizes = [8, 512], strides = [1, 1]} : vector<16x512xf32> to vector<8x512xf32>
    %c0_26 = arith.constant 0 : index
    %c0_27 = arith.constant 0 : index
    %59 = vector.load %arg3[%c0_26, %c0_27] : memref<128x512xf32, #tpu.memory_space<vmem>>, vector<128x512xf32>
    %cst_28 = arith.constant dense<0.000000e+00> : vector<8x512xf32>
    %60 = tpu.matmul %31, %59, %cst_28 {dimension_numbers = #tpu.dot_dimension_numbers<[1], [0], [0], [1], [0, 0, 1, 1], [], []>} : vector<8x128xf32>, vector<128x512xf32>, vector<8x512xf32> -> vector<8x512xf32>
    %61 = arith.addf %58, %60 : vector<8x512xf32>
    %62 = vector.extract_strided_slice %61 {offsets = [0, 0], sizes = [8, 384], strides = [1, 1]} : vector<8x512xf32> to vector<8x384xf32>
    %63 = arith.negf %62 : vector<8x384xf32>
    %64 = math.exp %63 : vector<8x384xf32>
    %cst_29 = arith.constant 1.000000e+00 : f32
    %65 = vector.broadcast %cst_29 : f32 to vector<8x384xf32>
    %66 = arith.addf %65, %64 : vector<8x384xf32>
    %67 = arith.divf %65, %66 : vector<8x384xf32>
    %68 = vector.extract_strided_slice %61 {offsets = [0, 384], sizes = [8, 128], strides = [1, 1]} : vector<8x512xf32> to vector<8x128xf32>
    %69 = math.tanh %68 : vector<8x128xf32>
    %70 = vector.extract_strided_slice %67 {offsets = [0, 0], sizes = [8, 128], strides = [1, 1]} : vector<8x384xf32> to vector<8x128xf32>
    %71 = vector.extract_strided_slice %67 {offsets = [0, 128], sizes = [8, 128], strides = [1, 1]} : vector<8x384xf32> to vector<8x128xf32>
    %72 = vector.extract_strided_slice %67 {offsets = [0, 256], sizes = [8, 128], strides = [1, 1]} : vector<8x384xf32> to vector<8x128xf32>
    %73 = arith.mulf %71, %29 : vector<8x128xf32>
    %74 = arith.mulf %70, %69 : vector<8x128xf32>
    %75 = arith.addf %73, %74 : vector<8x128xf32>
    %76 = math.tanh %75 : vector<8x128xf32>
    %77 = arith.mulf %72, %76 : vector<8x128xf32>
    %78 = vector.extract_strided_slice %57 {offsets = [8, 0], sizes = [8, 512], strides = [1, 1]} : vector<16x512xf32> to vector<8x512xf32>
    %c0_30 = arith.constant 0 : index
    %c0_31 = arith.constant 0 : index
    %79 = vector.load %arg3[%c0_30, %c0_31] : memref<128x512xf32, #tpu.memory_space<vmem>>, vector<128x512xf32>
    %cst_32 = arith.constant dense<0.000000e+00> : vector<8x512xf32>
    %80 = tpu.matmul %51, %79, %cst_32 {dimension_numbers = #tpu.dot_dimension_numbers<[1], [0], [0], [1], [0, 0, 1, 1], [], []>} : vector<8x128xf32>, vector<128x512xf32>, vector<8x512xf32> -> vector<8x512xf32>
    %81 = arith.addf %78, %80 : vector<8x512xf32>
    %82 = vector.extract_strided_slice %81 {offsets = [0, 0], sizes = [8, 384], strides = [1, 1]} : vector<8x512xf32> to vector<8x384xf32>
    %83 = arith.negf %82 : vector<8x384xf32>
    %84 = math.exp %83 : vector<8x384xf32>
    %cst_33 = arith.constant 1.000000e+00 : f32
    %85 = vector.broadcast %cst_33 : f32 to vector<8x384xf32>
    %86 = arith.addf %85, %84 : vector<8x384xf32>
    %87 = arith.divf %85, %86 : vector<8x384xf32>
    %88 = vector.extract_strided_slice %81 {offsets = [0, 384], sizes = [8, 128], strides = [1, 1]} : vector<8x512xf32> to vector<8x128xf32>
    %89 = math.tanh %88 : vector<8x128xf32>
    %90 = vector.extract_strided_slice %87 {offsets = [0, 0], sizes = [8, 128], strides = [1, 1]} : vector<8x384xf32> to vector<8x128xf32>
    %91 = vector.extract_strided_slice %87 {offsets = [0, 128], sizes = [8, 128], strides = [1, 1]} : vector<8x384xf32> to vector<8x128xf32>
    %92 = vector.extract_strided_slice %87 {offsets = [0, 256], sizes = [8, 128], strides = [1, 1]} : vector<8x384xf32> to vector<8x128xf32>
    %93 = arith.mulf %91, %49 : vector<8x128xf32>
    %94 = arith.mulf %90, %89 : vector<8x128xf32>
    %95 = arith.addf %93, %94 : vector<8x128xf32>
    %96 = math.tanh %95 : vector<8x128xf32>
    %97 = arith.mulf %92, %96 : vector<8x128xf32>
    %98 = tpu.concatenate %77, %97 in 0 : vector<8x128xf32>, vector<8x128xf32> -> vector<16x128xf32>
    %c1_34 = arith.constant 1 : index
    %c0_35 = arith.constant 0 : index
    %c0_36 = arith.constant 0 : index
    %99 = vector.load %arg12[%c1_34, %c0_35, %c0_36] : memref<8x16x128xf32, #tpu.memory_space<vmem>>, vector<1x16x128xf32>
    %100 = vector.shape_cast %99 : vector<1x16x128xf32> to vector<16x128xf32>
    %101 = vector.shape_cast %98 : vector<16x128xf32> to vector<1x16x128xf32>
    tpu.vector_store %arg12[%c1_34, %c0_35, %c0_36], %101 {strides = array<i32>} : memref<8x16x128xf32, #tpu.memory_space<vmem>>, vector<1x16x128xf32>,
    %c2 = arith.constant 2 : index
    %c0_37 = arith.constant 0 : index
    %c0_38 = arith.constant 0 : index
    %102 = vector.load %arg11[%c2, %c0_37, %c0_38] : memref<8x16x512xf32, #tpu.memory_space<vmem>>, vector<1x16x512xf32>
    %103 = vector.shape_cast %102 : vector<1x16x512xf32> to vector<16x512xf32>
    %104 = vector.extract_strided_slice %103 {offsets = [0, 0], sizes = [8, 512], strides = [1, 1]} : vector<16x512xf32> to vector<8x512xf32>
    %c0_39 = arith.constant 0 : index
    %c0_40 = arith.constant 0 : index
    %105 = vector.load %arg3[%c0_39, %c0_40] : memref<128x512xf32, #tpu.memory_space<vmem>>, vector<128x512xf32>
    %cst_41 = arith.constant dense<0.000000e+00> : vector<8x512xf32>
    %106 = tpu.matmul %77, %105, %cst_41 {dimension_numbers = #tpu.dot_dimension_numbers<[1], [0], [0], [1], [0, 0, 1, 1], [], []>} : vector<8x128xf32>, vector<128x512xf32>, vector<8x512xf32> -> vector<8x512xf32>
    %107 = arith.addf %104, %106 : vector<8x512xf32>
    %108 = vector.extract_strided_slice %107 {offsets = [0, 0], sizes = [8, 384], strides = [1, 1]} : vector<8x512xf32> to vector<8x384xf32>
    %109 = arith.negf %108 : vector<8x384xf32>
    %110 = math.exp %109 : vector<8x384xf32>
    %cst_42 = arith.constant 1.000000e+00 : f32
    %111 = vector.broadcast %cst_42 : f32 to vector<8x384xf32>
    %112 = arith.addf %111, %110 : vector<8x384xf32>
    %113 = arith.divf %111, %112 : vector<8x384xf32>
    %114 = vector.extract_strided_slice %107 {offsets = [0, 384], sizes = [8, 128], strides = [1, 1]} : vector<8x512xf32> to vector<8x128xf32>
    %115 = math.tanh %114 : vector<8x128xf32>
    %116 = vector.extract_strided_slice %113 {offsets = [0, 0], sizes = [8, 128], strides = [1, 1]} : vector<8x384xf32> to vector<8x128xf32>
    %117 = vector.extract_strided_slice %113 {offsets = [0, 128], sizes = [8, 128], strides = [1, 1]} : vector<8x384xf32> to vector<8x128xf32>
    %118 = vector.extract_strided_slice %113 {offsets = [0, 256], sizes = [8, 128], strides = [1, 1]} : vector<8x384xf32> to vector<8x128xf32>
    %119 = arith.mulf %117, %75 : vector<8x128xf32>
    %120 = arith.mulf %116, %115 : vector<8x128xf32>
    %121 = arith.addf %119, %120 : vector<8x128xf32>
    %122 = math.tanh %121 : vector<8x128xf32>
    %123 = arith.mulf %118, %122 : vector<8x128xf32>
    %124 = vector.extract_strided_slice %103 {offsets = [8, 0], sizes = [8, 512], strides = [1, 1]} : vector<16x512xf32> to vector<8x512xf32>
    %c0_43 = arith.constant 0 : index
    %c0_44 = arith.constant 0 : index
    %125 = vector.load %arg3[%c0_43, %c0_44] : memref<128x512xf32, #tpu.memory_space<vmem>>, vector<128x512xf32>
    %cst_45 = arith.constant dense<0.000000e+00> : vector<8x512xf32>
    %126 = tpu.matmul %97, %125, %cst_45 {dimension_numbers = #tpu.dot_dimension_numbers<[1], [0], [0], [1], [0, 0, 1, 1], [], []>} : vector<8x128xf32>, vector<128x512xf32>, vector<8x512xf32> -> vector<8x512xf32>
    %127 = arith.addf %124, %126 : vector<8x512xf32>
    %128 = vector.extract_strided_slice %127 {offsets = [0, 0], sizes = [8, 384], strides = [1, 1]} : vector<8x512xf32> to vector<8x384xf32>
    %129 = arith.negf %128 : vector<8x384xf32>
    %130 = math.exp %129 : vector<8x384xf32>
    %cst_46 = arith.constant 1.000000e+00 : f32
    %131 = vector.broadcast %cst_46 : f32 to vector<8x384xf32>
    %132 = arith.addf %131, %130 : vector<8x384xf32>
    %133 = arith.divf %131, %132 : vector<8x384xf32>
    %134 = vector.extract_strided_slice %127 {offsets = [0, 384], sizes = [8, 128], strides = [1, 1]} : vector<8x512xf32> to vector<8x128xf32>
    %135 = math.tanh %134 : vector<8x128xf32>
    %136 = vector.extract_strided_slice %133 {offsets = [0, 0], sizes = [8, 128], strides = [1, 1]} : vector<8x384xf32> to vector<8x128xf32>
    %137 = vector.extract_strided_slice %133 {offsets = [0, 128], sizes = [8, 128], strides = [1, 1]} : vector<8x384xf32> to vector<8x128xf32>
    %138 = vector.extract_strided_slice %133 {offsets = [0, 256], sizes = [8, 128], strides = [1, 1]} : vector<8x384xf32> to vector<8x128xf32>
    %139 = arith.mulf %137, %95 : vector<8x128xf32>
    %140 = arith.mulf %136, %135 : vector<8x128xf32>
    %141 = arith.addf %139, %140 : vector<8x128xf32>
    %142 = math.tanh %141 : vector<8x128xf32>
    %143 = arith.mulf %138, %142 : vector<8x128xf32>
    %144 = tpu.concatenate %123, %143 in 0 : vector<8x128xf32>, vector<8x128xf32> -> vector<16x128xf32>
    %c2_47 = arith.constant 2 : index
    %c0_48 = arith.constant 0 : index
    %c0_49 = arith.constant 0 : index
    %145 = vector.load %arg12[%c2_47, %c0_48, %c0_49] : memref<8x16x128xf32, #tpu.memory_space<vmem>>, vector<1x16x128xf32>
    %146 = vector.shape_cast %145 : vector<1x16x128xf32> to vector<16x128xf32>
    %147 = vector.shape_cast %144 : vector<16x128xf32> to vector<1x16x128xf32>
    tpu.vector_store %arg12[%c2_47, %c0_48, %c0_49], %147 {strides = array<i32>} : memref<8x16x128xf32, #tpu.memory_space<vmem>>, vector<1x16x128xf32>,
    %c3 = arith.constant 3 : index
    %c0_50 = arith.constant 0 : index
    %c0_51 = arith.constant 0 : index
    %148 = vector.load %arg11[%c3, %c0_50, %c0_51] : memref<8x16x512xf32, #tpu.memory_space<vmem>>, vector<1x16x512xf32>
    %149 = vector.shape_cast %148 : vector<1x16x512xf32> to vector<16x512xf32>
    %150 = vector.extract_strided_slice %149 {offsets = [0, 0], sizes = [8, 512], strides = [1, 1]} : vector<16x512xf32> to vector<8x512xf32>
    %c0_52 = arith.constant 0 : index
    %c0_53 = arith.constant 0 : index
    %151 = vector.load %arg3[%c0_52, %c0_53] : memref<128x512xf32, #tpu.memory_space<vmem>>, vector<128x512xf32>
    %cst_54 = arith.constant dense<0.000000e+00> : vector<8x512xf32>
    %152 = tpu.matmul %123, %151, %cst_54 {dimension_numbers = #tpu.dot_dimension_numbers<[1], [0], [0], [1], [0, 0, 1, 1], [], []>} : vector<8x128xf32>, vector<128x512xf32>, vector<8x512xf32> -> vector<8x512xf32>
    %153 = arith.addf %150, %152 : vector<8x512xf32>
    %154 = vector.extract_strided_slice %153 {offsets = [0, 0], sizes = [8, 384], strides = [1, 1]} : vector<8x512xf32> to vector<8x384xf32>
    %155 = arith.negf %154 : vector<8x384xf32>
    %156 = math.exp %155 : vector<8x384xf32>
    %cst_55 = arith.constant 1.000000e+00 : f32
    %157 = vector.broadcast %cst_55 : f32 to vector<8x384xf32>
    %158 = arith.addf %157, %156 : vector<8x384xf32>
    %159 = arith.divf %157, %158 : vector<8x384xf32>
    %160 = vector.extract_strided_slice %153 {offsets = [0, 384], sizes = [8, 128], strides = [1, 1]} : vector<8x512xf32> to vector<8x128xf32>
    %161 = math.tanh %160 : vector<8x128xf32>
    %162 = vector.extract_strided_slice %159 {offsets = [0, 0], sizes = [8, 128], strides = [1, 1]} : vector<8x384xf32> to vector<8x128xf32>
    %163 = vector.extract_strided_slice %159 {offsets = [0, 128], sizes = [8, 128], strides = [1, 1]} : vector<8x384xf32> to vector<8x128xf32>
    %164 = vector.extract_strided_slice %159 {offsets = [0, 256], sizes = [8, 128], strides = [1, 1]} : vector<8x384xf32> to vector<8x128xf32>
    %165 = arith.mulf %163, %121 : vector<8x128xf32>
    %166 = arith.mulf %162, %161 : vector<8x128xf32>
    %167 = arith.addf %165, %166 : vector<8x128xf32>
    %168 = math.tanh %167 : vector<8x128xf32>
    %169 = arith.mulf %164, %168 : vector<8x128xf32>
    %170 = vector.extract_strided_slice %149 {offsets = [8, 0], sizes = [8, 512], strides = [1, 1]} : vector<16x512xf32> to vector<8x512xf32>
    %c0_56 = arith.constant 0 : index
    %c0_57 = arith.constant 0 : index
    %171 = vector.load %arg3[%c0_56, %c0_57] : memref<128x512xf32, #tpu.memory_space<vmem>>, vector<128x512xf32>
    %cst_58 = arith.constant dense<0.000000e+00> : vector<8x512xf32>
    %172 = tpu.matmul %143, %171, %cst_58 {dimension_numbers = #tpu.dot_dimension_numbers<[1], [0], [0], [1], [0, 0, 1, 1], [], []>} : vector<8x128xf32>, vector<128x512xf32>, vector<8x512xf32> -> vector<8x512xf32>
    %173 = arith.addf %170, %172 : vector<8x512xf32>
    %174 = vector.extract_strided_slice %173 {offsets = [0, 0], sizes = [8, 384], strides = [1, 1]} : vector<8x512xf32> to vector<8x384xf32>
    %175 = arith.negf %174 : vector<8x384xf32>
    %176 = math.exp %175 : vector<8x384xf32>
    %cst_59 = arith.constant 1.000000e+00 : f32
    %177 = vector.broadcast %cst_59 : f32 to vector<8x384xf32>
    %178 = arith.addf %177, %176 : vector<8x384xf32>
    %179 = arith.divf %177, %178 : vector<8x384xf32>
    %180 = vector.extract_strided_slice %173 {offsets = [0, 384], sizes = [8, 128], strides = [1, 1]} : vector<8x512xf32> to vector<8x128xf32>
    %181 = math.tanh %180 : vector<8x128xf32>
    %182 = vector.extract_strided_slice %179 {offsets = [0, 0], sizes = [8, 128], strides = [1, 1]} : vector<8x384xf32> to vector<8x128xf32>
    %183 = vector.extract_strided_slice %179 {offsets = [0, 128], sizes = [8, 128], strides = [1, 1]} : vector<8x384xf32> to vector<8x128xf32>
    %184 = vector.extract_strided_slice %179 {offsets = [0, 256], sizes = [8, 128], strides = [1, 1]} : vector<8x384xf32> to vector<8x128xf32>
    %185 = arith.mulf %183, %141 : vector<8x128xf32>
    %186 = arith.mulf %182, %181 : vector<8x128xf32>
    %187 = arith.addf %185, %186 : vector<8x128xf32>
    %188 = math.tanh %187 : vector<8x128xf32>
    %189 = arith.mulf %184, %188 : vector<8x128xf32>
    %190 = tpu.concatenate %169, %189 in 0 : vector<8x128xf32>, vector<8x128xf32> -> vector<16x128xf32>
    %c3_60 = arith.constant 3 : index
    %c0_61 = arith.constant 0 : index
    %c0_62 = arith.constant 0 : index
    %191 = vector.load %arg12[%c3_60, %c0_61, %c0_62] : memref<8x16x128xf32, #tpu.memory_space<vmem>>, vector<1x16x128xf32>
    %192 = vector.shape_cast %191 : vector<1x16x128xf32> to vector<16x128xf32>
    %193 = vector.shape_cast %190 : vector<16x128xf32> to vector<1x16x128xf32>
    tpu.vector_store %arg12[%c3_60, %c0_61, %c0_62], %193 {strides = array<i32>} : memref<8x16x128xf32, #tpu.memory_space<vmem>>, vector<1x16x128xf32>,
    %c4 = arith.constant 4 : index
    %c0_63 = arith.constant 0 : index
    %c0_64 = arith.constant 0 : index
    %194 = vector.load %arg11[%c4, %c0_63, %c0_64] : memref<8x16x512xf32, #tpu.memory_space<vmem>>, vector<1x16x512xf32>
    %195 = vector.shape_cast %194 : vector<1x16x512xf32> to vector<16x512xf32>
    %196 = vector.extract_strided_slice %195 {offsets = [0, 0], sizes = [8, 512], strides = [1, 1]} : vector<16x512xf32> to vector<8x512xf32>
    %c0_65 = arith.constant 0 : index
    %c0_66 = arith.constant 0 : index
    %197 = vector.load %arg3[%c0_65, %c0_66] : memref<128x512xf32, #tpu.memory_space<vmem>>, vector<128x512xf32>
    %cst_67 = arith.constant dense<0.000000e+00> : vector<8x512xf32>
    %198 = tpu.matmul %169, %197, %cst_67 {dimension_numbers = #tpu.dot_dimension_numbers<[1], [0], [0], [1], [0, 0, 1, 1], [], []>} : vector<8x128xf32>, vector<128x512xf32>, vector<8x512xf32> -> vector<8x512xf32>
    %199 = arith.addf %196, %198 : vector<8x512xf32>
    %200 = vector.extract_strided_slice %199 {offsets = [0, 0], sizes = [8, 384], strides = [1, 1]} : vector<8x512xf32> to vector<8x384xf32>
    %201 = arith.negf %200 : vector<8x384xf32>
    %202 = math.exp %201 : vector<8x384xf32>
    %cst_68 = arith.constant 1.000000e+00 : f32
    %203 = vector.broadcast %cst_68 : f32 to vector<8x384xf32>
    %204 = arith.addf %203, %202 : vector<8x384xf32>
    %205 = arith.divf %203, %204 : vector<8x384xf32>
    %206 = vector.extract_strided_slice %199 {offsets = [0, 384], sizes = [8, 128], strides = [1, 1]} : vector<8x512xf32> to vector<8x128xf32>
    %207 = math.tanh %206 : vector<8x128xf32>
    %208 = vector.extract_strided_slice %205 {offsets = [0, 0], sizes = [8, 128], strides = [1, 1]} : vector<8x384xf32> to vector<8x128xf32>
    %209 = vector.extract_strided_slice %205 {offsets = [0, 128], sizes = [8, 128], strides = [1, 1]} : vector<8x384xf32> to vector<8x128xf32>
    %210 = vector.extract_strided_slice %205 {offsets = [0, 256], sizes = [8, 128], strides = [1, 1]} : vector<8x384xf32> to vector<8x128xf32>
    %211 = arith.mulf %209, %167 : vector<8x128xf32>
    %212 = arith.mulf %208, %207 : vector<8x128xf32>
    %213 = arith.addf %211, %212 : vector<8x128xf32>
    %214 = math.tanh %213 : vector<8x128xf32>
    %215 = arith.mulf %210, %214 : vector<8x128xf32>
    %216 = vector.extract_strided_slice %195 {offsets = [8, 0], sizes = [8, 512], strides = [1, 1]} : vector<16x512xf32> to vector<8x512xf32>
    %c0_69 = arith.constant 0 : index
    %c0_70 = arith.constant 0 : index
    %217 = vector.load %arg3[%c0_69, %c0_70] : memref<128x512xf32, #tpu.memory_space<vmem>>, vector<128x512xf32>
    %cst_71 = arith.constant dense<0.000000e+00> : vector<8x512xf32>
    %218 = tpu.matmul %189, %217, %cst_71 {dimension_numbers = #tpu.dot_dimension_numbers<[1], [0], [0], [1], [0, 0, 1, 1], [], []>} : vector<8x128xf32>, vector<128x512xf32>, vector<8x512xf32> -> vector<8x512xf32>
    %219 = arith.addf %216, %218 : vector<8x512xf32>
    %220 = vector.extract_strided_slice %219 {offsets = [0, 0], sizes = [8, 384], strides = [1, 1]} : vector<8x512xf32> to vector<8x384xf32>
    %221 = arith.negf %220 : vector<8x384xf32>
    %222 = math.exp %221 : vector<8x384xf32>
    %cst_72 = arith.constant 1.000000e+00 : f32
    %223 = vector.broadcast %cst_72 : f32 to vector<8x384xf32>
    %224 = arith.addf %223, %222 : vector<8x384xf32>
    %225 = arith.divf %223, %224 : vector<8x384xf32>
    %226 = vector.extract_strided_slice %219 {offsets = [0, 384], sizes = [8, 128], strides = [1, 1]} : vector<8x512xf32> to vector<8x128xf32>
    %227 = math.tanh %226 : vector<8x128xf32>
    %228 = vector.extract_strided_slice %225 {offsets = [0, 0], sizes = [8, 128], strides = [1, 1]} : vector<8x384xf32> to vector<8x128xf32>
    %229 = vector.extract_strided_slice %225 {offsets = [0, 128], sizes = [8, 128], strides = [1, 1]} : vector<8x384xf32> to vector<8x128xf32>
    %230 = vector.extract_strided_slice %225 {offsets = [0, 256], sizes = [8, 128], strides = [1, 1]} : vector<8x384xf32> to vector<8x128xf32>
    %231 = arith.mulf %229, %187 : vector<8x128xf32>
    %232 = arith.mulf %228, %227 : vector<8x128xf32>
    %233 = arith.addf %231, %232 : vector<8x128xf32>
    %234 = math.tanh %233 : vector<8x128xf32>
    %235 = arith.mulf %230, %234 : vector<8x128xf32>
    %236 = tpu.concatenate %215, %235 in 0 : vector<8x128xf32>, vector<8x128xf32> -> vector<16x128xf32>
    %c4_73 = arith.constant 4 : index
    %c0_74 = arith.constant 0 : index
    %c0_75 = arith.constant 0 : index
    %237 = vector.load %arg12[%c4_73, %c0_74, %c0_75] : memref<8x16x128xf32, #tpu.memory_space<vmem>>, vector<1x16x128xf32>
    %238 = vector.shape_cast %237 : vector<1x16x128xf32> to vector<16x128xf32>
    %239 = vector.shape_cast %236 : vector<16x128xf32> to vector<1x16x128xf32>
    tpu.vector_store %arg12[%c4_73, %c0_74, %c0_75], %239 {strides = array<i32>} : memref<8x16x128xf32, #tpu.memory_space<vmem>>, vector<1x16x128xf32>,
    %c5 = arith.constant 5 : index
    %c0_76 = arith.constant 0 : index
    %c0_77 = arith.constant 0 : index
    %240 = vector.load %arg11[%c5, %c0_76, %c0_77] : memref<8x16x512xf32, #tpu.memory_space<vmem>>, vector<1x16x512xf32>
    %241 = vector.shape_cast %240 : vector<1x16x512xf32> to vector<16x512xf32>
    %242 = vector.extract_strided_slice %241 {offsets = [0, 0], sizes = [8, 512], strides = [1, 1]} : vector<16x512xf32> to vector<8x512xf32>
    %c0_78 = arith.constant 0 : index
    %c0_79 = arith.constant 0 : index
    %243 = vector.load %arg3[%c0_78, %c0_79] : memref<128x512xf32, #tpu.memory_space<vmem>>, vector<128x512xf32>
    %cst_80 = arith.constant dense<0.000000e+00> : vector<8x512xf32>
    %244 = tpu.matmul %215, %243, %cst_80 {dimension_numbers = #tpu.dot_dimension_numbers<[1], [0], [0], [1], [0, 0, 1, 1], [], []>} : vector<8x128xf32>, vector<128x512xf32>, vector<8x512xf32> -> vector<8x512xf32>
    %245 = arith.addf %242, %244 : vector<8x512xf32>
    %246 = vector.extract_strided_slice %245 {offsets = [0, 0], sizes = [8, 384], strides = [1, 1]} : vector<8x512xf32> to vector<8x384xf32>
    %247 = arith.negf %246 : vector<8x384xf32>
    %248 = math.exp %247 : vector<8x384xf32>
    %cst_81 = arith.constant 1.000000e+00 : f32
    %249 = vector.broadcast %cst_81 : f32 to vector<8x384xf32>
    %250 = arith.addf %249, %248 : vector<8x384xf32>
    %251 = arith.divf %249, %250 : vector<8x384xf32>
    %252 = vector.extract_strided_slice %245 {offsets = [0, 384], sizes = [8, 128], strides = [1, 1]} : vector<8x512xf32> to vector<8x128xf32>
    %253 = math.tanh %252 : vector<8x128xf32>
    %254 = vector.extract_strided_slice %251 {offsets = [0, 0], sizes = [8, 128], strides = [1, 1]} : vector<8x384xf32> to vector<8x128xf32>
    %255 = vector.extract_strided_slice %251 {offsets = [0, 128], sizes = [8, 128], strides = [1, 1]} : vector<8x384xf32> to vector<8x128xf32>
    %256 = vector.extract_strided_slice %251 {offsets = [0, 256], sizes = [8, 128], strides = [1, 1]} : vector<8x384xf32> to vector<8x128xf32>
    %257 = arith.mulf %255, %213 : vector<8x128xf32>
    %258 = arith.mulf %254, %253 : vector<8x128xf32>
    %259 = arith.addf %257, %258 : vector<8x128xf32>
    %260 = math.tanh %259 : vector<8x128xf32>
    %261 = arith.mulf %256, %260 : vector<8x128xf32>
    %262 = vector.extract_strided_slice %241 {offsets = [8, 0], sizes = [8, 512], strides = [1, 1]} : vector<16x512xf32> to vector<8x512xf32>
    %c0_82 = arith.constant 0 : index
    %c0_83 = arith.constant 0 : index
    %263 = vector.load %arg3[%c0_82, %c0_83] : memref<128x512xf32, #tpu.memory_space<vmem>>, vector<128x512xf32>
    %cst_84 = arith.constant dense<0.000000e+00> : vector<8x512xf32>
    %264 = tpu.matmul %235, %263, %cst_84 {dimension_numbers = #tpu.dot_dimension_numbers<[1], [0], [0], [1], [0, 0, 1, 1], [], []>} : vector<8x128xf32>, vector<128x512xf32>, vector<8x512xf32> -> vector<8x512xf32>
    %265 = arith.addf %262, %264 : vector<8x512xf32>
    %266 = vector.extract_strided_slice %265 {offsets = [0, 0], sizes = [8, 384], strides = [1, 1]} : vector<8x512xf32> to vector<8x384xf32>
    %267 = arith.negf %266 : vector<8x384xf32>
    %268 = math.exp %267 : vector<8x384xf32>
    %cst_85 = arith.constant 1.000000e+00 : f32
    %269 = vector.broadcast %cst_85 : f32 to vector<8x384xf32>
    %270 = arith.addf %269, %268 : vector<8x384xf32>
    %271 = arith.divf %269, %270 : vector<8x384xf32>
    %272 = vector.extract_strided_slice %265 {offsets = [0, 384], sizes = [8, 128], strides = [1, 1]} : vector<8x512xf32> to vector<8x128xf32>
    %273 = math.tanh %272 : vector<8x128xf32>
    %274 = vector.extract_strided_slice %271 {offsets = [0, 0], sizes = [8, 128], strides = [1, 1]} : vector<8x384xf32> to vector<8x128xf32>
    %275 = vector.extract_strided_slice %271 {offsets = [0, 128], sizes = [8, 128], strides = [1, 1]} : vector<8x384xf32> to vector<8x128xf32>
    %276 = vector.extract_strided_slice %271 {offsets = [0, 256], sizes = [8, 128], strides = [1, 1]} : vector<8x384xf32> to vector<8x128xf32>
    %277 = arith.mulf %275, %233 : vector<8x128xf32>
    %278 = arith.mulf %274, %273 : vector<8x128xf32>
    %279 = arith.addf %277, %278 : vector<8x128xf32>
    %280 = math.tanh %279 : vector<8x128xf32>
    %281 = arith.mulf %276, %280 : vector<8x128xf32>
    %282 = tpu.concatenate %261, %281 in 0 : vector<8x128xf32>, vector<8x128xf32> -> vector<16x128xf32>
    %c5_86 = arith.constant 5 : index
    %c0_87 = arith.constant 0 : index
    %c0_88 = arith.constant 0 : index
    %283 = vector.load %arg12[%c5_86, %c0_87, %c0_88] : memref<8x16x128xf32, #tpu.memory_space<vmem>>, vector<1x16x128xf32>
    %284 = vector.shape_cast %283 : vector<1x16x128xf32> to vector<16x128xf32>
    %285 = vector.shape_cast %282 : vector<16x128xf32> to vector<1x16x128xf32>
    tpu.vector_store %arg12[%c5_86, %c0_87, %c0_88], %285 {strides = array<i32>} : memref<8x16x128xf32, #tpu.memory_space<vmem>>, vector<1x16x128xf32>,
    %c6 = arith.constant 6 : index
    %c0_89 = arith.constant 0 : index
    %c0_90 = arith.constant 0 : index
    %286 = vector.load %arg11[%c6, %c0_89, %c0_90] : memref<8x16x512xf32, #tpu.memory_space<vmem>>, vector<1x16x512xf32>
    %287 = vector.shape_cast %286 : vector<1x16x512xf32> to vector<16x512xf32>
    %288 = vector.extract_strided_slice %287 {offsets = [0, 0], sizes = [8, 512], strides = [1, 1]} : vector<16x512xf32> to vector<8x512xf32>
    %c0_91 = arith.constant 0 : index
    %c0_92 = arith.constant 0 : index
    %289 = vector.load %arg3[%c0_91, %c0_92] : memref<128x512xf32, #tpu.memory_space<vmem>>, vector<128x512xf32>
    %cst_93 = arith.constant dense<0.000000e+00> : vector<8x512xf32>
    %290 = tpu.matmul %261, %289, %cst_93 {dimension_numbers = #tpu.dot_dimension_numbers<[1], [0], [0], [1], [0, 0, 1, 1], [], []>} : vector<8x128xf32>, vector<128x512xf32>, vector<8x512xf32> -> vector<8x512xf32>
    %291 = arith.addf %288, %290 : vector<8x512xf32>
    %292 = vector.extract_strided_slice %291 {offsets = [0, 0], sizes = [8, 384], strides = [1, 1]} : vector<8x512xf32> to vector<8x384xf32>
    %293 = arith.negf %292 : vector<8x384xf32>
    %294 = math.exp %293 : vector<8x384xf32>
    %cst_94 = arith.constant 1.000000e+00 : f32
    %295 = vector.broadcast %cst_94 : f32 to vector<8x384xf32>
    %296 = arith.addf %295, %294 : vector<8x384xf32>
    %297 = arith.divf %295, %296 : vector<8x384xf32>
    %298 = vector.extract_strided_slice %291 {offsets = [0, 384], sizes = [8, 128], strides = [1, 1]} : vector<8x512xf32> to vector<8x128xf32>
    %299 = math.tanh %298 : vector<8x128xf32>
    %300 = vector.extract_strided_slice %297 {offsets = [0, 0], sizes = [8, 128], strides = [1, 1]} : vector<8x384xf32> to vector<8x128xf32>
    %301 = vector.extract_strided_slice %297 {offsets = [0, 128], sizes = [8, 128], strides = [1, 1]} : vector<8x384xf32> to vector<8x128xf32>
    %302 = vector.extract_strided_slice %297 {offsets = [0, 256], sizes = [8, 128], strides = [1, 1]} : vector<8x384xf32> to vector<8x128xf32>
    %303 = arith.mulf %301, %259 : vector<8x128xf32>
    %304 = arith.mulf %300, %299 : vector<8x128xf32>
    %305 = arith.addf %303, %304 : vector<8x128xf32>
    %306 = math.tanh %305 : vector<8x128xf32>
    %307 = arith.mulf %302, %306 : vector<8x128xf32>
    %308 = vector.extract_strided_slice %287 {offsets = [8, 0], sizes = [8, 512], strides = [1, 1]} : vector<16x512xf32> to vector<8x512xf32>
    %c0_95 = arith.constant 0 : index
    %c0_96 = arith.constant 0 : index
    %309 = vector.load %arg3[%c0_95, %c0_96] : memref<128x512xf32, #tpu.memory_space<vmem>>, vector<128x512xf32>
    %cst_97 = arith.constant dense<0.000000e+00> : vector<8x512xf32>
    %310 = tpu.matmul %281, %309, %cst_97 {dimension_numbers = #tpu.dot_dimension_numbers<[1], [0], [0], [1], [0, 0, 1, 1], [], []>} : vector<8x128xf32>, vector<128x512xf32>, vector<8x512xf32> -> vector<8x512xf32>
    %311 = arith.addf %308, %310 : vector<8x512xf32>
    %312 = vector.extract_strided_slice %311 {offsets = [0, 0], sizes = [8, 384], strides = [1, 1]} : vector<8x512xf32> to vector<8x384xf32>
    %313 = arith.negf %312 : vector<8x384xf32>
    %314 = math.exp %313 : vector<8x384xf32>
    %cst_98 = arith.constant 1.000000e+00 : f32
    %315 = vector.broadcast %cst_98 : f32 to vector<8x384xf32>
    %316 = arith.addf %315, %314 : vector<8x384xf32>
    %317 = arith.divf %315, %316 : vector<8x384xf32>
    %318 = vector.extract_strided_slice %311 {offsets = [0, 384], sizes = [8, 128], strides = [1, 1]} : vector<8x512xf32> to vector<8x128xf32>
    %319 = math.tanh %318 : vector<8x128xf32>
    %320 = vector.extract_strided_slice %317 {offsets = [0, 0], sizes = [8, 128], strides = [1, 1]} : vector<8x384xf32> to vector<8x128xf32>
    %321 = vector.extract_strided_slice %317 {offsets = [0, 128], sizes = [8, 128], strides = [1, 1]} : vector<8x384xf32> to vector<8x128xf32>
    %322 = vector.extract_strided_slice %317 {offsets = [0, 256], sizes = [8, 128], strides = [1, 1]} : vector<8x384xf32> to vector<8x128xf32>
    %323 = arith.mulf %321, %279 : vector<8x128xf32>
    %324 = arith.mulf %320, %319 : vector<8x128xf32>
    %325 = arith.addf %323, %324 : vector<8x128xf32>
    %326 = math.tanh %325 : vector<8x128xf32>
    %327 = arith.mulf %322, %326 : vector<8x128xf32>
    %328 = tpu.concatenate %307, %327 in 0 : vector<8x128xf32>, vector<8x128xf32> -> vector<16x128xf32>
    %c6_99 = arith.constant 6 : index
    %c0_100 = arith.constant 0 : index
    %c0_101 = arith.constant 0 : index
    %329 = vector.load %arg12[%c6_99, %c0_100, %c0_101] : memref<8x16x128xf32, #tpu.memory_space<vmem>>, vector<1x16x128xf32>
    %330 = vector.shape_cast %329 : vector<1x16x128xf32> to vector<16x128xf32>
    %331 = vector.shape_cast %328 : vector<16x128xf32> to vector<1x16x128xf32>
    tpu.vector_store %arg12[%c6_99, %c0_100, %c0_101], %331 {strides = array<i32>} : memref<8x16x128xf32, #tpu.memory_space<vmem>>, vector<1x16x128xf32>,
    %c7 = arith.constant 7 : index
    %c0_102 = arith.constant 0 : index
    %c0_103 = arith.constant 0 : index
    %332 = vector.load %arg11[%c7, %c0_102, %c0_103] : memref<8x16x512xf32, #tpu.memory_space<vmem>>, vector<1x16x512xf32>
    %333 = vector.shape_cast %332 : vector<1x16x512xf32> to vector<16x512xf32>
    %334 = vector.extract_strided_slice %333 {offsets = [0, 0], sizes = [8, 512], strides = [1, 1]} : vector<16x512xf32> to vector<8x512xf32>
    %c0_104 = arith.constant 0 : index
    %c0_105 = arith.constant 0 : index
    %335 = vector.load %arg3[%c0_104, %c0_105] : memref<128x512xf32, #tpu.memory_space<vmem>>, vector<128x512xf32>
    %cst_106 = arith.constant dense<0.000000e+00> : vector<8x512xf32>
    %336 = tpu.matmul %307, %335, %cst_106 {dimension_numbers = #tpu.dot_dimension_numbers<[1], [0], [0], [1], [0, 0, 1, 1], [], []>} : vector<8x128xf32>, vector<128x512xf32>, vector<8x512xf32> -> vector<8x512xf32>
    %337 = arith.addf %334, %336 : vector<8x512xf32>
    %338 = vector.extract_strided_slice %337 {offsets = [0, 0], sizes = [8, 384], strides = [1, 1]} : vector<8x512xf32> to vector<8x384xf32>
    %339 = arith.negf %338 : vector<8x384xf32>
    %340 = math.exp %339 : vector<8x384xf32>
    %cst_107 = arith.constant 1.000000e+00 : f32
    %341 = vector.broadcast %cst_107 : f32 to vector<8x384xf32>
    %342 = arith.addf %341, %340 : vector<8x384xf32>
    %343 = arith.divf %341, %342 : vector<8x384xf32>
    %344 = vector.extract_strided_slice %337 {offsets = [0, 384], sizes = [8, 128], strides = [1, 1]} : vector<8x512xf32> to vector<8x128xf32>
    %345 = math.tanh %344 : vector<8x128xf32>
    %346 = vector.extract_strided_slice %343 {offsets = [0, 0], sizes = [8, 128], strides = [1, 1]} : vector<8x384xf32> to vector<8x128xf32>
    %347 = vector.extract_strided_slice %343 {offsets = [0, 128], sizes = [8, 128], strides = [1, 1]} : vector<8x384xf32> to vector<8x128xf32>
    %348 = vector.extract_strided_slice %343 {offsets = [0, 256], sizes = [8, 128], strides = [1, 1]} : vector<8x384xf32> to vector<8x128xf32>
    %349 = arith.mulf %347, %305 : vector<8x128xf32>
    %350 = arith.mulf %346, %345 : vector<8x128xf32>
    %351 = arith.addf %349, %350 : vector<8x128xf32>
    %352 = math.tanh %351 : vector<8x128xf32>
    %353 = arith.mulf %348, %352 : vector<8x128xf32>
    %354 = vector.extract_strided_slice %333 {offsets = [8, 0], sizes = [8, 512], strides = [1, 1]} : vector<16x512xf32> to vector<8x512xf32>
    %c0_108 = arith.constant 0 : index
    %c0_109 = arith.constant 0 : index
    %355 = vector.load %arg3[%c0_108, %c0_109] : memref<128x512xf32, #tpu.memory_space<vmem>>, vector<128x512xf32>
    %cst_110 = arith.constant dense<0.000000e+00> : vector<8x512xf32>
    %356 = tpu.matmul %327, %355, %cst_110 {dimension_numbers = #tpu.dot_dimension_numbers<[1], [0], [0], [1], [0, 0, 1, 1], [], []>} : vector<8x128xf32>, vector<128x512xf32>, vector<8x512xf32> -> vector<8x512xf32>
    %357 = arith.addf %354, %356 : vector<8x512xf32>
    %358 = vector.extract_strided_slice %357 {offsets = [0, 0], sizes = [8, 384], strides = [1, 1]} : vector<8x512xf32> to vector<8x384xf32>
    %359 = arith.negf %358 : vector<8x384xf32>
    %360 = math.exp %359 : vector<8x384xf32>
    %cst_111 = arith.constant 1.000000e+00 : f32
    %361 = vector.broadcast %cst_111 : f32 to vector<8x384xf32>
    %362 = arith.addf %361, %360 : vector<8x384xf32>
    %363 = arith.divf %361, %362 : vector<8x384xf32>
    %364 = vector.extract_strided_slice %357 {offsets = [0, 384], sizes = [8, 128], strides = [1, 1]} : vector<8x512xf32> to vector<8x128xf32>
    %365 = math.tanh %364 : vector<8x128xf32>
    %366 = vector.extract_strided_slice %363 {offsets = [0, 0], sizes = [8, 128], strides = [1, 1]} : vector<8x384xf32> to vector<8x128xf32>
    %367 = vector.extract_strided_slice %363 {offsets = [0, 128], sizes = [8, 128], strides = [1, 1]} : vector<8x384xf32> to vector<8x128xf32>
    %368 = vector.extract_strided_slice %363 {offsets = [0, 256], sizes = [8, 128], strides = [1, 1]} : vector<8x384xf32> to vector<8x128xf32>
    %369 = arith.mulf %367, %325 : vector<8x128xf32>
    %370 = arith.mulf %366, %365 : vector<8x128xf32>
    %371 = arith.addf %369, %370 : vector<8x128xf32>
    %372 = math.tanh %371 : vector<8x128xf32>
    %373 = arith.mulf %368, %372 : vector<8x128xf32>
    %374 = tpu.concatenate %353, %373 in 0 : vector<8x128xf32>, vector<8x128xf32> -> vector<16x128xf32>
    %c7_112 = arith.constant 7 : index
    %c0_113 = arith.constant 0 : index
    %c0_114 = arith.constant 0 : index
    %375 = vector.load %arg12[%c7_112, %c0_113, %c0_114] : memref<8x16x128xf32, #tpu.memory_space<vmem>>, vector<1x16x128xf32>
    %376 = vector.shape_cast %375 : vector<1x16x128xf32> to vector<16x128xf32>
    %377 = vector.shape_cast %374 : vector<16x128xf32> to vector<1x16x128xf32>
    tpu.vector_store %arg12[%c7_112, %c0_113, %c0_114], %377 {strides = array<i32>} : memref<8x16x128xf32, #tpu.memory_space<vmem>>, vector<1x16x128xf32>,
    %c0_115 = arith.constant 0 : index
    %c0_116 = arith.constant 0 : index
    %c0_117 = arith.constant 0 : index
    %378 = vector.load %arg12[%c0_115, %c0_116, %c0_117] : memref<8x16x128xf32, #tpu.memory_space<vmem>>, vector<8x16x128xf32>
    %379 = vector.shape_cast %378 : vector<8x16x128xf32> to vector<128x128xf32>
    %c0_118 = arith.constant 0 : index
    %c0_119 = arith.constant 0 : index
    %380 = vector.load %arg5[%c0_118, %c0_119] : memref<128x512xf32, #tpu.memory_space<vmem>>, vector<128x512xf32>
    %cst_120 = arith.constant dense<0.000000e+00> : vector<128x512xf32>
    %381 = tpu.matmul %379, %380, %cst_120 {dimension_numbers = #tpu.dot_dimension_numbers<[1], [0], [0], [1], [0, 0, 1, 1], [], []>} : vector<128x128xf32>, vector<128x512xf32>, vector<128x512xf32> -> vector<128x512xf32>
    %c0_121 = arith.constant 0 : index
    %c0_122 = arith.constant 0 : index
    %382 = vector.load %arg7[%c0_121, %c0_122] : memref<1x512xf32, #tpu.memory_space<vmem>>, vector<1x512xf32>
    %383 = vector.broadcast %382 : vector<1x512xf32> to vector<128x512xf32>
    %384 = arith.addf %381, %383 : vector<128x512xf32>
    %385 = vector.shape_cast %384 : vector<128x512xf32> to vector<8x16x512xf32>
    %c0_123 = arith.constant 0 : index
    %c0_124 = arith.constant 0 : index
    %c0_125 = arith.constant 0 : index
    %386 = vector.load %arg11[%c0_123, %c0_124, %c0_125] : memref<8x16x512xf32, #tpu.memory_space<vmem>>, vector<8x16x512xf32>
    tpu.vector_store %arg11[%c0_123, %c0_124, %c0_125], %385 {strides = array<i32>} : memref<8x16x512xf32, #tpu.memory_space<vmem>>, vector<8x16x512xf32>,
    %cst_126 = arith.constant 0.000000e+00 : f32
    %387 = vector.broadcast %cst_126 : f32 to vector<8x128xf32>
    %c0_127 = arith.constant 0 : index
    %c0_128 = arith.constant 0 : index
    %c0_129 = arith.constant 0 : index
    %388 = vector.load %arg11[%c0_127, %c0_128, %c0_129] : memref<8x16x512xf32, #tpu.memory_space<vmem>>, vector<1x16x512xf32>
    %389 = vector.shape_cast %388 : vector<1x16x512xf32> to vector<16x512xf32>
    %390 = vector.extract_strided_slice %389 {offsets = [0, 0], sizes = [8, 512], strides = [1, 1]} : vector<16x512xf32> to vector<8x512xf32>
    %c0_130 = arith.constant 0 : index
    %c0_131 = arith.constant 0 : index
    %391 = vector.load %arg6[%c0_130, %c0_131] : memref<128x512xf32, #tpu.memory_space<vmem>>, vector<128x512xf32>
    %cst_132 = arith.constant dense<0.000000e+00> : vector<8x512xf32>
    %392 = tpu.matmul %387, %391, %cst_132 {dimension_numbers = #tpu.dot_dimension_numbers<[1], [0], [0], [1], [0, 0, 1, 1], [], []>} : vector<8x128xf32>, vector<128x512xf32>, vector<8x512xf32> -> vector<8x512xf32>
    %393 = arith.addf %390, %392 : vector<8x512xf32>
    %394 = vector.extract_strided_slice %393 {offsets = [0, 0], sizes = [8, 384], strides = [1, 1]} : vector<8x512xf32> to vector<8x384xf32>
    %395 = arith.negf %394 : vector<8x384xf32>
    %396 = math.exp %395 : vector<8x384xf32>
    %cst_133 = arith.constant 1.000000e+00 : f32
    %397 = vector.broadcast %cst_133 : f32 to vector<8x384xf32>
    %398 = arith.addf %397, %396 : vector<8x384xf32>
    %399 = arith.divf %397, %398 : vector<8x384xf32>
    %400 = vector.extract_strided_slice %393 {offsets = [0, 384], sizes = [8, 128], strides = [1, 1]} : vector<8x512xf32> to vector<8x128xf32>
    %401 = math.tanh %400 : vector<8x128xf32>
    %402 = vector.extract_strided_slice %399 {offsets = [0, 0], sizes = [8, 128], strides = [1, 1]} : vector<8x384xf32> to vector<8x128xf32>
    %403 = vector.extract_strided_slice %399 {offsets = [0, 128], sizes = [8, 128], strides = [1, 1]} : vector<8x384xf32> to vector<8x128xf32>
    %404 = vector.extract_strided_slice %399 {offsets = [0, 256], sizes = [8, 128], strides = [1, 1]} : vector<8x384xf32> to vector<8x128xf32>
    %405 = arith.mulf %403, %387 : vector<8x128xf32>
    %406 = arith.mulf %402, %401 : vector<8x128xf32>
    %407 = arith.addf %405, %406 : vector<8x128xf32>
    %408 = math.tanh %407 : vector<8x128xf32>
    %409 = arith.mulf %404, %408 : vector<8x128xf32>
    %410 = vector.extract_strided_slice %389 {offsets = [8, 0], sizes = [8, 512], strides = [1, 1]} : vector<16x512xf32> to vector<8x512xf32>
    %c0_134 = arith.constant 0 : index
    %c0_135 = arith.constant 0 : index
    %411 = vector.load %arg6[%c0_134, %c0_135] : memref<128x512xf32, #tpu.memory_space<vmem>>, vector<128x512xf32>
    %cst_136 = arith.constant dense<0.000000e+00> : vector<8x512xf32>
    %412 = tpu.matmul %387, %411, %cst_136 {dimension_numbers = #tpu.dot_dimension_numbers<[1], [0], [0], [1], [0, 0, 1, 1], [], []>} : vector<8x128xf32>, vector<128x512xf32>, vector<8x512xf32> -> vector<8x512xf32>
    %413 = arith.addf %410, %412 : vector<8x512xf32>
    %414 = vector.extract_strided_slice %413 {offsets = [0, 0], sizes = [8, 384], strides = [1, 1]} : vector<8x512xf32> to vector<8x384xf32>
    %415 = arith.negf %414 : vector<8x384xf32>
    %416 = math.exp %415 : vector<8x384xf32>
    %cst_137 = arith.constant 1.000000e+00 : f32
    %417 = vector.broadcast %cst_137 : f32 to vector<8x384xf32>
    %418 = arith.addf %417, %416 : vector<8x384xf32>
    %419 = arith.divf %417, %418 : vector<8x384xf32>
    %420 = vector.extract_strided_slice %413 {offsets = [0, 384], sizes = [8, 128], strides = [1, 1]} : vector<8x512xf32> to vector<8x128xf32>
    %421 = math.tanh %420 : vector<8x128xf32>
    %422 = vector.extract_strided_slice %419 {offsets = [0, 0], sizes = [8, 128], strides = [1, 1]} : vector<8x384xf32> to vector<8x128xf32>
    %423 = vector.extract_strided_slice %419 {offsets = [0, 128], sizes = [8, 128], strides = [1, 1]} : vector<8x384xf32> to vector<8x128xf32>
    %424 = vector.extract_strided_slice %419 {offsets = [0, 256], sizes = [8, 128], strides = [1, 1]} : vector<8x384xf32> to vector<8x128xf32>
    %425 = arith.mulf %423, %387 : vector<8x128xf32>
    %426 = arith.mulf %422, %421 : vector<8x128xf32>
    %427 = arith.addf %425, %426 : vector<8x128xf32>
    %428 = math.tanh %427 : vector<8x128xf32>
    %429 = arith.mulf %424, %428 : vector<8x128xf32>
    %c1_138 = arith.constant 1 : index
    %c0_139 = arith.constant 0 : index
    %c0_140 = arith.constant 0 : index
    %430 = vector.load %arg11[%c1_138, %c0_139, %c0_140] : memref<8x16x512xf32, #tpu.memory_space<vmem>>, vector<1x16x512xf32>
    %431 = vector.shape_cast %430 : vector<1x16x512xf32> to vector<16x512xf32>
    %432 = vector.extract_strided_slice %431 {offsets = [0, 0], sizes = [8, 512], strides = [1, 1]} : vector<16x512xf32> to vector<8x512xf32>
    %c0_141 = arith.constant 0 : index
    %c0_142 = arith.constant 0 : index
    %433 = vector.load %arg6[%c0_141, %c0_142] : memref<128x512xf32, #tpu.memory_space<vmem>>, vector<128x512xf32>
    %cst_143 = arith.constant dense<0.000000e+00> : vector<8x512xf32>
    %434 = tpu.matmul %409, %433, %cst_143 {dimension_numbers = #tpu.dot_dimension_numbers<[1], [0], [0], [1], [0, 0, 1, 1], [], []>} : vector<8x128xf32>, vector<128x512xf32>, vector<8x512xf32> -> vector<8x512xf32>
    %435 = arith.addf %432, %434 : vector<8x512xf32>
    %436 = vector.extract_strided_slice %435 {offsets = [0, 0], sizes = [8, 384], strides = [1, 1]} : vector<8x512xf32> to vector<8x384xf32>
    %437 = arith.negf %436 : vector<8x384xf32>
    %438 = math.exp %437 : vector<8x384xf32>
    %cst_144 = arith.constant 1.000000e+00 : f32
    %439 = vector.broadcast %cst_144 : f32 to vector<8x384xf32>
    %440 = arith.addf %439, %438 : vector<8x384xf32>
    %441 = arith.divf %439, %440 : vector<8x384xf32>
    %442 = vector.extract_strided_slice %435 {offsets = [0, 384], sizes = [8, 128], strides = [1, 1]} : vector<8x512xf32> to vector<8x128xf32>
    %443 = math.tanh %442 : vector<8x128xf32>
    %444 = vector.extract_strided_slice %441 {offsets = [0, 0], sizes = [8, 128], strides = [1, 1]} : vector<8x384xf32> to vector<8x128xf32>
    %445 = vector.extract_strided_slice %441 {offsets = [0, 128], sizes = [8, 128], strides = [1, 1]} : vector<8x384xf32> to vector<8x128xf32>
    %446 = vector.extract_strided_slice %441 {offsets = [0, 256], sizes = [8, 128], strides = [1, 1]} : vector<8x384xf32> to vector<8x128xf32>
    %447 = arith.mulf %445, %407 : vector<8x128xf32>
    %448 = arith.mulf %444, %443 : vector<8x128xf32>
    %449 = arith.addf %447, %448 : vector<8x128xf32>
    %450 = math.tanh %449 : vector<8x128xf32>
    %451 = arith.mulf %446, %450 : vector<8x128xf32>
    %452 = vector.extract_strided_slice %431 {offsets = [8, 0], sizes = [8, 512], strides = [1, 1]} : vector<16x512xf32> to vector<8x512xf32>
    %c0_145 = arith.constant 0 : index
    %c0_146 = arith.constant 0 : index
    %453 = vector.load %arg6[%c0_145, %c0_146] : memref<128x512xf32, #tpu.memory_space<vmem>>, vector<128x512xf32>
    %cst_147 = arith.constant dense<0.000000e+00> : vector<8x512xf32>
    %454 = tpu.matmul %429, %453, %cst_147 {dimension_numbers = #tpu.dot_dimension_numbers<[1], [0], [0], [1], [0, 0, 1, 1], [], []>} : vector<8x128xf32>, vector<128x512xf32>, vector<8x512xf32> -> vector<8x512xf32>
    %455 = arith.addf %452, %454 : vector<8x512xf32>
    %456 = vector.extract_strided_slice %455 {offsets = [0, 0], sizes = [8, 384], strides = [1, 1]} : vector<8x512xf32> to vector<8x384xf32>
    %457 = arith.negf %456 : vector<8x384xf32>
    %458 = math.exp %457 : vector<8x384xf32>
    %cst_148 = arith.constant 1.000000e+00 : f32
    %459 = vector.broadcast %cst_148 : f32 to vector<8x384xf32>
    %460 = arith.addf %459, %458 : vector<8x384xf32>
    %461 = arith.divf %459, %460 : vector<8x384xf32>
    %462 = vector.extract_strided_slice %455 {offsets = [0, 384], sizes = [8, 128], strides = [1, 1]} : vector<8x512xf32> to vector<8x128xf32>
    %463 = math.tanh %462 : vector<8x128xf32>
    %464 = vector.extract_strided_slice %461 {offsets = [0, 0], sizes = [8, 128], strides = [1, 1]} : vector<8x384xf32> to vector<8x128xf32>
    %465 = vector.extract_strided_slice %461 {offsets = [0, 128], sizes = [8, 128], strides = [1, 1]} : vector<8x384xf32> to vector<8x128xf32>
    %466 = vector.extract_strided_slice %461 {offsets = [0, 256], sizes = [8, 128], strides = [1, 1]} : vector<8x384xf32> to vector<8x128xf32>
    %467 = arith.mulf %465, %427 : vector<8x128xf32>
    %468 = arith.mulf %464, %463 : vector<8x128xf32>
    %469 = arith.addf %467, %468 : vector<8x128xf32>
    %470 = math.tanh %469 : vector<8x128xf32>
    %471 = arith.mulf %466, %470 : vector<8x128xf32>
    %c2_149 = arith.constant 2 : index
    %c0_150 = arith.constant 0 : index
    %c0_151 = arith.constant 0 : index
    %472 = vector.load %arg11[%c2_149, %c0_150, %c0_151] : memref<8x16x512xf32, #tpu.memory_space<vmem>>, vector<1x16x512xf32>
    %473 = vector.shape_cast %472 : vector<1x16x512xf32> to vector<16x512xf32>
    %474 = vector.extract_strided_slice %473 {offsets = [0, 0], sizes = [8, 512], strides = [1, 1]} : vector<16x512xf32> to vector<8x512xf32>
    %c0_152 = arith.constant 0 : index
    %c0_153 = arith.constant 0 : index
    %475 = vector.load %arg6[%c0_152, %c0_153] : memref<128x512xf32, #tpu.memory_space<vmem>>, vector<128x512xf32>
    %cst_154 = arith.constant dense<0.000000e+00> : vector<8x512xf32>
    %476 = tpu.matmul %451, %475, %cst_154 {dimension_numbers = #tpu.dot_dimension_numbers<[1], [0], [0], [1], [0, 0, 1, 1], [], []>} : vector<8x128xf32>, vector<128x512xf32>, vector<8x512xf32> -> vector<8x512xf32>
    %477 = arith.addf %474, %476 : vector<8x512xf32>
    %478 = vector.extract_strided_slice %477 {offsets = [0, 0], sizes = [8, 384], strides = [1, 1]} : vector<8x512xf32> to vector<8x384xf32>
    %479 = arith.negf %478 : vector<8x384xf32>
    %480 = math.exp %479 : vector<8x384xf32>
    %cst_155 = arith.constant 1.000000e+00 : f32
    %481 = vector.broadcast %cst_155 : f32 to vector<8x384xf32>
    %482 = arith.addf %481, %480 : vector<8x384xf32>
    %483 = arith.divf %481, %482 : vector<8x384xf32>
    %484 = vector.extract_strided_slice %477 {offsets = [0, 384], sizes = [8, 128], strides = [1, 1]} : vector<8x512xf32> to vector<8x128xf32>
    %485 = math.tanh %484 : vector<8x128xf32>
    %486 = vector.extract_strided_slice %483 {offsets = [0, 0], sizes = [8, 128], strides = [1, 1]} : vector<8x384xf32> to vector<8x128xf32>
    %487 = vector.extract_strided_slice %483 {offsets = [0, 128], sizes = [8, 128], strides = [1, 1]} : vector<8x384xf32> to vector<8x128xf32>
    %488 = vector.extract_strided_slice %483 {offsets = [0, 256], sizes = [8, 128], strides = [1, 1]} : vector<8x384xf32> to vector<8x128xf32>
    %489 = arith.mulf %487, %449 : vector<8x128xf32>
    %490 = arith.mulf %486, %485 : vector<8x128xf32>
    %491 = arith.addf %489, %490 : vector<8x128xf32>
    %492 = math.tanh %491 : vector<8x128xf32>
    %493 = arith.mulf %488, %492 : vector<8x128xf32>
    %494 = vector.extract_strided_slice %473 {offsets = [8, 0], sizes = [8, 512], strides = [1, 1]} : vector<16x512xf32> to vector<8x512xf32>
    %c0_156 = arith.constant 0 : index
    %c0_157 = arith.constant 0 : index
    %495 = vector.load %arg6[%c0_156, %c0_157] : memref<128x512xf32, #tpu.memory_space<vmem>>, vector<128x512xf32>
    %cst_158 = arith.constant dense<0.000000e+00> : vector<8x512xf32>
    %496 = tpu.matmul %471, %495, %cst_158 {dimension_numbers = #tpu.dot_dimension_numbers<[1], [0], [0], [1], [0, 0, 1, 1], [], []>} : vector<8x128xf32>, vector<128x512xf32>, vector<8x512xf32> -> vector<8x512xf32>
    %497 = arith.addf %494, %496 : vector<8x512xf32>
    %498 = vector.extract_strided_slice %497 {offsets = [0, 0], sizes = [8, 384], strides = [1, 1]} : vector<8x512xf32> to vector<8x384xf32>
    %499 = arith.negf %498 : vector<8x384xf32>
    %500 = math.exp %499 : vector<8x384xf32>
    %cst_159 = arith.constant 1.000000e+00 : f32
    %501 = vector.broadcast %cst_159 : f32 to vector<8x384xf32>
    %502 = arith.addf %501, %500 : vector<8x384xf32>
    %503 = arith.divf %501, %502 : vector<8x384xf32>
    %504 = vector.extract_strided_slice %497 {offsets = [0, 384], sizes = [8, 128], strides = [1, 1]} : vector<8x512xf32> to vector<8x128xf32>
    %505 = math.tanh %504 : vector<8x128xf32>
    %506 = vector.extract_strided_slice %503 {offsets = [0, 0], sizes = [8, 128], strides = [1, 1]} : vector<8x384xf32> to vector<8x128xf32>
    %507 = vector.extract_strided_slice %503 {offsets = [0, 128], sizes = [8, 128], strides = [1, 1]} : vector<8x384xf32> to vector<8x128xf32>
    %508 = vector.extract_strided_slice %503 {offsets = [0, 256], sizes = [8, 128], strides = [1, 1]} : vector<8x384xf32> to vector<8x128xf32>
    %509 = arith.mulf %507, %469 : vector<8x128xf32>
    %510 = arith.mulf %506, %505 : vector<8x128xf32>
    %511 = arith.addf %509, %510 : vector<8x128xf32>
    %512 = math.tanh %511 : vector<8x128xf32>
    %513 = arith.mulf %508, %512 : vector<8x128xf32>
    %c3_160 = arith.constant 3 : index
    %c0_161 = arith.constant 0 : index
    %c0_162 = arith.constant 0 : index
    %514 = vector.load %arg11[%c3_160, %c0_161, %c0_162] : memref<8x16x512xf32, #tpu.memory_space<vmem>>, vector<1x16x512xf32>
    %515 = vector.shape_cast %514 : vector<1x16x512xf32> to vector<16x512xf32>
    %516 = vector.extract_strided_slice %515 {offsets = [0, 0], sizes = [8, 512], strides = [1, 1]} : vector<16x512xf32> to vector<8x512xf32>
    %c0_163 = arith.constant 0 : index
    %c0_164 = arith.constant 0 : index
    %517 = vector.load %arg6[%c0_163, %c0_164] : memref<128x512xf32, #tpu.memory_space<vmem>>, vector<128x512xf32>
    %cst_165 = arith.constant dense<0.000000e+00> : vector<8x512xf32>
    %518 = tpu.matmul %493, %517, %cst_165 {dimension_numbers = #tpu.dot_dimension_numbers<[1], [0], [0], [1], [0, 0, 1, 1], [], []>} : vector<8x128xf32>, vector<128x512xf32>, vector<8x512xf32> -> vector<8x512xf32>
    %519 = arith.addf %516, %518 : vector<8x512xf32>
    %520 = vector.extract_strided_slice %519 {offsets = [0, 0], sizes = [8, 384], strides = [1, 1]} : vector<8x512xf32> to vector<8x384xf32>
    %521 = arith.negf %520 : vector<8x384xf32>
    %522 = math.exp %521 : vector<8x384xf32>
    %cst_166 = arith.constant 1.000000e+00 : f32
    %523 = vector.broadcast %cst_166 : f32 to vector<8x384xf32>
    %524 = arith.addf %523, %522 : vector<8x384xf32>
    %525 = arith.divf %523, %524 : vector<8x384xf32>
    %526 = vector.extract_strided_slice %519 {offsets = [0, 384], sizes = [8, 128], strides = [1, 1]} : vector<8x512xf32> to vector<8x128xf32>
    %527 = math.tanh %526 : vector<8x128xf32>
    %528 = vector.extract_strided_slice %525 {offsets = [0, 0], sizes = [8, 128], strides = [1, 1]} : vector<8x384xf32> to vector<8x128xf32>
    %529 = vector.extract_strided_slice %525 {offsets = [0, 128], sizes = [8, 128], strides = [1, 1]} : vector<8x384xf32> to vector<8x128xf32>
    %530 = vector.extract_strided_slice %525 {offsets = [0, 256], sizes = [8, 128], strides = [1, 1]} : vector<8x384xf32> to vector<8x128xf32>
    %531 = arith.mulf %529, %491 : vector<8x128xf32>
    %532 = arith.mulf %528, %527 : vector<8x128xf32>
    %533 = arith.addf %531, %532 : vector<8x128xf32>
    %534 = math.tanh %533 : vector<8x128xf32>
    %535 = arith.mulf %530, %534 : vector<8x128xf32>
    %536 = vector.extract_strided_slice %515 {offsets = [8, 0], sizes = [8, 512], strides = [1, 1]} : vector<16x512xf32> to vector<8x512xf32>
    %c0_167 = arith.constant 0 : index
    %c0_168 = arith.constant 0 : index
    %537 = vector.load %arg6[%c0_167, %c0_168] : memref<128x512xf32, #tpu.memory_space<vmem>>, vector<128x512xf32>
    %cst_169 = arith.constant dense<0.000000e+00> : vector<8x512xf32>
    %538 = tpu.matmul %513, %537, %cst_169 {dimension_numbers = #tpu.dot_dimension_numbers<[1], [0], [0], [1], [0, 0, 1, 1], [], []>} : vector<8x128xf32>, vector<128x512xf32>, vector<8x512xf32> -> vector<8x512xf32>
    %539 = arith.addf %536, %538 : vector<8x512xf32>
    %540 = vector.extract_strided_slice %539 {offsets = [0, 0], sizes = [8, 384], strides = [1, 1]} : vector<8x512xf32> to vector<8x384xf32>
    %541 = arith.negf %540 : vector<8x384xf32>
    %542 = math.exp %541 : vector<8x384xf32>
    %cst_170 = arith.constant 1.000000e+00 : f32
    %543 = vector.broadcast %cst_170 : f32 to vector<8x384xf32>
    %544 = arith.addf %543, %542 : vector<8x384xf32>
    %545 = arith.divf %543, %544 : vector<8x384xf32>
    %546 = vector.extract_strided_slice %539 {offsets = [0, 384], sizes = [8, 128], strides = [1, 1]} : vector<8x512xf32> to vector<8x128xf32>
    %547 = math.tanh %546 : vector<8x128xf32>
    %548 = vector.extract_strided_slice %545 {offsets = [0, 0], sizes = [8, 128], strides = [1, 1]} : vector<8x384xf32> to vector<8x128xf32>
    %549 = vector.extract_strided_slice %545 {offsets = [0, 128], sizes = [8, 128], strides = [1, 1]} : vector<8x384xf32> to vector<8x128xf32>
    %550 = vector.extract_strided_slice %545 {offsets = [0, 256], sizes = [8, 128], strides = [1, 1]} : vector<8x384xf32> to vector<8x128xf32>
    %551 = arith.mulf %549, %511 : vector<8x128xf32>
    %552 = arith.mulf %548, %547 : vector<8x128xf32>
    %553 = arith.addf %551, %552 : vector<8x128xf32>
    %554 = math.tanh %553 : vector<8x128xf32>
    %555 = arith.mulf %550, %554 : vector<8x128xf32>
    %c4_171 = arith.constant 4 : index
    %c0_172 = arith.constant 0 : index
    %c0_173 = arith.constant 0 : index
    %556 = vector.load %arg11[%c4_171, %c0_172, %c0_173] : memref<8x16x512xf32, #tpu.memory_space<vmem>>, vector<1x16x512xf32>
    %557 = vector.shape_cast %556 : vector<1x16x512xf32> to vector<16x512xf32>
    %558 = vector.extract_strided_slice %557 {offsets = [0, 0], sizes = [8, 512], strides = [1, 1]} : vector<16x512xf32> to vector<8x512xf32>
    %c0_174 = arith.constant 0 : index
    %c0_175 = arith.constant 0 : index
    %559 = vector.load %arg6[%c0_174, %c0_175] : memref<128x512xf32, #tpu.memory_space<vmem>>, vector<128x512xf32>
    %cst_176 = arith.constant dense<0.000000e+00> : vector<8x512xf32>
    %560 = tpu.matmul %535, %559, %cst_176 {dimension_numbers = #tpu.dot_dimension_numbers<[1], [0], [0], [1], [0, 0, 1, 1], [], []>} : vector<8x128xf32>, vector<128x512xf32>, vector<8x512xf32> -> vector<8x512xf32>
    %561 = arith.addf %558, %560 : vector<8x512xf32>
    %562 = vector.extract_strided_slice %561 {offsets = [0, 0], sizes = [8, 384], strides = [1, 1]} : vector<8x512xf32> to vector<8x384xf32>
    %563 = arith.negf %562 : vector<8x384xf32>
    %564 = math.exp %563 : vector<8x384xf32>
    %cst_177 = arith.constant 1.000000e+00 : f32
    %565 = vector.broadcast %cst_177 : f32 to vector<8x384xf32>
    %566 = arith.addf %565, %564 : vector<8x384xf32>
    %567 = arith.divf %565, %566 : vector<8x384xf32>
    %568 = vector.extract_strided_slice %561 {offsets = [0, 384], sizes = [8, 128], strides = [1, 1]} : vector<8x512xf32> to vector<8x128xf32>
    %569 = math.tanh %568 : vector<8x128xf32>
    %570 = vector.extract_strided_slice %567 {offsets = [0, 0], sizes = [8, 128], strides = [1, 1]} : vector<8x384xf32> to vector<8x128xf32>
    %571 = vector.extract_strided_slice %567 {offsets = [0, 128], sizes = [8, 128], strides = [1, 1]} : vector<8x384xf32> to vector<8x128xf32>
    %572 = vector.extract_strided_slice %567 {offsets = [0, 256], sizes = [8, 128], strides = [1, 1]} : vector<8x384xf32> to vector<8x128xf32>
    %573 = arith.mulf %571, %533 : vector<8x128xf32>
    %574 = arith.mulf %570, %569 : vector<8x128xf32>
    %575 = arith.addf %573, %574 : vector<8x128xf32>
    %576 = math.tanh %575 : vector<8x128xf32>
    %577 = arith.mulf %572, %576 : vector<8x128xf32>
    %578 = vector.extract_strided_slice %557 {offsets = [8, 0], sizes = [8, 512], strides = [1, 1]} : vector<16x512xf32> to vector<8x512xf32>
    %c0_178 = arith.constant 0 : index
    %c0_179 = arith.constant 0 : index
    %579 = vector.load %arg6[%c0_178, %c0_179] : memref<128x512xf32, #tpu.memory_space<vmem>>, vector<128x512xf32>
    %cst_180 = arith.constant dense<0.000000e+00> : vector<8x512xf32>
    %580 = tpu.matmul %555, %579, %cst_180 {dimension_numbers = #tpu.dot_dimension_numbers<[1], [0], [0], [1], [0, 0, 1, 1], [], []>} : vector<8x128xf32>, vector<128x512xf32>, vector<8x512xf32> -> vector<8x512xf32>
    %581 = arith.addf %578, %580 : vector<8x512xf32>
    %582 = vector.extract_strided_slice %581 {offsets = [0, 0], sizes = [8, 384], strides = [1, 1]} : vector<8x512xf32> to vector<8x384xf32>
    %583 = arith.negf %582 : vector<8x384xf32>
    %584 = math.exp %583 : vector<8x384xf32>
    %cst_181 = arith.constant 1.000000e+00 : f32
    %585 = vector.broadcast %cst_181 : f32 to vector<8x384xf32>
    %586 = arith.addf %585, %584 : vector<8x384xf32>
    %587 = arith.divf %585, %586 : vector<8x384xf32>
    %588 = vector.extract_strided_slice %581 {offsets = [0, 384], sizes = [8, 128], strides = [1, 1]} : vector<8x512xf32> to vector<8x128xf32>
    %589 = math.tanh %588 : vector<8x128xf32>
    %590 = vector.extract_strided_slice %587 {offsets = [0, 0], sizes = [8, 128], strides = [1, 1]} : vector<8x384xf32> to vector<8x128xf32>
    %591 = vector.extract_strided_slice %587 {offsets = [0, 128], sizes = [8, 128], strides = [1, 1]} : vector<8x384xf32> to vector<8x128xf32>
    %592 = vector.extract_strided_slice %587 {offsets = [0, 256], sizes = [8, 128], strides = [1, 1]} : vector<8x384xf32> to vector<8x128xf32>
    %593 = arith.mulf %591, %553 : vector<8x128xf32>
    %594 = arith.mulf %590, %589 : vector<8x128xf32>
    %595 = arith.addf %593, %594 : vector<8x128xf32>
    %596 = math.tanh %595 : vector<8x128xf32>
    %597 = arith.mulf %592, %596 : vector<8x128xf32>
    %c5_182 = arith.constant 5 : index
    %c0_183 = arith.constant 0 : index
    %c0_184 = arith.constant 0 : index
    %598 = vector.load %arg11[%c5_182, %c0_183, %c0_184] : memref<8x16x512xf32, #tpu.memory_space<vmem>>, vector<1x16x512xf32>
    %599 = vector.shape_cast %598 : vector<1x16x512xf32> to vector<16x512xf32>
    %600 = vector.extract_strided_slice %599 {offsets = [0, 0], sizes = [8, 512], strides = [1, 1]} : vector<16x512xf32> to vector<8x512xf32>
    %c0_185 = arith.constant 0 : index
    %c0_186 = arith.constant 0 : index
    %601 = vector.load %arg6[%c0_185, %c0_186] : memref<128x512xf32, #tpu.memory_space<vmem>>, vector<128x512xf32>
    %cst_187 = arith.constant dense<0.000000e+00> : vector<8x512xf32>
    %602 = tpu.matmul %577, %601, %cst_187 {dimension_numbers = #tpu.dot_dimension_numbers<[1], [0], [0], [1], [0, 0, 1, 1], [], []>} : vector<8x128xf32>, vector<128x512xf32>, vector<8x512xf32> -> vector<8x512xf32>
    %603 = arith.addf %600, %602 : vector<8x512xf32>
    %604 = vector.extract_strided_slice %603 {offsets = [0, 0], sizes = [8, 384], strides = [1, 1]} : vector<8x512xf32> to vector<8x384xf32>
    %605 = arith.negf %604 : vector<8x384xf32>
    %606 = math.exp %605 : vector<8x384xf32>
    %cst_188 = arith.constant 1.000000e+00 : f32
    %607 = vector.broadcast %cst_188 : f32 to vector<8x384xf32>
    %608 = arith.addf %607, %606 : vector<8x384xf32>
    %609 = arith.divf %607, %608 : vector<8x384xf32>
    %610 = vector.extract_strided_slice %603 {offsets = [0, 384], sizes = [8, 128], strides = [1, 1]} : vector<8x512xf32> to vector<8x128xf32>
    %611 = math.tanh %610 : vector<8x128xf32>
    %612 = vector.extract_strided_slice %609 {offsets = [0, 0], sizes = [8, 128], strides = [1, 1]} : vector<8x384xf32> to vector<8x128xf32>
    %613 = vector.extract_strided_slice %609 {offsets = [0, 128], sizes = [8, 128], strides = [1, 1]} : vector<8x384xf32> to vector<8x128xf32>
    %614 = vector.extract_strided_slice %609 {offsets = [0, 256], sizes = [8, 128], strides = [1, 1]} : vector<8x384xf32> to vector<8x128xf32>
    %615 = arith.mulf %613, %575 : vector<8x128xf32>
    %616 = arith.mulf %612, %611 : vector<8x128xf32>
    %617 = arith.addf %615, %616 : vector<8x128xf32>
    %618 = math.tanh %617 : vector<8x128xf32>
    %619 = arith.mulf %614, %618 : vector<8x128xf32>
    %620 = vector.extract_strided_slice %599 {offsets = [8, 0], sizes = [8, 512], strides = [1, 1]} : vector<16x512xf32> to vector<8x512xf32>
    %c0_189 = arith.constant 0 : index
    %c0_190 = arith.constant 0 : index
    %621 = vector.load %arg6[%c0_189, %c0_190] : memref<128x512xf32, #tpu.memory_space<vmem>>, vector<128x512xf32>
    %cst_191 = arith.constant dense<0.000000e+00> : vector<8x512xf32>
    %622 = tpu.matmul %597, %621, %cst_191 {dimension_numbers = #tpu.dot_dimension_numbers<[1], [0], [0], [1], [0, 0, 1, 1], [], []>} : vector<8x128xf32>, vector<128x512xf32>, vector<8x512xf32> -> vector<8x512xf32>
    %623 = arith.addf %620, %622 : vector<8x512xf32>
    %624 = vector.extract_strided_slice %623 {offsets = [0, 0], sizes = [8, 384], strides = [1, 1]} : vector<8x512xf32> to vector<8x384xf32>
    %625 = arith.negf %624 : vector<8x384xf32>
    %626 = math.exp %625 : vector<8x384xf32>
    %cst_192 = arith.constant 1.000000e+00 : f32
    %627 = vector.broadcast %cst_192 : f32 to vector<8x384xf32>
    %628 = arith.addf %627, %626 : vector<8x384xf32>
    %629 = arith.divf %627, %628 : vector<8x384xf32>
    %630 = vector.extract_strided_slice %623 {offsets = [0, 384], sizes = [8, 128], strides = [1, 1]} : vector<8x512xf32> to vector<8x128xf32>
    %631 = math.tanh %630 : vector<8x128xf32>
    %632 = vector.extract_strided_slice %629 {offsets = [0, 0], sizes = [8, 128], strides = [1, 1]} : vector<8x384xf32> to vector<8x128xf32>
    %633 = vector.extract_strided_slice %629 {offsets = [0, 128], sizes = [8, 128], strides = [1, 1]} : vector<8x384xf32> to vector<8x128xf32>
    %634 = vector.extract_strided_slice %629 {offsets = [0, 256], sizes = [8, 128], strides = [1, 1]} : vector<8x384xf32> to vector<8x128xf32>
    %635 = arith.mulf %633, %595 : vector<8x128xf32>
    %636 = arith.mulf %632, %631 : vector<8x128xf32>
    %637 = arith.addf %635, %636 : vector<8x128xf32>
    %638 = math.tanh %637 : vector<8x128xf32>
    %639 = arith.mulf %634, %638 : vector<8x128xf32>
    %c6_193 = arith.constant 6 : index
    %c0_194 = arith.constant 0 : index
    %c0_195 = arith.constant 0 : index
    %640 = vector.load %arg11[%c6_193, %c0_194, %c0_195] : memref<8x16x512xf32, #tpu.memory_space<vmem>>, vector<1x16x512xf32>
    %641 = vector.shape_cast %640 : vector<1x16x512xf32> to vector<16x512xf32>
    %642 = vector.extract_strided_slice %641 {offsets = [0, 0], sizes = [8, 512], strides = [1, 1]} : vector<16x512xf32> to vector<8x512xf32>
    %c0_196 = arith.constant 0 : index
    %c0_197 = arith.constant 0 : index
    %643 = vector.load %arg6[%c0_196, %c0_197] : memref<128x512xf32, #tpu.memory_space<vmem>>, vector<128x512xf32>
    %cst_198 = arith.constant dense<0.000000e+00> : vector<8x512xf32>
    %644 = tpu.matmul %619, %643, %cst_198 {dimension_numbers = #tpu.dot_dimension_numbers<[1], [0], [0], [1], [0, 0, 1, 1], [], []>} : vector<8x128xf32>, vector<128x512xf32>, vector<8x512xf32> -> vector<8x512xf32>
    %645 = arith.addf %642, %644 : vector<8x512xf32>
    %646 = vector.extract_strided_slice %645 {offsets = [0, 0], sizes = [8, 384], strides = [1, 1]} : vector<8x512xf32> to vector<8x384xf32>
    %647 = arith.negf %646 : vector<8x384xf32>
    %648 = math.exp %647 : vector<8x384xf32>
    %cst_199 = arith.constant 1.000000e+00 : f32
    %649 = vector.broadcast %cst_199 : f32 to vector<8x384xf32>
    %650 = arith.addf %649, %648 : vector<8x384xf32>
    %651 = arith.divf %649, %650 : vector<8x384xf32>
    %652 = vector.extract_strided_slice %645 {offsets = [0, 384], sizes = [8, 128], strides = [1, 1]} : vector<8x512xf32> to vector<8x128xf32>
    %653 = math.tanh %652 : vector<8x128xf32>
    %654 = vector.extract_strided_slice %651 {offsets = [0, 0], sizes = [8, 128], strides = [1, 1]} : vector<8x384xf32> to vector<8x128xf32>
    %655 = vector.extract_strided_slice %651 {offsets = [0, 128], sizes = [8, 128], strides = [1, 1]} : vector<8x384xf32> to vector<8x128xf32>
    %656 = vector.extract_strided_slice %651 {offsets = [0, 256], sizes = [8, 128], strides = [1, 1]} : vector<8x384xf32> to vector<8x128xf32>
    %657 = arith.mulf %655, %617 : vector<8x128xf32>
    %658 = arith.mulf %654, %653 : vector<8x128xf32>
    %659 = arith.addf %657, %658 : vector<8x128xf32>
    %660 = math.tanh %659 : vector<8x128xf32>
    %661 = arith.mulf %656, %660 : vector<8x128xf32>
    %662 = vector.extract_strided_slice %641 {offsets = [8, 0], sizes = [8, 512], strides = [1, 1]} : vector<16x512xf32> to vector<8x512xf32>
    %c0_200 = arith.constant 0 : index
    %c0_201 = arith.constant 0 : index
    %663 = vector.load %arg6[%c0_200, %c0_201] : memref<128x512xf32, #tpu.memory_space<vmem>>, vector<128x512xf32>
    %cst_202 = arith.constant dense<0.000000e+00> : vector<8x512xf32>
    %664 = tpu.matmul %639, %663, %cst_202 {dimension_numbers = #tpu.dot_dimension_numbers<[1], [0], [0], [1], [0, 0, 1, 1], [], []>} : vector<8x128xf32>, vector<128x512xf32>, vector<8x512xf32> -> vector<8x512xf32>
    %665 = arith.addf %662, %664 : vector<8x512xf32>
    %666 = vector.extract_strided_slice %665 {offsets = [0, 0], sizes = [8, 384], strides = [1, 1]} : vector<8x512xf32> to vector<8x384xf32>
    %667 = arith.negf %666 : vector<8x384xf32>
    %668 = math.exp %667 : vector<8x384xf32>
    %cst_203 = arith.constant 1.000000e+00 : f32
    %669 = vector.broadcast %cst_203 : f32 to vector<8x384xf32>
    %670 = arith.addf %669, %668 : vector<8x384xf32>
    %671 = arith.divf %669, %670 : vector<8x384xf32>
    %672 = vector.extract_strided_slice %665 {offsets = [0, 384], sizes = [8, 128], strides = [1, 1]} : vector<8x512xf32> to vector<8x128xf32>
    %673 = math.tanh %672 : vector<8x128xf32>
    %674 = vector.extract_strided_slice %671 {offsets = [0, 0], sizes = [8, 128], strides = [1, 1]} : vector<8x384xf32> to vector<8x128xf32>
    %675 = vector.extract_strided_slice %671 {offsets = [0, 128], sizes = [8, 128], strides = [1, 1]} : vector<8x384xf32> to vector<8x128xf32>
    %676 = vector.extract_strided_slice %671 {offsets = [0, 256], sizes = [8, 128], strides = [1, 1]} : vector<8x384xf32> to vector<8x128xf32>
    %677 = arith.mulf %675, %637 : vector<8x128xf32>
    %678 = arith.mulf %674, %673 : vector<8x128xf32>
    %679 = arith.addf %677, %678 : vector<8x128xf32>
    %680 = math.tanh %679 : vector<8x128xf32>
    %681 = arith.mulf %676, %680 : vector<8x128xf32>
    %c7_204 = arith.constant 7 : index
    %c0_205 = arith.constant 0 : index
    %c0_206 = arith.constant 0 : index
    %682 = vector.load %arg11[%c7_204, %c0_205, %c0_206] : memref<8x16x512xf32, #tpu.memory_space<vmem>>, vector<1x16x512xf32>
    %683 = vector.shape_cast %682 : vector<1x16x512xf32> to vector<16x512xf32>
    %684 = vector.extract_strided_slice %683 {offsets = [0, 0], sizes = [8, 512], strides = [1, 1]} : vector<16x512xf32> to vector<8x512xf32>
    %c0_207 = arith.constant 0 : index
    %c0_208 = arith.constant 0 : index
    %685 = vector.load %arg6[%c0_207, %c0_208] : memref<128x512xf32, #tpu.memory_space<vmem>>, vector<128x512xf32>
    %cst_209 = arith.constant dense<0.000000e+00> : vector<8x512xf32>
    %686 = tpu.matmul %661, %685, %cst_209 {dimension_numbers = #tpu.dot_dimension_numbers<[1], [0], [0], [1], [0, 0, 1, 1], [], []>} : vector<8x128xf32>, vector<128x512xf32>, vector<8x512xf32> -> vector<8x512xf32>
    %687 = arith.addf %684, %686 : vector<8x512xf32>
    %688 = vector.extract_strided_slice %687 {offsets = [0, 0], sizes = [8, 384], strides = [1, 1]} : vector<8x512xf32> to vector<8x384xf32>
    %689 = arith.negf %688 : vector<8x384xf32>
    %690 = math.exp %689 : vector<8x384xf32>
    %cst_210 = arith.constant 1.000000e+00 : f32
    %691 = vector.broadcast %cst_210 : f32 to vector<8x384xf32>
    %692 = arith.addf %691, %690 : vector<8x384xf32>
    %693 = arith.divf %691, %692 : vector<8x384xf32>
    %694 = vector.extract_strided_slice %687 {offsets = [0, 384], sizes = [8, 128], strides = [1, 1]} : vector<8x512xf32> to vector<8x128xf32>
    %695 = math.tanh %694 : vector<8x128xf32>
    %696 = vector.extract_strided_slice %693 {offsets = [0, 0], sizes = [8, 128], strides = [1, 1]} : vector<8x384xf32> to vector<8x128xf32>
    %697 = vector.extract_strided_slice %693 {offsets = [0, 128], sizes = [8, 128], strides = [1, 1]} : vector<8x384xf32> to vector<8x128xf32>
    %698 = vector.extract_strided_slice %693 {offsets = [0, 256], sizes = [8, 128], strides = [1, 1]} : vector<8x384xf32> to vector<8x128xf32>
    %699 = arith.mulf %697, %659 : vector<8x128xf32>
    %700 = arith.mulf %696, %695 : vector<8x128xf32>
    %701 = arith.addf %699, %700 : vector<8x128xf32>
    %702 = math.tanh %701 : vector<8x128xf32>
    %703 = arith.mulf %698, %702 : vector<8x128xf32>
    %704 = vector.extract_strided_slice %683 {offsets = [8, 0], sizes = [8, 512], strides = [1, 1]} : vector<16x512xf32> to vector<8x512xf32>
    %c0_211 = arith.constant 0 : index
    %c0_212 = arith.constant 0 : index
    %705 = vector.load %arg6[%c0_211, %c0_212] : memref<128x512xf32, #tpu.memory_space<vmem>>, vector<128x512xf32>
    %cst_213 = arith.constant dense<0.000000e+00> : vector<8x512xf32>
    %706 = tpu.matmul %681, %705, %cst_213 {dimension_numbers = #tpu.dot_dimension_numbers<[1], [0], [0], [1], [0, 0, 1, 1], [], []>} : vector<8x128xf32>, vector<128x512xf32>, vector<8x512xf32> -> vector<8x512xf32>
    %707 = arith.addf %704, %706 : vector<8x512xf32>
    %708 = vector.extract_strided_slice %707 {offsets = [0, 0], sizes = [8, 384], strides = [1, 1]} : vector<8x512xf32> to vector<8x384xf32>
    %709 = arith.negf %708 : vector<8x384xf32>
    %710 = math.exp %709 : vector<8x384xf32>
    %cst_214 = arith.constant 1.000000e+00 : f32
    %711 = vector.broadcast %cst_214 : f32 to vector<8x384xf32>
    %712 = arith.addf %711, %710 : vector<8x384xf32>
    %713 = arith.divf %711, %712 : vector<8x384xf32>
    %714 = vector.extract_strided_slice %707 {offsets = [0, 384], sizes = [8, 128], strides = [1, 1]} : vector<8x512xf32> to vector<8x128xf32>
    %715 = math.tanh %714 : vector<8x128xf32>
    %716 = vector.extract_strided_slice %713 {offsets = [0, 0], sizes = [8, 128], strides = [1, 1]} : vector<8x384xf32> to vector<8x128xf32>
    %717 = vector.extract_strided_slice %713 {offsets = [0, 128], sizes = [8, 128], strides = [1, 1]} : vector<8x384xf32> to vector<8x128xf32>
    %718 = vector.extract_strided_slice %713 {offsets = [0, 256], sizes = [8, 128], strides = [1, 1]} : vector<8x384xf32> to vector<8x128xf32>
    %719 = arith.mulf %717, %679 : vector<8x128xf32>
    %720 = arith.mulf %716, %715 : vector<8x128xf32>
    %721 = arith.addf %719, %720 : vector<8x128xf32>
    %722 = math.tanh %721 : vector<8x128xf32>
    %723 = arith.mulf %718, %722 : vector<8x128xf32>
    %724 = tpu.concatenate %703, %723 in 0 : vector<8x128xf32>, vector<8x128xf32> -> vector<16x128xf32>
    %c0_215 = arith.constant 0 : index
    %c0_216 = arith.constant 0 : index
    %725 = vector.load %arg8[%c0_215, %c0_216] : memref<128x128xf32, #tpu.memory_space<vmem>>, vector<128x128xf32>
    %cst_217 = arith.constant dense<0.000000e+00> : vector<16x128xf32>
    %726 = tpu.matmul %724, %725, %cst_217 {dimension_numbers = #tpu.dot_dimension_numbers<[1], [0], [0], [1], [0, 0, 1, 1], [], []>} : vector<16x128xf32>, vector<128x128xf32>, vector<16x128xf32> -> vector<16x128xf32>
    %c0_218 = arith.constant 0 : index
    %c0_219 = arith.constant 0 : index
    %727 = vector.load %arg9[%c0_218, %c0_219] : memref<1x128xf32, #tpu.memory_space<vmem>>, vector<1x128xf32>
    %728 = vector.broadcast %727 : vector<1x128xf32> to vector<16x128xf32>
    %729 = arith.addf %726, %728 : vector<16x128xf32>
    %cst_220 = arith.constant dense<0xFF800000> : vector<16xf32>
    %730 = vector.multi_reduction <maximumf>, %729, %cst_220 [1] : vector<16x128xf32> to vector<16xf32>
    %731 = vector.shape_cast %730 : vector<16xf32> to vector<16x1xf32>
    %732 = vector.broadcast %731 : vector<16x1xf32> to vector<16x128xf32>
    %733 = arith.subf %729, %732 : vector<16x128xf32>
    %734 = math.exp %733 : vector<16x128xf32>
    %cst_221 = arith.constant dense<0.000000e+00> : vector<16xf32>
    %735 = vector.multi_reduction <add>, %734, %cst_221 [1] : vector<16x128xf32> to vector<16xf32>
    %736 = vector.shape_cast %735 : vector<16xf32> to vector<16x1xf32>
    %737 = math.log %736 : vector<16x1xf32>
    %738 = vector.broadcast %737 : vector<16x1xf32> to vector<16x128xf32>
    %739 = arith.subf %733, %738 : vector<16x128xf32>
    %c0_222 = arith.constant 0 : index
    %c0_223 = arith.constant 0 : index
    %740 = vector.load %arg10[%c0_222, %c0_223] : memref<16x128xf32, #tpu.memory_space<vmem>>, vector<16x128xf32>
    tpu.vector_store %arg10[%c0_222, %c0_223], %739 {strides = array<i32>} : memref<16x128xf32, #tpu.memory_space<vmem>>, vector<16x128xf32>,
    return
  }
  func.func @transform_0(%arg0: i32) -> (i32, i32, i32) {
    %c0_i32 = arith.constant 0 : i32
    %c0_i32_0 = arith.constant 0 : i32
    %c0_i32_1 = arith.constant 0 : i32
    return %c0_i32, %arg0, %c0_i32_0 : i32, i32, i32
  }
  func.func @transform_1(%arg0: i32) -> (i32, i32) {
    %c0_i32 = arith.constant 0 : i32
    %c0_i32_0 = arith.constant 0 : i32
    %c0_i32_1 = arith.constant 0 : i32
    return %c0_i32, %c0_i32_0 : i32, i32
  }
  func.func @transform_2(%arg0: i32) -> (i32, i32) {
    %c0_i32 = arith.constant 0 : i32
    %c0_i32_0 = arith.constant 0 : i32
    %c0_i32_1 = arith.constant 0 : i32
    return %c0_i32, %c0_i32_0 : i32, i32
  }
  func.func @transform_3(%arg0: i32) -> (i32, i32) {
    %c0_i32 = arith.constant 0 : i32
    %c0_i32_0 = arith.constant 0 : i32
    %c0_i32_1 = arith.constant 0 : i32
    return %c0_i32, %c0_i32_0 : i32, i32
  }
  func.func @transform_4(%arg0: i32) -> (i32, i32) {
    %c0_i32 = arith.constant 0 : i32
    %c0_i32_0 = arith.constant 0 : i32
    %c0_i32_1 = arith.constant 0 : i32
    return %c0_i32, %c0_i32_0 : i32, i32
  }
  func.func @transform_5(%arg0: i32) -> (i32, i32) {
    %c0_i32 = arith.constant 0 : i32
    %c0_i32_0 = arith.constant 0 : i32
    %c0_i32_1 = arith.constant 0 : i32
    return %c0_i32, %c0_i32_0 : i32, i32
  }
  func.func @transform_6(%arg0: i32) -> (i32, i32) {
    %c0_i32 = arith.constant 0 : i32
    %c0_i32_0 = arith.constant 0 : i32
    %c0_i32_1 = arith.constant 0 : i32
    return %c0_i32, %c0_i32_0 : i32, i32
  }
  func.func @transform_7(%arg0: i32) -> (i32, i32) {
    %c0_i32 = arith.constant 0 : i32
    %c0_i32_0 = arith.constant 0 : i32
    %c0_i32_1 = arith.constant 0 : i32
    return %c0_i32, %c0_i32_0 : i32, i32
  }
  func.func @transform_8(%arg0: i32) -> (i32, i32) {
    %c0_i32 = arith.constant 0 : i32
    %c0_i32_0 = arith.constant 0 : i32
    %c0_i32_1 = arith.constant 0 : i32
    return %c0_i32, %c0_i32_0 : i32, i32
  }
  func.func @transform_9(%arg0: i32) -> (i32, i32) {
    %c0_i32 = arith.constant 0 : i32
    %c0_i32_0 = arith.constant 0 : i32
    return %arg0, %c0_i32 : i32, i32
  }
}

</mosaic_0001>

<bundles_post_ra>
// kernel: _lambda_.1
= control target key start
LH: loop header
LB: loop body
LE: loop exit
PB: predicated region body
PF: predicated region fallthrough
CT: control target
= control target key end

     0   :  { %14 = vsyncpa [#allocation5], 0  ;;  %s11829_s0 = inlined_call_operand.vmem [shape: f32[8,16,16], index: 0, kind: input, shape index: {}]   ;;  %s11830_s1 = inlined_call_operand.hbm [shape: f32[16,512], index: 1, kind: input, shape index: {}]   ;;  %s11831_s2 = inlined_call_operand.hbm [shape: f32[128,512], index: 2, kind: input, shape index: {}]   ;;  %s11832_s3 = inlined_call_operand.vmem [shape: f32[1,512], index: 3, kind: input, shape index: {}]   ;;  %s11833_s4 = inlined_call_operand.hbm [shape: f32[128,512], index: 4, kind: input, shape index: {}]   ;;  %s11834_s5 = inlined_call_operand.hbm [shape: f32[128,512], index: 5, kind: input, shape index: {}]   ;;  %s11835_s6 = inlined_call_operand.vmem [shape: f32[1,512], index: 6, kind: input, shape index: {}]   ;;  %s11836_s7 = inlined_call_operand.vmem [shape: f32[128,128], index: 7, kind: input, shape index: {}]   ;;  %s11837_s8 = inlined_call_operand.vmem [shape: f32[1,128], index: 8, kind: input, shape index: {}]   ;;  %s11838_s9 = inlined_call_operand.vmem [shape: f32[16,128], index: 9, kind: output, shape index: {}]  }
   0x1   :  { %15 = vsyncpa [#allocation7], 0 }
   0x2   :  { %16 = vsyncpa [#allocation10], 0  ;;  %s8128_s30 = smov [#allocation6]   ;;  %s8129_s11 = smov [#allocation4]  }
   0x3   :  { %s36_s10 = sshll.u32 %s8128_s30, 4  ;;  %s24_s12 = sshll.u32 %s8129_s11, 4  ;;  %s37_s10 = int_to_ptr.vmem [resolvable:$true] %s36_s10  ;;  %s25_s12 = int_to_ptr.vmem [resolvable:$true] %s24_s12 }
   0x4   :  { %s8050_s13 = scalar_lea.vmem %s37_s10, 8192  ;;  %p8055_p1 = scmp.lt.s32.totalorder %s37_s10, %s37_s10 }
   0x5   :  { %p8051_p0 = scmp.ne.s32.totalorder %s37_s10, %s8050_s13  ;;  %p8056_p2 = scmp.lt.s32.totalorder %s8050_s13, %s8050_s13 }
   0x7   :  { %p8057_p3 = por %p8056_p2, %p8055_p1 }
   0x9   :  { %p8058_p4 = pnand %p8057_p3, %p8051_p0 }
   0xb   :  { %8061 = shalt.err (!%p8058_p4)
}
   0xc   :  { %s8130_s14 = smov 512   ;;  %s8131_s15 = smov 32  }
   0xd   :  { %42 = dma.hbm_to_vmem [thread:$0]  %s11831_s2, 8192, %s37_s10, [#allocation7], %s8130_s14, %s8130_s14, %s8131_s15  }
   0xe   :  { %s8070_s18 = scalar_lea.vmem %s25_s12, 1024  ;;  %p8075_p6 = scmp.lt.s32.totalorder %s25_s12, %s25_s12 }
   0xf   :  { %p8071_p5 = scmp.ne.s32.totalorder %s25_s12, %s8070_s18  ;;  %p8076_p7 = scmp.lt.s32.totalorder %s8070_s18, %s8070_s18 }
  0x11   :  { %p8077_p8 = por %p8076_p7, %p8075_p6 }
  0x13   :  { %p8078_p9 = pnand %p8077_p8, %p8071_p5 }
  0x15   :  { %8081 = shalt.err (!%p8078_p9)
}
  0x16   :  { %30 = dma.hbm_to_vmem [thread:$0]  %s11830_s1, 1024, %s25_s12, [#allocation5], %s8130_s14, %s8130_s14, %s8131_s15  }
  0x17   :  { %s8132_s21 = smov [#allocation8]   ;;  %s8133_s23 = smov [#allocation9]  }
  0x18   :  { %s50_s22 = sshll.u32 %s8132_s21, 4  ;;  %s62_s24 = sshll.u32 %s8133_s23, 4  ;;  %s51_s22 = int_to_ptr.vmem [resolvable:$true] %s50_s22  ;;  %s63_s24 = int_to_ptr.vmem [resolvable:$true] %s62_s24 }
  0x19   :  { %s8090_s2 = scalar_lea.vmem %s51_s22, 8192  ;;  %p8095_p11 = scmp.lt.s32.totalorder %s51_s22, %s51_s22 }
  0x1a   :  { %p8091_p10 = scmp.ne.s32.totalorder %s51_s22, %s8090_s2  ;;  %p8096_p12 = scmp.lt.s32.totalorder %s8090_s2, %s8090_s2 }
  0x1c   :  { %p8097_p13 = por %p8096_p12, %p8095_p11 }
  0x1e   :  { %p8098_p0 = pnand %p8097_p13, %p8091_p10 }
  0x20   :  { %8101 = shalt.err (!%p8098_p0)
}
  0x21   :  { %56 = dma.hbm_to_vmem [thread:$0]  %s11833_s4, 8192, %s51_s22, [#allocation7], %s8130_s14, %s8130_s14, %s8131_s15  }
  0x22   :  { %s8110_s1 = scalar_lea.vmem %s63_s24, 8192  ;;  %p8115_p2 = scmp.lt.s32.totalorder %s63_s24, %s63_s24 }
  0x23   :  { %p8111_p1 = scmp.ne.s32.totalorder %s63_s24, %s8110_s1  ;;  %p8116_p3 = scmp.lt.s32.totalorder %s8110_s1, %s8110_s1 }
  0x25   :  { %p8117_p4 = por %p8116_p3, %p8115_p2 }
  0x27   :  { %p8118_p5 = pnand %p8117_p4, %p8111_p1 }
  0x29   :  { %8121 = shalt.err (!%p8118_p5)
}
  0x2a   :  { %68 = dma.hbm_to_vmem [thread:$0]  %s11834_s5, 8192, %s63_s24, [#allocation10], %s8130_s14, %s8130_s14, %s8131_s15  }
  0x2b   :  { %8122 = dma.done.wait [#allocation5], 1024  }
  0x2c   :  { %8123 = vsyncadd [#allocation5], 4294966272 }
  0x2d   :  { %8124 = dma.done.wait [#allocation7], 16384  }
  0x2e   :  { %8125 = vsyncadd [#allocation7], 4294950912 }
  0x2f   :  { %8126 = dma.done.wait [#allocation10], 8192  }
  0x30   :  { %8127 = vsyncadd [#allocation10], 4294959104  ;;  %v11846_v0 = vmov 0.0   ;;  %v108_v1 = vld [vmem:[#allocation4 + $0x28] sm:$0xff]  ;;  %v107_v2 = vld [vmem:[#allocation4 + $0x20] sm:$0xff]  ;;  %vm133_vm0 = vcmask 130048  }
  0x31   :  { %246 = vmatprep.mubr.f32.mxu0 %v11846_v0  ;;  %318 = vmatprep.mubr.f32.mxu1 %v11846_v0  ;;  %v104_v3 = vld [vmem:[#allocation4 + $0x8] sm:$0xff]  ;;  %v103_v4 = vld [vmem:[#allocation4] sm:$0xff]  ;;  %v110_v7 = vld [vmem:[#allocation4 + $0x38] sm:$0xff] }
  0x32   :  { %210 = vmatprep.subr.mxu0 %v108_v1  ;;  %7255 = vmatprep.subr.mxu1 %v108_v1  ;;  %v87_v5 = vld [vmem:[%s11829_s0] sm:$0xff]  ;;  %v109_v8 = vld [vmem:[#allocation4 + $0x30] sm:$0xff]  ;;  %v106_v9 = vld [vmem:[#allocation4 + $0x18] sm:$0xff] }
  0x33   :  { %211 = vmatpush1.msra.mxu0 %v107_v2  ;;  %7257 = vmatpush1.msra.mxu1 %v107_v2  ;;  %v8217_v6 = vld [vmem:[%s11829_s0 + $0x60] sm:$0xff]  ;;  %v8222_v10 = vld [vmem:[#allocation6 + $0x1e8] sm:$0xff]  ;;  %v105_v13 = vld [vmem:[#allocation4 + $0x10] sm:$0xff] }
  0x34   :  { %212 = vmatprep.subr.mxu0 %v104_v3  ;;  %7256 = vmatprep.subr.mxu1 %v104_v3  ;;  %v88_v11 = vld [vmem:[%s11829_s0 + $0x8] sm:$0xff]  ;;  %v8235_v14 = vld [vmem:[#allocation6 + $0x1e0] sm:$0xff]  ;;  %v8240_v15 = vld [vmem:[#allocation6 + $0x1f8] sm:$0xff] }
  0x35   :  { %213 = vmatpush1.msra.mxu0 %v103_v4  ;;  %7258 = vmatpush1.msra.mxu1 %v103_v4  ;;  %v8231_v12 = vld [vmem:[%s11829_s0 + $0x68] sm:$0xff]  ;;  %12255 = vst [vmem:[#allocation14_spill] sm:$0xff] %v8235_v14  ;;  %v89_v17 = vld [vmem:[%s11829_s0 + $0x10] sm:$0xff]  ;;  %v8257_v19 = vld [vmem:[#allocation6 + $0x1c0] sm:$0xff] }
  0x36   :  { %7073 = vmatmul.mubr.msk.f32.vlgmr.msra.gmra.mxu0 %vm133_vm0, %v87_v5  ;;  %7085 = vmatmul.mubr.msk.f32.vlgmr.msra.gmra.mxu1 %vm133_vm0, %v8217_v6  ;;  %v8242_v16 = vld [vmem:[#allocation6 + $0x1c8] sm:$0xff]  ;;  %v8252_v18 = vld [vmem:[%s11829_s0 + $0x70] sm:$0xff]  ;;  %12257 = vst [vmem:[#allocation16_spill] sm:$0xff] %v8257_v19  ;;  %v90_v21 = vld [vmem:[%s11829_s0 + $0x18] sm:$0xff] }
  0x37   :  { %371 = vmatprep.subr.mxu1 %v110_v7  ;;  %252 = vmatprep.mubr.f32.mxu0 %v11846_v0  ;;  %12256 = vst [vmem:[#allocation15_spill] sm:$0xff] %v8242_v16  ;;  %v8262_v20 = vld [vmem:[#allocation6 + $0x1a8] sm:$0xff]  ;;  %v8272_v22 = vld [vmem:[%s11829_s0 + $0x78] sm:$0xff]  ;;  %v8276_v23 = vld [vmem:[#allocation6 + $0x1a0] sm:$0xff] }
  0x38   :  { %372 = vmatpush1.msra.mxu1 %v109_v8  ;;  %324 = vmatprep.mubr.f32.mxu1 %v11846_v0  ;;  %12258 = vst [vmem:[#allocation17_spill] sm:$0xff] %v8262_v20  ;;  %12259 = vst [vmem:[#allocation18_spill] sm:$0xff] %v8276_v23  ;;  %v8281_v24 = vld [vmem:[#allocation6 + $0x188] sm:$0xff]  ;;  %v91_v25 = vld [vmem:[%s11829_s0 + $0x20] sm:$0xff] }
  0x39   :  { %373 = vmatprep.subr.mxu1 %v106_v9  ;;  %640 = vmatprep.subr.mxu0 %v8222_v10  ;;  %v8288_v26 = vld [vmem:[#allocation6 + $0x1f0] sm:$0xff]  ;;  %v8291_v27 = vld [vmem:[#allocation6 + $0x1d8] sm:$0xff]  ;;  %v8298_v29 = vld [vmem:[#allocation6 + $0x180] sm:$0xff] }
  0x3a   :  { %7074 = vmatmul.mubr.msk.f32.gmra.mxu0 %vm133_vm0, %v88_v11  ;;  %7086 = vmatmul.mubr.msk.f32.gmra.mxu1 %vm133_vm0, %v8231_v12  ;;  %v8296_v28 = vld [vmem:[#allocation6 + $0x1d0] sm:$0xff]  ;;  %v8305_v30 = vld [vmem:[%s11829_s0 + $0x28] sm:$0xff]  ;;  %v8313_v32 = vld [vmem:[#allocation6 + $0x1b8] sm:$0xff] }
  0x3b   :  { %258 = vmatprep.mubr.f32.mxu0 %v11846_v0  ;;  %330 = vmatprep.mubr.f32.mxu1 %v11846_v0  ;;  %v8311_v31 = vld [vmem:[#allocation6 + $0x168] sm:$0xff]  ;;  %v8318_v33 = vld [vmem:[#allocation6 + $0x160] sm:$0xff]  ;;  %v8320_v34 = vld [vmem:[#allocation6 + $0x1b0] sm:$0xff] }
  0x3c   :  { %374 = vmatpush1.msra.mxu1 %v105_v13  ;;  %641 = vmatpush1.msra.mxu0 %v8235_v14  ;;  %v8327_v35 = vld [vmem:[%s11829_s0 + $0x30] sm:$0xff]  ;;  %v8331_v36 = vld [vmem:[#allocation6 + $0x148] sm:$0xff]  ;;  %v8335_v37 = vld [vmem:[#allocation6 + $0x140] sm:$0xff] }
  0x3d   :  { %711 = vmatprep.subr.mxu1 %v8240_v15  ;;  %642 = vmatprep.subr.mxu0 %v8242_v16  ;;  %v8340_v38 = vld [vmem:[#allocation6 + $0x128] sm:$0xff]  ;;  %v8342_v39 = vld [vmem:[#allocation6 + $0x198] sm:$0xff]  ;;  %v8353_v41 = vld [vmem:[#allocation6 + $0x120] sm:$0xff] }
  0x3e   :  { %7075 = vmatmul.mubr.msk.f32.gmra.mxu0 %vm133_vm0, %v89_v17  ;;  %7087 = vmatmul.mubr.msk.f32.gmra.mxu1 %vm133_vm0, %v8252_v18  ;;  %v8349_v40 = vld [vmem:[%s11829_s0 + $0x38] sm:$0xff]  ;;  %v8355_v42 = vld [vmem:[#allocation6 + $0x190] sm:$0xff]  ;;  %v8359_v43 = vld [vmem:[#allocation6 + $0x108] sm:$0xff] }
  0x3f   :  { %264 = vmatprep.mubr.f32.mxu0 %v11846_v0  ;;  %336 = vmatprep.mubr.f32.mxu1 %v11846_v0  ;;  %v8364_v44 = vld [vmem:[#allocation6 + $0x100] sm:$0xff]  ;;  %v8375_v46 = vld [vmem:[#allocation6 + $0xe8] sm:$0xff]  ;;  %v8377_v47 = vld [vmem:[#allocation6 + $0x178] sm:$0xff] }
  0x40   :  { %643 = vmatpush1.msra.mxu0 %v8257_v19  ;;  %v8371_v45 = vld [vmem:[%s11829_s0 + $0x40] sm:$0xff]  ;;  %v8383_v49 = vld [vmem:[#allocation6 + $0x170] sm:$0xff]  ;;  %v8388_v50 = vld [vmem:[#allocation6 + $0xc8] sm:$0xff] }
  0x41   :  { %644 = vmatprep.subr.mxu0 %v8262_v20  ;;  %v8381_v48 = vld [vmem:[#allocation6 + $0xe0] sm:$0xff]  ;;  %v8399_v52 = vld [vmem:[%s11829_s0 + $0x48] sm:$0xff]  ;;  %v8405_v54 = vld [vmem:[#allocation6 + $0x158] sm:$0xff] }
  0x42   :  { %7076 = vmatmul.mubr.msk.f32.gmra.mxu0 %vm133_vm0, %v90_v21  ;;  %7088 = vmatmul.mubr.msk.f32.gmra.mxu1 %vm133_vm0, %v8272_v22  ;;  %v8392_v51 = vld [vmem:[#allocation6 + $0xc0] sm:$0xff]  ;;  %v8403_v53 = vld [vmem:[#allocation6 + $0xa8] sm:$0xff]  ;;  %v8411_v56 = vld [vmem:[#allocation6 + $0x150] sm:$0xff] }
  0x43   :  { %270 = vmatprep.mubr.f32.mxu0 %v11846_v0  ;;  %407 = vmatprep.mubr.f32.mxu1 %v11846_v0  ;;  %v8409_v55 = vld [vmem:[#allocation6 + $0xa0] sm:$0xff]  ;;  %v8417_v57 = vld [vmem:[#allocation6 + $0x88] sm:$0xff]  ;;  %v8428_v59 = vld [vmem:[%s11829_s0 + $0x50] sm:$0xff] }
  0x44   :  { %645 = vmatpush1.msra.mxu0 %v8276_v23  ;;  %12260 = vst [vmem:[#allocation19_spill] sm:$0xff] %v8417_v57  ;;  %v8421_v58 = vld [vmem:[#allocation6 + $0x80] sm:$0xff]  ;;  %v8432_v60 = vld [vmem:[#allocation6 + $0x68] sm:$0xff]  ;;  %v8434_v61 = vld [vmem:[#allocation6 + $0x138] sm:$0xff] }
  0x45   :  { %646 = vmatprep.subr.mxu0 %v8281_v24  ;;  %12261 = vst [vmem:[#allocation20_spill] sm:$0xff] %v8421_v58  ;;  %12262 = vst [vmem:[#allocation21_spill] sm:$0xff] %v8432_v60  ;;  %v8438_v62 = vld [vmem:[#allocation6 + $0x60] sm:$0xff]  ;;  %v8440_v63 = vld [vmem:[#allocation6 + $0x130] sm:$0xff] }
  0x46   :  { %7077 = vmatmul.mubr.msk.f32.gmra.mxu0 %vm133_vm0, %v91_v25  ;;  %7089 = vmatmul.mubr.msk.f32.vlgmr.msra.gmra.mxu1 %vm133_vm0, %v87_v5  ;;  %12263 = vst [vmem:[#allocation22_spill] sm:$0xff] %v8438_v62  ;;  %v8446_v1 = vld [vmem:[#allocation6 + $0x48] sm:$0xff]  ;;  %v8450_v2 = vld [vmem:[#allocation6 + $0x40] sm:$0xff]  ;;  %v98_v3 = vld [vmem:[%s11829_s0 + $0x58] sm:$0xff] }
  0x47   :  { %712 = vmatpush1.msra.mxu1 %v8288_v26  ;;  %276 = vmatprep.mubr.f32.mxu0 %v11846_v0  ;;  %12264 = vst [vmem:[#allocation23_spill] sm:$0xff] %v8446_v1  ;;  %12265 = vst [vmem:[#allocation24_spill] sm:$0xff] %v8450_v2  ;;  %v8459_v4 = vld [vmem:[#allocation6 + $0x28] sm:$0xff]  ;;  %v8461_v5 = vld [vmem:[#allocation6 + $0x118] sm:$0xff] }
  0x48   :  { %413 = vmatprep.mubr.f32.mxu1 %v11846_v0  ;;  %713 = vmatprep.subr.mxu1 %v8291_v27  ;;  %12266 = vst [vmem:[#allocation25_spill] sm:$0xff] %v8459_v4  ;;  %v8465_v7 = vld [vmem:[#allocation6 + $0x20] sm:$0xff]  ;;  %v8467_v8 = vld [vmem:[#allocation6 + $0x110] sm:$0xff]  ;;  %v8472_v9 = vld [vmem:[#allocation6 + $0x8] sm:$0xff] }
  0x49   :  { %714 = vmatpush1.msra.mxu1 %v8296_v28  ;;  %647 = vmatpush1.msra.mxu0 %v8298_v29  ;;  %12267 = vst [vmem:[#allocation26_spill] sm:$0xff] %v8465_v7  ;;  %12268 = vst [vmem:[#allocation27_spill] sm:$0xff] %v8472_v9  ;;  %v8482_v13 = vld [vmem:[#allocation6 + $0xf8] sm:$0xff] }
  0x4a   :  { %7078 = vmatmul.mubr.msk.f32.gmra.mxu0 %vm133_vm0, %v8305_v30  ;;  %7090 = vmatmul.mubr.msk.f32.gmra.mxu1 %vm133_vm0, %v88_v11  ;;  %v8476_v11 = vld [vmem:[#allocation6] sm:$0xff] }
  0x4b   :  { %282 = vmatprep.mubr.f32.mxu0 %v11846_v0  ;;  %419 = vmatprep.mubr.f32.mxu1 %v11846_v0  ;;  %12269 = vst [vmem:[#allocation28_spill] sm:$0xff] %v8476_v11 }
  0x4c   :  { %648 = vmatprep.subr.mxu0 %v8311_v31  ;;  %715 = vmatprep.subr.mxu1 %v8313_v32 }
  0x4d   :  { %649 = vmatpush1.msra.mxu0 %v8318_v33  ;;  %716 = vmatpush1.msra.mxu1 %v8320_v34 }
  0x4e   :  { %7079 = vmatmul.mubr.msk.f32.gmra.mxu0 %vm133_vm0, %v8327_v35  ;;  %7091 = vmatmul.mubr.msk.f32.gmra.mxu1 %vm133_vm0, %v89_v17  ;;  %v8486_v17 = vld [vmem:[#allocation6 + $0xf0] sm:$0xff] }
  0x4f   :  { %650 = vmatprep.subr.mxu0 %v8331_v36  ;;  %288 = vmatprep.mubr.f32.mxu0 %v11846_v0 }
  0x50   :  { %425 = vmatprep.mubr.f32.mxu1 %v11846_v0  ;;  %651 = vmatpush1.msra.mxu0 %v8335_v37 }
  0x51   :  { %652 = vmatprep.subr.mxu0 %v8340_v38  ;;  %717 = vmatprep.subr.mxu1 %v8342_v39 }
  0x52   :  { %7080 = vmatmul.mubr.msk.f32.gmra.mxu0 %vm133_vm0, %v8349_v40  ;;  %7092 = vmatmul.mubr.msk.f32.gmra.mxu1 %vm133_vm0, %v90_v21  ;;  %v8491_v21 = vld [vmem:[#allocation6 + $0xd8] sm:$0xff] }
  0x53   :  { %653 = vmatpush1.msra.mxu0 %v8353_v41  ;;  %718 = vmatpush1.msra.mxu1 %v8355_v42 }
  0x54   :  { %654 = vmatprep.subr.mxu0 %v8359_v43  ;;  %294 = vmatprep.mubr.f32.mxu0 %v11846_v0 }
  0x55   :  { %431 = vmatprep.mubr.f32.mxu1 %v11846_v0  ;;  %655 = vmatpush1.msra.mxu0 %v8364_v44 }
  0x56   :  { %7081 = vmatmul.mubr.msk.f32.gmra.mxu0 %vm133_vm0, %v8371_v45  ;;  %7093 = vmatmul.mubr.msk.f32.gmra.mxu1 %vm133_vm0, %v91_v25  ;;  %v8496_v25 = vld [vmem:[#allocation6 + $0xd0] sm:$0xff] }
  0x57   :  { %656 = vmatprep.subr.mxu0 %v8375_v46  ;;  %719 = vmatprep.subr.mxu1 %v8377_v47 }
  0x58   :  { %657 = vmatpush1.msra.mxu0 %v8381_v48  ;;  %720 = vmatpush1.msra.mxu1 %v8383_v49 }
  0x59   :  { %658 = vmatprep.subr.mxu0 %v8388_v50  ;;  %300 = vmatprep.mubr.f32.mxu0 %v11846_v0 }
  0x5a   :  { %437 = vmatprep.mubr.f32.mxu1 %v11846_v0  ;;  %659 = vmatpush1.msra.mxu0 %v8392_v51 }
  0x5b   :  { %7082 = vmatmul.mubr.msk.f32.gmra.mxu0 %vm133_vm0, %v8399_v52  ;;  %7094 = vmatmul.mubr.msk.f32.gmra.mxu1 %vm133_vm0, %v8305_v30  ;;  %v8500_v30 = vld [vmem:[#allocation6 + $0xb8] sm:$0xff] }
  0x5c   :  { %660 = vmatprep.subr.mxu0 %v8403_v53  ;;  %721 = vmatprep.subr.mxu1 %v8405_v54 }
  0x5d   :  { %661 = vmatpush1.msra.mxu0 %v8409_v55  ;;  %722 = vmatpush1.msra.mxu1 %v8411_v56 }
  0x5e   :  { %662 = vmatprep.subr.mxu0 %v8417_v57  ;;  %306 = vmatprep.mubr.f32.mxu0 %v11846_v0 }
  0x5f   :  { %443 = vmatprep.mubr.f32.mxu1 %v11846_v0  ;;  %663 = vmatpush1.msra.mxu0 %v8421_v58 }
  0x60   :  { %7083 = vmatmul.mubr.msk.f32.gmra.mxu0 %vm133_vm0, %v8428_v59  ;;  %7095 = vmatmul.mubr.msk.f32.gmra.mxu1 %vm133_vm0, %v8327_v35  ;;  %v8505_v35 = vld [vmem:[#allocation6 + $0xb0] sm:$0xff] }
  0x61   :  { %664 = vmatprep.subr.mxu0 %v8432_v60  ;;  %723 = vmatprep.subr.mxu1 %v8434_v61  ;;  %12270 = vst [vmem:[#allocation29_spill] sm:$0xff] %v8505_v35 }
  0x62   :  { %665 = vmatpush1.msra.mxu0 %v8438_v62  ;;  %724 = vmatpush1.msra.mxu1 %v8440_v63 }
  0x63   :  { %666 = vmatprep.subr.mxu0 %v8446_v1  ;;  %312 = vmatprep.mubr.f32.mxu0 %v11846_v0 }
  0x64   :  { %449 = vmatprep.mubr.f32.mxu1 %v11846_v0  ;;  %667 = vmatpush1.msra.mxu0 %v8450_v2 }
  0x65   :  { %7084 = vmatmul.mubr.msk.f32.gmra.mxu0 %vm133_vm0, %v98_v3  ;;  %7096 = vmatmul.mubr.msk.f32.gmra.mxu1 %vm133_vm0, %v8349_v40  ;;  %v8510_v40 = vld [vmem:[#allocation6 + $0x98] sm:$0xff] }
  0x66   :  { %668 = vmatprep.subr.mxu0 %v8459_v4  ;;  %725 = vmatprep.subr.mxu1 %v8461_v5  ;;  %12271 = vst [vmem:[#allocation30_spill] sm:$0xff] %v8510_v40 }
  0x67   :  { %669 = vmatpush1.msra.mxu0 %v8465_v7  ;;  %726 = vmatpush1.msra.mxu1 %v8467_v8 }
  0x68   :  { %670 = vmatprep.subr.mxu0 %v8472_v9  ;;  %455 = vmatprep.mubr.f32.mxu1 %v11846_v0 }
  0x69   :  { %671 = vmatpush1.msra.mxu0 %v8476_v11  ;;  %704 = vmatprep.mubr.f32.mxu0 %v11846_v0 }
  0x6a   :  { %7097 = vmatmul.mubr.msk.f32.gmra.mxu1 %vm133_vm0, %v8371_v45  ;;  %705 = vmatmul.mubr.f32.vlgmr.msra.gmra.mxu0 %v11846_v0  ;;  %v8513_v45 = vld [vmem:[#allocation6 + $0x90] sm:$0xff] }
  0x6b   :  { %727 = vmatprep.subr.mxu1 %v8482_v13  ;;  %461 = vmatprep.mubr.f32.mxu1 %v11846_v0  ;;  %12272 = vst [vmem:[#allocation31_spill] sm:$0xff] %v8513_v45 }
  0x6c   :  { %728 = vmatpush1.msra.mxu1 %v8486_v17  ;;  %913 = vmatprep.subr.mxu0 %v8222_v10 }
  0x6d   :  { %729 = vmatprep.subr.mxu1 %v8491_v21  ;;  %914 = vmatpush1.msra.mxu0 %v8235_v14  ;;  %v8517_v14 = vld [vmem:[#allocation6 + $0x78] sm:$0xff] }
  0x6e   :  { %7098 = vmatmul.mubr.msk.f32.gmra.mxu1 %vm133_vm0, %v8399_v52  ;;  %915 = vmatprep.subr.mxu0 %v8242_v16  ;;  %12273 = vst [vmem:[#allocation32_spill] sm:$0xff] %v8517_v14  ;;  %v8523_v52 = vld [vmem:[#allocation6 + $0x70] sm:$0xff]  ;;  %v8527_v16 = vld [vmem:[#allocation6 + $0x58] sm:$0xff] }
  0x6f   :  { %730 = vmatpush1.msra.mxu1 %v8496_v25  ;;  %467 = vmatprep.mubr.f32.mxu1 %v11846_v0  ;;  %12274 = vst [vmem:[#allocation33_spill] sm:$0xff] %v8523_v52  ;;  %12275 = vst [vmem:[#allocation34_spill] sm:$0xff] %v8527_v16 }
  0x70   :  { %731 = vmatprep.subr.mxu1 %v8500_v30  ;;  %916 = vmatpush1.msra.mxu0 %v8257_v19  ;;  %v8530_v19 = vld [vmem:[#allocation6 + $0x50] sm:$0xff] }
  0x71   :  { %732 = vmatpush1.msra.mxu1 %v8505_v35  ;;  %917 = vmatprep.subr.mxu0 %v8262_v20  ;;  %12276 = vst [vmem:[#allocation35_spill] sm:$0xff] %v8530_v19  ;;  %v8534_v20 = vld [vmem:[#allocation6 + $0x38] sm:$0xff] }
  0x72   :  { %7099 = vmatmul.mubr.msk.f32.gmra.mxu1 %vm133_vm0, %v8428_v59  ;;  %733 = vmatprep.subr.mxu1 %v8510_v40  ;;  %12277 = vst [vmem:[#allocation36_spill] sm:$0xff] %v8534_v20  ;;  %v8539_v59 = vld [vmem:[#allocation6 + $0x30] sm:$0xff] }
  0x73   :  { %473 = vmatprep.mubr.f32.mxu1 %v11846_v0  ;;  %734 = vmatpush1.msra.mxu1 %v8513_v45  ;;  %12278 = vst [vmem:[#allocation37_spill] sm:$0xff] %v8539_v59 }
  0x74   :  { %735 = vmatprep.subr.mxu1 %v8517_v14  ;;  %918 = vmatpush1.msra.mxu0 %v8276_v23  ;;  %v8543_v14 = vld [vmem:[#allocation6 + $0x18] sm:$0xff]  ;;  %v8546_v23 = vld [vmem:[#allocation6 + $0x10] sm:$0xff] }
  0x75   :  { %736 = vmatpush1.msra.mxu1 %v8523_v52  ;;  %919 = vmatprep.subr.mxu0 %v8281_v24  ;;  %12279 = vst [vmem:[#allocation38_spill] sm:$0xff] %v8543_v14  ;;  %12280 = vst [vmem:[#allocation39_spill] sm:$0xff] %v8546_v23 }
  0x76   :  { %7100 = vmatmul.mubr.msk.f32.gmra.mxu1 %vm133_vm0, %v98_v3  ;;  %737 = vmatprep.subr.mxu1 %v8527_v16 }
  0x77   :  { %479 = vmatprep.mubr.f32.mxu1 %v11846_v0  ;;  %738 = vmatpush1.msra.mxu1 %v8530_v19 }
  0x78   :  { %739 = vmatprep.subr.mxu1 %v8534_v20  ;;  %920 = vmatpush1.msra.mxu0 %v8298_v29 }
  0x79   :  { %740 = vmatpush1.msra.mxu1 %v8539_v59  ;;  %921 = vmatprep.subr.mxu0 %v8311_v31 }
  0x7a   :  { %7101 = vmatmul.mubr.msk.f32.gmra.mxu1 %vm133_vm0, %v8217_v6  ;;  %741 = vmatprep.subr.mxu1 %v8543_v14  ;;  %v12281_v6 = vld [vmem:[#allocation32_spill] sm:$0xff] }
  0x7b   :  { %485 = vmatprep.mubr.f32.mxu1 %v11846_v0  ;;  %742 = vmatpush1.msra.mxu1 %v8546_v23 }
  0x7c   :  { %984 = vmatprep.subr.mxu1 %v8240_v15  ;;  %922 = vmatpush1.msra.mxu0 %v8318_v33 }
  0x7d   :  { %923 = vmatprep.subr.mxu0 %v8331_v36  ;;  %977 = vmatprep.mubr.f32.mxu0 %v11846_v0 }
  0x7e   :  { %7102 = vmatmul.mubr.msk.f32.gmra.mxu1 %vm133_vm0, %v8231_v12  ;;  %924 = vmatpush1.msra.mxu0 %v8335_v37 }
  0x7f   :  { %491 = vmatprep.mubr.f32.mxu1 %v11846_v0  ;;  %925 = vmatprep.subr.mxu0 %v8340_v38 }
  0x80   :  { %926 = vmatpush1.msra.mxu0 %v8353_v41 }
  0x81   :  { %927 = vmatprep.subr.mxu0 %v8359_v43 }
  0x82   :  { %7103 = vmatmul.mubr.msk.f32.gmra.mxu1 %vm133_vm0, %v8252_v18  ;;  %928 = vmatpush1.msra.mxu0 %v8364_v44 }
  0x83   :  { %497 = vmatprep.mubr.f32.mxu1 %v11846_v0  ;;  %929 = vmatprep.subr.mxu0 %v8375_v46 }
  0x84   :  { %930 = vmatpush1.msra.mxu0 %v8381_v48 }
  0x85   :  { %931 = vmatprep.subr.mxu0 %v8388_v50 }
  0x86   :  { %7104 = vmatmul.mubr.msk.f32.gmra.mxu1 %vm133_vm0, %v8272_v22  ;;  %932 = vmatpush1.msra.mxu0 %v8392_v51  ;;  %v8631_v22 = vld [vmem:[%s11832_s3] sm:$0xf] }
  0x87   :  { %775 = vmatprep.mubr.f32.mxu1 %v11846_v0  ;;  %933 = vmatprep.subr.mxu0 %v8403_v53 }
  0x88   :  { %934 = vmatpush1.msra.mxu0 %v8409_v55 }
  0x89   :  { %935 = vmatprep.subr.mxu0 %v8417_v57 }
  0x8a   :  { %776 = vmatmul.mubr.f32.vlgmr.msra.gmra.mxu1 %v11846_v0  ;;  %936 = vmatpush1.msra.mxu0 %v8421_v58 }
  0x8b   :  { %985 = vmatpush1.msra.mxu1 %v8288_v26  ;;  %937 = vmatprep.subr.mxu0 %v8432_v60 }
  0x8c   :  { %986 = vmatprep.subr.mxu1 %v8291_v27  ;;  %938 = vmatpush1.msra.mxu0 %v8438_v62 }
  0x8d   :  { %987 = vmatpush1.msra.mxu1 %v8296_v28  ;;  %939 = vmatprep.subr.mxu0 %v8446_v1 }
  0x8e   :  { %988 = vmatprep.subr.mxu1 %v8313_v32  ;;  %940 = vmatpush1.msra.mxu0 %v8450_v2 }
  0x8f   :  { %989 = vmatpush1.msra.mxu1 %v8320_v34  ;;  %941 = vmatprep.subr.mxu0 %v8459_v4 }
  0x90   :  { %990 = vmatprep.subr.mxu1 %v8342_v39  ;;  %942 = vmatpush1.msra.mxu0 %v8465_v7 }
  0x91   :  { %991 = vmatpush1.msra.mxu1 %v8355_v42  ;;  %943 = vmatprep.subr.mxu0 %v8472_v9 }
  0x92   :  { %992 = vmatprep.subr.mxu1 %v8377_v47  ;;  %944 = vmatpush1.msra.mxu0 %v8476_v11 }
  0x93   :  { %993 = vmatpush1.msra.mxu1 %v8383_v49  ;;  %1048 = vmatprep.mubr.f32.mxu1 %v11846_v0 }
  0x94   :  { %994 = vmatprep.subr.mxu1 %v8405_v54  ;;  %1083 = vmatprep.subr.mxu0 %v8222_v10  ;;  %v113_v10 = vlaneseq }
  0x95   :  { %995 = vmatpush1.msra.mxu1 %v8411_v56 }
  0x96   :  { %996 = vmatprep.subr.mxu1 %v8434_v61  ;;  %v8625_v12 = vshrl.u32 %v113_v10, 7 }
  0x97   :  { %997 = vmatpush1.msra.mxu1 %v8440_v63 }
  0x98   :  { %998 = vmatprep.subr.mxu1 %v8461_v5  ;;  %12282 = vst [vmem:[#allocation40_spill] sm:$0xff] %v8625_v12  ;;  %v11854_v18 = vsub.s32 0, %v8625_v12 }
  0x99   :  { %999 = vmatpush1.msra.mxu1 %v8467_v8 }
  0x9a   :  { %1000 = vmatprep.subr.mxu1 %v8482_v13  ;;  %v8636_v3 = vrot.slane %v8631_v22, %v11854_v18 }
  0x9b   :  { %1001 = vmatpush1.msra.mxu1 %v8486_v17 }
  0x9c   :  { %1002 = vmatprep.subr.mxu1 %v8491_v21 }
  0x9d   :  { %1003 = vmatpush1.msra.mxu1 %v8496_v25 }
  0x9e   :  { %1004 = vmatprep.subr.mxu1 %v8500_v30 }
  0x9f   :  { %1005 = vmatpush1.msra.mxu1 %v8505_v35 }
  0xa0   :  { %1006 = vmatprep.subr.mxu1 %v8510_v40 }
  0xa1   :  { %1007 = vmatpush1.msra.mxu1 %v8513_v45 }
  0xa2   :  { %1008 = vmatprep.subr.mxu1 %v12281_v6 }
  0xa3   :  { %1009 = vmatpush1.msra.mxu1 %v8523_v52 }
  0xa4   :  { %1010 = vmatprep.subr.mxu1 %v8527_v16 }
  0xa5   :  { %1011 = vmatpush1.msra.mxu1 %v8530_v19  ;;  %v11861_v19 = vsub.s32 1, %v8625_v12 }
  0xa6   :  { %1012 = vmatprep.subr.mxu1 %v8534_v20 }
  0xa7   :  { %1013 = vmatpush1.msra.mxu1 %v8539_v59 }
  0xa8   :  { %1014 = vmatprep.subr.mxu1 %v8543_v14 }
  0xa9   :  { %1015 = vmatpush1.msra.mxu1 %v8546_v23 }
  0xaa   :  { %1154 = vmatprep.subr.mxu1 %v8240_v15 }
  0xf6   :  { %v8638_v0 = vpop.f32.mrf.mxu0  ;;  %v320_v23 = vpop.f32.mrf.mxu1 }
  0xf7   :  { %v8641_v15 = vadd.f32 %v320_v23, %v8636_v3 }
  0xf8   :  { %v8643_v10 = vpop.f32.mrf.mxu0  ;;  %v8645_v11 = vpop.f32.mrf.mxu1 }
  0xf9   :  { %12283 = vst [vmem:[#allocation41_spill] sm:$0xff] %v8641_v15  ;;  %12284 = vst [vmem:[#allocation42_spill] sm:$0xff] %v8645_v11 }
  0xfa   :  { %v8647_v14 = vpop.f32.mrf.mxu0  ;;  %v326_v9 = vpop.f32.mrf.mxu1 }
  0xfb   :  { %v8650_v59 = vadd.f32 %v326_v9, %v8636_v3 }
  0xfc   :  { %v8652_v7 = vpop.f32.mrf.mxu0  ;;  %v8654_v18 = vpop.f32.mrf.mxu1 }
  0xfd   :  { %12285 = vst [vmem:[#allocation43_spill] sm:$0xff] %v8650_v59  ;;  %12286 = vst [vmem:[#allocation44_spill] sm:$0xff] %v8654_v18  ;;  %v8670_v18 = vrot.slane %v8631_v22, %v11861_v19 }
  0xfe   :  { %v260_v20 = vpop.f32.mrf.mxu0  ;;  %v332_v4 = vpop.f32.mrf.mxu1 }
  0xff   :  { %v8658_v23 = vadd.f32 %v260_v20, %v8636_v3  ;;  %v8661_v15 = vadd.f32 %v332_v4, %v8636_v3  ;;  %12291 = vst [vmem:[#allocation49_spill] sm:$0xff] %v8670_v18 }
 0x100   :  { %v8663_v11 = vpop.f32.mrf.mxu0  ;;  %v8665_v2 = vpop.f32.mrf.mxu1 }
 0x101   :  { %12287 = vst [vmem:[#allocation45_spill] sm:$0xff] %v8658_v23  ;;  %12288 = vst [vmem:[#allocation46_spill] sm:$0xff] %v8661_v15 }
 0x102   :  { %12289 = vst [vmem:[#allocation47_spill] sm:$0xff] %v8663_v11  ;;  %12290 = vst [vmem:[#allocation48_spill] sm:$0xff] %v8665_v2  ;;  %v266_v9 = vpop.f32.mrf.mxu0  ;;  %v338_v59 = vpop.f32.mrf.mxu1 }
 0x103   :  { %v8673_v16 = vadd.f32 %v266_v9, %v8636_v3  ;;  %v8676_v20 = vadd.f32 %v338_v59, %v8636_v3  ;;  %v11866_v9 = vsub.s32 2, %v8625_v12 }
 0x104   :  { %v268_v23 = vpop.f32.mrf.mxu0  ;;  %v8678_v4 = vpop.f32.mrf.mxu1 }
 0x105   :  { %12292 = vst [vmem:[#allocation50_spill] sm:$0xff] %v8673_v16  ;;  %12293 = vst [vmem:[#allocation51_spill] sm:$0xff] %v8676_v20  ;;  %v8681_v15 = vadd.f32 %v268_v23, %v8670_v18 }
 0x106   :  { %12294 = vst [vmem:[#allocation52_spill] sm:$0xff] %v8678_v4  ;;  %v272_v2 = vpop.f32.mrf.mxu0  ;;  %v8683_v11 = vpop.f32.mrf.mxu1 }
 0x107   :  { %12295 = vst [vmem:[#allocation53_spill] sm:$0xff] %v8681_v15  ;;  %v8686_v1 = vadd.f32 %v272_v2, %v8636_v3  ;;  %v8704_v2 = vrot.slane %v8631_v22, %v11866_v9 }
 0x108   :  { %v274_v19 = vpop.f32.mrf.mxu0  ;;  %v8688_v52 = vpop.f32.mrf.mxu1 }
 0x109   :  { %12296 = vst [vmem:[#allocation54_spill] sm:$0xff] %v8686_v1  ;;  %v8692_v59 = vadd.f32 %v274_v19, %v8670_v18 }
 0x10a   :  { %v278_v20 = vpop.f32.mrf.mxu0  ;;  %v8694_v16 = vpop.f32.mrf.mxu1 }
 0x10b   :  { %12297 = vst [vmem:[#allocation55_spill] sm:$0xff] %v8692_v59  ;;  %v8697_v23 = vadd.f32 %v278_v20, %v8636_v3 }
 0x10c   :  { %v280_v4 = vpop.f32.mrf.mxu0  ;;  %v8699_v15 = vpop.f32.mrf.mxu1 }
 0x10d   :  { %12298 = vst [vmem:[#allocation56_spill] sm:$0xff] %v8697_v23  ;;  %v8707_v1 = vadd.f32 %v280_v4, %v8670_v18 }
 0x10e   :  { %v284_v62 = vpop.f32.mrf.mxu0  ;;  %v421_v19 = vpop.f32.mrf.mxu1 }
 0x10f   :  { %12299 = vst [vmem:[#allocation57_spill] sm:$0xff] %v8707_v1  ;;  %v8710_v59 = vadd.f32 %v284_v62, %v8636_v3  ;;  %v8713_v6 = vadd.f32 %v421_v19, %v8704_v2 }
 0x110   :  { %v286_v20 = vpop.f32.mrf.mxu0  ;;  %v8715_v23 = vpop.f32.mrf.mxu1 }
 0x111   :  { %12300 = vst [vmem:[#allocation58_spill] sm:$0xff] %v8710_v59  ;;  %12301 = vst [vmem:[#allocation59_spill] sm:$0xff] %v8713_v6  ;;  %v8718_v60 = vadd.f32 %v286_v20, %v8670_v18 }
 0x112   :  { %12302 = vst [vmem:[#allocation60_spill] sm:$0xff] %v8715_v23  ;;  %v290_v45 = vpop.f32.mrf.mxu0  ;;  %v427_v9 = vpop.f32.mrf.mxu1 }
 0x113   :  { %12303 = vst [vmem:[#allocation61_spill] sm:$0xff] %v8718_v60  ;;  %v8721_v58 = vadd.f32 %v290_v45, %v8636_v3  ;;  %v8724_v4 = vadd.f32 %v427_v9, %v8704_v2 }
 0x114   :  { %v292_v1 = vpop.f32.mrf.mxu0  ;;  %v8726_v62 = vpop.f32.mrf.mxu1 }
 0x115   :  { %12304 = vst [vmem:[#allocation62_spill] sm:$0xff] %v8721_v58  ;;  %12305 = vst [vmem:[#allocation63_spill] sm:$0xff] %v8724_v4  ;;  %v8729_v19 = vadd.f32 %v292_v1, %v8670_v18 }
 0x116   :  { %12306 = vst [vmem:[#allocation64_spill] sm:$0xff] %v8726_v62  ;;  %v296_v59 = vpop.f32.mrf.mxu0  ;;  %v433_v6 = vpop.f32.mrf.mxu1 }
 0x117   :  { %12307 = vst [vmem:[#allocation65_spill] sm:$0xff] %v8729_v19  ;;  %v8732_v23 = vadd.f32 %v296_v59, %v8636_v3  ;;  %v8735_v20 = vadd.f32 %v433_v6, %v8704_v2  ;;  %v11870_v59 = vsub.s32 3, %v8625_v12 }
 0x118   :  { %v298_v60 = vpop.f32.mrf.mxu0  ;;  %v8737_v45 = vpop.f32.mrf.mxu1 }
 0x119   :  { %12308 = vst [vmem:[#allocation66_spill] sm:$0xff] %v8732_v23  ;;  %12309 = vst [vmem:[#allocation67_spill] sm:$0xff] %v8735_v20  ;;  %v8740_v9 = vadd.f32 %v298_v60, %v8670_v18  ;;  %v8757_v60 = vrot.slane %v8631_v22, %v11870_v59 }
 0x11a   :  { %12310 = vst [vmem:[#allocation68_spill] sm:$0xff] %v8737_v45 }
 0x11b   :  { %12311 = vst [vmem:[#allocation69_spill] sm:$0xff] %v8740_v9  ;;  %v302_v58 = vpop.f32.mrf.mxu0  ;;  %v439_v4 = vpop.f32.mrf.mxu1  ;;  %12316 = vst [vmem:[#allocation74_spill] sm:$0xff] %v8757_v60 }
 0x11c   :  { %v8743_v62 = vadd.f32 %v302_v58, %v8636_v3  ;;  %v8746_v1 = vadd.f32 %v439_v4, %v8704_v2 }
 0x11d   :  { %v304_v23 = vpop.f32.mrf.mxu0  ;;  %v8749_v19 = vpop.f32.mrf.mxu1 }
 0x11e   :  { %12312 = vst [vmem:[#allocation70_spill] sm:$0xff] %v8743_v62  ;;  %12313 = vst [vmem:[#allocation71_spill] sm:$0xff] %v8746_v1  ;;  %v8752_v6 = vadd.f32 %v304_v23, %v8670_v18 }
 0x11f   :  { %12314 = vst [vmem:[#allocation72_spill] sm:$0xff] %v8749_v19 }
 0x120   :  { %12315 = vst [vmem:[#allocation73_spill] sm:$0xff] %v8752_v6  ;;  %v308_v45 = vpop.f32.mrf.mxu0  ;;  %v445_v20 = vpop.f32.mrf.mxu1 }
 0x121   :  { %v8760_v58 = vadd.f32 %v308_v45, %v8636_v3  ;;  %v8763_v4 = vadd.f32 %v445_v20, %v8704_v2 }
 0x122   :  { %v310_v62 = vpop.f32.mrf.mxu0  ;;  %v447_v9 = vpop.f32.mrf.mxu1 }
 0x123   :  { %12317 = vst [vmem:[#allocation75_spill] sm:$0xff] %v8760_v58  ;;  %12318 = vst [vmem:[#allocation76_spill] sm:$0xff] %v8763_v4  ;;  %v8766_v19 = vadd.f32 %v310_v62, %v8670_v18  ;;  %v8769_v23 = vadd.f32 %v447_v9, %v8757_v60 }
 0x125   :  { %12319 = vst [vmem:[#allocation77_spill] sm:$0xff] %v8766_v19  ;;  %12320 = vst [vmem:[#allocation78_spill] sm:$0xff] %v8769_v23  ;;  %v314_v6 = vpop.f32.mrf.mxu0  ;;  %v451_v1 = vpop.f32.mrf.mxu1 }
 0x126   :  { %v8772_v12 = vadd.f32 %v314_v6, %v8636_v3  ;;  %v8775_v22 = vadd.f32 %v451_v1, %v8704_v2 }
 0x127   :  { %v316_v45 = vpop.f32.mrf.mxu0  ;;  %v453_v59 = vpop.f32.mrf.mxu1 }
 0x128   :  { %12321 = vst [vmem:[#allocation79_spill] sm:$0xff] %v8772_v12  ;;  %12322 = vst [vmem:[#allocation80_spill] sm:$0xff] %v8775_v22  ;;  %v8778_v20 = vadd.f32 %v316_v45, %v8670_v18  ;;  %v8781_v58 = vadd.f32 %v453_v59, %v8757_v60  ;;  %v251_v45 = vadd.f32 %v8643_v10, %v8670_v18 }
 0x12a   :  { %12323 = vst [vmem:[#allocation81_spill] sm:$0xff] %v8778_v20  ;;  %12324 = vst [vmem:[#allocation82_spill] sm:$0xff] %v8781_v58  ;;  %v457_v62 = vpop.f32.mrf.mxu1  ;;  %v706_v19 = vpop.f32.mrf.mxu0 }
 0x12b   :  { %v8784_v9 = vadd.f32 %v457_v62, %v8704_v2  ;;  %v249_v62 = vadd.f32 %v8638_v0, %v8636_v3 }
 0x12c   :  { %v459_v23 = vpop.f32.mrf.mxu1  ;;  %v708_v1 = vpop.f32.mrf.mxu0 }
 0x12d   :  { %12325 = vst [vmem:[#allocation83_spill] sm:$0xff] %v8784_v9  ;;  %v8787_v6 = vadd.f32 %v459_v23, %v8757_v60  ;;  %v783_v9 = vadd.f32 %v708_v1, %v251_v45 }
 0x12e   :  { %v463_v12 = vpop.f32.mrf.mxu1 }
 0x12f   :  { %12326 = vst [vmem:[#allocation84_spill] sm:$0xff] %v8787_v6  ;;  %v8790_v22 = vadd.f32 %v463_v12, %v8704_v2  ;;  %v782_v6 = vadd.f32 %v706_v19, %v249_v62 }
 0x130   :  { %v465_v20 = vpop.f32.mrf.mxu1 }
 0x131   :  { %12327 = vst [vmem:[#allocation85_spill] sm:$0xff] %v8790_v22  ;;  %v8795_v59 = vadd.f32 %v465_v20, %v8757_v60  ;;  %v7106_v22 = vmul.f32 -1.442695, %v783_v9  ;;  %v7105_v20 = vmul.f32 -1.442695, %v782_v6 }
 0x132   :  { %v469_v58 = vpop.f32.mrf.mxu1 }
 0x133   :  { %12328 = vst [vmem:[#allocation86_spill] sm:$0xff] %v8795_v59  ;;  %v8800_v23 = vadd.f32 %v469_v58, %v8704_v2  ;;  %7266 = vpow2.f32 %v7106_v22 }
 0x134   :  { %v471_v4 = vpop.f32.mrf.mxu1  ;;  %7268 = vpow2.f32 %v7105_v20 }
 0x135   :  { %12329 = vst [vmem:[#allocation87_spill] sm:$0xff] %v8800_v23  ;;  %v8803_v12 = vadd.f32 %v471_v4, %v8757_v60  ;;  %v257_v23 = vadd.f32 %v8652_v7, %v8670_v18 }
 0x136   :  { %v475_v40 = vpop.f32.mrf.mxu1 }
 0x137   :  { %12330 = vst [vmem:[#allocation88_spill] sm:$0xff] %v8803_v12  ;;  %v8806_v10 = vadd.f32 %v475_v40, %v8704_v2 }
 0x138   :  { %v477_v59 = vpop.f32.mrf.mxu1 }
 0x139   :  { %12331 = vst [vmem:[#allocation89_spill] sm:$0xff] %v8806_v10  ;;  %v8809_v57 = vadd.f32 %v477_v59, %v8757_v60 }
 0x13a   :  { %v481_v0 = vpop.f32.mrf.mxu1 }
 0x13b   :  { %12332 = vst [vmem:[#allocation90_spill] sm:$0xff] %v8809_v57  ;;  %v8812_v58 = vadd.f32 %v481_v0, %v8704_v2 }
 0x13c   :  { %v483_v45 = vpop.f32.mrf.mxu1 }
 0x13d   :  { %12333 = vst [vmem:[#allocation91_spill] sm:$0xff] %v8812_v58  ;;  %v8815_v4 = vadd.f32 %v483_v45, %v8757_v60 }
 0x13e   :  { %v487_v9 = vpop.f32.mrf.mxu1 }
 0x13f   :  { %12334 = vst [vmem:[#allocation92_spill] sm:$0xff] %v8815_v4  ;;  %v8818_v62 = vadd.f32 %v487_v9, %v8704_v2 }
 0x140   :  { %v489_v40 = vpop.f32.mrf.mxu1  ;;  %v7267_v58 = vpop.eup %7266 }
 0x141   :  { %12335 = vst [vmem:[#allocation93_spill] sm:$0xff] %v8818_v62  ;;  %v8821_v6 = vadd.f32 %v489_v40, %v8757_v60  ;;  %v7269_v9 = vpop.eup %7268  ;;  %v410_v62 = vadd.f32 %v8683_v11, %v8704_v2 }
 0x142   :  { %v493_v59 = vpop.f32.mrf.mxu1 }
 0x143   :  { %12336 = vst [vmem:[#allocation94_spill] sm:$0xff] %v8821_v6  ;;  %v8824_v22 = vadd.f32 %v493_v59, %v8704_v2  ;;  %v796_v6 = vadd.f32 1.0, %v7267_v58  ;;  %v811_v58 = vadd.f32 %v708_v1, %v257_v23  ;;  %v416_v23 = vadd.f32 %v8694_v16, %v8704_v2  ;;  %v12343_v16 = vld [vmem:[#allocation15_spill] sm:$0xff] }
 0x144   :  { %v495_v57 = vpop.f32.mrf.mxu1 }
 0x145   :  { %12337 = vst [vmem:[#allocation95_spill] sm:$0xff] %v8824_v22  ;;  %v8827_v0 = vadd.f32 %v495_v57, %v8757_v60  ;;  %v412_v22 = vadd.f32 %v8688_v52, %v8757_v60  ;;  %7270 = vrcp.f32 %v796_v6 }
 0x146   :  { %v499_v20 = vpop.f32.mrf.mxu1 }
 0x147   :  { %12338 = vst [vmem:[#allocation96_spill] sm:$0xff] %v8827_v0  ;;  %v8830_v45 = vadd.f32 %v499_v20, %v8704_v2  ;;  %v795_v0 = vadd.f32 1.0, %v7269_v9  ;;  %v255_v20 = vadd.f32 %v8647_v14, %v8636_v3  ;;  %v12344_v2 = vld [vmem:[#allocation16_spill] sm:$0xff] }
 0x148   :  { %v501_v4 = vpop.f32.mrf.mxu1 }
 0x149   :  { %12339 = vst [vmem:[#allocation97_spill] sm:$0xff] %v8830_v45  ;;  %v8835_v40 = vadd.f32 %v501_v4, %v8757_v60  ;;  %v810_v11 = vadd.f32 %v706_v19, %v255_v20  ;;  %v418_v19 = vadd.f32 %v8699_v15, %v8757_v60  ;;  %v12342_v15 = vld [vmem:[#allocation14_spill] sm:$0xff] }
 0x14a   :  { %v777_v59 = vpop.f32.mrf.mxu1 }
 0x14b   :  { %12340 = vst [vmem:[#allocation98_spill] sm:$0xff] %v8835_v40  ;;  %v784_v57 = vadd.f32 %v777_v59, %v410_v62  ;;  %v7108_v4 = vmul.f32 -1.442695, %v810_v11  ;;  %v7109_v40 = vmul.f32 -1.442695, %v811_v58 }
 0x14c   :  { %v779_v10 = vpop.f32.mrf.mxu1 }
 0x14d   :  { %v7107_v45 = vmul.f32 -1.442695, %v784_v57  ;;  %v785_v12 = vadd.f32 %v779_v10, %v412_v22 }
 0x14f   :  { %7272 = vpow2.f32 %v7107_v45  ;;  %v812_v45 = vadd.f32 %v777_v59, %v416_v23  ;;  %v12345_v59 = vld [vmem:[#allocation17_spill] sm:$0xff]  ;;  %v8969_v23 = vld [vmem:[#allocation6 + $0x180] sm:$0xff] }
 0x150   :  { %7274 = vrcp.f32 %v795_v0 }
 0x151   :  { %7276 = vtanh.f32 %v785_v12  ;;  %v813_v12 = vadd.f32 %v779_v10, %v418_v19  ;;  %v8963_v19 = vld [vmem:[#allocation6 + $0x188] sm:$0xff] }
 0x152   :  { %7278 = vpow2.f32 %v7108_v4  ;;  %v7271_v52 = vpop.eup %7270  ;;  %v12346_v4 = vld [vmem:[#allocation18_spill] sm:$0xff] }
 0x153   :  { %7280 = vpow2.f32 %v7109_v40  ;;  %v805_v3 = vmul.f32 0.0, %v7271_v52 }
 0x15c   :  { %v7273_v62 = vpop.eup %7272 }
 0x15d   :  { %v7275_v9 = vpop.eup %7274  ;;  %v797_v14 = vadd.f32 1.0, %v7273_v62  ;;  %v8945_v62 = vld [vmem:[#allocation6 + $0x1c0] sm:$0xff] }
 0x15e   :  { %v7277_v35 = vpop.eup %7276 }
 0x15f   :  { %v806_v22 = vmul.f32 %v7277_v35, %v7275_v9  ;;  %7282 = vrcp.f32 %v797_v14  ;;  %v7279_v7 = vpop.eup %7278  ;;  %v7110_v35 = vmul.f32 -1.442695, %v812_v45  ;;  %v8947_v9 = vld [vmem:[#allocation6 + $0x1d0] sm:$0xff]  ;;  %v8951_v14 = vld [vmem:[#allocation6 + $0x1a8] sm:$0xff]  ;;  %v8981_v45 = vld [vmem:[#allocation6 + $0x160] sm:$0xff] }
 0x160   :  { %v7281_v1 = vpop.eup %7280  ;;  %v823_v6 = vadd.f32 1.0, %v7279_v7  ;;  %v8959_v7 = vld [vmem:[#allocation6 + $0x1b0] sm:$0xff] }
 0x161   :  { %v8843_v57 = vadd.f32 %v806_v22, %v805_v3  ;;  %v824_v0 = vadd.f32 1.0, %v7281_v1  ;;  %v8953_v3 = vld [vmem:[#allocation6 + $0x1b8] sm:$0xff]  ;;  %v8957_v22 = vld [vmem:[#allocation6 + $0x1a0] sm:$0xff] }
 0x162   :  { %v8965_v1 = vld [vmem:[#allocation6 + $0x198] sm:$0xff] }
 0x163   :  { %7284 = vtanh.f32 %v8843_v57 }
 0x164   :  { %7286 = vtanh.f32 %v813_v12  ;;  %v8971_v12 = vld [vmem:[#allocation6 + $0x190] sm:$0xff] }
 0x165   :  { %7288 = vrcp.f32 %v823_v6  ;;  %v8975_v6 = vld [vmem:[#allocation6 + $0x168] sm:$0xff] }
 0x166   :  { %7290 = vrcp.f32 %v824_v0  ;;  %v8977_v0 = vld [vmem:[#allocation6 + $0x178] sm:$0xff] }
 0x167   :  { %7292 = vpow2.f32 %v7110_v35  ;;  %v8983_v35 = vld [vmem:[#allocation6 + $0x170] sm:$0xff] }
 0x16c   :  { %v7283_v40 = vpop.eup %7282 }
 0x170   :  { %v7285_v20 = vpop.eup %7284 }
 0x171   :  { %v8850_v11 = vmul.f32 %v7285_v20, %v7283_v40  ;;  %v7287_v10 = vpop.eup %7286  ;;  %v8987_v40 = vld [vmem:[#allocation6 + $0x148] sm:$0xff]  ;;  %v8989_v20 = vld [vmem:[#allocation6 + $0x158] sm:$0xff] }
 0x172   :  { %v7289_v58 = vpop.eup %7288 }
 0x173   :  { %12341 = vst [vmem:[#allocation99_spill] sm:$0xff] %v8850_v11  ;;  %978 = vmatmul.mubr.f32.vlgmr.msra.gmra.mxu0 %v8850_v11  ;;  %1049 = vmatmul.mubr.f32.vlgmr.msra.gmra.mxu1 %v8850_v11  ;;  %v7291_v52 = vpop.eup %7290  ;;  %v9101_v11 = vld [vmem:[#allocation6 + $0x20] sm:$0xff] }
 0x174   :  { %1084 = vmatpush1.msra.mxu0 %v12342_v15  ;;  %1155 = vmatpush1.msra.mxu1 %v8288_v26  ;;  %v834_v26 = vmul.f32 %v7289_v58, %v7287_v10  ;;  %v8993_v15 = vld [vmem:[#allocation6 + $0x140] sm:$0xff]  ;;  %v9001_v10 = vld [vmem:[#allocation6 + $0x138] sm:$0xff]  ;;  %v9007_v58 = vld [vmem:[#allocation6 + $0x130] sm:$0xff] }
 0x175   :  { %1085 = vmatprep.subr.mxu0 %v12343_v16  ;;  %1156 = vmatprep.subr.mxu1 %v8291_v27  ;;  %v833_v27 = vmul.f32 0.0, %v7291_v52  ;;  %v8995_v16 = vld [vmem:[#allocation6 + $0x150] sm:$0xff]  ;;  %v9013_v52 = vld [vmem:[#allocation6 + $0x118] sm:$0xff] }
 0x176   :  { %1086 = vmatpush1.msra.mxu0 %v12344_v2  ;;  %1157 = vmatpush1.msra.mxu1 %v8296_v28  ;;  %v7293_v28 = vpop.eup %7292  ;;  %v8999_v2 = vld [vmem:[#allocation6 + $0x128] sm:$0xff] }
 0x177   :  { %1087 = vmatprep.subr.mxu0 %v12345_v59  ;;  %1158 = vmatprep.subr.mxu1 %v8313_v32  ;;  %v12348_v32 = vld [vmem:[#allocation19_spill] sm:$0xff]  ;;  %v9005_v59 = vld [vmem:[#allocation6 + $0x120] sm:$0xff] }
 0x178   :  { %1088 = vmatpush1.msra.mxu0 %v12346_v4  ;;  %1159 = vmatpush1.msra.mxu1 %v8320_v34  ;;  %v12350_v34 = vld [vmem:[#allocation20_spill] sm:$0xff]  ;;  %v9011_v4 = vld [vmem:[#allocation6 + $0x108] sm:$0xff] }
 0x179   :  { %1089 = vmatprep.subr.mxu0 %v8281_v24  ;;  %1160 = vmatprep.subr.mxu1 %v8342_v39  ;;  %v8874_v24 = vadd.f32 %v834_v26, %v833_v27  ;;  %v12354_v39 = vld [vmem:[#allocation22_spill] sm:$0xff]  ;;  %v9019_v27 = vld [vmem:[#allocation6 + $0x110] sm:$0xff] }
 0x17a   :  { %1090 = vmatpush1.msra.mxu0 %v8298_v29  ;;  %1161 = vmatpush1.msra.mxu1 %v8355_v42  ;;  %v825_v29 = vadd.f32 1.0, %v7293_v28  ;;  %v12356_v42 = vld [vmem:[#allocation23_spill] sm:$0xff]  ;;  %v9017_v26 = vld [vmem:[#allocation6 + $0x100] sm:$0xff] }
 0x17b   :  { %1091 = vmatprep.subr.mxu0 %v8311_v31  ;;  %1162 = vmatprep.subr.mxu1 %v8377_v47  ;;  %7294 = vtanh.f32 %v8874_v24  ;;  %v12347_v31 = vld [vmem:[#allocation29_spill] sm:$0xff]  ;;  %v9023_v28 = vld [vmem:[#allocation6 + $0xe8] sm:$0xff] }
 0x17c   :  { %1092 = vmatpush1.msra.mxu0 %v8318_v33  ;;  %1163 = vmatpush1.msra.mxu1 %v8383_v49  ;;  %7296 = vrcp.f32 %v825_v29  ;;  %v12349_v33 = vld [vmem:[#allocation30_spill] sm:$0xff]  ;;  %v12361_v49 = vld [vmem:[#allocation36_spill] sm:$0xff]  ;;  %v9025_v29 = vld [vmem:[#allocation6 + $0xf8] sm:$0xff] }
 0x17d   :  { %1093 = vmatprep.subr.mxu0 %v8331_v36  ;;  %1164 = vmatprep.subr.mxu1 %v8405_v54  ;;  %v12351_v36 = vld [vmem:[#allocation31_spill] sm:$0xff] }
 0x17e   :  { %1094 = vmatpush1.msra.mxu0 %v8335_v37  ;;  %1165 = vmatpush1.msra.mxu1 %v8411_v56  ;;  %v12352_v37 = vld [vmem:[#allocation21_spill] sm:$0xff]  ;;  %v12364_v54 = vld [vmem:[#allocation27_spill] sm:$0xff]  ;;  %v12366_v56 = vld [vmem:[#allocation28_spill] sm:$0xff] }
 0x17f   :  { %1095 = vmatprep.subr.mxu0 %v8340_v38  ;;  %1166 = vmatprep.subr.mxu1 %v8434_v61  ;;  %v12353_v38 = vld [vmem:[#allocation32_spill] sm:$0xff]  ;;  %v12367_v61 = vmov 0.0  }
 0x180   :  { %1096 = vmatpush1.msra.mxu0 %v8353_v41  ;;  %1167 = vmatpush1.msra.mxu1 %v8440_v63  ;;  %v12355_v41 = vld [vmem:[#allocation33_spill] sm:$0xff] }
 0x181   :  { %1097 = vmatprep.subr.mxu0 %v8359_v43  ;;  %1168 = vmatprep.subr.mxu1 %v8461_v5  ;;  %v12357_v43 = vld [vmem:[#allocation34_spill] sm:$0xff]  ;;  %v12369_v5 = vld [vmem:[#allocation39_spill] sm:$0xff] }
 0x182   :  { %1098 = vmatpush1.msra.mxu0 %v8364_v44  ;;  %1169 = vmatpush1.msra.mxu1 %v8467_v8  ;;  %v12358_v44 = vld [vmem:[#allocation24_spill] sm:$0xff]  ;;  %v8927_v8 = vld [vmem:[#allocation6 + $0x1e8] sm:$0xff] }
 0x183   :  { %1099 = vmatprep.subr.mxu0 %v8375_v46  ;;  %1170 = vmatprep.subr.mxu1 %v8482_v13  ;;  %v12359_v46 = vld [vmem:[#allocation35_spill] sm:$0xff]  ;;  %12370 = vst [vmem:[#allocation15_spill] sm:$0xff] %v8927_v8  ;;  %v8929_v13 = vld [vmem:[#allocation6 + $0x1f8] sm:$0xff] }
 0x184   :  { %1100 = vmatpush1.msra.mxu0 %v8381_v48  ;;  %1171 = vmatpush1.msra.mxu1 %v8486_v17  ;;  %v12360_v48 = vld [vmem:[#allocation25_spill] sm:$0xff]  ;;  %12371 = vst [vmem:[#allocation16_spill] sm:$0xff] %v8929_v13  ;;  %v8933_v17 = vld [vmem:[#allocation6 + $0x1e0] sm:$0xff] }
 0x185   :  { %1101 = vmatprep.subr.mxu0 %v8388_v50  ;;  %1172 = vmatprep.subr.mxu1 %v8491_v21  ;;  %v12362_v50 = vld [vmem:[#allocation26_spill] sm:$0xff]  ;;  %v8935_v21 = vld [vmem:[#allocation6 + $0x1f0] sm:$0xff]  ;;  %12387 = vst [vmem:[#allocation25_spill] sm:$0xff] %v9101_v11 }
 0x186   :  { %1102 = vmatpush1.msra.mxu0 %v8392_v51  ;;  %1173 = vmatpush1.msra.mxu1 %v8496_v25  ;;  %v12363_v51 = vld [vmem:[#allocation37_spill] sm:$0xff]  ;;  %v8939_v25 = vld [vmem:[#allocation6 + $0x1c8] sm:$0xff] }
 0x187   :  { %1103 = vmatprep.subr.mxu0 %v8403_v53  ;;  %1174 = vmatprep.subr.mxu1 %v8500_v30  ;;  %v8941_v30 = vld [vmem:[#allocation6 + $0x1d8] sm:$0xff] }
 0x188   :  { %1104 = vmatpush1.msra.mxu0 %v8409_v55  ;;  %1175 = vmatpush1.msra.mxu1 %v12347_v31  ;;  %v7295_v47 = vpop.eup %7294  ;;  %v12365_v55 = vld [vmem:[#allocation38_spill] sm:$0xff] }
 0x189   :  { %1105 = vmatprep.subr.mxu0 %v12348_v32  ;;  %1176 = vmatprep.subr.mxu1 %v12349_v33  ;;  %v7297_v53 = vpop.eup %7296  ;;  %v9029_v31 = vld [vmem:[#allocation6 + $0xe0] sm:$0xff]  ;;  %v9031_v32 = vld [vmem:[#allocation6 + $0xf0] sm:$0xff]  ;;  %v9035_v33 = vld [vmem:[#allocation6 + $0xc8] sm:$0xff] }
 0x18a   :  { %1106 = vmatpush1.msra.mxu0 %v12350_v34  ;;  %1177 = vmatpush1.msra.mxu1 %v12351_v36  ;;  %v8919_v63 = vmul.f32 %v7297_v53, %v7295_v47  ;;  %v9037_v34 = vld [vmem:[#allocation6 + $0xd8] sm:$0xff]  ;;  %v9041_v36 = vld [vmem:[#allocation6 + $0xc0] sm:$0xff]  ;;  %v9067_v47 = vld [vmem:[#allocation6 + $0x90] sm:$0xff] }
 0x18b   :  { %1107 = vmatprep.subr.mxu0 %v12352_v37  ;;  %1178 = vmatprep.subr.mxu1 %v12353_v38  ;;  %v9043_v37 = vld [vmem:[#allocation6 + $0xd0] sm:$0xff]  ;;  %v9047_v38 = vld [vmem:[#allocation6 + $0xa8] sm:$0xff]  ;;  %12376 = vst [vmem:[#allocation30_spill] sm:$0xff] %v9067_v47 }
 0x18c   :  { %1108 = vmatpush1.msra.mxu0 %v12354_v39  ;;  %1179 = vmatpush1.msra.mxu1 %v12355_v41  ;;  %12368 = vst [vmem:[#allocation14_spill] sm:$0xff] %v8919_v63  ;;  %v9049_v39 = vld [vmem:[#allocation6 + $0xb8] sm:$0xff]  ;;  %v9053_v41 = vld [vmem:[#allocation6 + $0xa0] sm:$0xff]  ;;  %v9083_v53 = vld [vmem:[#allocation6 + $0x48] sm:$0xff] }
 0x18d   :  { %1109 = vmatprep.subr.mxu0 %v12356_v42  ;;  %1180 = vmatprep.subr.mxu1 %v12357_v43  ;;  %v9055_v42 = vld [vmem:[#allocation6 + $0xb0] sm:$0xff]  ;;  %v9059_v43 = vld [vmem:[#allocation6 + $0x88] sm:$0xff]  ;;  %12381 = vst [vmem:[#allocation22_spill] sm:$0xff] %v9083_v53 }
 0x18e   :  { %1110 = vmatpush1.msra.mxu0 %v12358_v44  ;;  %1181 = vmatpush1.msra.mxu1 %v12359_v46  ;;  %12372 = vst [vmem:[#allocation17_spill] sm:$0xff] %v9055_v42  ;;  %12373 = vst [vmem:[#allocation18_spill] sm:$0xff] %v9059_v43  ;;  %v9061_v44 = vld [vmem:[#allocation6 + $0x98] sm:$0xff]  ;;  %v9065_v46 = vld [vmem:[#allocation6 + $0x80] sm:$0xff] }
 0x18f   :  { %1111 = vmatprep.subr.mxu0 %v12360_v48  ;;  %1182 = vmatprep.subr.mxu1 %v12361_v49  ;;  %12374 = vst [vmem:[#allocation29_spill] sm:$0xff] %v9061_v44  ;;  %12375 = vst [vmem:[#allocation19_spill] sm:$0xff] %v9065_v46  ;;  %v9071_v48 = vld [vmem:[#allocation6 + $0x68] sm:$0xff]  ;;  %v9073_v49 = vld [vmem:[#allocation6 + $0x78] sm:$0xff] }
 0x190   :  { %1112 = vmatpush1.msra.mxu0 %v12362_v50  ;;  %1183 = vmatpush1.msra.mxu1 %v12363_v51  ;;  %12377 = vst [vmem:[#allocation20_spill] sm:$0xff] %v9071_v48  ;;  %12378 = vst [vmem:[#allocation31_spill] sm:$0xff] %v9073_v49  ;;  %v9077_v50 = vld [vmem:[#allocation6 + $0x60] sm:$0xff]  ;;  %v9079_v51 = vld [vmem:[#allocation6 + $0x70] sm:$0xff] }
 0x191   :  { %1113 = vmatprep.subr.mxu0 %v12364_v54  ;;  %1184 = vmatprep.subr.mxu1 %v12365_v55  ;;  %12379 = vst [vmem:[#allocation21_spill] sm:$0xff] %v9077_v50  ;;  %12380 = vst [vmem:[#allocation32_spill] sm:$0xff] %v9079_v51  ;;  %v9085_v54 = vld [vmem:[#allocation6 + $0x58] sm:$0xff]  ;;  %v9089_v55 = vld [vmem:[#allocation6 + $0x40] sm:$0xff] }
 0x192   :  { %1114 = vmatpush1.msra.mxu0 %v12366_v56  ;;  %1147 = vmatprep.mubr.f32.mxu0 %v12367_v61  ;;  %12382 = vst [vmem:[#allocation33_spill] sm:$0xff] %v9085_v54  ;;  %12383 = vst [vmem:[#allocation23_spill] sm:$0xff] %v9089_v55  ;;  %v9091_v56 = vld [vmem:[#allocation6 + $0x50] sm:$0xff] }
 0x193   :  { %1185 = vmatpush1.msra.mxu1 %v12369_v5  ;;  %1218 = vmatprep.mubr.f32.mxu1 %v12367_v61  ;;  %12384 = vst [vmem:[#allocation34_spill] sm:$0xff] %v9091_v56  ;;  %v9095_v5 = vld [vmem:[#allocation6 + $0x28] sm:$0xff] }
 0x194   :  { %1148 = vmatmul.mubr.f32.vlgmr.msra.gmra.mxu0 %v8919_v63  ;;  %1219 = vmatmul.mubr.f32.vlgmr.msra.gmra.mxu1 %v8919_v63  ;;  %12385 = vst [vmem:[#allocation24_spill] sm:$0xff] %v9095_v5  ;;  %v9097_v63 = vld [vmem:[#allocation6 + $0x38] sm:$0xff] }
 0x195   :  { %1393 = vmatprep.mubr.f32.mxu0 %v12367_v61  ;;  %1464 = vmatprep.mubr.f32.mxu1 %v12367_v61  ;;  %12386 = vst [vmem:[#allocation35_spill] sm:$0xff] %v9097_v63  ;;  %v9103_v61 = vld [vmem:[#allocation6 + $0x30] sm:$0xff] }
 0x196   :  { %1329 = vmatprep.subr.mxu0 %v8927_v8  ;;  %1400 = vmatprep.subr.mxu1 %v8929_v13  ;;  %12388 = vst [vmem:[#allocation36_spill] sm:$0xff] %v9103_v61 }
 0x197   :  { %1330 = vmatpush1.msra.mxu0 %v8933_v17  ;;  %1401 = vmatpush1.msra.mxu1 %v8935_v21 }
 0x198   :  { %1331 = vmatprep.subr.mxu0 %v8939_v25  ;;  %1402 = vmatprep.subr.mxu1 %v8941_v30 }
 0x199   :  { %1332 = vmatpush1.msra.mxu0 %v8945_v62  ;;  %1403 = vmatpush1.msra.mxu1 %v8947_v9 }
 0x19a   :  { %1333 = vmatprep.subr.mxu0 %v8951_v14  ;;  %1404 = vmatprep.subr.mxu1 %v8953_v3 }
 0x19b   :  { %1334 = vmatpush1.msra.mxu0 %v8957_v22  ;;  %1405 = vmatpush1.msra.mxu1 %v8959_v7 }
 0x19c   :  { %1335 = vmatprep.subr.mxu0 %v8963_v19  ;;  %1406 = vmatprep.subr.mxu1 %v8965_v1 }
 0x19d   :  { %1336 = vmatpush1.msra.mxu0 %v8969_v23  ;;  %1407 = vmatpush1.msra.mxu1 %v8971_v12 }
 0x19e   :  { %1337 = vmatprep.subr.mxu0 %v8975_v6  ;;  %1408 = vmatprep.subr.mxu1 %v8977_v0 }
 0x19f   :  { %1338 = vmatpush1.msra.mxu0 %v8981_v45  ;;  %1409 = vmatpush1.msra.mxu1 %v8983_v35 }
 0x1a0   :  { %1339 = vmatprep.subr.mxu0 %v8987_v40  ;;  %1410 = vmatprep.subr.mxu1 %v8989_v20 }
 0x1a1   :  { %1340 = vmatpush1.msra.mxu0 %v8993_v15  ;;  %1411 = vmatpush1.msra.mxu1 %v8995_v16 }
 0x1a2   :  { %1341 = vmatprep.subr.mxu0 %v8999_v2  ;;  %1412 = vmatprep.subr.mxu1 %v9001_v10 }
 0x1a3   :  { %1342 = vmatpush1.msra.mxu0 %v9005_v59  ;;  %1413 = vmatpush1.msra.mxu1 %v9007_v58 }
 0x1a4   :  { %1343 = vmatprep.subr.mxu0 %v9011_v4  ;;  %1414 = vmatprep.subr.mxu1 %v9013_v52 }
 0x1a5   :  { %1344 = vmatpush1.msra.mxu0 %v9017_v26  ;;  %1415 = vmatpush1.msra.mxu1 %v9019_v27 }
 0x1a6   :  { %1345 = vmatprep.subr.mxu0 %v9023_v28  ;;  %1416 = vmatprep.subr.mxu1 %v9025_v29 }
 0x1a7   :  { %1346 = vmatpush1.msra.mxu0 %v9029_v31  ;;  %1417 = vmatpush1.msra.mxu1 %v9031_v32 }
 0x1a8   :  { %1347 = vmatprep.subr.mxu0 %v9035_v33  ;;  %1418 = vmatprep.subr.mxu1 %v9037_v34 }
 0x1a9   :  { %1348 = vmatpush1.msra.mxu0 %v9041_v36  ;;  %1419 = vmatpush1.msra.mxu1 %v9043_v37 }
 0x1aa   :  { %1349 = vmatprep.subr.mxu0 %v9047_v38  ;;  %1420 = vmatprep.subr.mxu1 %v9049_v39 }
 0x1ab   :  { %1350 = vmatpush1.msra.mxu0 %v9053_v41  ;;  %1421 = vmatpush1.msra.mxu1 %v9055_v42 }
 0x1ac   :  { %1351 = vmatprep.subr.mxu0 %v9059_v43  ;;  %1422 = vmatprep.subr.mxu1 %v9061_v44 }
 0x1ad   :  { %1352 = vmatpush1.msra.mxu0 %v9065_v46  ;;  %1423 = vmatpush1.msra.mxu1 %v9067_v47 }
 0x1ae   :  { %1353 = vmatprep.subr.mxu0 %v9071_v48  ;;  %1424 = vmatprep.subr.mxu1 %v9073_v49 }
 0x1af   :  { %1354 = vmatpush1.msra.mxu0 %v9077_v50  ;;  %1425 = vmatpush1.msra.mxu1 %v9079_v51 }
 0x1b0   :  { %1355 = vmatprep.subr.mxu0 %v9083_v53  ;;  %1426 = vmatprep.subr.mxu1 %v9085_v54  ;;  %v9107_v54 = vld [vmem:[#allocation6 + $0x8] sm:$0xff]  ;;  %v12394_v53 = vld [vmem:[#allocation45_spill] sm:$0xff] }
 0x1b1   :  { %1356 = vmatpush1.msra.mxu0 %v9089_v55  ;;  %1427 = vmatpush1.msra.mxu1 %v9091_v56  ;;  %12389 = vst [vmem:[#allocation26_spill] sm:$0xff] %v9107_v54  ;;  %v9109_v55 = vld [vmem:[#allocation6 + $0x18] sm:$0xff]  ;;  %v9113_v56 = vld [vmem:[#allocation6] sm:$0xff] }
 0x1b2   :  { %1357 = vmatprep.subr.mxu0 %v9095_v5  ;;  %1428 = vmatprep.subr.mxu1 %v9097_v63  ;;  %12390 = vst [vmem:[#allocation37_spill] sm:$0xff] %v9109_v55  ;;  %12391 = vst [vmem:[#allocation27_spill] sm:$0xff] %v9113_v56  ;;  %v9115_v5 = vld [vmem:[#allocation6 + $0x10] sm:$0xff] }
 0x1b3   :  { %1358 = vmatpush1.msra.mxu0 %v9101_v11  ;;  %1429 = vmatpush1.msra.mxu1 %v9103_v61  ;;  %12392 = vst [vmem:[#allocation38_spill] sm:$0xff] %v9115_v5  ;;  %v12393_v11 = vld [vmem:[#allocation47_spill] sm:$0xff] }
 0x1b4   :  { %1359 = vmatprep.subr.mxu0 %v9107_v54  ;;  %1430 = vmatprep.subr.mxu1 %v9109_v55  ;;  %v263_v63 = vadd.f32 %v12393_v11, %v8670_v18 }
 0x1b5   :  { %1360 = vmatpush1.msra.mxu0 %v9113_v56  ;;  %1431 = vmatpush1.msra.mxu1 %v9115_v5  ;;  %v12395_v56 = vld [vmem:[#allocation59_spill] sm:$0xff] }
 0x1b6   :  { %1499 = vmatprep.subr.mxu0 %v8927_v8  ;;  %1570 = vmatprep.subr.mxu1 %v8929_v13  ;;  %v12396_v8 = vld [vmem:[#allocation60_spill] sm:$0xff] }
 0x1b7   :  { %v424_v46 = vadd.f32 %v12396_v8, %v8757_v60 }
 0x1b8   :  { %v12421_v18 = vld [vmem:[#allocation26_spill] sm:$0xff] }
 0x233   :  { %v979_v61 = vpop.f32.mrf.mxu0  ;;  %v1050_v48 = vpop.f32.mrf.mxu1 }
 0x234   :  { %v1055_v54 = vadd.f32 %v979_v61, %v12394_v53  ;;  %v1057_v47 = vadd.f32 %v1050_v48, %v12395_v56  ;;  %v12397_v53 = vld [vmem:[#allocation50_spill] sm:$0xff] }
 0x235   :  { %v981_v51 = vpop.f32.mrf.mxu0  ;;  %v1052_v5 = vpop.f32.mrf.mxu1 }
 0x236   :  { %v7111_v55 = vmul.f32 -1.442695, %v1055_v54  ;;  %v1056_v50 = vadd.f32 %v981_v51, %v263_v63  ;;  %v7113_v13 = vmul.f32 -1.442695, %v1057_v47  ;;  %v1058_v44 = vadd.f32 %v1052_v5, %v424_v46  ;;  %v12398_v46 = vld [vmem:[#allocation53_spill] sm:$0xff] }
 0x238   :  { %7298 = vpow2.f32 %v7111_v55  ;;  %v7112_v49 = vmul.f32 -1.442695, %v1056_v50 }
 0x23a   :  { %7300 = vpow2.f32 %v7112_v49 }
 0x23b   :  { %7302 = vpow2.f32 %v7113_v13 }
 0x23c   :  { %7304 = vtanh.f32 %v1058_v44 }
 0x245   :  { %v7299_v43 = vpop.eup %7298 }
 0x246   :  { %v1068_v42 = vadd.f32 1.0, %v7299_v43 }
 0x247   :  { %v7301_v11 = vpop.eup %7300 }
 0x248   :  { %7306 = vrcp.f32 %v1068_v42  ;;  %v1069_v61 = vadd.f32 1.0, %v7301_v11  ;;  %v7303_v63 = vpop.eup %7302  ;;  %v12400_v11 = vld [vmem:[#allocation63_spill] sm:$0xff] }
 0x249   :  { %v7305_v50 = vpop.eup %7304  ;;  %v1070_v54 = vadd.f32 1.0, %v7303_v63 }
 0x24a   :  { %7308 = vrcp.f32 %v1069_v61 }
 0x254   :  { %v1149_v49 = vpop.f32.mrf.mxu0  ;;  %v1220_v44 = vpop.f32.mrf.mxu1 }
 0x255   :  { %v7307_v51 = vpop.eup %7306  ;;  %v1225_v48 = vadd.f32 %v1149_v49, %v12397_v53  ;;  %v1227_v61 = vadd.f32 %v1220_v44, %v12400_v11 }
 0x256   :  { %v1079_v55 = vmul.f32 %v7307_v51, %v7305_v50  ;;  %v1151_v56 = vpop.f32.mrf.mxu0  ;;  %v1222_v63 = vpop.f32.mrf.mxu1  ;;  %v12401_v50 = vld [vmem:[#allocation64_spill] sm:$0xff] }
 0x257   :  { %v7309_v8 = vpop.eup %7308  ;;  %v7114_v47 = vmul.f32 -1.442695, %v1225_v48  ;;  %v1226_v5 = vadd.f32 %v1151_v56, %v12398_v46  ;;  %v430_v49 = vadd.f32 %v12401_v50, %v8757_v60  ;;  %v7116_v51 = vmul.f32 -1.442695, %v1227_v61  ;;  %v12405_v50 = vld [vmem:[#allocation18_spill] sm:$0xff] }
 0x258   :  { %v1078_v13 = vmul.f32 %v7309_v8, %v8843_v57  ;;  %v12424_v60 = vmov 0.0  }
 0x259   :  { %7310 = vpow2.f32 %v7114_v47  ;;  %v7115_v43 = vmul.f32 -1.442695, %v1226_v5  ;;  %v1228_v53 = vadd.f32 %v1222_v63, %v430_v49  ;;  %v12406_v49 = vld [vmem:[#allocation29_spill] sm:$0xff] }
 0x25a   :  { %7312 = vrcp.f32 %v1070_v54  ;;  %v9130_v42 = vadd.f32 %v1079_v55, %v1078_v13 }
 0x25b   :  { %7314 = vpow2.f32 %v7115_v43 }
 0x25c   :  { %12399 = vst [vmem:[#allocation28_spill] sm:$0xff] %v9130_v42  ;;  %7316 = vtanh.f32 %v9130_v42  ;;  %v12423_v42 = vld [vmem:[#allocation27_spill] sm:$0xff] }
 0x25d   :  { %7318 = vpow2.f32 %v7116_v51  ;;  %v12407_v51 = vld [vmem:[#allocation19_spill] sm:$0xff] }
 0x25e   :  { %7320 = vtanh.f32 %v1228_v53  ;;  %v12408_v53 = vld [vmem:[#allocation30_spill] sm:$0xff] }
 0x266   :  { %v7311_v48 = vpop.eup %7310 }
 0x267   :  { %v7313_v56 = vpop.eup %7312  ;;  %v1238_v57 = vadd.f32 1.0, %v7311_v48  ;;  %v12409_v48 = vld [vmem:[#allocation20_spill] sm:$0xff] }
 0x268   :  { %v7315_v8 = vpop.eup %7314 }
 0x269   :  { %v7317_v54 = vpop.eup %7316  ;;  %7322 = vrcp.f32 %v1238_v57  ;;  %v1239_v55 = vadd.f32 1.0, %v7315_v8  ;;  %v12411_v57 = vld [vmem:[#allocation21_spill] sm:$0xff]  ;;  %v12412_v8 = vld [vmem:[#allocation32_spill] sm:$0xff] }
 0x26a   :  { %v9136_v47 = vmul.f32 %v7317_v54, %v7313_v56  ;;  %v7319_v46 = vpop.eup %7318  ;;  %v12410_v56 = vld [vmem:[#allocation31_spill] sm:$0xff]  ;;  %v12413_v54 = vld [vmem:[#allocation22_spill] sm:$0xff] }
 0x26b   :  { %7324 = vrcp.f32 %v1239_v55  ;;  %v7321_v5 = vpop.eup %7320  ;;  %v1240_v11 = vadd.f32 1.0, %v7319_v46  ;;  %v12414_v55 = vld [vmem:[#allocation33_spill] sm:$0xff]  ;;  %v12415_v46 = vld [vmem:[#allocation23_spill] sm:$0xff] }
 0x26c   :  { %12402 = vst [vmem:[#allocation39_spill] sm:$0xff] %v9136_v47  ;;  %1394 = vmatmul.mubr.f32.vlgmr.msra.gmra.mxu0 %v9136_v47  ;;  %1465 = vmatmul.mubr.f32.vlgmr.msra.gmra.mxu1 %v9136_v47 }
 0x26d   :  { %1500 = vmatpush1.msra.mxu0 %v8933_v17  ;;  %1571 = vmatpush1.msra.mxu1 %v8935_v21  ;;  %7326 = vrcp.f32 %v1240_v11  ;;  %v12419_v11 = vld [vmem:[#allocation25_spill] sm:$0xff] }
 0x26e   :  { %1501 = vmatprep.subr.mxu0 %v8939_v25  ;;  %1572 = vmatprep.subr.mxu1 %v8941_v30 }
 0x26f   :  { %1502 = vmatpush1.msra.mxu0 %v8945_v62  ;;  %1573 = vmatpush1.msra.mxu1 %v8947_v9 }
 0x270   :  { %1503 = vmatprep.subr.mxu0 %v8951_v14  ;;  %1574 = vmatprep.subr.mxu1 %v8953_v3 }
 0x271   :  { %1504 = vmatpush1.msra.mxu0 %v8957_v22  ;;  %1575 = vmatpush1.msra.mxu1 %v8959_v7 }
 0x272   :  { %1505 = vmatprep.subr.mxu0 %v8963_v19  ;;  %1576 = vmatprep.subr.mxu1 %v8965_v1 }
 0x273   :  { %1506 = vmatpush1.msra.mxu0 %v8969_v23  ;;  %1577 = vmatpush1.msra.mxu1 %v8971_v12 }
 0x274   :  { %1507 = vmatprep.subr.mxu0 %v8975_v6  ;;  %1578 = vmatprep.subr.mxu1 %v8977_v0 }
 0x275   :  { %1508 = vmatpush1.msra.mxu0 %v8981_v45  ;;  %1579 = vmatpush1.msra.mxu1 %v8983_v35 }
 0x276   :  { %v7323_v13 = vpop.eup %7322  ;;  %1509 = vmatprep.subr.mxu0 %v8987_v40  ;;  %1580 = vmatprep.subr.mxu1 %v8989_v20 }
 0x277   :  { %v1249_v43 = vmul.f32 %v7323_v13, %v7321_v5  ;;  %1510 = vmatpush1.msra.mxu0 %v8993_v15  ;;  %1581 = vmatpush1.msra.mxu1 %v8995_v16  ;;  %v12416_v5 = vld [vmem:[#allocation34_spill] sm:$0xff]  ;;  %v12417_v13 = vld [vmem:[#allocation24_spill] sm:$0xff] }
 0x278   :  { %v7325_v44 = vpop.eup %7324  ;;  %1511 = vmatprep.subr.mxu0 %v8999_v2  ;;  %1582 = vmatprep.subr.mxu1 %v9001_v10 }
 0x279   :  { %v1248_v61 = vmul.f32 %v7325_v44, %v8874_v24  ;;  %1512 = vmatpush1.msra.mxu0 %v9005_v59  ;;  %1583 = vmatpush1.msra.mxu1 %v9007_v58  ;;  %v12404_v24 = vld [vmem:[#allocation17_spill] sm:$0xff] }
 0x27a   :  { %1513 = vmatprep.subr.mxu0 %v9011_v4  ;;  %1584 = vmatprep.subr.mxu1 %v9013_v52  ;;  %v7327_v44 = vpop.eup %7326 }
 0x27b   :  { %v9169_v63 = vadd.f32 %v1249_v43, %v1248_v61  ;;  %1514 = vmatpush1.msra.mxu0 %v9017_v26  ;;  %1585 = vmatpush1.msra.mxu1 %v9019_v27  ;;  %v12418_v43 = vld [vmem:[#allocation35_spill] sm:$0xff]  ;;  %v12420_v61 = vld [vmem:[#allocation36_spill] sm:$0xff] }
 0x27c   :  { %1515 = vmatprep.subr.mxu0 %v9023_v28  ;;  %1586 = vmatprep.subr.mxu1 %v9025_v29 }
 0x27d   :  { %12403 = vst [vmem:[#allocation47_spill] sm:$0xff] %v9169_v63  ;;  %7328 = vtanh.f32 %v9169_v63  ;;  %1516 = vmatpush1.msra.mxu0 %v9029_v31  ;;  %1587 = vmatpush1.msra.mxu1 %v9031_v32  ;;  %v12422_v63 = vld [vmem:[#allocation37_spill] sm:$0xff] }
 0x27e   :  { %1517 = vmatprep.subr.mxu0 %v9035_v33  ;;  %1588 = vmatprep.subr.mxu1 %v9037_v34 }
 0x27f   :  { %1518 = vmatpush1.msra.mxu0 %v9041_v36  ;;  %1589 = vmatpush1.msra.mxu1 %v9043_v37 }
 0x280   :  { %1519 = vmatprep.subr.mxu0 %v9047_v38  ;;  %1590 = vmatprep.subr.mxu1 %v9049_v39 }
 0x281   :  { %1520 = vmatpush1.msra.mxu0 %v9053_v41  ;;  %1591 = vmatpush1.msra.mxu1 %v12404_v24 }
 0x282   :  { %1521 = vmatprep.subr.mxu0 %v12405_v50  ;;  %1592 = vmatprep.subr.mxu1 %v12406_v49 }
 0x283   :  { %1522 = vmatpush1.msra.mxu0 %v12407_v51  ;;  %1593 = vmatpush1.msra.mxu1 %v12408_v53 }
 0x284   :  { %1523 = vmatprep.subr.mxu0 %v12409_v48  ;;  %1594 = vmatprep.subr.mxu1 %v12410_v56 }
 0x285   :  { %1524 = vmatpush1.msra.mxu0 %v12411_v57  ;;  %1595 = vmatpush1.msra.mxu1 %v12412_v8 }
 0x286   :  { %1525 = vmatprep.subr.mxu0 %v12413_v54  ;;  %1596 = vmatprep.subr.mxu1 %v12414_v55 }
 0x287   :  { %1526 = vmatpush1.msra.mxu0 %v12415_v46  ;;  %1597 = vmatpush1.msra.mxu1 %v12416_v5  ;;  %v12426_v5 = vld [vmem:[#allocation38_spill] sm:$0xff] }
 0x288   :  { %1527 = vmatprep.subr.mxu0 %v12417_v13  ;;  %1598 = vmatprep.subr.mxu1 %v12418_v43 }
 0x289   :  { %1528 = vmatpush1.msra.mxu0 %v12419_v11  ;;  %1599 = vmatpush1.msra.mxu1 %v12420_v61  ;;  %v12427_v61 = vld [vmem:[#allocation15_spill] sm:$0xff]  ;;  %v12428_v11 = vld [vmem:[#allocation16_spill] sm:$0xff] }
 0x28a   :  { %v7329_v47 = vpop.eup %7328  ;;  %1529 = vmatprep.subr.mxu0 %v12421_v18  ;;  %1600 = vmatprep.subr.mxu1 %v12422_v63 }
 0x28b   :  { %1530 = vmatpush1.msra.mxu0 %v12423_v42  ;;  %1563 = vmatprep.mubr.f32.mxu0 %v12424_v60  ;;  %v9206_v46 = vmul.f32 %v7329_v47, %v7327_v44  ;;  %v12429_v47 = vld [vmem:[#allocation23_spill] sm:$0xff]  ;;  %v12430_v44 = vld [vmem:[#allocation34_spill] sm:$0xff] }
 0x28c   :  { %1601 = vmatpush1.msra.mxu1 %v12426_v5  ;;  %1634 = vmatprep.mubr.f32.mxu1 %v12424_v60 }
 0x28d   :  { %12425 = vst [vmem:[#allocation45_spill] sm:$0xff] %v9206_v46  ;;  %1564 = vmatmul.mubr.f32.vlgmr.msra.gmra.mxu0 %v9206_v46  ;;  %1635 = vmatmul.mubr.f32.vlgmr.msra.gmra.mxu1 %v9206_v46  ;;  %v12431_v46 = vld [vmem:[#allocation25_spill] sm:$0xff] }
 0x28e   :  { %1745 = vmatprep.subr.mxu0 %v12427_v61  ;;  %1816 = vmatprep.subr.mxu1 %v12428_v11 }
 0x28f   :  { %1746 = vmatpush1.msra.mxu0 %v8933_v17  ;;  %1817 = vmatpush1.msra.mxu1 %v8935_v21 }
 0x290   :  { %1747 = vmatprep.subr.mxu0 %v8939_v25  ;;  %1818 = vmatprep.subr.mxu1 %v8941_v30 }
 0x291   :  { %1748 = vmatpush1.msra.mxu0 %v8945_v62  ;;  %1819 = vmatpush1.msra.mxu1 %v8947_v9 }
 0x292   :  { %1749 = vmatprep.subr.mxu0 %v8951_v14  ;;  %1820 = vmatprep.subr.mxu1 %v8953_v3 }
 0x293   :  { %1750 = vmatpush1.msra.mxu0 %v8957_v22  ;;  %1821 = vmatpush1.msra.mxu1 %v8959_v7 }
 0x294   :  { %1751 = vmatprep.subr.mxu0 %v8963_v19  ;;  %1822 = vmatprep.subr.mxu1 %v8965_v1 }
 0x295   :  { %1752 = vmatpush1.msra.mxu0 %v8969_v23  ;;  %1823 = vmatpush1.msra.mxu1 %v8971_v12 }
 0x296   :  { %1753 = vmatprep.subr.mxu0 %v8975_v6  ;;  %1824 = vmatprep.subr.mxu1 %v8977_v0 }
 0x297   :  { %1754 = vmatpush1.msra.mxu0 %v8981_v45  ;;  %1825 = vmatpush1.msra.mxu1 %v8983_v35 }
 0x298   :  { %1755 = vmatprep.subr.mxu0 %v8987_v40  ;;  %1826 = vmatprep.subr.mxu1 %v8989_v20 }
 0x299   :  { %1756 = vmatpush1.msra.mxu0 %v8993_v15  ;;  %1827 = vmatpush1.msra.mxu1 %v8995_v16 }
 0x29a   :  { %1757 = vmatprep.subr.mxu0 %v8999_v2  ;;  %1828 = vmatprep.subr.mxu1 %v9001_v10 }
 0x29b   :  { %1758 = vmatpush1.msra.mxu0 %v9005_v59  ;;  %1829 = vmatpush1.msra.mxu1 %v9007_v58 }
 0x29c   :  { %1759 = vmatprep.subr.mxu0 %v9011_v4  ;;  %1830 = vmatprep.subr.mxu1 %v9013_v52 }
 0x29d   :  { %1760 = vmatpush1.msra.mxu0 %v9017_v26  ;;  %1831 = vmatpush1.msra.mxu1 %v9019_v27 }
 0x29e   :  { %1761 = vmatprep.subr.mxu0 %v9023_v28  ;;  %1832 = vmatprep.subr.mxu1 %v9025_v29 }
 0x29f   :  { %1762 = vmatpush1.msra.mxu0 %v9029_v31  ;;  %1833 = vmatpush1.msra.mxu1 %v9031_v32 }
 0x2a0   :  { %1763 = vmatprep.subr.mxu0 %v9035_v33  ;;  %1834 = vmatprep.subr.mxu1 %v9037_v34 }
 0x2a1   :  { %1764 = vmatpush1.msra.mxu0 %v9041_v36  ;;  %1835 = vmatpush1.msra.mxu1 %v9043_v37 }
 0x2a2   :  { %1765 = vmatprep.subr.mxu0 %v9047_v38  ;;  %1836 = vmatprep.subr.mxu1 %v9049_v39 }
 0x2a3   :  { %1766 = vmatpush1.msra.mxu0 %v9053_v41  ;;  %1837 = vmatpush1.msra.mxu1 %v12404_v24 }
 0x2a4   :  { %1767 = vmatprep.subr.mxu0 %v12405_v50  ;;  %1838 = vmatprep.subr.mxu1 %v12406_v49 }
 0x2a5   :  { %1768 = vmatpush1.msra.mxu0 %v12407_v51  ;;  %1839 = vmatpush1.msra.mxu1 %v12408_v53 }
 0x2a6   :  { %1769 = vmatprep.subr.mxu0 %v12409_v48  ;;  %1840 = vmatprep.subr.mxu1 %v12410_v56  ;;  %v12432_v48 = vld [vmem:[#allocation36_spill] sm:$0xff] }
 0x2a7   :  { %1770 = vmatpush1.msra.mxu0 %v12411_v57  ;;  %1841 = vmatpush1.msra.mxu1 %v12412_v8  ;;  %v12436_v8 = vld [vmem:[#allocation74_spill] sm:$0xff] }
 0x2a8   :  { %1771 = vmatprep.subr.mxu0 %v12413_v54  ;;  %1842 = vmatprep.subr.mxu1 %v12414_v55 }
 0x2a9   :  { %1772 = vmatpush1.msra.mxu0 %v12429_v47  ;;  %1843 = vmatpush1.msra.mxu1 %v12430_v44 }
 0x2aa   :  { %1773 = vmatprep.subr.mxu0 %v12417_v13  ;;  %1844 = vmatprep.subr.mxu1 %v12418_v43 }
 0x2ab   :  { %1774 = vmatpush1.msra.mxu0 %v12431_v46  ;;  %1845 = vmatpush1.msra.mxu1 %v12432_v48  ;;  %v12433_v46 = vld [vmem:[#allocation54_spill] sm:$0xff] }
 0x2ac   :  { %1775 = vmatprep.subr.mxu0 %v12421_v18  ;;  %1846 = vmatprep.subr.mxu1 %v12422_v63  ;;  %v12434_v18 = vld [vmem:[#allocation55_spill] sm:$0xff] }
 0x2ad   :  { %1776 = vmatpush1.msra.mxu0 %v12423_v42  ;;  %1847 = vmatpush1.msra.mxu1 %v12426_v5  ;;  %v12435_v5 = vld [vmem:[#allocation67_spill] sm:$0xff] }
 0x2ae   :  { %1809 = vmatprep.mubr.f32.mxu0 %v12424_v60  ;;  %1880 = vmatprep.mubr.f32.mxu1 %v12424_v60  ;;  %v12437_v60 = vld [vmem:[#allocation68_spill] sm:$0xff] }
 0x2af   :  { %1915 = vmatprep.subr.mxu0 %v12427_v61  ;;  %1986 = vmatprep.subr.mxu1 %v12428_v11  ;;  %v436_v57 = vadd.f32 %v12437_v60, %v12436_v8 }
 0x32c   :  { %v1395_v43 = vpop.f32.mrf.mxu0  ;;  %v1466_v42 = vpop.f32.mrf.mxu1 }
 0x32d   :  { %v1471_v13 = vadd.f32 %v1395_v43, %v12433_v46  ;;  %v1473_v55 = vadd.f32 %v1466_v42, %v12435_v5 }
 0x32e   :  { %v1397_v48 = vpop.f32.mrf.mxu0  ;;  %v1468_v54 = vpop.f32.mrf.mxu1 }
 0x32f   :  { %v7117_v44 = vmul.f32 -1.442695, %v1471_v13  ;;  %v1472_v47 = vadd.f32 %v1397_v48, %v12434_v18  ;;  %v7119_v61 = vmul.f32 -1.442695, %v1473_v55  ;;  %v1474_v56 = vadd.f32 %v1468_v54, %v436_v57  ;;  %v12439_v57 = vld [vmem:[#allocation57_spill] sm:$0xff] }
 0x331   :  { %7330 = vpow2.f32 %v7117_v44  ;;  %v7118_v63 = vmul.f32 -1.442695, %v1472_v47  ;;  %v12438_v47 = vld [vmem:[#allocation56_spill] sm:$0xff] }
 0x333   :  { %7332 = vpow2.f32 %v7118_v63 }
 0x334   :  { %7334 = vpow2.f32 %v7119_v61 }
 0x335   :  { %7336 = vtanh.f32 %v1474_v56 }
 0x33e   :  { %v7331_v11 = vpop.eup %7330 }
 0x33f   :  { %v1484_v53 = vadd.f32 1.0, %v7331_v11  ;;  %v12440_v11 = vld [vmem:[#allocation28_spill] sm:$0xff] }
 0x340   :  { %v7333_v46 = vpop.eup %7332 }
 0x341   :  { %7338 = vrcp.f32 %v1484_v53  ;;  %v1485_v13 = vadd.f32 1.0, %v7333_v46  ;;  %v7335_v18 = vpop.eup %7334 }
 0x342   :  { %v7337_v48 = vpop.eup %7336  ;;  %v1486_v5 = vadd.f32 1.0, %v7335_v18 }
 0x343   :  { %7340 = vrcp.f32 %v1485_v13  ;;  %v12442_v13 = vld [vmem:[#allocation71_spill] sm:$0xff] }
 0x34d   :  { %v1565_v63 = vpop.f32.mrf.mxu0  ;;  %v1636_v46 = vpop.f32.mrf.mxu1 }
 0x34e   :  { %v7339_v43 = vpop.eup %7338  ;;  %v1641_v42 = vadd.f32 %v1565_v63, %v12438_v47  ;;  %v1643_v63 = vadd.f32 %v1636_v46, %v12442_v13 }
 0x34f   :  { %v1495_v44 = vmul.f32 %v7339_v43, %v7337_v48  ;;  %v1567_v51 = vpop.f32.mrf.mxu0  ;;  %v1638_v18 = vpop.f32.mrf.mxu1  ;;  %v12443_v48 = vld [vmem:[#allocation72_spill] sm:$0xff] }
 0x350   :  { %v7341_v60 = vpop.eup %7340  ;;  %v7120_v55 = vmul.f32 -1.442695, %v1641_v42  ;;  %v1642_v54 = vadd.f32 %v1567_v51, %v12439_v57  ;;  %v442_v43 = vadd.f32 %v12443_v48, %v12436_v8  ;;  %v7122_v47 = vmul.f32 -1.442695, %v1643_v63  ;;  %v12445_v63 = vld [vmem:[#allocation47_spill] sm:$0xff] }
 0x351   :  { %v1494_v61 = vmul.f32 %v7341_v60, %v12440_v11 }
 0x352   :  { %7342 = vpow2.f32 %v7120_v55  ;;  %v7121_v56 = vmul.f32 -1.442695, %v1642_v54  ;;  %v1644_v42 = vadd.f32 %v1638_v18, %v442_v43  ;;  %v12447_v43 = vld [vmem:[#allocation19_spill] sm:$0xff] }
 0x353   :  { %7344 = vrcp.f32 %v1486_v5  ;;  %v9288_v53 = vadd.f32 %v1495_v44, %v1494_v61 }
 0x354   :  { %7346 = vpow2.f32 %v7121_v56 }
 0x355   :  { %12441 = vst [vmem:[#allocation59_spill] sm:$0xff] %v9288_v53  ;;  %7348 = vtanh.f32 %v9288_v53  ;;  %v12464_v53 = vmov 0.0  }
 0x356   :  { %7350 = vpow2.f32 %v7122_v47  ;;  %v12448_v47 = vld [vmem:[#allocation30_spill] sm:$0xff] }
 0x357   :  { %7352 = vtanh.f32 %v1644_v42  ;;  %v12449_v42 = vld [vmem:[#allocation20_spill] sm:$0xff] }
 0x35f   :  { %v7343_v51 = vpop.eup %7342 }
 0x360   :  { %v7345_v57 = vpop.eup %7344  ;;  %v1654_v60 = vadd.f32 1.0, %v7343_v51  ;;  %v12450_v51 = vld [vmem:[#allocation31_spill] sm:$0xff] }
 0x361   :  { %v7347_v55 = vpop.eup %7346 }
 0x362   :  { %v7349_v5 = vpop.eup %7348  ;;  %7354 = vrcp.f32 %v1654_v60  ;;  %v1655_v44 = vadd.f32 1.0, %v7347_v55  ;;  %v12452_v60 = vld [vmem:[#allocation32_spill] sm:$0xff]  ;;  %v12453_v55 = vld [vmem:[#allocation22_spill] sm:$0xff] }
 0x363   :  { %v9294_v54 = vmul.f32 %v7349_v5, %v7345_v57  ;;  %v7351_v8 = vpop.eup %7350  ;;  %v12451_v57 = vld [vmem:[#allocation21_spill] sm:$0xff] }
 0x364   :  { %7356 = vrcp.f32 %v1655_v44  ;;  %v7353_v11 = vpop.eup %7352  ;;  %v1656_v13 = vadd.f32 1.0, %v7351_v8  ;;  %v12454_v5 = vld [vmem:[#allocation33_spill] sm:$0xff]  ;;  %v12455_v44 = vld [vmem:[#allocation23_spill] sm:$0xff]  ;;  %v12456_v8 = vld [vmem:[#allocation34_spill] sm:$0xff] }
 0x365   :  { %12444 = vst [vmem:[#allocation60_spill] sm:$0xff] %v9294_v54  ;;  %1810 = vmatmul.mubr.f32.vlgmr.msra.gmra.mxu0 %v9294_v54  ;;  %1881 = vmatmul.mubr.f32.vlgmr.msra.gmra.mxu1 %v9294_v54  ;;  %v12462_v54 = vld [vmem:[#allocation37_spill] sm:$0xff] }
 0x366   :  { %1916 = vmatpush1.msra.mxu0 %v8933_v17  ;;  %1987 = vmatpush1.msra.mxu1 %v8935_v21  ;;  %7358 = vrcp.f32 %v1656_v13  ;;  %v12460_v13 = vld [vmem:[#allocation36_spill] sm:$0xff] }
 0x367   :  { %1917 = vmatprep.subr.mxu0 %v8939_v25  ;;  %1988 = vmatprep.subr.mxu1 %v8941_v30 }
 0x368   :  { %1918 = vmatpush1.msra.mxu0 %v8945_v62  ;;  %1989 = vmatpush1.msra.mxu1 %v8947_v9 }
 0x369   :  { %1919 = vmatprep.subr.mxu0 %v8951_v14  ;;  %1990 = vmatprep.subr.mxu1 %v8953_v3 }
 0x36a   :  { %1920 = vmatpush1.msra.mxu0 %v8957_v22  ;;  %1991 = vmatpush1.msra.mxu1 %v8959_v7 }
 0x36b   :  { %1921 = vmatprep.subr.mxu0 %v8963_v19  ;;  %1992 = vmatprep.subr.mxu1 %v8965_v1 }
 0x36c   :  { %1922 = vmatpush1.msra.mxu0 %v8969_v23  ;;  %1993 = vmatpush1.msra.mxu1 %v8971_v12 }
 0x36d   :  { %1923 = vmatprep.subr.mxu0 %v8975_v6  ;;  %1994 = vmatprep.subr.mxu1 %v8977_v0 }
 0x36e   :  { %1924 = vmatpush1.msra.mxu0 %v8981_v45  ;;  %1995 = vmatpush1.msra.mxu1 %v8983_v35 }
 0x36f   :  { %v7355_v61 = vpop.eup %7354  ;;  %1925 = vmatprep.subr.mxu0 %v8987_v40  ;;  %1996 = vmatprep.subr.mxu1 %v8989_v20 }
 0x370   :  { %v1665_v56 = vmul.f32 %v7355_v61, %v7353_v11  ;;  %1926 = vmatpush1.msra.mxu0 %v8993_v15  ;;  %1997 = vmatpush1.msra.mxu1 %v8995_v16  ;;  %v12457_v11 = vld [vmem:[#allocation24_spill] sm:$0xff]  ;;  %v12458_v61 = vld [vmem:[#allocation35_spill] sm:$0xff] }
 0x371   :  { %v7357_v46 = vpop.eup %7356  ;;  %1927 = vmatprep.subr.mxu0 %v8999_v2  ;;  %1998 = vmatprep.subr.mxu1 %v9001_v10 }
 0x372   :  { %v1664_v18 = vmul.f32 %v7357_v46, %v12445_v63  ;;  %1928 = vmatpush1.msra.mxu0 %v9005_v59  ;;  %1999 = vmatpush1.msra.mxu1 %v9007_v58  ;;  %v12459_v46 = vld [vmem:[#allocation25_spill] sm:$0xff] }
 0x373   :  { %1929 = vmatprep.subr.mxu0 %v9011_v4  ;;  %2000 = vmatprep.subr.mxu1 %v9013_v52 }
 0x374   :  { %v9327_v48 = vadd.f32 %v1665_v56, %v1664_v18  ;;  %1930 = vmatpush1.msra.mxu0 %v9017_v26  ;;  %2001 = vmatpush1.msra.mxu1 %v9019_v27  ;;  %v7359_v56 = vpop.eup %7358  ;;  %v12461_v18 = vld [vmem:[#allocation26_spill] sm:$0xff] }
 0x375   :  { %1931 = vmatprep.subr.mxu0 %v9023_v28  ;;  %2002 = vmatprep.subr.mxu1 %v9025_v29 }
 0x376   :  { %12446 = vst [vmem:[#allocation50_spill] sm:$0xff] %v9327_v48  ;;  %7360 = vtanh.f32 %v9327_v48  ;;  %1932 = vmatpush1.msra.mxu0 %v9029_v31  ;;  %2003 = vmatpush1.msra.mxu1 %v9031_v32  ;;  %v12463_v48 = vld [vmem:[#allocation27_spill] sm:$0xff] }
 0x377   :  { %1933 = vmatprep.subr.mxu0 %v9035_v33  ;;  %2004 = vmatprep.subr.mxu1 %v9037_v34 }
 0x378   :  { %1934 = vmatpush1.msra.mxu0 %v9041_v36  ;;  %2005 = vmatpush1.msra.mxu1 %v9043_v37 }
 0x379   :  { %1935 = vmatprep.subr.mxu0 %v9047_v38  ;;  %2006 = vmatprep.subr.mxu1 %v9049_v39 }
 0x37a   :  { %1936 = vmatpush1.msra.mxu0 %v9053_v41  ;;  %2007 = vmatpush1.msra.mxu1 %v12404_v24 }
 0x37b   :  { %1937 = vmatprep.subr.mxu0 %v12405_v50  ;;  %2008 = vmatprep.subr.mxu1 %v12406_v49 }
 0x37c   :  { %1938 = vmatpush1.msra.mxu0 %v12447_v43  ;;  %2009 = vmatpush1.msra.mxu1 %v12448_v47 }
 0x37d   :  { %1939 = vmatprep.subr.mxu0 %v12449_v42  ;;  %2010 = vmatprep.subr.mxu1 %v12450_v51 }
 0x37e   :  { %1940 = vmatpush1.msra.mxu0 %v12451_v57  ;;  %2011 = vmatpush1.msra.mxu1 %v12452_v60 }
 0x37f   :  { %1941 = vmatprep.subr.mxu0 %v12453_v55  ;;  %2012 = vmatprep.subr.mxu1 %v12454_v5 }
 0x380   :  { %1942 = vmatpush1.msra.mxu0 %v12455_v44  ;;  %2013 = vmatpush1.msra.mxu1 %v12456_v8  ;;  %v12466_v8 = vld [vmem:[#allocation38_spill] sm:$0xff] }
 0x381   :  { %1943 = vmatprep.subr.mxu0 %v12457_v11  ;;  %2014 = vmatprep.subr.mxu1 %v12458_v61 }
 0x382   :  { %1944 = vmatpush1.msra.mxu0 %v12459_v46  ;;  %2015 = vmatpush1.msra.mxu1 %v12460_v13  ;;  %v12467_v13 = vld [vmem:[#allocation15_spill] sm:$0xff]  ;;  %v12468_v46 = vld [vmem:[#allocation16_spill] sm:$0xff] }
 0x383   :  { %v7361_v63 = vpop.eup %7360  ;;  %1945 = vmatprep.subr.mxu0 %v12461_v18  ;;  %2016 = vmatprep.subr.mxu1 %v12462_v54 }
 0x384   :  { %1946 = vmatpush1.msra.mxu0 %v12463_v48  ;;  %1979 = vmatprep.mubr.f32.mxu0 %v12464_v53  ;;  %v9364_v44 = vmul.f32 %v7361_v63, %v7359_v56  ;;  %v7789_v56 = vld [vmem:[#allocation6 + $0x1f0] sm:$0xff]  ;;  %v7792_v63 = vld [vmem:[#allocation6 + $0x1c0] sm:$0xff] }
 0x385   :  { %2017 = vmatpush1.msra.mxu1 %v12466_v8  ;;  %2050 = vmatprep.mubr.f32.mxu1 %v12464_v53 }
 0x386   :  { %12465 = vst [vmem:[#allocation53_spill] sm:$0xff] %v9364_v44  ;;  %1980 = vmatmul.mubr.f32.vlgmr.msra.gmra.mxu0 %v9364_v44  ;;  %2051 = vmatmul.mubr.f32.vlgmr.msra.gmra.mxu1 %v9364_v44  ;;  %v9644_v44 = vld [vmem:[#allocation6 + $0x8] sm:$0xff] }
 0x387   :  { %2161 = vmatprep.subr.mxu0 %v12467_v13  ;;  %2232 = vmatprep.subr.mxu1 %v12468_v46  ;;  %v7790_v46 = vld [vmem:[#allocation6 + $0x1c8] sm:$0xff]  ;;  %v7791_v13 = vld [vmem:[#allocation6 + $0x1d8] sm:$0xff]  ;;  %12502 = vst [vmem:[#allocation31_spill] sm:$0xff] %v9644_v44 }
 0x388   :  { %2162 = vmatpush1.msra.mxu0 %v8933_v17  ;;  %2233 = vmatpush1.msra.mxu1 %v8935_v21  ;;  %v12469_v17 = vld [vmem:[#allocation23_spill] sm:$0xff]  ;;  %v12470_v21 = vld [vmem:[#allocation34_spill] sm:$0xff] }
 0x389   :  { %2163 = vmatprep.subr.mxu0 %v8939_v25  ;;  %2234 = vmatprep.subr.mxu1 %v8941_v30  ;;  %v12471_v25 = vld [vmem:[#allocation25_spill] sm:$0xff]  ;;  %v12472_v30 = vld [vmem:[#allocation36_spill] sm:$0xff] }
 0x38a   :  { %2164 = vmatpush1.msra.mxu0 %v8945_v62  ;;  %2235 = vmatpush1.msra.mxu1 %v8947_v9  ;;  %v7786_v62 = vld [vmem:[#allocation6 + $0x1e8] sm:$0xff]  ;;  %v7787_v9 = vld [vmem:[#allocation6 + $0x1f8] sm:$0xff] }
 0x38b   :  { %2165 = vmatprep.subr.mxu0 %v8951_v14  ;;  %2236 = vmatprep.subr.mxu1 %v8953_v3  ;;  %v12473_v3 = vld [vmem:[#allocation58_spill] sm:$0xff] }
 0x38c   :  { %2166 = vmatpush1.msra.mxu0 %v8957_v22  ;;  %2237 = vmatpush1.msra.mxu1 %v8959_v7 }
 0x38d   :  { %2167 = vmatprep.subr.mxu0 %v8963_v19  ;;  %2238 = vmatprep.subr.mxu1 %v8965_v1  ;;  %v12474_v1 = vld [vmem:[#allocation61_spill] sm:$0xff] }
 0x38e   :  { %2168 = vmatpush1.msra.mxu0 %v8969_v23  ;;  %2239 = vmatpush1.msra.mxu1 %v8971_v12 }
 0x38f   :  { %2169 = vmatprep.subr.mxu0 %v8975_v6  ;;  %2240 = vmatprep.subr.mxu1 %v8977_v0  ;;  %v12475_v0 = vld [vmem:[#allocation76_spill] sm:$0xff] }
 0x390   :  { %2170 = vmatpush1.msra.mxu0 %v8981_v45  ;;  %2241 = vmatpush1.msra.mxu1 %v8983_v35 }
 0x391   :  { %2171 = vmatprep.subr.mxu0 %v8987_v40  ;;  %2242 = vmatprep.subr.mxu1 %v8989_v20  ;;  %v12476_v20 = vld [vmem:[#allocation78_spill] sm:$0xff] }
 0x392   :  { %2172 = vmatpush1.msra.mxu0 %v8993_v15  ;;  %2243 = vmatpush1.msra.mxu1 %v8995_v16 }
 0x393   :  { %2173 = vmatprep.subr.mxu0 %v8999_v2  ;;  %2244 = vmatprep.subr.mxu1 %v9001_v10 }
 0x394   :  { %2174 = vmatpush1.msra.mxu0 %v9005_v59  ;;  %2245 = vmatpush1.msra.mxu1 %v9007_v58 }
 0x395   :  { %2175 = vmatprep.subr.mxu0 %v9011_v4  ;;  %2246 = vmatprep.subr.mxu1 %v9013_v52 }
 0x396   :  { %2176 = vmatpush1.msra.mxu0 %v9017_v26  ;;  %2247 = vmatpush1.msra.mxu1 %v9019_v27  ;;  %v12477_v27 = vld [vmem:[#allocation62_spill] sm:$0xff] }
 0x397   :  { %2177 = vmatprep.subr.mxu0 %v9023_v28  ;;  %2248 = vmatprep.subr.mxu1 %v9025_v29 }
 0x398   :  { %2178 = vmatpush1.msra.mxu0 %v9029_v31  ;;  %2249 = vmatpush1.msra.mxu1 %v9031_v32 }
 0x399   :  { %2179 = vmatprep.subr.mxu0 %v9035_v33  ;;  %2250 = vmatprep.subr.mxu1 %v9037_v34 }
 0x39a   :  { %2180 = vmatpush1.msra.mxu0 %v9041_v36  ;;  %2251 = vmatpush1.msra.mxu1 %v9043_v37  ;;  %v12478_v36 = vld [vmem:[#allocation65_spill] sm:$0xff] }
 0x39b   :  { %2181 = vmatprep.subr.mxu0 %v9047_v38  ;;  %2252 = vmatprep.subr.mxu1 %v9049_v39  ;;  %v12479_v38 = vld [vmem:[#allocation59_spill] sm:$0xff] }
 0x39c   :  { %2182 = vmatpush1.msra.mxu0 %v9053_v41  ;;  %2253 = vmatpush1.msra.mxu1 %v12404_v24 }
 0x39d   :  { %2183 = vmatprep.subr.mxu0 %v12405_v50  ;;  %2254 = vmatprep.subr.mxu1 %v12406_v49  ;;  %v12480_v49 = vld [vmem:[#allocation80_spill] sm:$0xff] }
 0x39e   :  { %2184 = vmatpush1.msra.mxu0 %v12447_v43  ;;  %2255 = vmatpush1.msra.mxu1 %v12448_v47  ;;  %v12481_v47 = vld [vmem:[#allocation82_spill] sm:$0xff] }
 0x39f   :  { %2185 = vmatprep.subr.mxu0 %v12449_v42  ;;  %2256 = vmatprep.subr.mxu1 %v12450_v51 }
 0x3a0   :  { %2186 = vmatpush1.msra.mxu0 %v12451_v57  ;;  %2257 = vmatpush1.msra.mxu1 %v12452_v60 }
 0x3a1   :  { %2187 = vmatprep.subr.mxu0 %v12453_v55  ;;  %2258 = vmatprep.subr.mxu1 %v12454_v5 }
 0x3a2   :  { %2188 = vmatpush1.msra.mxu0 %v12469_v17  ;;  %2259 = vmatpush1.msra.mxu1 %v12470_v21  ;;  %v7794_v17 = vld [vmem:[#allocation6 + $0x1a8] sm:$0xff]  ;;  %v7795_v21 = vld [vmem:[#allocation6 + $0x1b8] sm:$0xff] }
 0x3a3   :  { %2189 = vmatprep.subr.mxu0 %v12457_v11  ;;  %2260 = vmatprep.subr.mxu1 %v12458_v61  ;;  %v7788_v61 = vld [vmem:[#allocation6 + $0x1e0] sm:$0xff] }
 0x3a4   :  { %2190 = vmatpush1.msra.mxu0 %v12471_v25  ;;  %2261 = vmatpush1.msra.mxu1 %v12472_v30  ;;  %v7796_v25 = vld [vmem:[#allocation6 + $0x1a0] sm:$0xff]  ;;  %v7797_v30 = vld [vmem:[#allocation6 + $0x1b0] sm:$0xff] }
 0x3a5   :  { %2191 = vmatprep.subr.mxu0 %v12461_v18  ;;  %2262 = vmatprep.subr.mxu1 %v12462_v54  ;;  %v7793_v18 = vld [vmem:[#allocation6 + $0x1d0] sm:$0xff] }
 0x3a6   :  { %2192 = vmatpush1.msra.mxu0 %v12463_v48  ;;  %2263 = vmatpush1.msra.mxu1 %v12466_v8 }
 0x3a7   :  { %2225 = vmatprep.mubr.f32.mxu0 %v12464_v53  ;;  %2296 = vmatprep.mubr.f32.mxu1 %v12464_v53 }
 0x3a8   :  { %2331 = vmatprep.subr.mxu0 %v7786_v62  ;;  %2402 = vmatprep.subr.mxu1 %v7787_v9  ;;  %v7798_v62 = vld [vmem:[#allocation6 + $0x188] sm:$0xff]  ;;  %v7799_v9 = vld [vmem:[#allocation6 + $0x198] sm:$0xff] }
 0x425   :  { %v1811_v14 = vpop.f32.mrf.mxu0  ;;  %v1882_v6 = vpop.f32.mrf.mxu1 }
 0x426   :  { %v1887_v22 = vadd.f32 %v1811_v14, %v12473_v3  ;;  %v1889_v45 = vadd.f32 %v1882_v6, %v12475_v0  ;;  %v7800_v14 = vld [vmem:[#allocation6 + $0x180] sm:$0xff]  ;;  %v7801_v3 = vld [vmem:[#allocation6 + $0x190] sm:$0xff]  ;;  %v7806_v0 = vld [vmem:[#allocation6 + $0x148] sm:$0xff] }
 0x427   :  { %v1813_v7 = vpop.f32.mrf.mxu0  ;;  %v1884_v35 = vpop.f32.mrf.mxu1 }
 0x428   :  { %v7123_v19 = vmul.f32 -1.442695, %v1887_v22  ;;  %v1888_v23 = vadd.f32 %v1813_v7, %v12474_v1  ;;  %v7125_v40 = vmul.f32 -1.442695, %v1889_v45  ;;  %v1890_v15 = vadd.f32 %v1884_v35, %v12476_v20  ;;  %v7802_v7 = vld [vmem:[#allocation6 + $0x168] sm:$0xff]  ;;  %v7807_v45 = vld [vmem:[#allocation6 + $0x158] sm:$0xff] }
 0x429   :  { %v7809_v20 = vld [vmem:[#allocation6 + $0x150] sm:$0xff] }
 0x42a   :  { %7362 = vpow2.f32 %v7123_v19  ;;  %v7124_v12 = vmul.f32 -1.442695, %v1888_v23  ;;  %v7803_v19 = vld [vmem:[#allocation6 + $0x178] sm:$0xff]  ;;  %v7804_v23 = vld [vmem:[#allocation6 + $0x160] sm:$0xff] }
 0x42c   :  { %7364 = vpow2.f32 %v7124_v12  ;;  %v7805_v12 = vld [vmem:[#allocation6 + $0x170] sm:$0xff] }
 0x42d   :  { %7366 = vpow2.f32 %v7125_v40  ;;  %v7808_v40 = vld [vmem:[#allocation6 + $0x140] sm:$0xff] }
 0x42e   :  { %7368 = vtanh.f32 %v1890_v15 }
 0x437   :  { %v7363_v16 = vpop.eup %7362 }
 0x438   :  { %v1900_v2 = vadd.f32 1.0, %v7363_v16 }
 0x439   :  { %v7365_v10 = vpop.eup %7364 }
 0x43a   :  { %7370 = vrcp.f32 %v1900_v2  ;;  %v1901_v59 = vadd.f32 1.0, %v7365_v10  ;;  %v7367_v58 = vpop.eup %7366  ;;  %v7810_v2 = vld [vmem:[#allocation6 + $0x128] sm:$0xff]  ;;  %v7811_v10 = vld [vmem:[#allocation6 + $0x138] sm:$0xff] }
 0x43b   :  { %v7369_v4 = vpop.eup %7368  ;;  %v1902_v29 = vadd.f32 1.0, %v7367_v58 }
 0x43c   :  { %7372 = vrcp.f32 %v1901_v59  ;;  %v12483_v59 = vld [vmem:[#allocation50_spill] sm:$0xff] }
 0x446   :  { %v1981_v52 = vpop.f32.mrf.mxu0  ;;  %v2052_v50 = vpop.f32.mrf.mxu1 }
 0x447   :  { %v7371_v26 = vpop.eup %7370  ;;  %v2057_v28 = vadd.f32 %v1981_v52, %v12477_v27  ;;  %v2059_v54 = vadd.f32 %v2052_v50, %v12480_v49  ;;  %v7813_v52 = vld [vmem:[#allocation6 + $0x130] sm:$0xff]  ;;  %v7815_v27 = vld [vmem:[#allocation6 + $0x118] sm:$0xff]  ;;  %v7826_v50 = vld [vmem:[#allocation6 + $0xa8] sm:$0xff] }
 0x448   :  { %v1911_v31 = vmul.f32 %v7371_v26, %v7369_v4  ;;  %v1983_v32 = vpop.f32.mrf.mxu0  ;;  %v2054_v48 = vpop.f32.mrf.mxu1  ;;  %v7812_v4 = vld [vmem:[#allocation6 + $0x120] sm:$0xff]  ;;  %v7814_v26 = vld [vmem:[#allocation6 + $0x108] sm:$0xff]  ;;  %v7827_v49 = vld [vmem:[#allocation6 + $0xb8] sm:$0xff] }
 0x449   :  { %v7373_v33 = vpop.eup %7372  ;;  %v7126_v34 = vmul.f32 -1.442695, %v2057_v28  ;;  %v2058_v37 = vadd.f32 %v1983_v32, %v12478_v36  ;;  %v7128_v43 = vmul.f32 -1.442695, %v2059_v54  ;;  %v2060_v42 = vadd.f32 %v2054_v48, %v12481_v47  ;;  %v7818_v32 = vld [vmem:[#allocation6 + $0xe8] sm:$0xff]  ;;  %v7821_v36 = vld [vmem:[#allocation6 + $0xf0] sm:$0xff] }
 0x44a   :  { %v1910_v39 = vmul.f32 %v7373_v33, %v12479_v38  ;;  %v7819_v33 = vld [vmem:[#allocation6 + $0xf8] sm:$0xff]  ;;  %v7828_v54 = vld [vmem:[#allocation6 + $0xa0] sm:$0xff]  ;;  %v7829_v48 = vld [vmem:[#allocation6 + $0xb0] sm:$0xff] }
 0x44b   :  { %7374 = vpow2.f32 %v7126_v34  ;;  %v7127_v41 = vmul.f32 -1.442695, %v2058_v37  ;;  %v7820_v34 = vld [vmem:[#allocation6 + $0xe0] sm:$0xff]  ;;  %v7822_v37 = vld [vmem:[#allocation6 + $0xc8] sm:$0xff]  ;;  %v7823_v38 = vld [vmem:[#allocation6 + $0xd8] sm:$0xff] }
 0x44c   :  { %7376 = vrcp.f32 %v1902_v29  ;;  %v9443_v24 = vadd.f32 %v1911_v31, %v1910_v39  ;;  %v7816_v29 = vld [vmem:[#allocation6 + $0x100] sm:$0xff]  ;;  %v7817_v31 = vld [vmem:[#allocation6 + $0x110] sm:$0xff]  ;;  %v7831_v47 = vld [vmem:[#allocation6 + $0x98] sm:$0xff] }
 0x44d   :  { %7378 = vpow2.f32 %v7127_v41  ;;  %v7824_v39 = vld [vmem:[#allocation6 + $0xc0] sm:$0xff]  ;;  %v7825_v41 = vld [vmem:[#allocation6 + $0xd0] sm:$0xff] }
 0x44e   :  { %7380 = vtanh.f32 %v9443_v24 }
 0x44f   :  { %7382 = vpow2.f32 %v7128_v43  ;;  %v7830_v43 = vld [vmem:[#allocation6 + $0x88] sm:$0xff] }
 0x450   :  { %7384 = vtanh.f32 %v2060_v42  ;;  %v7832_v42 = vld [vmem:[#allocation6 + $0x80] sm:$0xff] }
 0x458   :  { %v7375_v51 = vpop.eup %7374 }
 0x459   :  { %v7377_v57 = vpop.eup %7376  ;;  %v2070_v60 = vadd.f32 1.0, %v7375_v51  ;;  %v7833_v51 = vld [vmem:[#allocation6 + $0x90] sm:$0xff] }
 0x45a   :  { %v7379_v55 = vpop.eup %7378 }
 0x45b   :  { %v7381_v5 = vpop.eup %7380  ;;  %7386 = vrcp.f32 %v2070_v60  ;;  %v2071_v8 = vadd.f32 1.0, %v7379_v55  ;;  %v7835_v60 = vld [vmem:[#allocation6 + $0x78] sm:$0xff]  ;;  %v7836_v55 = vld [vmem:[#allocation6 + $0x60] sm:$0xff] }
 0x45c   :  { %v9448_v11 = vmul.f32 %v7381_v5, %v7377_v57  ;;  %v7383_v22 = vpop.eup %7382  ;;  %v7834_v57 = vld [vmem:[#allocation6 + $0x68] sm:$0xff]  ;;  %v7837_v5 = vld [vmem:[#allocation6 + $0x70] sm:$0xff] }
 0x45d   :  { %7388 = vrcp.f32 %v2071_v8  ;;  %v7385_v1 = vpop.eup %7384  ;;  %v2072_v16 = vadd.f32 1.0, %v7383_v22  ;;  %v7838_v8 = vld [vmem:[#allocation6 + $0x48] sm:$0xff] }
 0x45e   :  { %12482 = vst [vmem:[#allocation63_spill] sm:$0xff] %v9448_v11  ;;  %2226 = vmatmul.mubr.f32.vlgmr.msra.gmra.mxu0 %v9448_v11  ;;  %2297 = vmatmul.mubr.f32.vlgmr.msra.gmra.mxu1 %v9448_v11  ;;  %v9464_v22 = vld [vmem:[#allocation6 + $0x1e8] sm:$0xff]  ;;  %v9640_v11 = vld [vmem:[#allocation6 + $0x30] sm:$0xff] }
 0x45f   :  { %2332 = vmatpush1.msra.mxu0 %v7788_v61  ;;  %2403 = vmatpush1.msra.mxu1 %v7789_v56  ;;  %7390 = vrcp.f32 %v2072_v16  ;;  %v7839_v61 = vld [vmem:[#allocation6 + $0x58] sm:$0xff]  ;;  %v7840_v56 = vld [vmem:[#allocation6 + $0x40] sm:$0xff]  ;;  %12485 = vst [vmem:[#allocation17_spill] sm:$0xff] %v9464_v22  ;;  %12501 = vst [vmem:[#allocation20_spill] sm:$0xff] %v9640_v11 }
 0x460   :  { %2333 = vmatprep.subr.mxu0 %v7790_v46  ;;  %2404 = vmatprep.subr.mxu1 %v7791_v13  ;;  %v7841_v46 = vld [vmem:[#allocation6 + $0x50] sm:$0xff]  ;;  %v7842_v13 = vld [vmem:[#allocation6 + $0x28] sm:$0xff]  ;;  %v9502_v16 = vld [vmem:[#allocation6 + $0x198] sm:$0xff] }
 0x461   :  { %2334 = vmatpush1.msra.mxu0 %v7792_v63  ;;  %2405 = vmatpush1.msra.mxu1 %v7793_v18  ;;  %v7843_v63 = vld [vmem:[#allocation6 + $0x38] sm:$0xff] }
 0x462   :  { %2335 = vmatprep.subr.mxu0 %v7794_v17  ;;  %2406 = vmatprep.subr.mxu1 %v7795_v21  ;;  %v7844_v17 = vld [vmem:[#allocation6 + $0x20] sm:$0xff]  ;;  %v7845_v21 = vld [vmem:[#allocation6 + $0x30] sm:$0xff] }
 0x463   :  { %2336 = vmatpush1.msra.mxu0 %v7796_v25  ;;  %2407 = vmatpush1.msra.mxu1 %v7797_v30  ;;  %v7846_v30 = vld [vmem:[#allocation6 + $0x8] sm:$0xff] }
 0x464   :  { %2337 = vmatprep.subr.mxu0 %v7798_v62  ;;  %2408 = vmatprep.subr.mxu1 %v7799_v9  ;;  %v7847_v62 = vld [vmem:[#allocation6 + $0x18] sm:$0xff]  ;;  %v7848_v9 = vld [vmem:[#allocation6] sm:$0xff] }
 0x465   :  { %2338 = vmatpush1.msra.mxu0 %v7800_v14  ;;  %2409 = vmatpush1.msra.mxu1 %v7801_v3  ;;  %v7849_v3 = vld [vmem:[#allocation6 + $0x10] sm:$0xff] }
 0x466   :  { %2339 = vmatprep.subr.mxu0 %v7802_v7  ;;  %2410 = vmatprep.subr.mxu1 %v7803_v19  ;;  %v9466_v7 = vld [vmem:[#allocation6 + $0x1f8] sm:$0xff]  ;;  %v9470_v19 = vld [vmem:[#allocation6 + $0x1e0] sm:$0xff] }
 0x467   :  { %2340 = vmatpush1.msra.mxu0 %v7804_v23  ;;  %2411 = vmatpush1.msra.mxu1 %v7805_v12  ;;  %12486 = vst [vmem:[#allocation18_spill] sm:$0xff] %v9466_v7  ;;  %v9476_v23 = vld [vmem:[#allocation6 + $0x1c8] sm:$0xff]  ;;  %v9478_v12 = vld [vmem:[#allocation6 + $0x1d8] sm:$0xff] }
 0x468   :  { %v7387_v6 = vpop.eup %7386  ;;  %2341 = vmatprep.subr.mxu0 %v7806_v0  ;;  %2412 = vmatprep.subr.mxu1 %v7807_v45  ;;  %v9484_v0 = vld [vmem:[#allocation6 + $0x1d0] sm:$0xff]  ;;  %v9488_v45 = vld [vmem:[#allocation6 + $0x1a8] sm:$0xff] }
 0x469   :  { %v2081_v35 = vmul.f32 %v7387_v6, %v7385_v1  ;;  %2342 = vmatpush1.msra.mxu0 %v7808_v40  ;;  %2413 = vmatpush1.msra.mxu1 %v7809_v20  ;;  %v9472_v1 = vld [vmem:[#allocation6 + $0x1f0] sm:$0xff]  ;;  %v9482_v6 = vld [vmem:[#allocation6 + $0x1c0] sm:$0xff] }
 0x46a   :  { %v7389_v15 = vpop.eup %7388  ;;  %2343 = vmatprep.subr.mxu0 %v7810_v2  ;;  %2414 = vmatprep.subr.mxu1 %v7811_v10  ;;  %v9494_v40 = vld [vmem:[#allocation6 + $0x1a0] sm:$0xff]  ;;  %v9496_v20 = vld [vmem:[#allocation6 + $0x1b0] sm:$0xff] }
 0x46b   :  { %v2080_v58 = vmul.f32 %v7389_v15, %v12483_v59  ;;  %2344 = vmatpush1.msra.mxu0 %v7812_v4  ;;  %2415 = vmatpush1.msra.mxu1 %v7813_v52  ;;  %v9500_v15 = vld [vmem:[#allocation6 + $0x188] sm:$0xff]  ;;  %v9506_v2 = vld [vmem:[#allocation6 + $0x180] sm:$0xff]  ;;  %v9508_v10 = vld [vmem:[#allocation6 + $0x190] sm:$0xff] }
 0x46c   :  { %2345 = vmatprep.subr.mxu0 %v7814_v26  ;;  %2416 = vmatprep.subr.mxu1 %v7815_v27  ;;  %v7391_v18 = vpop.eup %7390  ;;  %v9512_v59 = vld [vmem:[#allocation6 + $0x168] sm:$0xff]  ;;  %v9518_v4 = vld [vmem:[#allocation6 + $0x160] sm:$0xff]  ;;  %v9520_v52 = vld [vmem:[#allocation6 + $0x170] sm:$0xff] }
 0x46d   :  { %v9453_v28 = vadd.f32 %v2081_v35, %v2080_v58  ;;  %2346 = vmatpush1.msra.mxu0 %v7816_v29  ;;  %2417 = vmatpush1.msra.mxu1 %v7817_v31  ;;  %v9490_v35 = vld [vmem:[#allocation6 + $0x1b8] sm:$0xff]  ;;  %v9524_v26 = vld [vmem:[#allocation6 + $0x148] sm:$0xff]  ;;  %v9530_v29 = vld [vmem:[#allocation6 + $0x140] sm:$0xff] }
 0x46e   :  { %2347 = vmatprep.subr.mxu0 %v7818_v32  ;;  %2418 = vmatprep.subr.mxu1 %v7819_v33  ;;  %v9514_v58 = vld [vmem:[#allocation6 + $0x178] sm:$0xff]  ;;  %v9532_v31 = vld [vmem:[#allocation6 + $0x150] sm:$0xff]  ;;  %v9536_v32 = vld [vmem:[#allocation6 + $0x128] sm:$0xff] }
 0x46f   :  { %7392 = vtanh.f32 %v9453_v28  ;;  %2348 = vmatpush1.msra.mxu0 %v7820_v34  ;;  %2419 = vmatpush1.msra.mxu1 %v7821_v36  ;;  %v9526_v27 = vld [vmem:[#allocation6 + $0x158] sm:$0xff]  ;;  %v9542_v34 = vld [vmem:[#allocation6 + $0x120] sm:$0xff]  ;;  %v9544_v36 = vld [vmem:[#allocation6 + $0x130] sm:$0xff] }
 0x470   :  { %2349 = vmatprep.subr.mxu0 %v7822_v37  ;;  %2420 = vmatprep.subr.mxu1 %v7823_v38  ;;  %v9538_v33 = vld [vmem:[#allocation6 + $0x138] sm:$0xff]  ;;  %v9548_v37 = vld [vmem:[#allocation6 + $0x108] sm:$0xff] }
 0x471   :  { %2350 = vmatpush1.msra.mxu0 %v7824_v39  ;;  %2421 = vmatpush1.msra.mxu1 %v7825_v41  ;;  %v9550_v38 = vld [vmem:[#allocation6 + $0x118] sm:$0xff]  ;;  %v9554_v39 = vld [vmem:[#allocation6 + $0x100] sm:$0xff]  ;;  %v9556_v41 = vld [vmem:[#allocation6 + $0x110] sm:$0xff] }
 0x472   :  { %2351 = vmatprep.subr.mxu0 %v7826_v50  ;;  %2422 = vmatprep.subr.mxu1 %v7827_v49  ;;  %v9560_v50 = vld [vmem:[#allocation6 + $0xe8] sm:$0xff]  ;;  %v9562_v49 = vld [vmem:[#allocation6 + $0xf8] sm:$0xff] }
 0x473   :  { %2352 = vmatpush1.msra.mxu0 %v7828_v54  ;;  %2423 = vmatpush1.msra.mxu1 %v7829_v48  ;;  %v9566_v54 = vld [vmem:[#allocation6 + $0xe0] sm:$0xff]  ;;  %v9568_v48 = vld [vmem:[#allocation6 + $0xf0] sm:$0xff] }
 0x474   :  { %2353 = vmatprep.subr.mxu0 %v7830_v43  ;;  %2424 = vmatprep.subr.mxu1 %v7831_v47  ;;  %v9572_v43 = vld [vmem:[#allocation6 + $0xc8] sm:$0xff]  ;;  %v9574_v47 = vld [vmem:[#allocation6 + $0xd8] sm:$0xff] }
 0x475   :  { %2354 = vmatpush1.msra.mxu0 %v7832_v42  ;;  %2425 = vmatpush1.msra.mxu1 %v7833_v51  ;;  %v9578_v42 = vld [vmem:[#allocation6 + $0xc0] sm:$0xff]  ;;  %v9580_v51 = vld [vmem:[#allocation6 + $0xd0] sm:$0xff] }
 0x476   :  { %2355 = vmatprep.subr.mxu0 %v7834_v57  ;;  %2426 = vmatprep.subr.mxu1 %v7835_v60  ;;  %v9584_v57 = vld [vmem:[#allocation6 + $0xa8] sm:$0xff]  ;;  %v9586_v60 = vld [vmem:[#allocation6 + $0xb8] sm:$0xff] }
 0x477   :  { %2356 = vmatpush1.msra.mxu0 %v7836_v55  ;;  %2427 = vmatpush1.msra.mxu1 %v7837_v5  ;;  %v9590_v55 = vld [vmem:[#allocation6 + $0xa0] sm:$0xff]  ;;  %v9592_v5 = vld [vmem:[#allocation6 + $0xb0] sm:$0xff] }
 0x478   :  { %2357 = vmatprep.subr.mxu0 %v7838_v8  ;;  %2428 = vmatprep.subr.mxu1 %v7839_v61  ;;  %v9596_v8 = vld [vmem:[#allocation6 + $0x88] sm:$0xff]  ;;  %v9598_v61 = vld [vmem:[#allocation6 + $0x98] sm:$0xff] }
 0x479   :  { %2358 = vmatpush1.msra.mxu0 %v7840_v56  ;;  %2429 = vmatpush1.msra.mxu1 %v7841_v46  ;;  %12487 = vst [vmem:[#allocation29_spill] sm:$0xff] %v9598_v61  ;;  %v9602_v56 = vld [vmem:[#allocation6 + $0x80] sm:$0xff]  ;;  %v9604_v46 = vld [vmem:[#allocation6 + $0x90] sm:$0xff] }
 0x47a   :  { %2359 = vmatprep.subr.mxu0 %v7842_v13  ;;  %2430 = vmatprep.subr.mxu1 %v7843_v63  ;;  %12488 = vst [vmem:[#allocation54_spill] sm:$0xff] %v9602_v56  ;;  %12489 = vst [vmem:[#allocation55_spill] sm:$0xff] %v9604_v46  ;;  %v9608_v13 = vld [vmem:[#allocation6 + $0x68] sm:$0xff]  ;;  %v9610_v63 = vld [vmem:[#allocation6 + $0x78] sm:$0xff] }
 0x47b   :  { %2360 = vmatpush1.msra.mxu0 %v7844_v17  ;;  %2431 = vmatpush1.msra.mxu1 %v7845_v21  ;;  %12490 = vst [vmem:[#allocation67_spill] sm:$0xff] %v9608_v13  ;;  %12491 = vst [vmem:[#allocation74_spill] sm:$0xff] %v9610_v63  ;;  %v9616_v17 = vld [vmem:[#allocation6 + $0x70] sm:$0xff]  ;;  %v9620_v21 = vld [vmem:[#allocation6 + $0x48] sm:$0xff] }
 0x47c   :  { %v7393_v25 = vpop.eup %7392  ;;  %2361 = vmatprep.subr.mxu0 %v7846_v30  ;;  %2432 = vmatprep.subr.mxu1 %v7847_v62  ;;  %12493 = vst [vmem:[#allocation56_spill] sm:$0xff] %v9616_v17  ;;  %12494 = vst [vmem:[#allocation57_spill] sm:$0xff] %v9620_v21  ;;  %v9626_v30 = vld [vmem:[#allocation6 + $0x40] sm:$0xff]  ;;  %v9628_v62 = vld [vmem:[#allocation6 + $0x50] sm:$0xff] }
 0x47d   :  { %2362 = vmatpush1.msra.mxu0 %v7848_v9  ;;  %2395 = vmatprep.mubr.f32.mxu0 %v12464_v53  ;;  %v9457_v14 = vmul.f32 %v7393_v25, %v7391_v18  ;;  %v9614_v18 = vld [vmem:[#allocation6 + $0x60] sm:$0xff]  ;;  %v9622_v25 = vld [vmem:[#allocation6 + $0x58] sm:$0xff]  ;;  %12496 = vst [vmem:[#allocation71_spill] sm:$0xff] %v9626_v30  ;;  %12497 = vst [vmem:[#allocation72_spill] sm:$0xff] %v9628_v62 }
 0x47e   :  { %2433 = vmatpush1.msra.mxu1 %v7849_v3  ;;  %2466 = vmatprep.mubr.f32.mxu1 %v12464_v53  ;;  %12492 = vst [vmem:[#allocation68_spill] sm:$0xff] %v9614_v18  ;;  %12495 = vst [vmem:[#allocation28_spill] sm:$0xff] %v9622_v25  ;;  %v9632_v9 = vld [vmem:[#allocation6 + $0x28] sm:$0xff]  ;;  %v9634_v3 = vld [vmem:[#allocation6 + $0x38] sm:$0xff] }
 0x47f   :  { %12484 = vst [vmem:[#allocation64_spill] sm:$0xff] %v9457_v14  ;;  %2396 = vmatmul.mubr.f32.vlgmr.msra.gmra.mxu0 %v9457_v14  ;;  %2467 = vmatmul.mubr.f32.vlgmr.msra.gmra.mxu1 %v9457_v14  ;;  %12498 = vst [vmem:[#allocation47_spill] sm:$0xff] %v9632_v9  ;;  %v9638_v14 = vld [vmem:[#allocation6 + $0x20] sm:$0xff] }
 0x480   :  { %2641 = vmatprep.mubr.f32.mxu0 %v12464_v53  ;;  %2712 = vmatprep.mubr.f32.mxu1 %v12464_v53  ;;  %12499 = vst [vmem:[#allocation19_spill] sm:$0xff] %v9634_v3  ;;  %12500 = vst [vmem:[#allocation30_spill] sm:$0xff] %v9638_v14  ;;  %v9646_v53 = vld [vmem:[#allocation6 + $0x18] sm:$0xff] }
 0x481   :  { %2577 = vmatprep.subr.mxu0 %v9464_v22  ;;  %2648 = vmatprep.subr.mxu1 %v9466_v7  ;;  %12503 = vst [vmem:[#allocation21_spill] sm:$0xff] %v9646_v53 }
 0x482   :  { %2578 = vmatpush1.msra.mxu0 %v9470_v19  ;;  %2649 = vmatpush1.msra.mxu1 %v9472_v1 }
 0x483   :  { %2579 = vmatprep.subr.mxu0 %v9476_v23  ;;  %2650 = vmatprep.subr.mxu1 %v9478_v12 }
 0x484   :  { %2580 = vmatpush1.msra.mxu0 %v9482_v6  ;;  %2651 = vmatpush1.msra.mxu1 %v9484_v0 }
 0x485   :  { %2581 = vmatprep.subr.mxu0 %v9488_v45  ;;  %2652 = vmatprep.subr.mxu1 %v9490_v35 }
 0x486   :  { %2582 = vmatpush1.msra.mxu0 %v9494_v40  ;;  %2653 = vmatpush1.msra.mxu1 %v9496_v20 }
 0x487   :  { %2583 = vmatprep.subr.mxu0 %v9500_v15  ;;  %2654 = vmatprep.subr.mxu1 %v9502_v16 }
 0x488   :  { %2584 = vmatpush1.msra.mxu0 %v9506_v2  ;;  %2655 = vmatpush1.msra.mxu1 %v9508_v10 }
 0x489   :  { %2585 = vmatprep.subr.mxu0 %v9512_v59  ;;  %2656 = vmatprep.subr.mxu1 %v9514_v58 }
 0x48a   :  { %2586 = vmatpush1.msra.mxu0 %v9518_v4  ;;  %2657 = vmatpush1.msra.mxu1 %v9520_v52 }
 0x48b   :  { %2587 = vmatprep.subr.mxu0 %v9524_v26  ;;  %2658 = vmatprep.subr.mxu1 %v9526_v27 }
 0x48c   :  { %2588 = vmatpush1.msra.mxu0 %v9530_v29  ;;  %2659 = vmatpush1.msra.mxu1 %v9532_v31 }
 0x48d   :  { %2589 = vmatprep.subr.mxu0 %v9536_v32  ;;  %2660 = vmatprep.subr.mxu1 %v9538_v33 }
 0x48e   :  { %2590 = vmatpush1.msra.mxu0 %v9542_v34  ;;  %2661 = vmatpush1.msra.mxu1 %v9544_v36 }
 0x48f   :  { %2591 = vmatprep.subr.mxu0 %v9548_v37  ;;  %2662 = vmatprep.subr.mxu1 %v9550_v38 }
 0x490   :  { %2592 = vmatpush1.msra.mxu0 %v9554_v39  ;;  %2663 = vmatpush1.msra.mxu1 %v9556_v41 }
 0x491   :  { %2593 = vmatprep.subr.mxu0 %v9560_v50  ;;  %2664 = vmatprep.subr.mxu1 %v9562_v49 }
 0x492   :  { %2594 = vmatpush1.msra.mxu0 %v9566_v54  ;;  %2665 = vmatpush1.msra.mxu1 %v9568_v48 }
 0x493   :  { %2595 = vmatprep.subr.mxu0 %v9572_v43  ;;  %2666 = vmatprep.subr.mxu1 %v9574_v47 }
 0x494   :  { %2596 = vmatpush1.msra.mxu0 %v9578_v42  ;;  %2667 = vmatpush1.msra.mxu1 %v9580_v51 }
 0x495   :  { %2597 = vmatprep.subr.mxu0 %v9584_v57  ;;  %2668 = vmatprep.subr.mxu1 %v9586_v60 }
 0x496   :  { %2598 = vmatpush1.msra.mxu0 %v9590_v55  ;;  %2669 = vmatpush1.msra.mxu1 %v9592_v5 }
 0x497   :  { %2599 = vmatprep.subr.mxu0 %v9596_v8  ;;  %2670 = vmatprep.subr.mxu1 %v9598_v61 }
 0x498   :  { %2600 = vmatpush1.msra.mxu0 %v9602_v56  ;;  %2671 = vmatpush1.msra.mxu1 %v9604_v46 }
 0x499   :  { %2601 = vmatprep.subr.mxu0 %v9608_v13  ;;  %2672 = vmatprep.subr.mxu1 %v9610_v63 }
 0x49a   :  { %2602 = vmatpush1.msra.mxu0 %v9614_v18  ;;  %2673 = vmatpush1.msra.mxu1 %v9616_v17  ;;  %v12508_v18 = vld [vmem:[#allocation83_spill] sm:$0xff] }
 0x49b   :  { %2603 = vmatprep.subr.mxu0 %v9620_v21  ;;  %2674 = vmatprep.subr.mxu1 %v9622_v25 }
 0x49c   :  { %2604 = vmatpush1.msra.mxu0 %v9626_v30  ;;  %2675 = vmatpush1.msra.mxu1 %v9628_v62  ;;  %v9650_v62 = vld [vmem:[#allocation6] sm:$0xff] }
 0x49d   :  { %2605 = vmatprep.subr.mxu0 %v9632_v9  ;;  %2676 = vmatprep.subr.mxu1 %v9634_v3  ;;  %12504 = vst [vmem:[#allocation32_spill] sm:$0xff] %v9650_v62  ;;  %v9652_v9 = vld [vmem:[#allocation6 + $0x10] sm:$0xff] }
 0x49e   :  { %2606 = vmatpush1.msra.mxu0 %v9638_v14  ;;  %2677 = vmatpush1.msra.mxu1 %v9640_v11  ;;  %12505 = vst [vmem:[#allocation22_spill] sm:$0xff] %v9652_v9  ;;  %v12506_v14 = vld [vmem:[#allocation66_spill] sm:$0xff] }
 0x49f   :  { %2607 = vmatprep.subr.mxu0 %v9644_v44  ;;  %2678 = vmatprep.subr.mxu1 %v9646_v53  ;;  %v12507_v44 = vld [vmem:[#allocation69_spill] sm:$0xff] }
 0x4a0   :  { %2608 = vmatpush1.msra.mxu0 %v9650_v62  ;;  %2679 = vmatpush1.msra.mxu1 %v9652_v9  ;;  %v12509_v9 = vld [vmem:[#allocation84_spill] sm:$0xff] }
 0x4a1   :  { %2747 = vmatprep.subr.mxu0 %v9464_v22  ;;  %2818 = vmatprep.subr.mxu1 %v9466_v7 }
 0x51e   :  { %v2227_v11 = vpop.f32.mrf.mxu0  ;;  %v2298_v17 = vpop.f32.mrf.mxu1 }
 0x51f   :  { %v2303_v3 = vadd.f32 %v2227_v11, %v12506_v14  ;;  %v2305_v63 = vadd.f32 %v2298_v17, %v12508_v18 }
 0x520   :  { %v2229_v30 = vpop.f32.mrf.mxu0  ;;  %v2300_v62 = vpop.f32.mrf.mxu1 }
 0x521   :  { %v7129_v25 = vmul.f32 -1.442695, %v2303_v3  ;;  %v2304_v21 = vadd.f32 %v2229_v30, %v12507_v44  ;;  %v7131_v13 = vmul.f32 -1.442695, %v2305_v63  ;;  %v2306_v46 = vadd.f32 %v2300_v62, %v12509_v9  ;;  %v12511_v62 = vld [vmem:[#allocation73_spill] sm:$0xff] }
 0x523   :  { %7394 = vpow2.f32 %v7129_v25  ;;  %v7130_v53 = vmul.f32 -1.442695, %v2304_v21 }
 0x525   :  { %7396 = vpow2.f32 %v7130_v53  ;;  %v12510_v53 = vld [vmem:[#allocation70_spill] sm:$0xff] }
 0x526   :  { %7398 = vpow2.f32 %v7131_v13  ;;  %v12513_v13 = vld [vmem:[#allocation85_spill] sm:$0xff] }
 0x527   :  { %7400 = vtanh.f32 %v2306_v46 }
 0x530   :  { %v7395_v22 = vpop.eup %7394 }
 0x531   :  { %v2316_v56 = vadd.f32 1.0, %v7395_v22 }
 0x532   :  { %v7397_v7 = vpop.eup %7396 }
 0x533   :  { %7402 = vrcp.f32 %v2316_v56  ;;  %v2317_v11 = vadd.f32 1.0, %v7397_v7  ;;  %v7399_v14 = vpop.eup %7398 }
 0x534   :  { %v7401_v44 = vpop.eup %7400  ;;  %v2318_v3 = vadd.f32 1.0, %v7399_v14 }
 0x535   :  { %7404 = vrcp.f32 %v2317_v11 }
 0x53f   :  { %v2397_v25 = vpop.f32.mrf.mxu0  ;;  %v2468_v56 = vpop.f32.mrf.mxu1 }
 0x540   :  { %v7403_v21 = vpop.eup %7402  ;;  %v2473_v30 = vadd.f32 %v2397_v25, %v12510_v53  ;;  %v2475_v11 = vadd.f32 %v2468_v56, %v12513_v13  ;;  %v12514_v25 = vld [vmem:[#allocation86_spill] sm:$0xff] }
 0x541   :  { %v2327_v18 = vmul.f32 %v7403_v21, %v7401_v44  ;;  %v2399_v17 = vpop.f32.mrf.mxu0  ;;  %v2470_v14 = vpop.f32.mrf.mxu1 }
 0x542   :  { %v7405_v63 = vpop.eup %7404  ;;  %v7132_v61 = vmul.f32 -1.442695, %v2473_v30  ;;  %v2474_v9 = vadd.f32 %v2399_v17, %v12511_v62  ;;  %v7134_v44 = vmul.f32 -1.442695, %v2475_v11  ;;  %v2476_v21 = vadd.f32 %v2470_v14, %v12514_v25  ;;  %v12518_v14 = vld [vmem:[#allocation54_spill] sm:$0xff]  ;;  %v12520_v25 = vld [vmem:[#allocation67_spill] sm:$0xff] }
 0x543   :  { %v2326_v22 = vmul.f32 %v7405_v63, %v9443_v24 }
 0x544   :  { %7406 = vpow2.f32 %v7132_v61  ;;  %v7133_v46 = vmul.f32 -1.442695, %v2474_v9 }
 0x545   :  { %7408 = vrcp.f32 %v2318_v3  ;;  %v9665_v7 = vadd.f32 %v2327_v18, %v2326_v22 }
 0x546   :  { %7410 = vpow2.f32 %v7133_v46 }
 0x547   :  { %12512 = vst [vmem:[#allocation33_spill] sm:$0xff] %v9665_v7  ;;  %7412 = vtanh.f32 %v9665_v7  ;;  %v12535_v7 = vmov 0.0  }
 0x548   :  { %7414 = vpow2.f32 %v7134_v44  ;;  %v12519_v44 = vld [vmem:[#allocation55_spill] sm:$0xff] }
 0x549   :  { %7416 = vtanh.f32 %v2476_v21  ;;  %v12521_v21 = vld [vmem:[#allocation74_spill] sm:$0xff] }
 0x551   :  { %v7407_v53 = vpop.eup %7406 }
 0x552   :  { %v7409_v30 = vpop.eup %7408  ;;  %v2486_v17 = vadd.f32 1.0, %v7407_v53  ;;  %v12522_v53 = vld [vmem:[#allocation68_spill] sm:$0xff] }
 0x553   :  { %v7411_v24 = vpop.eup %7410 }
 0x554   :  { %v7413_v61 = vpop.eup %7412  ;;  %7418 = vrcp.f32 %v2486_v17  ;;  %v2487_v3 = vadd.f32 1.0, %v7411_v24  ;;  %v12524_v17 = vld [vmem:[#allocation57_spill] sm:$0xff]  ;;  %v12525_v24 = vld [vmem:[#allocation28_spill] sm:$0xff] }
 0x555   :  { %v9670_v18 = vmul.f32 %v7413_v61, %v7409_v30  ;;  %v7415_v63 = vpop.eup %7414  ;;  %v12523_v30 = vld [vmem:[#allocation56_spill] sm:$0xff]  ;;  %v12526_v61 = vld [vmem:[#allocation71_spill] sm:$0xff] }
 0x556   :  { %7420 = vrcp.f32 %v2487_v3  ;;  %v7417_v62 = vpop.eup %7416  ;;  %v2488_v56 = vadd.f32 1.0, %v7415_v63  ;;  %v12527_v3 = vld [vmem:[#allocation72_spill] sm:$0xff]  ;;  %v12528_v63 = vld [vmem:[#allocation47_spill] sm:$0xff] }
 0x557   :  { %12515 = vst [vmem:[#allocation24_spill] sm:$0xff] %v9670_v18  ;;  %2642 = vmatmul.mubr.f32.vlgmr.msra.gmra.mxu0 %v9670_v18  ;;  %2713 = vmatmul.mubr.f32.vlgmr.msra.gmra.mxu1 %v9670_v18  ;;  %v12533_v18 = vld [vmem:[#allocation21_spill] sm:$0xff] }
 0x558   :  { %2748 = vmatpush1.msra.mxu0 %v9470_v19  ;;  %2819 = vmatpush1.msra.mxu1 %v9472_v1  ;;  %7422 = vrcp.f32 %v2488_v56 }
 0x559   :  { %2749 = vmatprep.subr.mxu0 %v9476_v23  ;;  %2820 = vmatprep.subr.mxu1 %v9478_v12 }
 0x55a   :  { %2750 = vmatpush1.msra.mxu0 %v9482_v6  ;;  %2821 = vmatpush1.msra.mxu1 %v9484_v0 }
 0x55b   :  { %2751 = vmatprep.subr.mxu0 %v9488_v45  ;;  %2822 = vmatprep.subr.mxu1 %v9490_v35 }
 0x55c   :  { %2752 = vmatpush1.msra.mxu0 %v9494_v40  ;;  %2823 = vmatpush1.msra.mxu1 %v9496_v20 }
 0x55d   :  { %2753 = vmatprep.subr.mxu0 %v9500_v15  ;;  %2824 = vmatprep.subr.mxu1 %v9502_v16 }
 0x55e   :  { %2754 = vmatpush1.msra.mxu0 %v9506_v2  ;;  %2825 = vmatpush1.msra.mxu1 %v9508_v10 }
 0x55f   :  { %2755 = vmatprep.subr.mxu0 %v9512_v59  ;;  %2826 = vmatprep.subr.mxu1 %v9514_v58 }
 0x560   :  { %2756 = vmatpush1.msra.mxu0 %v9518_v4  ;;  %2827 = vmatpush1.msra.mxu1 %v9520_v52 }
 0x561   :  { %v7419_v9 = vpop.eup %7418  ;;  %2757 = vmatprep.subr.mxu0 %v9524_v26  ;;  %2828 = vmatprep.subr.mxu1 %v9526_v27 }
 0x562   :  { %v2497_v22 = vmul.f32 %v7419_v9, %v7417_v62  ;;  %2758 = vmatpush1.msra.mxu0 %v9530_v29  ;;  %2829 = vmatpush1.msra.mxu1 %v9532_v31  ;;  %v12529_v62 = vld [vmem:[#allocation19_spill] sm:$0xff] }
 0x563   :  { %v7421_v46 = vpop.eup %7420  ;;  %2759 = vmatprep.subr.mxu0 %v9536_v32  ;;  %2830 = vmatprep.subr.mxu1 %v9538_v33 }
 0x564   :  { %v2496_v13 = vmul.f32 %v7421_v46, %v9453_v28  ;;  %2760 = vmatpush1.msra.mxu0 %v9542_v34  ;;  %2831 = vmatpush1.msra.mxu1 %v9544_v36  ;;  %v12517_v28 = vld [vmem:[#allocation29_spill] sm:$0xff]  ;;  %v12531_v46 = vld [vmem:[#allocation20_spill] sm:$0xff] }
 0x565   :  { %2761 = vmatprep.subr.mxu0 %v9548_v37  ;;  %2832 = vmatprep.subr.mxu1 %v9550_v38  ;;  %v7423_v9 = vpop.eup %7422 }
 0x566   :  { %v9703_v11 = vadd.f32 %v2497_v22, %v2496_v13  ;;  %2762 = vmatpush1.msra.mxu0 %v9554_v39  ;;  %2833 = vmatpush1.msra.mxu1 %v9556_v41  ;;  %v12530_v22 = vld [vmem:[#allocation30_spill] sm:$0xff]  ;;  %v12532_v13 = vld [vmem:[#allocation31_spill] sm:$0xff] }
 0x567   :  { %2763 = vmatprep.subr.mxu0 %v9560_v50  ;;  %2834 = vmatprep.subr.mxu1 %v9562_v49 }
 0x568   :  { %12516 = vst [vmem:[#allocation35_spill] sm:$0xff] %v9703_v11  ;;  %7424 = vtanh.f32 %v9703_v11  ;;  %2764 = vmatpush1.msra.mxu0 %v9566_v54  ;;  %2835 = vmatpush1.msra.mxu1 %v9568_v48  ;;  %v12534_v11 = vld [vmem:[#allocation32_spill] sm:$0xff] }
 0x569   :  { %2765 = vmatprep.subr.mxu0 %v9572_v43  ;;  %2836 = vmatprep.subr.mxu1 %v9574_v47 }
 0x56a   :  { %2766 = vmatpush1.msra.mxu0 %v9578_v42  ;;  %2837 = vmatpush1.msra.mxu1 %v9580_v51 }
 0x56b   :  { %2767 = vmatprep.subr.mxu0 %v9584_v57  ;;  %2838 = vmatprep.subr.mxu1 %v9586_v60 }
 0x56c   :  { %2768 = vmatpush1.msra.mxu0 %v9590_v55  ;;  %2839 = vmatpush1.msra.mxu1 %v9592_v5 }
 0x56d   :  { %2769 = vmatprep.subr.mxu0 %v9596_v8  ;;  %2840 = vmatprep.subr.mxu1 %v12517_v28 }
 0x56e   :  { %2770 = vmatpush1.msra.mxu0 %v12518_v14  ;;  %2841 = vmatpush1.msra.mxu1 %v12519_v44 }
 0x56f   :  { %2771 = vmatprep.subr.mxu0 %v12520_v25  ;;  %2842 = vmatprep.subr.mxu1 %v12521_v21 }
 0x570   :  { %2772 = vmatpush1.msra.mxu0 %v12522_v53  ;;  %2843 = vmatpush1.msra.mxu1 %v12523_v30 }
 0x571   :  { %2773 = vmatprep.subr.mxu0 %v12524_v17  ;;  %2844 = vmatprep.subr.mxu1 %v12525_v24 }
 0x572   :  { %2774 = vmatpush1.msra.mxu0 %v12526_v61  ;;  %2845 = vmatpush1.msra.mxu1 %v12527_v3  ;;  %v12537_v3 = vld [vmem:[#allocation22_spill] sm:$0xff] }
 0x573   :  { %2775 = vmatprep.subr.mxu0 %v12528_v63  ;;  %2846 = vmatprep.subr.mxu1 %v12529_v62 }
 0x574   :  { %2776 = vmatpush1.msra.mxu0 %v12530_v22  ;;  %2847 = vmatpush1.msra.mxu1 %v12531_v46  ;;  %v12538_v46 = vld [vmem:[#allocation17_spill] sm:$0xff]  ;;  %v12539_v22 = vld [vmem:[#allocation18_spill] sm:$0xff] }
 0x575   :  { %v7425_v56 = vpop.eup %7424  ;;  %2777 = vmatprep.subr.mxu0 %v12532_v13  ;;  %2848 = vmatprep.subr.mxu1 %v12533_v18 }
 0x576   :  { %2778 = vmatpush1.msra.mxu0 %v12534_v11  ;;  %2811 = vmatprep.mubr.f32.mxu0 %v12535_v7  ;;  %v9740_v61 = vmul.f32 %v7425_v56, %v7423_v9  ;;  %v12540_v9 = vld [vmem:[#allocation71_spill] sm:$0xff]  ;;  %v12541_v56 = vld [vmem:[#allocation72_spill] sm:$0xff] }
 0x577   :  { %2849 = vmatpush1.msra.mxu1 %v12537_v3  ;;  %2882 = vmatprep.mubr.f32.mxu1 %v12535_v7 }
 0x578   :  { %12536 = vst [vmem:[#allocation26_spill] sm:$0xff] %v9740_v61  ;;  %2812 = vmatmul.mubr.f32.vlgmr.msra.gmra.mxu0 %v9740_v61  ;;  %2883 = vmatmul.mubr.f32.vlgmr.msra.gmra.mxu1 %v9740_v61  ;;  %v12542_v61 = vld [vmem:[#allocation30_spill] sm:$0xff] }
 0x579   :  { %2993 = vmatprep.subr.mxu0 %v12538_v46  ;;  %3064 = vmatprep.subr.mxu1 %v12539_v22 }
 0x57a   :  { %2994 = vmatpush1.msra.mxu0 %v9470_v19  ;;  %3065 = vmatpush1.msra.mxu1 %v9472_v1 }
 0x57b   :  { %2995 = vmatprep.subr.mxu0 %v9476_v23  ;;  %3066 = vmatprep.subr.mxu1 %v9478_v12 }
 0x57c   :  { %2996 = vmatpush1.msra.mxu0 %v9482_v6  ;;  %3067 = vmatpush1.msra.mxu1 %v9484_v0 }
 0x57d   :  { %2997 = vmatprep.subr.mxu0 %v9488_v45  ;;  %3068 = vmatprep.subr.mxu1 %v9490_v35 }
 0x57e   :  { %2998 = vmatpush1.msra.mxu0 %v9494_v40  ;;  %3069 = vmatpush1.msra.mxu1 %v9496_v20 }
 0x57f   :  { %2999 = vmatprep.subr.mxu0 %v9500_v15  ;;  %3070 = vmatprep.subr.mxu1 %v9502_v16 }
 0x580   :  { %3000 = vmatpush1.msra.mxu0 %v9506_v2  ;;  %3071 = vmatpush1.msra.mxu1 %v9508_v10 }
 0x581   :  { %3001 = vmatprep.subr.mxu0 %v9512_v59  ;;  %3072 = vmatprep.subr.mxu1 %v9514_v58 }
 0x582   :  { %3002 = vmatpush1.msra.mxu0 %v9518_v4  ;;  %3073 = vmatpush1.msra.mxu1 %v9520_v52 }
 0x583   :  { %3003 = vmatprep.subr.mxu0 %v9524_v26  ;;  %3074 = vmatprep.subr.mxu1 %v9526_v27 }
 0x584   :  { %3004 = vmatpush1.msra.mxu0 %v9530_v29  ;;  %3075 = vmatpush1.msra.mxu1 %v9532_v31 }
 0x585   :  { %3005 = vmatprep.subr.mxu0 %v9536_v32  ;;  %3076 = vmatprep.subr.mxu1 %v9538_v33 }
 0x586   :  { %3006 = vmatpush1.msra.mxu0 %v9542_v34  ;;  %3077 = vmatpush1.msra.mxu1 %v9544_v36 }
 0x587   :  { %3007 = vmatprep.subr.mxu0 %v9548_v37  ;;  %3078 = vmatprep.subr.mxu1 %v9550_v38 }
 0x588   :  { %3008 = vmatpush1.msra.mxu0 %v9554_v39  ;;  %3079 = vmatpush1.msra.mxu1 %v9556_v41 }
 0x589   :  { %3009 = vmatprep.subr.mxu0 %v9560_v50  ;;  %3080 = vmatprep.subr.mxu1 %v9562_v49 }
 0x58a   :  { %3010 = vmatpush1.msra.mxu0 %v9566_v54  ;;  %3081 = vmatpush1.msra.mxu1 %v9568_v48 }
 0x58b   :  { %3011 = vmatprep.subr.mxu0 %v9572_v43  ;;  %3082 = vmatprep.subr.mxu1 %v9574_v47 }
 0x58c   :  { %3012 = vmatpush1.msra.mxu0 %v9578_v42  ;;  %3083 = vmatpush1.msra.mxu1 %v9580_v51 }
 0x58d   :  { %3013 = vmatprep.subr.mxu0 %v9584_v57  ;;  %3084 = vmatprep.subr.mxu1 %v9586_v60 }
 0x58e   :  { %3014 = vmatpush1.msra.mxu0 %v9590_v55  ;;  %3085 = vmatpush1.msra.mxu1 %v9592_v5 }
 0x58f   :  { %3015 = vmatprep.subr.mxu0 %v9596_v8  ;;  %3086 = vmatprep.subr.mxu1 %v12517_v28 }
 0x590   :  { %3016 = vmatpush1.msra.mxu0 %v12518_v14  ;;  %3087 = vmatpush1.msra.mxu1 %v12519_v44 }
 0x591   :  { %3017 = vmatprep.subr.mxu0 %v12520_v25  ;;  %3088 = vmatprep.subr.mxu1 %v12521_v21  ;;  %v12543_v25 = vld [vmem:[#allocation20_spill] sm:$0xff] }
 0x592   :  { %3018 = vmatpush1.msra.mxu0 %v12522_v53  ;;  %3089 = vmatpush1.msra.mxu1 %v12523_v30 }
 0x593   :  { %3019 = vmatprep.subr.mxu0 %v12524_v17  ;;  %3090 = vmatprep.subr.mxu1 %v12525_v24 }
 0x594   :  { %3020 = vmatpush1.msra.mxu0 %v12540_v9  ;;  %3091 = vmatpush1.msra.mxu1 %v12541_v56 }
 0x595   :  { %3021 = vmatprep.subr.mxu0 %v12528_v63  ;;  %3092 = vmatprep.subr.mxu1 %v12529_v62 }
 0x596   :  { %3022 = vmatpush1.msra.mxu0 %v12542_v61  ;;  %3093 = vmatpush1.msra.mxu1 %v12543_v25  ;;  %v12544_v61 = vld [vmem:[#allocation75_spill] sm:$0xff] }
 0x597   :  { %3023 = vmatprep.subr.mxu0 %v12532_v13  ;;  %3094 = vmatprep.subr.mxu1 %v12533_v18  ;;  %v12545_v13 = vld [vmem:[#allocation77_spill] sm:$0xff] }
 0x598   :  { %3024 = vmatpush1.msra.mxu0 %v12534_v11  ;;  %3095 = vmatpush1.msra.mxu1 %v12537_v3  ;;  %v12546_v3 = vld [vmem:[#allocation87_spill] sm:$0xff] }
 0x599   :  { %3057 = vmatprep.mubr.f32.mxu0 %v12535_v7  ;;  %3128 = vmatprep.mubr.f32.mxu1 %v12535_v7  ;;  %v12547_v7 = vld [vmem:[#allocation88_spill] sm:$0xff] }
 0x59a   :  { %3163 = vmatprep.subr.mxu0 %v12538_v46  ;;  %3234 = vmatprep.subr.mxu1 %v12539_v22 }
 0x617   :  { %v2643_v62 = vpop.f32.mrf.mxu0  ;;  %v2714_v11 = vpop.f32.mrf.mxu1 }
 0x618   :  { %v2719_v63 = vadd.f32 %v2643_v62, %v12544_v61  ;;  %v2721_v24 = vadd.f32 %v2714_v11, %v12546_v3 }
 0x619   :  { %v2645_v25 = vpop.f32.mrf.mxu0  ;;  %v2716_v17 = vpop.f32.mrf.mxu1 }
 0x61a   :  { %v7135_v56 = vmul.f32 -1.442695, %v2719_v63  ;;  %v2720_v9 = vadd.f32 %v2645_v25, %v12545_v13  ;;  %v7137_v30 = vmul.f32 -1.442695, %v2721_v24  ;;  %v2722_v53 = vadd.f32 %v2716_v17, %v12547_v7  ;;  %v12549_v7 = vld [vmem:[#allocation81_spill] sm:$0xff] }
 0x61c   :  { %7426 = vpow2.f32 %v7135_v56  ;;  %v7136_v18 = vmul.f32 -1.442695, %v2720_v9 }
 0x61e   :  { %7428 = vpow2.f32 %v7136_v18  ;;  %v12548_v18 = vld [vmem:[#allocation79_spill] sm:$0xff] }
 0x61f   :  { %7430 = vpow2.f32 %v7137_v30 }
 0x620   :  { %7432 = vtanh.f32 %v2722_v53 }
 0x629   :  { %v7427_v46 = vpop.eup %7426 }
 0x62a   :  { %v2732_v21 = vadd.f32 1.0, %v7427_v46  ;;  %v12550_v46 = vld [vmem:[#allocation33_spill] sm:$0xff] }
 0x62b   :  { %v7429_v22 = vpop.eup %7428 }
 0x62c   :  { %7434 = vrcp.f32 %v2732_v21  ;;  %v2733_v61 = vadd.f32 1.0, %v7429_v22  ;;  %v7431_v63 = vpop.eup %7430 }
 0x62d   :  { %v7433_v25 = vpop.eup %7432  ;;  %v2734_v56 = vadd.f32 1.0, %v7431_v63 }
 0x62e   :  { %7436 = vrcp.f32 %v2733_v61  ;;  %v12552_v61 = vld [vmem:[#allocation89_spill] sm:$0xff] }
 0x638   :  { %v2813_v62 = vpop.f32.mrf.mxu0  ;;  %v2884_v22 = vpop.f32.mrf.mxu1 }
 0x639   :  { %v7435_v13 = vpop.eup %7434  ;;  %v2889_v9 = vadd.f32 %v2813_v62, %v12548_v18  ;;  %v2891_v62 = vadd.f32 %v2884_v22, %v12552_v61  ;;  %v12555_v22 = vld [vmem:[#allocation35_spill] sm:$0xff] }
 0x63a   :  { %v2743_v11 = vmul.f32 %v7435_v13, %v7433_v25  ;;  %v2815_v3 = vpop.f32.mrf.mxu0  ;;  %v2886_v63 = vpop.f32.mrf.mxu1  ;;  %v12553_v13 = vld [vmem:[#allocation90_spill] sm:$0xff] }
 0x63b   :  { %v7437_v24 = vpop.eup %7436  ;;  %v7138_v44 = vmul.f32 -1.442695, %v2889_v9  ;;  %v2890_v17 = vadd.f32 %v2815_v3, %v12549_v7  ;;  %v7140_v25 = vmul.f32 -1.442695, %v2891_v62  ;;  %v2892_v18 = vadd.f32 %v2886_v63, %v12553_v13  ;;  %v12557_v63 = vld [vmem:[#allocation54_spill] sm:$0xff]  ;;  %v12559_v13 = vld [vmem:[#allocation67_spill] sm:$0xff] }
 0x63c   :  { %v2742_v30 = vmul.f32 %v7437_v24, %v12550_v46 }
 0x63d   :  { %7438 = vpow2.f32 %v7138_v44  ;;  %v7139_v53 = vmul.f32 -1.442695, %v2890_v17 }
 0x63e   :  { %7440 = vrcp.f32 %v2734_v56  ;;  %v9821_v21 = vadd.f32 %v2743_v11, %v2742_v30 }
 0x63f   :  { %7442 = vpow2.f32 %v7139_v53 }
 0x640   :  { %12551 = vst [vmem:[#allocation37_spill] sm:$0xff] %v9821_v21  ;;  %7444 = vtanh.f32 %v9821_v21  ;;  %v12574_v21 = vmov 0.0  }
 0x641   :  { %7446 = vpow2.f32 %v7140_v25  ;;  %v12558_v25 = vld [vmem:[#allocation55_spill] sm:$0xff] }
 0x642   :  { %7448 = vtanh.f32 %v2892_v18  ;;  %v12560_v18 = vld [vmem:[#allocation74_spill] sm:$0xff] }
 0x64a   :  { %v7439_v9 = vpop.eup %7438 }
 0x64b   :  { %v7441_v14 = vpop.eup %7440  ;;  %v2902_v3 = vadd.f32 1.0, %v7439_v9  ;;  %v12561_v9 = vld [vmem:[#allocation68_spill] sm:$0xff] }
 0x64c   :  { %v7443_v24 = vpop.eup %7442 }
 0x64d   :  { %v7445_v44 = vpop.eup %7444  ;;  %7450 = vrcp.f32 %v2902_v3  ;;  %v2903_v56 = vadd.f32 1.0, %v7443_v24  ;;  %v12562_v3 = vld [vmem:[#allocation56_spill] sm:$0xff]  ;;  %v12563_v24 = vld [vmem:[#allocation57_spill] sm:$0xff] }
 0x64e   :  { %v9826_v11 = vmul.f32 %v7445_v44, %v7441_v14  ;;  %v7447_v14 = vpop.eup %7446  ;;  %v12564_v44 = vld [vmem:[#allocation28_spill] sm:$0xff] }
 0x64f   :  { %7452 = vrcp.f32 %v2903_v56  ;;  %v7449_v7 = vpop.eup %7448  ;;  %v2904_v53 = vadd.f32 1.0, %v7447_v14  ;;  %v12565_v56 = vld [vmem:[#allocation71_spill] sm:$0xff]  ;;  %v12566_v14 = vld [vmem:[#allocation72_spill] sm:$0xff] }
 0x650   :  { %12554 = vst [vmem:[#allocation27_spill] sm:$0xff] %v9826_v11  ;;  %3058 = vmatmul.mubr.f32.vlgmr.msra.gmra.mxu0 %v9826_v11  ;;  %3129 = vmatmul.mubr.f32.vlgmr.msra.gmra.mxu1 %v9826_v11  ;;  %v12572_v11 = vld [vmem:[#allocation21_spill] sm:$0xff] }
 0x651   :  { %3164 = vmatpush1.msra.mxu0 %v9470_v19  ;;  %3235 = vmatpush1.msra.mxu1 %v9472_v1  ;;  %7454 = vrcp.f32 %v2904_v53  ;;  %v12570_v53 = vld [vmem:[#allocation20_spill] sm:$0xff] }
 0x652   :  { %3165 = vmatprep.subr.mxu0 %v9476_v23  ;;  %3236 = vmatprep.subr.mxu1 %v9478_v12 }
 0x653   :  { %3166 = vmatpush1.msra.mxu0 %v9482_v6  ;;  %3237 = vmatpush1.msra.mxu1 %v9484_v0 }
 0x654   :  { %3167 = vmatprep.subr.mxu0 %v9488_v45  ;;  %3238 = vmatprep.subr.mxu1 %v9490_v35 }
 0x655   :  { %3168 = vmatpush1.msra.mxu0 %v9494_v40  ;;  %3239 = vmatpush1.msra.mxu1 %v9496_v20 }
 0x656   :  { %3169 = vmatprep.subr.mxu0 %v9500_v15  ;;  %3240 = vmatprep.subr.mxu1 %v9502_v16 }
 0x657   :  { %3170 = vmatpush1.msra.mxu0 %v9506_v2  ;;  %3241 = vmatpush1.msra.mxu1 %v9508_v10 }
 0x658   :  { %3171 = vmatprep.subr.mxu0 %v9512_v59  ;;  %3242 = vmatprep.subr.mxu1 %v9514_v58 }
 0x659   :  { %3172 = vmatpush1.msra.mxu0 %v9518_v4  ;;  %3243 = vmatpush1.msra.mxu1 %v9520_v52 }
 0x65a   :  { %v7451_v17 = vpop.eup %7450  ;;  %3173 = vmatprep.subr.mxu0 %v9524_v26  ;;  %3244 = vmatprep.subr.mxu1 %v9526_v27 }
 0x65b   :  { %v2913_v46 = vmul.f32 %v7451_v17, %v7449_v7  ;;  %3174 = vmatpush1.msra.mxu0 %v9530_v29  ;;  %3245 = vmatpush1.msra.mxu1 %v9532_v31  ;;  %v12567_v7 = vld [vmem:[#allocation47_spill] sm:$0xff] }
 0x65c   :  { %v7453_v30 = vpop.eup %7452  ;;  %3175 = vmatprep.subr.mxu0 %v9536_v32  ;;  %3246 = vmatprep.subr.mxu1 %v9538_v33  ;;  %v12568_v17 = vld [vmem:[#allocation19_spill] sm:$0xff] }
 0x65d   :  { %v2912_v61 = vmul.f32 %v7453_v30, %v12555_v22  ;;  %3176 = vmatpush1.msra.mxu0 %v9542_v34  ;;  %3247 = vmatpush1.msra.mxu1 %v9544_v36  ;;  %v12569_v30 = vld [vmem:[#allocation30_spill] sm:$0xff] }
 0x65e   :  { %3177 = vmatprep.subr.mxu0 %v9548_v37  ;;  %3248 = vmatprep.subr.mxu1 %v9550_v38 }
 0x65f   :  { %v9859_v62 = vadd.f32 %v2913_v46, %v2912_v61  ;;  %3178 = vmatpush1.msra.mxu0 %v9554_v39  ;;  %3249 = vmatpush1.msra.mxu1 %v9556_v41  ;;  %v7455_v46 = vpop.eup %7454  ;;  %v12571_v61 = vld [vmem:[#allocation31_spill] sm:$0xff] }
 0x660   :  { %3179 = vmatprep.subr.mxu0 %v9560_v50  ;;  %3250 = vmatprep.subr.mxu1 %v9562_v49 }
 0x661   :  { %12556 = vst [vmem:[#allocation38_spill] sm:$0xff] %v9859_v62  ;;  %7456 = vtanh.f32 %v9859_v62  ;;  %3180 = vmatpush1.msra.mxu0 %v9566_v54  ;;  %3251 = vmatpush1.msra.mxu1 %v9568_v48  ;;  %v12573_v62 = vld [vmem:[#allocation32_spill] sm:$0xff] }
 0x662   :  { %3181 = vmatprep.subr.mxu0 %v9572_v43  ;;  %3252 = vmatprep.subr.mxu1 %v9574_v47 }
 0x663   :  { %3182 = vmatpush1.msra.mxu0 %v9578_v42  ;;  %3253 = vmatpush1.msra.mxu1 %v9580_v51 }
 0x664   :  { %3183 = vmatprep.subr.mxu0 %v9584_v57  ;;  %3254 = vmatprep.subr.mxu1 %v9586_v60 }
 0x665   :  { %3184 = vmatpush1.msra.mxu0 %v9590_v55  ;;  %3255 = vmatpush1.msra.mxu1 %v9592_v5 }
 0x666   :  { %3185 = vmatprep.subr.mxu0 %v9596_v8  ;;  %3256 = vmatprep.subr.mxu1 %v12517_v28 }
 0x667   :  { %3186 = vmatpush1.msra.mxu0 %v12557_v63  ;;  %3257 = vmatpush1.msra.mxu1 %v12558_v25 }
 0x668   :  { %3187 = vmatprep.subr.mxu0 %v12559_v13  ;;  %3258 = vmatprep.subr.mxu1 %v12560_v18 }
 0x669   :  { %3188 = vmatpush1.msra.mxu0 %v12561_v9  ;;  %3259 = vmatpush1.msra.mxu1 %v12562_v3 }
 0x66a   :  { %3189 = vmatprep.subr.mxu0 %v12563_v24  ;;  %3260 = vmatprep.subr.mxu1 %v12564_v44 }
 0x66b   :  { %3190 = vmatpush1.msra.mxu0 %v12565_v56  ;;  %3261 = vmatpush1.msra.mxu1 %v12566_v14  ;;  %v12575_v14 = vld [vmem:[#allocation22_spill] sm:$0xff] }
 0x66c   :  { %3191 = vmatprep.subr.mxu0 %v12567_v7  ;;  %3262 = vmatprep.subr.mxu1 %v12568_v17 }
 0x66d   :  { %3192 = vmatpush1.msra.mxu0 %v12569_v30  ;;  %3263 = vmatpush1.msra.mxu1 %v12570_v53  ;;  %v12576_v53 = vld [vmem:[#allocation17_spill] sm:$0xff]  ;;  %v12577_v30 = vld [vmem:[#allocation18_spill] sm:$0xff] }
 0x66e   :  { %v7457_v22 = vpop.eup %7456  ;;  %3193 = vmatprep.subr.mxu0 %v12571_v61  ;;  %3264 = vmatprep.subr.mxu1 %v12572_v11 }
 0x66f   :  { %3194 = vmatpush1.msra.mxu0 %v12573_v62  ;;  %3227 = vmatprep.mubr.f32.mxu0 %v12574_v21  ;;  %v9896_v56 = vmul.f32 %v7457_v22, %v7455_v46  ;;  %v7853_v22 = vld [vmem:[#allocation6 + $0x1f0] sm:$0xff] }
 0x670   :  { %3265 = vmatpush1.msra.mxu1 %v12575_v14  ;;  %3298 = vmatprep.mubr.f32.mxu1 %v12574_v21 }
 0x671   :  { %3228 = vmatmul.mubr.f32.vlgmr.msra.gmra.mxu0 %v9896_v56  ;;  %3299 = vmatmul.mubr.f32.vlgmr.msra.gmra.mxu1 %v9896_v56 }
 0x672   :  { %3409 = vmatprep.subr.mxu0 %v12576_v53  ;;  %3480 = vmatprep.subr.mxu1 %v12577_v30  ;;  %v7852_v53 = vld [vmem:[#allocation6 + $0x1e0] sm:$0xff] }
 0x673   :  { %3410 = vmatpush1.msra.mxu0 %v9470_v19  ;;  %3481 = vmatpush1.msra.mxu1 %v9472_v1  ;;  %v12578_v19 = vld [vmem:[#allocation71_spill] sm:$0xff]  ;;  %v12579_v1 = vld [vmem:[#allocation72_spill] sm:$0xff] }
 0x674   :  { %3411 = vmatprep.subr.mxu0 %v9476_v23  ;;  %3482 = vmatprep.subr.mxu1 %v9478_v12  ;;  %v12580_v23 = vld [vmem:[#allocation30_spill] sm:$0xff]  ;;  %v12581_v12 = vld [vmem:[#allocation20_spill] sm:$0xff] }
 0x675   :  { %3412 = vmatpush1.msra.mxu0 %v9482_v6  ;;  %3483 = vmatpush1.msra.mxu1 %v9484_v0  ;;  %v7850_v6 = vld [vmem:[#allocation6 + $0x1e8] sm:$0xff]  ;;  %v7851_v0 = vld [vmem:[#allocation6 + $0x1f8] sm:$0xff] }
 0x676   :  { %3413 = vmatprep.subr.mxu0 %v9488_v45  ;;  %3484 = vmatprep.subr.mxu1 %v9490_v35  ;;  %v12582_v35 = vld [vmem:[#allocation49_spill] sm:$0xff] }
 0x677   :  { %3414 = vmatpush1.msra.mxu0 %v9494_v40  ;;  %3485 = vmatpush1.msra.mxu1 %v9496_v20  ;;  %v12583_v40 = vld [vmem:[#allocation42_spill] sm:$0xff] }
 0x678   :  { %3415 = vmatprep.subr.mxu0 %v9500_v15  ;;  %3486 = vmatprep.subr.mxu1 %v9502_v16  ;;  %v323_v20 = vadd.f32 %v12583_v40, %v12582_v35  ;;  %v12584_v15 = vld [vmem:[#allocation41_spill] sm:$0xff]  ;;  %v7862_v40 = vld [vmem:[#allocation6 + $0x188] sm:$0xff] }
 0x679   :  { %3416 = vmatpush1.msra.mxu0 %v9506_v2  ;;  %3487 = vmatpush1.msra.mxu1 %v9508_v10 }
 0x67a   :  { %3417 = vmatprep.subr.mxu0 %v9512_v59  ;;  %3488 = vmatprep.subr.mxu1 %v9514_v58 }
 0x67b   :  { %3418 = vmatpush1.msra.mxu0 %v9518_v4  ;;  %3489 = vmatpush1.msra.mxu1 %v9520_v52  ;;  %v12585_v52 = vld [vmem:[#allocation91_spill] sm:$0xff] }
 0x67c   :  { %3419 = vmatprep.subr.mxu0 %v9524_v26  ;;  %3490 = vmatprep.subr.mxu1 %v9526_v27 }
 0x67d   :  { %3420 = vmatpush1.msra.mxu0 %v9530_v29  ;;  %3491 = vmatpush1.msra.mxu1 %v9532_v31  ;;  %v12586_v31 = vld [vmem:[#allocation92_spill] sm:$0xff] }
 0x67e   :  { %3421 = vmatprep.subr.mxu0 %v9536_v32  ;;  %3492 = vmatprep.subr.mxu1 %v9538_v33 }
 0x67f   :  { %3422 = vmatpush1.msra.mxu0 %v9542_v34  ;;  %3493 = vmatpush1.msra.mxu1 %v9544_v36 }
 0x680   :  { %3423 = vmatprep.subr.mxu0 %v9548_v37  ;;  %3494 = vmatprep.subr.mxu1 %v9550_v38 }
 0x681   :  { %3424 = vmatpush1.msra.mxu0 %v9554_v39  ;;  %3495 = vmatpush1.msra.mxu1 %v9556_v41 }
 0x682   :  { %3425 = vmatprep.subr.mxu0 %v9560_v50  ;;  %3496 = vmatprep.subr.mxu1 %v9562_v49  ;;  %v12587_v49 = vld [vmem:[#allocation44_spill] sm:$0xff] }
 0x683   :  { %3426 = vmatpush1.msra.mxu0 %v9566_v54  ;;  %3497 = vmatpush1.msra.mxu1 %v9568_v48  ;;  %v329_v54 = vadd.f32 %v12587_v49, %v12582_v35  ;;  %v12588_v48 = vld [vmem:[#allocation43_spill] sm:$0xff]  ;;  %v7877_v49 = vld [vmem:[#allocation6 + $0x130] sm:$0xff] }
 0x684   :  { %3427 = vmatprep.subr.mxu0 %v9572_v43  ;;  %3498 = vmatprep.subr.mxu1 %v9574_v47 }
 0x685   :  { %3428 = vmatpush1.msra.mxu0 %v9578_v42  ;;  %3499 = vmatpush1.msra.mxu1 %v9580_v51 }
 0x686   :  { %3429 = vmatprep.subr.mxu0 %v9584_v57  ;;  %3500 = vmatprep.subr.mxu1 %v9586_v60 }
 0x687   :  { %3430 = vmatpush1.msra.mxu0 %v9590_v55  ;;  %3501 = vmatpush1.msra.mxu1 %v9592_v5  ;;  %v12589_v5 = vld [vmem:[#allocation37_spill] sm:$0xff] }
 0x688   :  { %3431 = vmatprep.subr.mxu0 %v9596_v8  ;;  %3502 = vmatprep.subr.mxu1 %v12517_v28 }
 0x689   :  { %3432 = vmatpush1.msra.mxu0 %v12557_v63  ;;  %3503 = vmatpush1.msra.mxu1 %v12558_v25  ;;  %v12590_v63 = vld [vmem:[#allocation93_spill] sm:$0xff] }
 0x68a   :  { %3433 = vmatprep.subr.mxu0 %v12559_v13  ;;  %3504 = vmatprep.subr.mxu1 %v12560_v18 }
 0x68b   :  { %3434 = vmatpush1.msra.mxu0 %v12561_v9  ;;  %3505 = vmatpush1.msra.mxu1 %v12562_v3  ;;  %v12591_v9 = vld [vmem:[#allocation94_spill] sm:$0xff] }
 0x68c   :  { %3435 = vmatprep.subr.mxu0 %v12563_v24  ;;  %3506 = vmatprep.subr.mxu1 %v12564_v44 }
 0x68d   :  { %3436 = vmatpush1.msra.mxu0 %v12578_v19  ;;  %3507 = vmatpush1.msra.mxu1 %v12579_v1  ;;  %v7855_v19 = vld [vmem:[#allocation6 + $0x1d8] sm:$0xff]  ;;  %v7856_v1 = vld [vmem:[#allocation6 + $0x1c0] sm:$0xff] }
 0x68e   :  { %3437 = vmatprep.subr.mxu0 %v12567_v7  ;;  %3508 = vmatprep.subr.mxu1 %v12568_v17 }
 0x68f   :  { %3438 = vmatpush1.msra.mxu0 %v12580_v23  ;;  %3509 = vmatpush1.msra.mxu1 %v12581_v12  ;;  %v7857_v23 = vld [vmem:[#allocation6 + $0x1d0] sm:$0xff]  ;;  %v7858_v12 = vld [vmem:[#allocation6 + $0x1a8] sm:$0xff] }
 0x690   :  { %3439 = vmatprep.subr.mxu0 %v12571_v61  ;;  %3510 = vmatprep.subr.mxu1 %v12572_v11  ;;  %v7854_v61 = vld [vmem:[#allocation6 + $0x1c8] sm:$0xff] }
 0x691   :  { %3440 = vmatpush1.msra.mxu0 %v12573_v62  ;;  %3511 = vmatpush1.msra.mxu1 %v12575_v14 }
 0x692   :  { %3473 = vmatprep.mubr.f32.mxu0 %v12574_v21  ;;  %3544 = vmatprep.mubr.f32.mxu1 %v12574_v21 }
 0x693   :  { %3579 = vmatprep.subr.mxu0 %v7850_v6  ;;  %3650 = vmatprep.subr.mxu1 %v7851_v0  ;;  %v7859_v6 = vld [vmem:[#allocation6 + $0x1b8] sm:$0xff]  ;;  %v7860_v0 = vld [vmem:[#allocation6 + $0x1a0] sm:$0xff] }
 0x710   :  { %v3059_v45 = vpop.f32.mrf.mxu0  ;;  %v3130_v4 = vpop.f32.mrf.mxu1 }
 0x711   :  { %v3135_v16 = vadd.f32 %v3059_v45, %v12584_v15  ;;  %v3137_v26 = vadd.f32 %v3130_v4, %v12585_v52  ;;  %v7861_v45 = vld [vmem:[#allocation6 + $0x1b0] sm:$0xff]  ;;  %v7864_v15 = vld [vmem:[#allocation6 + $0x180] sm:$0xff] }
 0x712   :  { %v3061_v2 = vpop.f32.mrf.mxu0  ;;  %v3132_v27 = vpop.f32.mrf.mxu1  ;;  %v7868_v4 = vld [vmem:[#allocation6 + $0x160] sm:$0xff]  ;;  %v7869_v52 = vld [vmem:[#allocation6 + $0x170] sm:$0xff] }
 0x713   :  { %v7141_v10 = vmul.f32 -1.442695, %v3135_v16  ;;  %v3136_v59 = vadd.f32 %v3061_v2, %v323_v20  ;;  %v7143_v29 = vmul.f32 -1.442695, %v3137_v26  ;;  %v3138_v32 = vadd.f32 %v3132_v27, %v12586_v31  ;;  %v7863_v20 = vld [vmem:[#allocation6 + $0x198] sm:$0xff]  ;;  %v7865_v16 = vld [vmem:[#allocation6 + $0x190] sm:$0xff] }
 0x714   :  { %v7870_v27 = vld [vmem:[#allocation6 + $0x148] sm:$0xff] }
 0x715   :  { %7458 = vpow2.f32 %v7141_v10  ;;  %v7142_v58 = vmul.f32 -1.442695, %v3136_v59  ;;  %v7866_v10 = vld [vmem:[#allocation6 + $0x168] sm:$0xff]  ;;  %v7867_v59 = vld [vmem:[#allocation6 + $0x178] sm:$0xff] }
 0x717   :  { %7460 = vpow2.f32 %v7142_v58 }
 0x718   :  { %7462 = vpow2.f32 %v7143_v29  ;;  %v7871_v29 = vld [vmem:[#allocation6 + $0x158] sm:$0xff] }
 0x719   :  { %7464 = vtanh.f32 %v3138_v32  ;;  %v7872_v32 = vld [vmem:[#allocation6 + $0x140] sm:$0xff] }
 0x722   :  { %v7459_v33 = vpop.eup %7458 }
 0x723   :  { %v3148_v34 = vadd.f32 1.0, %v7459_v33  ;;  %v7873_v33 = vld [vmem:[#allocation6 + $0x150] sm:$0xff] }
 0x724   :  { %v7461_v36 = vpop.eup %7460 }
 0x725   :  { %7466 = vrcp.f32 %v3148_v34  ;;  %v3149_v37 = vadd.f32 1.0, %v7461_v36  ;;  %v7463_v38 = vpop.eup %7462 }
 0x726   :  { %v7465_v39 = vpop.eup %7464  ;;  %v3150_v47 = vadd.f32 1.0, %v7463_v38  ;;  %v7875_v38 = vld [vmem:[#allocation6 + $0x138] sm:$0xff] }
 0x727   :  { %7468 = vrcp.f32 %v3149_v37  ;;  %v7874_v37 = vld [vmem:[#allocation6 + $0x128] sm:$0xff] }
 0x731   :  { %v3229_v41 = vpop.f32.mrf.mxu0  ;;  %v3300_v62 = vpop.f32.mrf.mxu1 }
 0x732   :  { %v7467_v50 = vpop.eup %7466  ;;  %v3305_v43 = vadd.f32 %v3229_v41, %v12588_v48  ;;  %v3307_v25 = vadd.f32 %v3300_v62, %v12590_v63  ;;  %v7879_v48 = vld [vmem:[#allocation6 + $0x118] sm:$0xff]  ;;  %v7889_v62 = vld [vmem:[#allocation6 + $0xd0] sm:$0xff]  ;;  %v7890_v63 = vld [vmem:[#allocation6 + $0xa8] sm:$0xff] }
 0x733   :  { %v3159_v42 = vmul.f32 %v7467_v50, %v7465_v39  ;;  %v3231_v51 = vpop.f32.mrf.mxu0  ;;  %v3302_v13 = vpop.f32.mrf.mxu1  ;;  %v12592_v39 = vld [vmem:[#allocation38_spill] sm:$0xff] }
 0x734   :  { %v7469_v57 = vpop.eup %7468  ;;  %v7144_v60 = vmul.f32 -1.442695, %v3305_v43  ;;  %v3306_v55 = vadd.f32 %v3231_v51, %v329_v54  ;;  %v7146_v18 = vmul.f32 -1.442695, %v3307_v25  ;;  %v3308_v3 = vadd.f32 %v3302_v13, %v12591_v9  ;;  %v7876_v50 = vld [vmem:[#allocation6 + $0x120] sm:$0xff]  ;;  %v7878_v54 = vld [vmem:[#allocation6 + $0x108] sm:$0xff] }
 0x735   :  { %v3158_v8 = vmul.f32 %v7469_v57, %v12589_v5  ;;  %v7882_v51 = vld [vmem:[#allocation6 + $0xe8] sm:$0xff]  ;;  %v7883_v57 = vld [vmem:[#allocation6 + $0xf8] sm:$0xff]  ;;  %v7892_v13 = vld [vmem:[#allocation6 + $0xa0] sm:$0xff] }
 0x736   :  { %7470 = vpow2.f32 %v7144_v60  ;;  %v7145_v28 = vmul.f32 -1.442695, %v3306_v55  ;;  %v7884_v60 = vld [vmem:[#allocation6 + $0xe0] sm:$0xff]  ;;  %v7885_v55 = vld [vmem:[#allocation6 + $0xf0] sm:$0xff]  ;;  %v7886_v5 = vld [vmem:[#allocation6 + $0xc8] sm:$0xff] }
 0x737   :  { %7472 = vrcp.f32 %v3150_v47  ;;  %v9977_v11 = vadd.f32 %v3159_v42, %v3158_v8  ;;  %v7880_v47 = vld [vmem:[#allocation6 + $0x100] sm:$0xff]  ;;  %v7881_v42 = vld [vmem:[#allocation6 + $0x110] sm:$0xff]  ;;  %v7887_v8 = vld [vmem:[#allocation6 + $0xd8] sm:$0xff] }
 0x738   :  { %7474 = vpow2.f32 %v7145_v28  ;;  %v7888_v28 = vld [vmem:[#allocation6 + $0xc0] sm:$0xff]  ;;  %v7891_v25 = vld [vmem:[#allocation6 + $0xb8] sm:$0xff]  ;;  %v7894_v9 = vld [vmem:[#allocation6 + $0x88] sm:$0xff] }
 0x739   :  { %7476 = vtanh.f32 %v9977_v11 }
 0x73a   :  { %7478 = vpow2.f32 %v7146_v18  ;;  %v7893_v18 = vld [vmem:[#allocation6 + $0xb0] sm:$0xff] }
 0x73b   :  { %7480 = vtanh.f32 %v3308_v3  ;;  %v7895_v3 = vld [vmem:[#allocation6 + $0x98] sm:$0xff] }
 0x743   :  { %v7471_v24 = vpop.eup %7470 }
 0x744   :  { %v7473_v44 = vpop.eup %7472  ;;  %v3318_v14 = vadd.f32 1.0, %v7471_v24  ;;  %v7896_v24 = vld [vmem:[#allocation6 + $0x80] sm:$0xff] }
 0x745   :  { %v7475_v7 = vpop.eup %7474 }
 0x746   :  { %v7477_v17 = vpop.eup %7476  ;;  %7482 = vrcp.f32 %v3318_v14  ;;  %v3319_v46 = vadd.f32 1.0, %v7475_v7  ;;  %v7898_v14 = vld [vmem:[#allocation6 + $0x68] sm:$0xff]  ;;  %v7899_v7 = vld [vmem:[#allocation6 + $0x78] sm:$0xff] }
 0x747   :  { %v9982_v30 = vmul.f32 %v7477_v17, %v7473_v44  ;;  %v7479_v2 = vpop.eup %7478  ;;  %v7897_v44 = vld [vmem:[#allocation6 + $0x90] sm:$0xff]  ;;  %v7900_v17 = vld [vmem:[#allocation6 + $0x60] sm:$0xff] }
 0x748   :  { %7484 = vrcp.f32 %v3319_v46  ;;  %v7481_v58 = vpop.eup %7480  ;;  %v3320_v36 = vadd.f32 1.0, %v7479_v2  ;;  %v7901_v46 = vld [vmem:[#allocation6 + $0x70] sm:$0xff]  ;;  %v3829_v2 = vld [vmem:[#allocation8 + $0x1e8] sm:$0xff] }
 0x749   :  { %3474 = vmatmul.mubr.f32.vlgmr.msra.gmra.mxu0 %v9982_v30  ;;  %3545 = vmatmul.mubr.f32.vlgmr.msra.gmra.mxu1 %v9982_v30 }
 0x74a   :  { %3580 = vmatpush1.msra.mxu0 %v7852_v53  ;;  %3651 = vmatpush1.msra.mxu1 %v7853_v22  ;;  %7486 = vrcp.f32 %v3320_v36  ;;  %v7902_v53 = vld [vmem:[#allocation6 + $0x48] sm:$0xff]  ;;  %v7903_v22 = vld [vmem:[#allocation6 + $0x58] sm:$0xff] }
 0x74b   :  { %3581 = vmatprep.subr.mxu0 %v7854_v61  ;;  %3652 = vmatprep.subr.mxu1 %v7855_v19  ;;  %v7904_v61 = vld [vmem:[#allocation6 + $0x40] sm:$0xff]  ;;  %v7905_v19 = vld [vmem:[#allocation6 + $0x50] sm:$0xff]  ;;  %v3817_v36 = vld [vmem:[#allocation8 + $0x188] sm:$0xff] }
 0x74c   :  { %3582 = vmatpush1.msra.mxu0 %v7856_v1  ;;  %3653 = vmatpush1.msra.mxu1 %v7857_v23  ;;  %v7906_v1 = vld [vmem:[#allocation6 + $0x28] sm:$0xff]  ;;  %v7907_v23 = vld [vmem:[#allocation6 + $0x38] sm:$0xff] }
 0x74d   :  { %3583 = vmatprep.subr.mxu0 %v7858_v12  ;;  %3654 = vmatprep.subr.mxu1 %v7859_v6  ;;  %v7908_v6 = vld [vmem:[#allocation6 + $0x20] sm:$0xff] }
 0x74e   :  { %3584 = vmatpush1.msra.mxu0 %v7860_v0  ;;  %3655 = vmatpush1.msra.mxu1 %v7861_v45  ;;  %v7909_v0 = vld [vmem:[#allocation6 + $0x30] sm:$0xff] }
 0x74f   :  { %3585 = vmatprep.subr.mxu0 %v7862_v40  ;;  %3656 = vmatprep.subr.mxu1 %v7863_v20  ;;  %v7910_v40 = vld [vmem:[#allocation6 + $0x8] sm:$0xff]  ;;  %v7911_v20 = vld [vmem:[#allocation6 + $0x18] sm:$0xff] }
 0x750   :  { %3586 = vmatpush1.msra.mxu0 %v7864_v15  ;;  %3657 = vmatpush1.msra.mxu1 %v7865_v16  ;;  %v7912_v15 = vld [vmem:[#allocation6] sm:$0xff] }
 0x751   :  { %3587 = vmatprep.subr.mxu0 %v7866_v10  ;;  %3658 = vmatprep.subr.mxu1 %v7867_v59  ;;  %v3831_v10 = vld [vmem:[#allocation8 + $0x1f8] sm:$0xff]  ;;  %v7913_v59 = vld [vmem:[#allocation6 + $0x10] sm:$0xff] }
 0x752   :  { %3588 = vmatpush1.msra.mxu0 %v7868_v4  ;;  %3659 = vmatpush1.msra.mxu1 %v7869_v52  ;;  %v3830_v4 = vld [vmem:[#allocation8 + $0x1f0] sm:$0xff]  ;;  %v3825_v52 = vld [vmem:[#allocation8 + $0x1c8] sm:$0xff] }
 0x753   :  { %v7483_v26 = vpop.eup %7482  ;;  %3589 = vmatprep.subr.mxu0 %v7870_v27  ;;  %3660 = vmatprep.subr.mxu1 %v7871_v29  ;;  %v3824_v27 = vld [vmem:[#allocation8 + $0x1c0] sm:$0xff]  ;;  %v3826_v29 = vld [vmem:[#allocation8 + $0x1d0] sm:$0xff] }
 0x754   :  { %v3329_v31 = vmul.f32 %v7483_v26, %v7481_v58  ;;  %3590 = vmatpush1.msra.mxu0 %v7872_v32  ;;  %3661 = vmatpush1.msra.mxu1 %v7873_v33  ;;  %v3828_v58 = vld [vmem:[#allocation8 + $0x1e0] sm:$0xff]  ;;  %v3827_v26 = vld [vmem:[#allocation8 + $0x1d8] sm:$0xff] }
 0x755   :  { %v7485_v34 = vpop.eup %7484  ;;  %3591 = vmatprep.subr.mxu0 %v7874_v37  ;;  %3662 = vmatprep.subr.mxu1 %v7875_v38  ;;  %v3823_v32 = vld [vmem:[#allocation8 + $0x1b8] sm:$0xff]  ;;  %v3820_v33 = vld [vmem:[#allocation8 + $0x1a0] sm:$0xff] }
 0x756   :  { %v3328_v41 = vmul.f32 %v7485_v34, %v12592_v39  ;;  %3592 = vmatpush1.msra.mxu0 %v7876_v50  ;;  %3663 = vmatpush1.msra.mxu1 %v7877_v49  ;;  %v3822_v34 = vld [vmem:[#allocation8 + $0x1b0] sm:$0xff]  ;;  %v3819_v37 = vld [vmem:[#allocation8 + $0x198] sm:$0xff]  ;;  %v3816_v38 = vld [vmem:[#allocation8 + $0x180] sm:$0xff] }
 0x757   :  { %3593 = vmatprep.subr.mxu0 %v7878_v54  ;;  %3664 = vmatprep.subr.mxu1 %v7879_v48  ;;  %v7487_v12 = vpop.eup %7486  ;;  %v3818_v39 = vld [vmem:[#allocation8 + $0x190] sm:$0xff]  ;;  %v3815_v50 = vld [vmem:[#allocation8 + $0x178] sm:$0xff]  ;;  %v3812_v49 = vld [vmem:[#allocation8 + $0x160] sm:$0xff] }
 0x758   :  { %v9987_v43 = vadd.f32 %v3329_v31, %v3328_v41  ;;  %3594 = vmatpush1.msra.mxu0 %v7880_v47  ;;  %3665 = vmatpush1.msra.mxu1 %v7881_v42  ;;  %v3821_v31 = vld [vmem:[#allocation8 + $0x1a8] sm:$0xff]  ;;  %v3814_v54 = vld [vmem:[#allocation8 + $0x170] sm:$0xff]  ;;  %v3811_v47 = vld [vmem:[#allocation8 + $0x158] sm:$0xff] }
 0x759   :  { %3595 = vmatprep.subr.mxu0 %v7882_v51  ;;  %3666 = vmatprep.subr.mxu1 %v7883_v57  ;;  %v3813_v41 = vld [vmem:[#allocation8 + $0x168] sm:$0xff]  ;;  %v3808_v42 = vld [vmem:[#allocation8 + $0x140] sm:$0xff]  ;;  %v3810_v51 = vld [vmem:[#allocation8 + $0x150] sm:$0xff] }
 0x75a   :  { %7488 = vtanh.f32 %v9987_v43  ;;  %3596 = vmatpush1.msra.mxu0 %v7884_v60  ;;  %3667 = vmatpush1.msra.mxu1 %v7885_v55  ;;  %v3809_v48 = vld [vmem:[#allocation8 + $0x148] sm:$0xff]  ;;  %v3807_v60 = vld [vmem:[#allocation8 + $0x138] sm:$0xff]  ;;  %v3804_v55 = vld [vmem:[#allocation8 + $0x120] sm:$0xff] }
 0x75b   :  { %3597 = vmatprep.subr.mxu0 %v7886_v5  ;;  %3668 = vmatprep.subr.mxu1 %v7887_v8  ;;  %v3805_v57 = vld [vmem:[#allocation8 + $0x128] sm:$0xff]  ;;  %v3806_v5 = vld [vmem:[#allocation8 + $0x130] sm:$0xff] }
 0x75c   :  { %3598 = vmatpush1.msra.mxu0 %v7888_v28  ;;  %3669 = vmatpush1.msra.mxu1 %v7889_v62  ;;  %v3801_v8 = vld [vmem:[#allocation8 + $0x108] sm:$0xff]  ;;  %v3803_v28 = vld [vmem:[#allocation8 + $0x118] sm:$0xff]  ;;  %v3800_v62 = vld [vmem:[#allocation8 + $0x100] sm:$0xff] }
 0x75d   :  { %3599 = vmatprep.subr.mxu0 %v7890_v63  ;;  %3670 = vmatprep.subr.mxu1 %v7891_v25  ;;  %v3802_v63 = vld [vmem:[#allocation8 + $0x110] sm:$0xff]  ;;  %v3797_v25 = vld [vmem:[#allocation8 + $0xe8] sm:$0xff] }
 0x75e   :  { %3600 = vmatpush1.msra.mxu0 %v7892_v13  ;;  %3671 = vmatpush1.msra.mxu1 %v7893_v18  ;;  %v3799_v13 = vld [vmem:[#allocation8 + $0xf8] sm:$0xff]  ;;  %v3796_v18 = vld [vmem:[#allocation8 + $0xe0] sm:$0xff] }
 0x75f   :  { %3601 = vmatprep.subr.mxu0 %v7894_v9  ;;  %3672 = vmatprep.subr.mxu1 %v7895_v3  ;;  %v3798_v9 = vld [vmem:[#allocation8 + $0xf0] sm:$0xff]  ;;  %v3793_v3 = vld [vmem:[#allocation8 + $0xc8] sm:$0xff] }
 0x760   :  { %3602 = vmatpush1.msra.mxu0 %v7896_v24  ;;  %3673 = vmatpush1.msra.mxu1 %v7897_v44  ;;  %v3795_v24 = vld [vmem:[#allocation8 + $0xd8] sm:$0xff]  ;;  %v3792_v44 = vld [vmem:[#allocation8 + $0xc0] sm:$0xff] }
 0x761   :  { %3603 = vmatprep.subr.mxu0 %v7898_v14  ;;  %3674 = vmatprep.subr.mxu1 %v7899_v7  ;;  %v3794_v14 = vld [vmem:[#allocation8 + $0xd0] sm:$0xff]  ;;  %v3789_v7 = vld [vmem:[#allocation8 + $0xa8] sm:$0xff] }
 0x762   :  { %3604 = vmatpush1.msra.mxu0 %v7900_v17  ;;  %3675 = vmatpush1.msra.mxu1 %v7901_v46  ;;  %v3791_v17 = vld [vmem:[#allocation8 + $0xb8] sm:$0xff]  ;;  %v3788_v46 = vld [vmem:[#allocation8 + $0xa0] sm:$0xff] }
 0x763   :  { %3605 = vmatprep.subr.mxu0 %v7902_v53  ;;  %3676 = vmatprep.subr.mxu1 %v7903_v22  ;;  %v3790_v53 = vld [vmem:[#allocation8 + $0xb0] sm:$0xff]  ;;  %v3785_v22 = vld [vmem:[#allocation8 + $0x88] sm:$0xff] }
 0x764   :  { %3606 = vmatpush1.msra.mxu0 %v7904_v61  ;;  %3677 = vmatpush1.msra.mxu1 %v7905_v19  ;;  %v3787_v61 = vld [vmem:[#allocation8 + $0x98] sm:$0xff]  ;;  %v3784_v19 = vld [vmem:[#allocation8 + $0x80] sm:$0xff] }
 0x765   :  { %3607 = vmatprep.subr.mxu0 %v7906_v1  ;;  %3678 = vmatprep.subr.mxu1 %v7907_v23  ;;  %v3786_v1 = vld [vmem:[#allocation8 + $0x90] sm:$0xff]  ;;  %v3781_v23 = vld [vmem:[#allocation8 + $0x68] sm:$0xff] }
 0x766   :  { %3608 = vmatpush1.msra.mxu0 %v7908_v6  ;;  %3679 = vmatpush1.msra.mxu1 %v7909_v0  ;;  %v3780_v6 = vld [vmem:[#allocation8 + $0x60] sm:$0xff]  ;;  %v3782_v0 = vld [vmem:[#allocation8 + $0x70] sm:$0xff] }
 0x767   :  { %v7489_v45 = vpop.eup %7488  ;;  %3609 = vmatprep.subr.mxu0 %v7910_v40  ;;  %3680 = vmatprep.subr.mxu1 %v7911_v20  ;;  %v3779_v40 = vld [vmem:[#allocation8 + $0x58] sm:$0xff]  ;;  %v3776_v20 = vld [vmem:[#allocation8 + $0x40] sm:$0xff] }
 0x768   :  { %3610 = vmatpush1.msra.mxu0 %v7912_v15  ;;  %3643 = vmatprep.mubr.f32.mxu0 %v12574_v21  ;;  %v9991_v16 = vmul.f32 %v7489_v45, %v7487_v12  ;;  %v3783_v12 = vld [vmem:[#allocation8 + $0x78] sm:$0xff]  ;;  %v3777_v45 = vld [vmem:[#allocation8 + $0x48] sm:$0xff]  ;;  %v3778_v15 = vld [vmem:[#allocation8 + $0x50] sm:$0xff] }
 0x769   :  { %3681 = vmatpush1.msra.mxu1 %v7913_v59  ;;  %3714 = vmatprep.mubr.f32.mxu1 %v12574_v21  ;;  %v3772_v59 = vld [vmem:[#allocation8 + $0x20] sm:$0xff] }
 0x76a   :  { %3644 = vmatmul.mubr.f32.vlgmr.msra.gmra.mxu0 %v9991_v16  ;;  %3715 = vmatmul.mubr.f32.vlgmr.msra.gmra.mxu1 %v9991_v16 }
 0x76b   :  { %3854 = vmatprep.subr.mxu0 %v3829_v2  ;;  %4015 = vmatprep.subr.mxu1 %v3831_v10  ;;  %v3773_v2 = vld [vmem:[#allocation8 + $0x28] sm:$0xff]  ;;  %v3775_v10 = vld [vmem:[#allocation8 + $0x38] sm:$0xff] }
 0x76c   :  { %3855 = vmatpush1.msra.mxu0 %v3828_v58  ;;  %4016 = vmatpush1.msra.mxu1 %v3830_v4  ;;  %v3774_v58 = vld [vmem:[#allocation8 + $0x30] sm:$0xff]  ;;  %v3769_v4 = vld [vmem:[#allocation8 + $0x8] sm:$0xff] }
 0x76d   :  { %3856 = vmatprep.subr.mxu0 %v3825_v52  ;;  %4017 = vmatprep.subr.mxu1 %v3827_v26  ;;  %v3771_v52 = vld [vmem:[#allocation8 + $0x18] sm:$0xff]  ;;  %v3768_v26 = vld [vmem:[#allocation8] sm:$0xff] }
 0x76e   :  { %3857 = vmatpush1.msra.mxu0 %v3824_v27  ;;  %4018 = vmatpush1.msra.mxu1 %v3826_v29  ;;  %v3770_v27 = vld [vmem:[#allocation8 + $0x10] sm:$0xff]  ;;  %v12593_v29 = vld [vmem:[#allocation99_spill] sm:$0xff] }
 0x76f   :  { %3858 = vmatprep.subr.mxu0 %v3821_v31  ;;  %4019 = vmatprep.subr.mxu1 %v3823_v32  ;;  %v12594_v31 = vld [vmem:[#allocation14_spill] sm:$0xff]  ;;  %v12595_v32 = vld [vmem:[#allocation39_spill] sm:$0xff] }
 0x770   :  { %3859 = vmatpush1.msra.mxu0 %v3820_v33  ;;  %4020 = vmatpush1.msra.mxu1 %v3822_v34  ;;  %v12596_v33 = vld [vmem:[#allocation45_spill] sm:$0xff]  ;;  %v12597_v34 = vld [vmem:[#allocation60_spill] sm:$0xff] }
 0x771   :  { %3860 = vmatprep.subr.mxu0 %v3817_v36  ;;  %4021 = vmatprep.subr.mxu1 %v3819_v37  ;;  %v12598_v36 = vld [vmem:[#allocation53_spill] sm:$0xff]  ;;  %v12599_v37 = vld [vmem:[#allocation63_spill] sm:$0xff] }
 0x772   :  { %3861 = vmatpush1.msra.mxu0 %v3816_v38  ;;  %4022 = vmatpush1.msra.mxu1 %v3818_v39  ;;  %v12600_v38 = vld [vmem:[#allocation64_spill] sm:$0xff] }
 0x773   :  { %3862 = vmatprep.subr.mxu0 %v3813_v41  ;;  %4023 = vmatprep.subr.mxu1 %v3815_v50  ;;  %v12601_v39 = vld [vmem:[#allocation24_spill] sm:$0xff]  ;;  %v12602_v41 = vld [vmem:[#allocation26_spill] sm:$0xff]  ;;  %v10038_v50 = vld [vmem:[#allocation9 + $0x1e8] sm:$0xff] }
 0x774   :  { %3863 = vmatpush1.msra.mxu0 %v3812_v49  ;;  %4024 = vmatpush1.msra.mxu1 %v3814_v54  ;;  %12603 = vst [vmem:[#allocation15_spill] sm:$0xff] %v10038_v50  ;;  %v10041_v49 = vld [vmem:[#allocation9 + $0x1e0] sm:$0xff]  ;;  %v12604_v54 = vld [vmem:[#allocation27_spill] sm:$0xff] }
 0x775   :  { %3864 = vmatprep.subr.mxu0 %v3809_v48  ;;  %4025 = vmatprep.subr.mxu1 %v3811_v47  ;;  %v10058_v48 = vld [vmem:[#allocation9 + $0x1c8] sm:$0xff]  ;;  %v10069_v47 = vld [vmem:[#allocation9 + $0x1d8] sm:$0xff] }
 0x776   :  { %3865 = vmatpush1.msra.mxu0 %v3808_v42  ;;  %4026 = vmatpush1.msra.mxu1 %v3810_v51  ;;  %v10071_v42 = vld [vmem:[#allocation9 + $0x1c0] sm:$0xff]  ;;  %v10077_v51 = vld [vmem:[#allocation9 + $0x1a8] sm:$0xff] }
 0x777   :  { %3866 = vmatprep.subr.mxu0 %v3805_v57  ;;  %4027 = vmatprep.subr.mxu1 %v3807_v60  ;;  %v10080_v57 = vld [vmem:[#allocation9 + $0x1b8] sm:$0xff]  ;;  %v10083_v60 = vld [vmem:[#allocation9 + $0x1a0] sm:$0xff] }
 0x778   :  { %3867 = vmatpush1.msra.mxu0 %v3804_v55  ;;  %4028 = vmatpush1.msra.mxu1 %v3806_v5  ;;  %v10086_v55 = vld [vmem:[#allocation9 + $0x1b0] sm:$0xff]  ;;  %v10089_v5 = vld [vmem:[#allocation9 + $0x188] sm:$0xff] }
 0x779   :  { %3868 = vmatprep.subr.mxu0 %v3801_v8  ;;  %4029 = vmatprep.subr.mxu1 %v3803_v28  ;;  %v10092_v8 = vld [vmem:[#allocation9 + $0x198] sm:$0xff]  ;;  %v10095_v28 = vld [vmem:[#allocation9 + $0x180] sm:$0xff] }
 0x77a   :  { %3869 = vmatpush1.msra.mxu0 %v3800_v62  ;;  %4030 = vmatpush1.msra.mxu1 %v3802_v63  ;;  %v10098_v62 = vld [vmem:[#allocation9 + $0x190] sm:$0xff]  ;;  %v10101_v63 = vld [vmem:[#allocation9 + $0x168] sm:$0xff] }
 0x77b   :  { %3870 = vmatprep.subr.mxu0 %v3797_v25  ;;  %4031 = vmatprep.subr.mxu1 %v3799_v13  ;;  %v10104_v25 = vld [vmem:[#allocation9 + $0x178] sm:$0xff]  ;;  %v10107_v13 = vld [vmem:[#allocation9 + $0x160] sm:$0xff] }
 0x77c   :  { %3871 = vmatpush1.msra.mxu0 %v3796_v18  ;;  %4032 = vmatpush1.msra.mxu1 %v3798_v9  ;;  %v10109_v18 = vld [vmem:[#allocation9 + $0x148] sm:$0xff]  ;;  %v10111_v9 = vld [vmem:[#allocation9 + $0x140] sm:$0xff] }
 0x77d   :  { %3872 = vmatprep.subr.mxu0 %v3793_v3  ;;  %4033 = vmatprep.subr.mxu1 %v3795_v24  ;;  %v10115_v3 = vld [vmem:[#allocation9 + $0x128] sm:$0xff]  ;;  %v10118_v24 = vld [vmem:[#allocation9 + $0x120] sm:$0xff] }
 0x77e   :  { %3873 = vmatpush1.msra.mxu0 %v3792_v44  ;;  %4034 = vmatpush1.msra.mxu1 %v3794_v14  ;;  %v10121_v44 = vld [vmem:[#allocation9 + $0x108] sm:$0xff]  ;;  %v10123_v14 = vld [vmem:[#allocation9 + $0x170] sm:$0xff] }
 0x77f   :  { %3874 = vmatprep.subr.mxu0 %v3789_v7  ;;  %4035 = vmatprep.subr.mxu1 %v3791_v17  ;;  %v10126_v7 = vld [vmem:[#allocation9 + $0x100] sm:$0xff]  ;;  %v10129_v17 = vld [vmem:[#allocation9 + $0x158] sm:$0xff] }
 0x780   :  { %3875 = vmatpush1.msra.mxu0 %v3788_v46  ;;  %4036 = vmatpush1.msra.mxu1 %v3790_v53  ;;  %v10131_v46 = vld [vmem:[#allocation9 + $0x150] sm:$0xff]  ;;  %v10134_v53 = vld [vmem:[#allocation9 + $0xe8] sm:$0xff] }
 0x781   :  { %3876 = vmatprep.subr.mxu0 %v3785_v22  ;;  %4037 = vmatprep.subr.mxu1 %v3787_v61  ;;  %v10137_v22 = vld [vmem:[#allocation9 + $0x138] sm:$0xff]  ;;  %v10139_v61 = vld [vmem:[#allocation9 + $0x130] sm:$0xff] }
 0x782   :  { %3877 = vmatpush1.msra.mxu0 %v3784_v19  ;;  %4038 = vmatpush1.msra.mxu1 %v3786_v1  ;;  %v10142_v19 = vld [vmem:[#allocation9 + $0xe0] sm:$0xff]  ;;  %v10145_v1 = vld [vmem:[#allocation9 + $0x118] sm:$0xff] }
 0x783   :  { %3878 = vmatprep.subr.mxu0 %v3781_v23  ;;  %4039 = vmatprep.subr.mxu1 %v3783_v12  ;;  %v10148_v23 = vld [vmem:[#allocation9 + $0xc8] sm:$0xff]  ;;  %v10151_v12 = vld [vmem:[#allocation9 + $0x110] sm:$0xff] }
 0x784   :  { %3879 = vmatpush1.msra.mxu0 %v3780_v6  ;;  %4040 = vmatpush1.msra.mxu1 %v3782_v0  ;;  %v10154_v6 = vld [vmem:[#allocation9 + $0xc0] sm:$0xff]  ;;  %v10157_v0 = vld [vmem:[#allocation9 + $0xf8] sm:$0xff] }
 0x785   :  { %3880 = vmatprep.subr.mxu0 %v3777_v45  ;;  %4041 = vmatprep.subr.mxu1 %v3779_v40  ;;  %v10160_v45 = vld [vmem:[#allocation9 + $0xa8] sm:$0xff]  ;;  %v10163_v40 = vld [vmem:[#allocation9 + $0xf0] sm:$0xff] }
 0x786   :  { %3881 = vmatpush1.msra.mxu0 %v3776_v20  ;;  %4042 = vmatpush1.msra.mxu1 %v3778_v15  ;;  %12606 = vst [vmem:[#allocation23_spill] sm:$0xff] %v10160_v45  ;;  %v10166_v20 = vld [vmem:[#allocation9 + $0xa0] sm:$0xff]  ;;  %v10169_v15 = vld [vmem:[#allocation9 + $0xd8] sm:$0xff] }
 0x787   :  { %3882 = vmatprep.subr.mxu0 %v3773_v2  ;;  %4043 = vmatprep.subr.mxu1 %v3775_v10  ;;  %12607 = vst [vmem:[#allocation34_spill] sm:$0xff] %v10166_v20  ;;  %v10172_v2 = vld [vmem:[#allocation9 + $0x88] sm:$0xff]  ;;  %v10175_v10 = vld [vmem:[#allocation9 + $0xd0] sm:$0xff] }
 0x788   :  { %3883 = vmatpush1.msra.mxu0 %v3772_v59  ;;  %4044 = vmatpush1.msra.mxu1 %v3774_v58  ;;  %12608 = vst [vmem:[#allocation25_spill] sm:$0xff] %v10172_v2  ;;  %v10178_v59 = vld [vmem:[#allocation9 + $0x80] sm:$0xff]  ;;  %v10181_v58 = vld [vmem:[#allocation9 + $0xb8] sm:$0xff] }
 0x789   :  { %3884 = vmatprep.subr.mxu0 %v3769_v4  ;;  %4045 = vmatprep.subr.mxu1 %v3771_v52  ;;  %12609 = vst [vmem:[#allocation36_spill] sm:$0xff] %v10178_v59  ;;  %12610 = vst [vmem:[#allocation58_spill] sm:$0xff] %v10181_v58  ;;  %v10184_v4 = vld [vmem:[#allocation9 + $0x68] sm:$0xff]  ;;  %v10187_v52 = vld [vmem:[#allocation9 + $0xb0] sm:$0xff] }
 0x78a   :  { %3885 = vmatpush1.msra.mxu0 %v3768_v26  ;;  %3918 = vmatprep.mubr.f32.mxu0 %v12574_v21  ;;  %12611 = vst [vmem:[#allocation61_spill] sm:$0xff] %v10184_v4  ;;  %12612 = vst [vmem:[#allocation76_spill] sm:$0xff] %v10187_v52  ;;  %v10190_v26 = vld [vmem:[#allocation9 + $0x60] sm:$0xff] }
 0x78b   :  { %4046 = vmatpush1.msra.mxu1 %v3770_v27  ;;  %4079 = vmatprep.mubr.f32.mxu1 %v12574_v21  ;;  %12613 = vst [vmem:[#allocation78_spill] sm:$0xff] %v10190_v26  ;;  %v10193_v27 = vld [vmem:[#allocation9 + $0x98] sm:$0xff] }
 0x78c   :  { %3919 = vmatmul.mubr.f32.vlgmr.msra.gmra.mxu0 %v12593_v29  ;;  %4080 = vmatmul.mubr.f32.vlgmr.msra.gmra.mxu1 %v12593_v29  ;;  %12614 = vst [vmem:[#allocation62_spill] sm:$0xff] %v10193_v27  ;;  %v10196_v29 = vld [vmem:[#allocation9 + $0x48] sm:$0xff] }
 0x78d   :  { %3924 = vmatprep.mubr.f32.mxu0 %v12574_v21  ;;  %4085 = vmatprep.mubr.f32.mxu1 %v12574_v21  ;;  %12615 = vst [vmem:[#allocation65_spill] sm:$0xff] %v10196_v29 }
 0x78e   :  { %4312 = vmatprep.subr.mxu0 %v10038_v50 }
 0x78f   :  { %4313 = vmatpush1.msra.mxu0 %v10041_v49 }
 0x790   :  { %3925 = vmatmul.mubr.f32.gmra.mxu0 %v12594_v31  ;;  %4086 = vmatmul.mubr.f32.gmra.mxu1 %v12594_v31  ;;  %v10199_v31 = vld [vmem:[#allocation9 + $0x90] sm:$0xff] }
 0x791   :  { %3930 = vmatprep.mubr.f32.mxu0 %v12574_v21  ;;  %4091 = vmatprep.mubr.f32.mxu1 %v12574_v21  ;;  %12616 = vst [vmem:[#allocation59_spill] sm:$0xff] %v10199_v31 }
 0x792   :  { %4314 = vmatprep.subr.mxu0 %v10058_v48 }
 0x793   :  { %4315 = vmatpush1.msra.mxu0 %v10071_v42 }
 0x794   :  { %3931 = vmatmul.mubr.f32.gmra.mxu0 %v12595_v32  ;;  %4092 = vmatmul.mubr.f32.gmra.mxu1 %v12595_v32  ;;  %v10202_v32 = vld [vmem:[#allocation9 + $0x40] sm:$0xff] }
 0x795   :  { %3936 = vmatprep.mubr.f32.mxu0 %v12574_v21  ;;  %4097 = vmatprep.mubr.f32.mxu1 %v12574_v21  ;;  %12617 = vst [vmem:[#allocation80_spill] sm:$0xff] %v10202_v32 }
 0x796   :  { %4316 = vmatprep.subr.mxu0 %v10077_v51 }
 0x797   :  { %4317 = vmatpush1.msra.mxu0 %v10083_v60 }
 0x798   :  { %3937 = vmatmul.mubr.f32.gmra.mxu0 %v12596_v33  ;;  %4098 = vmatmul.mubr.f32.gmra.mxu1 %v12596_v33  ;;  %v10205_v33 = vld [vmem:[#allocation9 + $0x78] sm:$0xff] }
 0x799   :  { %3942 = vmatprep.mubr.f32.mxu0 %v12574_v21  ;;  %4103 = vmatprep.mubr.f32.mxu1 %v12574_v21  ;;  %12618 = vst [vmem:[#allocation82_spill] sm:$0xff] %v10205_v33 }
 0x79a   :  { %4318 = vmatprep.subr.mxu0 %v10089_v5 }
 0x79b   :  { %4319 = vmatpush1.msra.mxu0 %v10095_v28 }
 0x79c   :  { %3943 = vmatmul.mubr.f32.gmra.mxu0 %v12597_v34  ;;  %4104 = vmatmul.mubr.f32.gmra.mxu1 %v12597_v34  ;;  %v10209_v34 = vld [vmem:[#allocation9 + $0x28] sm:$0xff] }
 0x79d   :  { %3948 = vmatprep.mubr.f32.mxu0 %v12574_v21  ;;  %4109 = vmatprep.mubr.f32.mxu1 %v12574_v21  ;;  %12619 = vst [vmem:[#allocation50_spill] sm:$0xff] %v10209_v34 }
 0x79e   :  { %4320 = vmatprep.subr.mxu0 %v10101_v63 }
 0x79f   :  { %4321 = vmatpush1.msra.mxu0 %v10107_v13 }
 0x7a0   :  { %3949 = vmatmul.mubr.f32.gmra.mxu0 %v12598_v36  ;;  %4110 = vmatmul.mubr.f32.gmra.mxu1 %v12598_v36  ;;  %v10211_v36 = vld [vmem:[#allocation9 + $0x70] sm:$0xff] }
 0x7a1   :  { %3954 = vmatprep.mubr.f32.mxu0 %v12574_v21  ;;  %4115 = vmatprep.mubr.f32.mxu1 %v12574_v21  ;;  %12620 = vst [vmem:[#allocation66_spill] sm:$0xff] %v10211_v36 }
 0x7a2   :  { %4322 = vmatprep.subr.mxu0 %v10109_v18 }
 0x7a3   :  { %4323 = vmatpush1.msra.mxu0 %v10111_v9 }
 0x7a4   :  { %3955 = vmatmul.mubr.f32.gmra.mxu0 %v12599_v37  ;;  %4116 = vmatmul.mubr.f32.gmra.mxu1 %v12599_v37  ;;  %v10215_v37 = vld [vmem:[#allocation9 + $0x20] sm:$0xff] }
 0x7a5   :  { %3960 = vmatprep.mubr.f32.mxu0 %v12574_v21  ;;  %4121 = vmatprep.mubr.f32.mxu1 %v12574_v21  ;;  %12621 = vst [vmem:[#allocation69_spill] sm:$0xff] %v10215_v37 }
 0x7a6   :  { %4324 = vmatprep.subr.mxu0 %v10115_v3 }
 0x7a7   :  { %4325 = vmatpush1.msra.mxu0 %v10118_v24 }
 0x7a8   :  { %3961 = vmatmul.mubr.f32.gmra.mxu0 %v12600_v38  ;;  %4122 = vmatmul.mubr.f32.gmra.mxu1 %v12600_v38  ;;  %v10217_v38 = vld [vmem:[#allocation9 + $0x58] sm:$0xff] }
 0x7a9   :  { %3966 = vmatprep.mubr.f32.mxu0 %v12574_v21  ;;  %4127 = vmatprep.mubr.f32.mxu1 %v12574_v21  ;;  %12622 = vst [vmem:[#allocation83_spill] sm:$0xff] %v10217_v38 }
 0x7aa   :  { %4326 = vmatprep.subr.mxu0 %v10121_v44 }
 0x7ab   :  { %4327 = vmatpush1.msra.mxu0 %v10126_v7 }
 0x7ac   :  { %3967 = vmatmul.mubr.f32.gmra.mxu0 %v12601_v39  ;;  %4128 = vmatmul.mubr.f32.gmra.mxu1 %v12601_v39  ;;  %v10221_v39 = vld [vmem:[#allocation9 + $0x50] sm:$0xff] }
 0x7ad   :  { %3972 = vmatprep.mubr.f32.mxu0 %v12574_v21  ;;  %4133 = vmatprep.mubr.f32.mxu1 %v12574_v21  ;;  %12623 = vst [vmem:[#allocation84_spill] sm:$0xff] %v10221_v39 }
 0x7ae   :  { %4328 = vmatprep.subr.mxu0 %v10134_v53 }
 0x7af   :  { %4329 = vmatpush1.msra.mxu0 %v10142_v19 }
 0x7b0   :  { %3973 = vmatmul.mubr.f32.gmra.mxu0 %v12602_v41  ;;  %4134 = vmatmul.mubr.f32.gmra.mxu1 %v12602_v41  ;;  %v10223_v41 = vld [vmem:[#allocation9 + $0x8] sm:$0xff] }
 0x7b1   :  { %3978 = vmatprep.mubr.f32.mxu0 %v12574_v21  ;;  %4139 = vmatprep.mubr.f32.mxu1 %v12574_v21  ;;  %12624 = vst [vmem:[#allocation70_spill] sm:$0xff] %v10223_v41 }
 0x7b2   :  { %4330 = vmatprep.subr.mxu0 %v10148_v23 }
 0x7b3   :  { %4331 = vmatpush1.msra.mxu0 %v10154_v6 }
 0x7b4   :  { %3979 = vmatmul.mubr.f32.gmra.mxu0 %v12604_v54  ;;  %4140 = vmatmul.mubr.f32.gmra.mxu1 %v12604_v54  ;;  %v10227_v54 = vld [vmem:[#allocation9 + $0x38] sm:$0xff] }
 0x7b5   :  { %3984 = vmatprep.mubr.f32.mxu0 %v12574_v21  ;;  %4145 = vmatprep.mubr.f32.mxu1 %v12574_v21  ;;  %12625 = vst [vmem:[#allocation73_spill] sm:$0xff] %v10227_v54 }
 0x7b6   :  { %4332 = vmatprep.subr.mxu0 %v10160_v45 }
 0x7b7   :  { %4333 = vmatpush1.msra.mxu0 %v10166_v20 }
 0x7b8   :  { %3985 = vmatmul.mubr.f32.gmra.mxu0 %v9896_v56  ;;  %4146 = vmatmul.mubr.f32.gmra.mxu1 %v9896_v56  ;;  %v10063_v56 = vld [vmem:[#allocation9 + $0x1f8] sm:$0xff] }
 0x7b9   :  { %3990 = vmatprep.mubr.f32.mxu0 %v12574_v21  ;;  %4151 = vmatprep.mubr.f32.mxu1 %v12574_v21  ;;  %12605 = vst [vmem:[#allocation16_spill] sm:$0xff] %v10063_v56 }
 0x7ba   :  { %4383 = vmatprep.subr.mxu1 %v10063_v56  ;;  %4334 = vmatprep.subr.mxu0 %v10172_v2 }
 0x7bb   :  { %4335 = vmatpush1.msra.mxu0 %v10178_v59 }
 0x7bc   :  { %3991 = vmatmul.mubr.f32.gmra.mxu0 %v9982_v30  ;;  %4152 = vmatmul.mubr.f32.gmra.mxu1 %v9982_v30  ;;  %v10066_v30 = vld [vmem:[#allocation9 + $0x1f0] sm:$0xff] }
 0x7bd   :  { %3996 = vmatprep.mubr.f32.mxu0 %v12574_v21  ;;  %4157 = vmatprep.mubr.f32.mxu1 %v12574_v21 }
 0x7be   :  { %4384 = vmatpush1.msra.mxu1 %v10066_v30  ;;  %4336 = vmatprep.subr.mxu0 %v10184_v4 }
 0x7bf   :  { %4385 = vmatprep.subr.mxu1 %v10069_v47  ;;  %4337 = vmatpush1.msra.mxu0 %v10190_v26  ;;  %v10233_v26 = vld [vmem:[#allocation9 + $0x30] sm:$0xff] }
 0x7c0   :  { %3997 = vmatmul.mubr.f32.gmra.mxu0 %v9991_v16  ;;  %4158 = vmatmul.mubr.f32.gmra.mxu1 %v9991_v16  ;;  %v10074_v16 = vld [vmem:[#allocation9 + $0x1d0] sm:$0xff]  ;;  %12627 = vst [vmem:[#allocation86_spill] sm:$0xff] %v10233_v26 }
 0x7c1   :  { %4002 = vmatprep.mubr.f32.mxu0 %v12574_v21  ;;  %4163 = vmatprep.mubr.f32.mxu1 %v12574_v21 }
 0x7c2   :  { %4386 = vmatpush1.msra.mxu1 %v10074_v16  ;;  %4338 = vmatprep.subr.mxu0 %v10196_v29  ;;  %v10229_v29 = vld [vmem:[#allocation9] sm:$0xff] }
 0x7c3   :  { %4387 = vmatprep.subr.mxu1 %v10080_v57  ;;  %4339 = vmatpush1.msra.mxu0 %v10202_v32  ;;  %12626 = vst [vmem:[#allocation85_spill] sm:$0xff] %v10229_v29  ;;  %v10237_v32 = vld [vmem:[#allocation9 + $0x18] sm:$0xff] }
 0x7c4   :  { %4388 = vmatpush1.msra.mxu1 %v10086_v55  ;;  %4340 = vmatprep.subr.mxu0 %v10209_v34  ;;  %12628 = vst [vmem:[#allocation29_spill] sm:$0xff] %v10237_v32  ;;  %v10241_v34 = vld [vmem:[#allocation9 + $0x10] sm:$0xff] }
 0x7c5   :  { %4389 = vmatprep.subr.mxu1 %v10092_v8  ;;  %4341 = vmatpush1.msra.mxu0 %v10215_v37  ;;  %12629 = vst [vmem:[#allocation75_spill] sm:$0xff] %v10241_v34 }
 0x7c6   :  { %4390 = vmatpush1.msra.mxu1 %v10098_v62  ;;  %4342 = vmatprep.subr.mxu0 %v10223_v41  ;;  %v12630_v41 = vld [vmem:[#allocation48_spill] sm:$0xff] }
 0x7c7   :  { %4391 = vmatprep.subr.mxu1 %v10104_v25  ;;  %4343 = vmatpush1.msra.mxu0 %v10229_v29 }
 0x7c8   :  { %4392 = vmatpush1.msra.mxu1 %v10123_v14  ;;  %4518 = vmatprep.subr.mxu0 %v10038_v50  ;;  %v12632_v50 = vld [vmem:[#allocation95_spill] sm:$0xff] }
 0x7c9   :  { %4393 = vmatprep.subr.mxu1 %v10129_v17 }
 0x7ca   :  { %4394 = vmatpush1.msra.mxu1 %v10131_v46 }
 0x7cb   :  { %4395 = vmatprep.subr.mxu1 %v10137_v22 }
 0x7cc   :  { %4396 = vmatpush1.msra.mxu1 %v10139_v61 }
 0x7cd   :  { %4397 = vmatprep.subr.mxu1 %v10145_v1 }
 0x7ce   :  { %4398 = vmatpush1.msra.mxu1 %v10151_v12 }
 0x7cf   :  { %4399 = vmatprep.subr.mxu1 %v10157_v0 }
 0x7d0   :  { %4400 = vmatpush1.msra.mxu1 %v10163_v40 }
 0x7d1   :  { %4401 = vmatprep.subr.mxu1 %v10169_v15 }
 0x7d2   :  { %4402 = vmatpush1.msra.mxu1 %v10175_v10 }
 0x7d3   :  { %4403 = vmatprep.subr.mxu1 %v10181_v58 }
 0x7d4   :  { %4404 = vmatpush1.msra.mxu1 %v10187_v52 }
 0x7d5   :  { %4405 = vmatprep.subr.mxu1 %v10193_v27 }
 0x7d6   :  { %4406 = vmatpush1.msra.mxu1 %v10199_v31 }
 0x7d7   :  { %4407 = vmatprep.subr.mxu1 %v10205_v33 }
 0x7d8   :  { %4408 = vmatpush1.msra.mxu1 %v10211_v36 }
 0x7d9   :  { %4409 = vmatprep.subr.mxu1 %v10217_v38  ;;  %v12631_v38 = vld [vmem:[#allocation46_spill] sm:$0xff] }
 0x7da   :  { %4410 = vmatpush1.msra.mxu1 %v10221_v39  ;;  %v335_v39 = vadd.f32 %v12630_v41, %v12582_v35 }
 0x7db   :  { %4411 = vmatprep.subr.mxu1 %v10227_v54 }
 0x7dc   :  { %4412 = vmatpush1.msra.mxu1 %v10233_v26 }
 0x7dd   :  { %4413 = vmatprep.subr.mxu1 %v10237_v32 }
 0x7de   :  { %4414 = vmatpush1.msra.mxu1 %v10241_v34  ;;  %v12633_v34 = vld [vmem:[#allocation96_spill] sm:$0xff] }
 0x7df   :  { %4589 = vmatprep.subr.mxu1 %v10063_v56 }
 0x809   :  { %v3475_v37 = vpop.f32.mrf.mxu0  ;;  %v3546_v26 = vpop.f32.mrf.mxu1 }
 0x80a   :  { %v3551_v54 = vadd.f32 %v3475_v37, %v12631_v38  ;;  %v3553_v31 = vadd.f32 %v3546_v26, %v12632_v50  ;;  %v12635_v50 = vld [vmem:[#allocation51_spill] sm:$0xff] }
 0x80b   :  { %v3477_v36 = vpop.f32.mrf.mxu0  ;;  %v3548_v32 = vpop.f32.mrf.mxu1 }
 0x80c   :  { %v7147_v29 = vmul.f32 -1.442695, %v3551_v54  ;;  %v3552_v33 = vadd.f32 %v3477_v36, %v335_v39  ;;  %v7149_v59 = vmul.f32 -1.442695, %v3553_v31  ;;  %v3554_v27 = vadd.f32 %v3548_v32, %v12633_v34 }
 0x80e   :  { %7490 = vpow2.f32 %v7147_v29  ;;  %v7148_v4 = vmul.f32 -1.442695, %v3552_v33 }
 0x810   :  { %7492 = vpow2.f32 %v7148_v4  ;;  %v12634_v4 = vld [vmem:[#allocation52_spill] sm:$0xff] }
 0x811   :  { %7494 = vpow2.f32 %v7149_v59  ;;  %v341_v39 = vadd.f32 %v12634_v4, %v12582_v35 }
 0x812   :  { %7496 = vtanh.f32 %v3554_v27 }
 0x81b   :  { %v7491_v56 = vpop.eup %7490 }
 0x81c   :  { %v3564_v2 = vadd.f32 1.0, %v7491_v56 }
 0x81d   :  { %v7493_v52 = vpop.eup %7492 }
 0x81e   :  { %7498 = vrcp.f32 %v3564_v2  ;;  %v3565_v37 = vadd.f32 1.0, %v7493_v52  ;;  %v7495_v38 = vpop.eup %7494 }
 0x81f   :  { %v7497_v36 = vpop.eup %7496  ;;  %v3566_v31 = vadd.f32 1.0, %v7495_v38 }
 0x820   :  { %7500 = vrcp.f32 %v3565_v37  ;;  %v12636_v37 = vld [vmem:[#allocation97_spill] sm:$0xff] }
 0x82a   :  { %v3645_v29 = vpop.f32.mrf.mxu0  ;;  %v3716_v54 = vpop.f32.mrf.mxu1 }
 0x82b   :  { %v7499_v33 = vpop.eup %7498  ;;  %v3721_v26 = vadd.f32 %v3645_v29, %v12635_v50  ;;  %v3723_v20 = vadd.f32 %v3716_v54, %v12636_v37  ;;  %v12637_v29 = vld [vmem:[#allocation98_spill] sm:$0xff] }
 0x82c   :  { %v3575_v41 = vmul.f32 %v7499_v33, %v7497_v36  ;;  %v3647_v32 = vpop.f32.mrf.mxu0  ;;  %v3718_v35 = vpop.f32.mrf.mxu1 }
 0x82d   :  { %v7501_v34 = vpop.eup %7500  ;;  %v7150_v56 = vmul.f32 -1.442695, %v3721_v26  ;;  %v3722_v59 = vadd.f32 %v3647_v32, %v341_v39  ;;  %v7152_v4 = vmul.f32 -1.442695, %v3723_v20  ;;  %v3724_v38 = vadd.f32 %v3718_v35, %v12637_v29  ;;  %v12639_v35 = vld [vmem:[#allocation76_spill] sm:$0xff]  ;;  %v12641_v29 = vld [vmem:[#allocation62_spill] sm:$0xff] }
 0x82e   :  { %v3574_v27 = vmul.f32 %v7501_v34, %v9977_v11 }
 0x82f   :  { %7502 = vpow2.f32 %v7150_v56  ;;  %v7151_v2 = vmul.f32 -1.442695, %v3722_v59 }
 0x830   :  { %7504 = vrcp.f32 %v3566_v31  ;;  %v3576_v52 = vadd.f32 %v3575_v41, %v3574_v27 }
 0x831   :  { %7506 = vpow2.f32 %v7151_v2 }
 0x832   :  { %7508 = vtanh.f32 %v3576_v52 }
 0x833   :  { %7510 = vpow2.f32 %v7152_v4  ;;  %v12640_v4 = vld [vmem:[#allocation25_spill] sm:$0xff] }
 0x834   :  { %7512 = vtanh.f32 %v3724_v38  ;;  %v12642_v38 = vld [vmem:[#allocation36_spill] sm:$0xff] }
 0x83c   :  { %v7503_v36 = vpop.eup %7502 }
 0x83d   :  { %v7505_v33 = vpop.eup %7504  ;;  %v3734_v50 = vadd.f32 1.0, %v7503_v36  ;;  %v12643_v36 = vld [vmem:[#allocation59_spill] sm:$0xff] }
 0x83e   :  { %v7507_v39 = vpop.eup %7506 }
 0x83f   :  { %v7509_v11 = vpop.eup %7508  ;;  %7514 = vrcp.f32 %v3734_v50  ;;  %v3735_v26 = vadd.f32 1.0, %v7507_v39  ;;  %v12645_v50 = vld [vmem:[#allocation82_spill] sm:$0xff] }
 0x840   :  { %v3578_v31 = vmul.f32 %v7509_v11, %v7505_v33  ;;  %v7511_v20 = vpop.eup %7510  ;;  %v12644_v33 = vld [vmem:[#allocation61_spill] sm:$0xff]  ;;  %v12646_v39 = vld [vmem:[#allocation78_spill] sm:$0xff] }
 0x841   :  { %7516 = vrcp.f32 %v3735_v26  ;;  %v7513_v41 = vpop.eup %7512  ;;  %v3736_v59 = vadd.f32 1.0, %v7511_v20  ;;  %v12647_v11 = vld [vmem:[#allocation66_spill] sm:$0xff]  ;;  %v12648_v26 = vld [vmem:[#allocation65_spill] sm:$0xff]  ;;  %v12650_v20 = vld [vmem:[#allocation80_spill] sm:$0xff] }
 0x842   :  { %4003 = vmatmul.mubr.f32.gmra.mxu0 %v3578_v31  ;;  %4164 = vmatmul.mubr.f32.gmra.mxu1 %v3578_v31  ;;  %v12649_v31 = vld [vmem:[#allocation83_spill] sm:$0xff] }
 0x843   :  { %4008 = vmatprep.mubr.f32.mxu0 %v12574_v21  ;;  %4169 = vmatprep.mubr.f32.mxu1 %v12574_v21  ;;  %7518 = vrcp.f32 %v3736_v59  ;;  %v12655_v59 = vld [vmem:[#allocation86_spill] sm:$0xff] }
 0x84c   :  { %v7515_v32 = vpop.eup %7514 }
 0x84d   :  { %v3745_v34 = vmul.f32 %v7515_v32, %v7513_v41  ;;  %v12651_v41 = vld [vmem:[#allocation84_spill] sm:$0xff]  ;;  %v12652_v32 = vld [vmem:[#allocation50_spill] sm:$0xff] }
 0x84e   :  { %v7517_v56 = vpop.eup %7516 }
 0x84f   :  { %v3744_v27 = vmul.f32 %v7517_v56, %v9987_v43  ;;  %v12638_v43 = vld [vmem:[#allocation34_spill] sm:$0xff]  ;;  %v12654_v56 = vld [vmem:[#allocation69_spill] sm:$0xff] }
 0x850   :  { %v7519_v52 = vpop.eup %7518 }
 0x851   :  { %v3746_v2 = vadd.f32 %v3745_v34, %v3744_v27  ;;  %v12653_v34 = vld [vmem:[#allocation73_spill] sm:$0xff]  ;;  %v12656_v27 = vld [vmem:[#allocation70_spill] sm:$0xff] }
 0x853   :  { %7520 = vtanh.f32 %v3746_v2  ;;  %v12657_v2 = vld [vmem:[#allocation29_spill] sm:$0xff] }
 0x860   :  { %v7521_v54 = vpop.eup %7520 }
 0x861   :  { %v3748_v37 = vmul.f32 %v7521_v54, %v7519_v52  ;;  %v12658_v52 = vld [vmem:[#allocation85_spill] sm:$0xff]  ;;  %v12659_v54 = vld [vmem:[#allocation75_spill] sm:$0xff] }
 0x863   :  { %4009 = vmatmul.mubr.f32.gmra.mxu0 %v3748_v37  ;;  %4170 = vmatmul.mubr.f32.gmra.mxu1 %v3748_v37  ;;  %v12660_v37 = vld [vmem:[#allocation15_spill] sm:$0xff] }
 0x864   :  { %4376 = vmatprep.mubr.f32.mxu0 %v12574_v21  ;;  %4447 = vmatprep.mubr.f32.mxu1 %v12574_v21 }
 0x867   :  { %4377 = vmatmul.mubr.f32.vlgmr.msra.gmra.mxu0 %v12574_v21  ;;  %4448 = vmatmul.mubr.f32.vlgmr.msra.gmra.mxu1 %v12574_v21 }
 0x868   :  { %4519 = vmatpush1.msra.mxu0 %v10041_v49  ;;  %4590 = vmatpush1.msra.mxu1 %v10066_v30 }
 0x869   :  { %4520 = vmatprep.subr.mxu0 %v10058_v48  ;;  %4591 = vmatprep.subr.mxu1 %v10069_v47 }
 0x86a   :  { %4521 = vmatpush1.msra.mxu0 %v10071_v42  ;;  %4592 = vmatpush1.msra.mxu1 %v10074_v16 }
 0x86b   :  { %4522 = vmatprep.subr.mxu0 %v10077_v51  ;;  %4593 = vmatprep.subr.mxu1 %v10080_v57 }
 0x86c   :  { %4523 = vmatpush1.msra.mxu0 %v10083_v60  ;;  %4594 = vmatpush1.msra.mxu1 %v10086_v55 }
 0x86d   :  { %4524 = vmatprep.subr.mxu0 %v10089_v5  ;;  %4595 = vmatprep.subr.mxu1 %v10092_v8 }
 0x86e   :  { %4525 = vmatpush1.msra.mxu0 %v10095_v28  ;;  %4596 = vmatpush1.msra.mxu1 %v10098_v62 }
 0x86f   :  { %4526 = vmatprep.subr.mxu0 %v10101_v63  ;;  %4597 = vmatprep.subr.mxu1 %v10104_v25 }
 0x870   :  { %4527 = vmatpush1.msra.mxu0 %v10107_v13  ;;  %4598 = vmatpush1.msra.mxu1 %v10123_v14 }
 0x871   :  { %4528 = vmatprep.subr.mxu0 %v10109_v18  ;;  %4599 = vmatprep.subr.mxu1 %v10129_v17 }
 0x872   :  { %4529 = vmatpush1.msra.mxu0 %v10111_v9  ;;  %4600 = vmatpush1.msra.mxu1 %v10131_v46 }
 0x873   :  { %4530 = vmatprep.subr.mxu0 %v10115_v3  ;;  %4601 = vmatprep.subr.mxu1 %v10137_v22 }
 0x874   :  { %4531 = vmatpush1.msra.mxu0 %v10118_v24  ;;  %4602 = vmatpush1.msra.mxu1 %v10139_v61 }
 0x875   :  { %4532 = vmatprep.subr.mxu0 %v10121_v44  ;;  %4603 = vmatprep.subr.mxu1 %v10145_v1 }
 0x876   :  { %4533 = vmatpush1.msra.mxu0 %v10126_v7  ;;  %4604 = vmatpush1.msra.mxu1 %v10151_v12 }
 0x877   :  { %4534 = vmatprep.subr.mxu0 %v10134_v53  ;;  %4605 = vmatprep.subr.mxu1 %v10157_v0 }
 0x878   :  { %4535 = vmatpush1.msra.mxu0 %v10142_v19  ;;  %4606 = vmatpush1.msra.mxu1 %v10163_v40 }
 0x879   :  { %4536 = vmatprep.subr.mxu0 %v10148_v23  ;;  %4607 = vmatprep.subr.mxu1 %v10169_v15 }
 0x87a   :  { %4537 = vmatpush1.msra.mxu0 %v10154_v6  ;;  %4608 = vmatpush1.msra.mxu1 %v10175_v10 }
 0x87b   :  { %4538 = vmatprep.subr.mxu0 %v10160_v45  ;;  %4609 = vmatprep.subr.mxu1 %v10181_v58 }
 0x87c   :  { %4539 = vmatpush1.msra.mxu0 %v12638_v43  ;;  %4610 = vmatpush1.msra.mxu1 %v12639_v35 }
 0x87d   :  { %4540 = vmatprep.subr.mxu0 %v12640_v4  ;;  %4611 = vmatprep.subr.mxu1 %v12641_v29 }
 0x87e   :  { %4541 = vmatpush1.msra.mxu0 %v12642_v38  ;;  %4612 = vmatpush1.msra.mxu1 %v12643_v36 }
 0x87f   :  { %4542 = vmatprep.subr.mxu0 %v12644_v33  ;;  %4613 = vmatprep.subr.mxu1 %v12645_v50 }
 0x880   :  { %4543 = vmatpush1.msra.mxu0 %v12646_v39  ;;  %4614 = vmatpush1.msra.mxu1 %v12647_v11 }
 0x881   :  { %4544 = vmatprep.subr.mxu0 %v12648_v26  ;;  %4615 = vmatprep.subr.mxu1 %v12649_v31 }
 0x882   :  { %4545 = vmatpush1.msra.mxu0 %v12650_v20  ;;  %4616 = vmatpush1.msra.mxu1 %v12651_v41 }
 0x883   :  { %4546 = vmatprep.subr.mxu0 %v12652_v32  ;;  %4617 = vmatprep.subr.mxu1 %v12653_v34  ;;  %v12661_v32 = vld [vmem:[#allocation16_spill] sm:$0xff]  ;;  %v10332_v34 = vpop.f32.mrf.mxu0 }
 0x884   :  { %4547 = vmatpush1.msra.mxu0 %v12654_v56  ;;  %4618 = vmatpush1.msra.mxu1 %v12655_v59  ;;  %v10336_v59 = vpop.f32.mrf.mxu1 }
 0x885   :  { %4548 = vmatprep.subr.mxu0 %v12656_v27  ;;  %4619 = vmatprep.subr.mxu1 %v12657_v2  ;;  %v10334_v56 = vpop.f32.mrf.mxu0 }
 0x886   :  { %4549 = vmatpush1.msra.mxu0 %v12658_v52  ;;  %4620 = vmatpush1.msra.mxu1 %v12659_v54  ;;  %v10338_v2 = vpop.f32.mrf.mxu1 }
 0x887   :  { %4582 = vmatprep.mubr.f32.mxu0 %v12574_v21  ;;  %4653 = vmatprep.mubr.f32.mxu1 %v12574_v21  ;;  %v3926_v27 = vpop.f32.mrf.mxu0 }
 0x888   :  { %4688 = vmatprep.subr.mxu0 %v12660_v37  ;;  %4759 = vmatprep.subr.mxu1 %v12661_v32  ;;  %v10342_v54 = vpop.f32.mrf.mxu1 }
 0x889   :  { %v10340_v52 = vpop.f32.mrf.mxu0 }
 0x88a   :  { %v10346_v21 = vpop.f32.mrf.mxu1 }
 0x88b   :  { %v10344_v41 = vpop.f32.mrf.mxu0 }
 0x88c   :  { %12662 = vst [vmem:[#allocation77_spill] sm:$0xff] %v10344_v41  ;;  %v10350_v32 = vpop.f32.mrf.mxu1 }
 0x88d   :  { %v10348_v37 = vpop.f32.mrf.mxu0  ;;  %12664 = vst [vmem:[#allocation88_spill] sm:$0xff] %v10350_v32 }
 0x88e   :  { %12663 = vst [vmem:[#allocation87_spill] sm:$0xff] %v10348_v37  ;;  %v10354_v31 = vpop.f32.mrf.mxu1 }
 0x88f   :  { %v10352_v20 = vpop.f32.mrf.mxu0  ;;  %12666 = vst [vmem:[#allocation81_spill] sm:$0xff] %v10354_v31 }
 0x890   :  { %12665 = vst [vmem:[#allocation79_spill] sm:$0xff] %v10352_v20  ;;  %v10358_v11 = vpop.f32.mrf.mxu1 }
 0x891   :  { %v10356_v26 = vpop.f32.mrf.mxu0  ;;  %12668 = vst [vmem:[#allocation89_spill] sm:$0xff] %v10358_v11 }
 0x892   :  { %12667 = vst [vmem:[#allocation33_spill] sm:$0xff] %v10356_v26  ;;  %v10362_v50 = vpop.f32.mrf.mxu1 }
 0x893   :  { %v10360_v39 = vpop.f32.mrf.mxu0  ;;  %12670 = vst [vmem:[#allocation35_spill] sm:$0xff] %v10362_v50 }
 0x894   :  { %12669 = vst [vmem:[#allocation90_spill] sm:$0xff] %v10360_v39  ;;  %v10366_v41 = vpop.f32.mrf.mxu1 }
 0x895   :  { %v10364_v33 = vpop.f32.mrf.mxu0  ;;  %12672 = vst [vmem:[#allocation55_spill] sm:$0xff] %v10366_v41 }
 0x896   :  { %12671 = vst [vmem:[#allocation54_spill] sm:$0xff] %v10364_v33  ;;  %v10370_v37 = vpop.f32.mrf.mxu1 }
 0x897   :  { %v10368_v36 = vpop.f32.mrf.mxu0  ;;  %12674 = vst [vmem:[#allocation74_spill] sm:$0xff] %v10370_v37 }
 0x898   :  { %12673 = vst [vmem:[#allocation67_spill] sm:$0xff] %v10368_v36  ;;  %v10374_v20 = vpop.f32.mrf.mxu1 }
 0x899   :  { %v10372_v32 = vpop.f32.mrf.mxu0  ;;  %12676 = vst [vmem:[#allocation56_spill] sm:$0xff] %v10374_v20 }
 0x89a   :  { %12675 = vst [vmem:[#allocation68_spill] sm:$0xff] %v10372_v32  ;;  %v10378_v26 = vpop.f32.mrf.mxu1 }
 0x89b   :  { %v10376_v31 = vpop.f32.mrf.mxu0  ;;  %12678 = vst [vmem:[#allocation28_spill] sm:$0xff] %v10378_v26 }
 0x89c   :  { %12677 = vst [vmem:[#allocation57_spill] sm:$0xff] %v10376_v31  ;;  %v10382_v39 = vpop.f32.mrf.mxu1 }
 0x89d   :  { %v10380_v11 = vpop.f32.mrf.mxu0  ;;  %12680 = vst [vmem:[#allocation19_spill] sm:$0xff] %v10382_v39 }
 0x89e   :  { %12679 = vst [vmem:[#allocation47_spill] sm:$0xff] %v10380_v11  ;;  %v10386_v33 = vpop.f32.mrf.mxu1 }
 0x89f   :  { %v10384_v50 = vpop.f32.mrf.mxu0  ;;  %12682 = vst [vmem:[#allocation21_spill] sm:$0xff] %v10386_v33 }
 0x8a0   :  { %12681 = vst [vmem:[#allocation31_spill] sm:$0xff] %v10384_v50  ;;  %v10390_v36 = vpop.f32.mrf.mxu1 }
 0x8a1   :  { %v10388_v41 = vpop.f32.mrf.mxu0  ;;  %12684 = vst [vmem:[#allocation22_spill] sm:$0xff] %v10390_v36 }
 0x8a2   :  { %12683 = vst [vmem:[#allocation32_spill] sm:$0xff] %v10388_v41  ;;  %v10394_v32 = vpop.f32.mrf.mxu1 }
 0x8a3   :  { %v10392_v37 = vpop.f32.mrf.mxu0  ;;  %12686 = vst [vmem:[#allocation18_spill] sm:$0xff] %v10394_v32 }
 0x8a4   :  { %12685 = vst [vmem:[#allocation17_spill] sm:$0xff] %v10392_v37  ;;  %v10398_v31 = vpop.f32.mrf.mxu1 }
 0x8a5   :  { %v10396_v20 = vpop.f32.mrf.mxu0  ;;  %12688 = vst [vmem:[#allocation72_spill] sm:$0xff] %v10398_v31 }
 0x8a6   :  { %12687 = vst [vmem:[#allocation71_spill] sm:$0xff] %v10396_v20  ;;  %v10402_v11 = vpop.f32.mrf.mxu1 }
 0x8a7   :  { %v10400_v26 = vpop.f32.mrf.mxu0  ;;  %12690 = vst [vmem:[#allocation20_spill] sm:$0xff] %v10402_v11 }
 0x8a8   :  { %12689 = vst [vmem:[#allocation30_spill] sm:$0xff] %v10400_v26  ;;  %v10406_v50 = vpop.f32.mrf.mxu1 }
 0x8a9   :  { %v10404_v39 = vpop.f32.mrf.mxu0  ;;  %12692 = vst [vmem:[#allocation42_spill] sm:$0xff] %v10406_v50 }
 0x8aa   :  { %12691 = vst [vmem:[#allocation49_spill] sm:$0xff] %v10404_v39  ;;  %v10410_v41 = vpop.f32.mrf.mxu1 }
 0x8ab   :  { %v10408_v33 = vpop.f32.mrf.mxu0  ;;  %12694 = vst [vmem:[#allocation91_spill] sm:$0xff] %v10410_v41 }
 0x8ac   :  { %12693 = vst [vmem:[#allocation41_spill] sm:$0xff] %v10408_v33  ;;  %v10414_v37 = vpop.f32.mrf.mxu1 }
 0x8ad   :  { %v10412_v36 = vpop.f32.mrf.mxu0  ;;  %12696 = vst [vmem:[#allocation44_spill] sm:$0xff] %v10414_v37 }
 0x8ae   :  { %12695 = vst [vmem:[#allocation92_spill] sm:$0xff] %v10412_v36  ;;  %v10418_v20 = vpop.f32.mrf.mxu1 }
 0x8af   :  { %v10416_v32 = vpop.f32.mrf.mxu0  ;;  %12698 = vst [vmem:[#allocation37_spill] sm:$0xff] %v10418_v20 }
 0x8b0   :  { %12697 = vst [vmem:[#allocation43_spill] sm:$0xff] %v10416_v32  ;;  %v10422_v26 = vpop.f32.mrf.mxu1 }
 0x8b1   :  { %v10420_v31 = vpop.f32.mrf.mxu0  ;;  %12700 = vst [vmem:[#allocation94_spill] sm:$0xff] %v10422_v26 }
 0x8b2   :  { %12699 = vst [vmem:[#allocation93_spill] sm:$0xff] %v10420_v31  ;;  %v10426_v39 = vpop.f32.mrf.mxu1 }
 0x8b3   :  { %v10424_v11 = vpop.f32.mrf.mxu0  ;;  %12702 = vst [vmem:[#allocation99_spill] sm:$0xff] %v10426_v39 }
 0x8b4   :  { %12701 = vst [vmem:[#allocation38_spill] sm:$0xff] %v10424_v11  ;;  %v10430_v33 = vpop.f32.mrf.mxu1  ;;  %v3832_v11 = vld [vmem:[%s11835_s6] sm:$0xf] }
 0x8b5   :  { %v10428_v50 = vpop.f32.mrf.mxu0  ;;  %12704 = vst [vmem:[#allocation39_spill] sm:$0xff] %v10430_v33 }
 0x8b6   :  { %12703 = vst [vmem:[#allocation14_spill] sm:$0xff] %v10428_v50  ;;  %v10434_v36 = vpop.f32.mrf.mxu1  ;;  %v12712_v50 = vld [vmem:[#allocation40_spill] sm:$0xff] }
 0x8b7   :  { %v10432_v41 = vpop.f32.mrf.mxu0  ;;  %12706 = vst [vmem:[#allocation60_spill] sm:$0xff] %v10434_v36  ;;  %v12713_v33 = vsub.s32 0, %v12712_v50 }
 0x8b8   :  { %12705 = vst [vmem:[#allocation45_spill] sm:$0xff] %v10432_v41  ;;  %v10438_v32 = vpop.f32.mrf.mxu1 }
 0x8b9   :  { %v10436_v37 = vpop.f32.mrf.mxu0  ;;  %12708 = vst [vmem:[#allocation63_spill] sm:$0xff] %v10438_v32  ;;  %v10451_v31 = vrot.slane %v3832_v11, %v12713_v33  ;;  %v12717_v32 = vsub.s32 1, %v12712_v50 }
 0x8ba   :  { %12707 = vst [vmem:[#allocation53_spill] sm:$0xff] %v10436_v37  ;;  %v10445_v26 = vpop.f32.mrf.mxu1 }
 0x8bb   :  { %12710 = vst [vmem:[#allocation24_spill] sm:$0xff] %v10445_v26  ;;  %12714 = vst [vmem:[#allocation27_spill] sm:$0xff] %v10451_v31  ;;  %v10459_v37 = vrot.slane %v3832_v11, %v12717_v32  ;;  %v3921_v38 = vadd.f32 %v10332_v34, %v10451_v31  ;;  %v3927_v26 = vadd.f32 %v3926_v27, %v10451_v31 }
 0x8bd   :  { %12718 = vst [vmem:[#allocation95_spill] sm:$0xff] %v10459_v37  ;;  %v3923_v33 = vadd.f32 %v10334_v56, %v10459_v37  ;;  %v3929_v32 = vadd.f32 %v10340_v52, %v10459_v37  ;;  %v12752_v37 = vmov 0.0  }
 0x902   :  { %v10440_v20 = vpop.f32.mrf.mxu0  ;;  %v10453_v41 = vpop.f32.mrf.mxu1 }
 0x903   :  { %12709 = vst [vmem:[#allocation64_spill] sm:$0xff] %v10440_v20  ;;  %12715 = vst [vmem:[#allocation48_spill] sm:$0xff] %v10453_v41 }
 0x904   :  { %v10447_v39 = vpop.f32.mrf.mxu0 }
 0x905   :  { %12711 = vst [vmem:[#allocation26_spill] sm:$0xff] %v10447_v39  ;;  %v10466_v39 = vpop.f32.mrf.mxu1 }
 0x906   :  { %12720 = vst [vmem:[#allocation52_spill] sm:$0xff] %v10466_v39  ;;  %v12723_v39 = vsub.s32 2, %v12712_v50 }
 0x908   :  { %v10478_v31 = vrot.slane %v3832_v11, %v12723_v39 }
 0x90a   :  { %12724 = vst [vmem:[#allocation98_spill] sm:$0xff] %v10478_v31 }
 0x923   :  { %v10455_v36 = vpop.f32.mrf.mxu0  ;;  %v10470_v41 = vpop.f32.mrf.mxu1 }
 0x924   :  { %12716 = vst [vmem:[#allocation46_spill] sm:$0xff] %v10455_v36  ;;  %12721 = vst [vmem:[#allocation51_spill] sm:$0xff] %v10470_v41  ;;  %v12748_v41 = vld [vmem:[#allocation86_spill] sm:$0xff] }
 0x925   :  { %v10461_v20 = vpop.f32.mrf.mxu0  ;;  %v10474_v45 = vpop.f32.mrf.mxu1 }
 0x926   :  { %12719 = vst [vmem:[#allocation96_spill] sm:$0xff] %v10461_v20  ;;  %12722 = vst [vmem:[#allocation97_spill] sm:$0xff] %v10474_v45  ;;  %v12747_v45 = vld [vmem:[#allocation69_spill] sm:$0xff] }
 0x927   :  { %v4378_v29 = vpop.f32.mrf.mxu0 }
 0x928   :  { %v4454_v36 = vadd.f32 %v4378_v29, %v3921_v38  ;;  %v4482_v4 = vadd.f32 %v4378_v29, %v3927_v26  ;;  %v4449_v38 = vpop.f32.mrf.mxu1  ;;  %v4082_v29 = vadd.f32 %v10336_v59, %v10478_v31 }
 0x929   :  { %v4380_v35 = vpop.f32.mrf.mxu0 }
 0x92a   :  { %v7153_v20 = vmul.f32 -1.442695, %v4454_v36  ;;  %v7156_v43 = vmul.f32 -1.442695, %v4482_v4  ;;  %v4455_v58 = vadd.f32 %v4380_v35, %v3923_v33  ;;  %v4483_v34 = vadd.f32 %v4380_v35, %v3929_v32  ;;  %v4451_v26 = vpop.f32.mrf.mxu1 }
 0x92b   :  { %v4456_v36 = vadd.f32 %v4449_v38, %v4082_v29  ;;  %v12725_v4 = vsub.s32 3, %v12712_v50 }
 0x92c   :  { %7522 = vpow2.f32 %v7153_v20  ;;  %v7154_v27 = vmul.f32 -1.442695, %v4455_v58  ;;  %v7157_v56 = vmul.f32 -1.442695, %v4483_v34 }
 0x92d   :  { %7524 = vpow2.f32 %v7156_v43  ;;  %v10484_v35 = vrot.slane %v3832_v11, %v12725_v4  ;;  %v7155_v20 = vmul.f32 -1.442695, %v4456_v36 }
 0x92e   :  { %7526 = vpow2.f32 %v7154_v27 }
 0x92f   :  { %7528 = vpow2.f32 %v7157_v56  ;;  %12726 = vst [vmem:[#allocation40_spill] sm:$0xff] %v10484_v35  ;;  %v4090_v58 = vadd.f32 %v10346_v21, %v10484_v35  ;;  %v4084_v43 = vadd.f32 %v10338_v2, %v10484_v35  ;;  %v12750_v35 = vld [vmem:[#allocation29_spill] sm:$0xff] }
 0x930   :  { %7530 = vpow2.f32 %v7155_v20 }
 0x931   :  { %v4485_v39 = vadd.f32 %v4451_v26, %v4090_v58  ;;  %v4457_v59 = vadd.f32 %v4451_v26, %v4084_v43 }
 0x933   :  { %7532 = vtanh.f32 %v4485_v39 }
 0x939   :  { %v7523_v52 = vpop.eup %7522 }
 0x93a   :  { %v7525_v33 = vpop.eup %7524  ;;  %v4467_v32 = vadd.f32 1.0, %v7523_v52 }
 0x93b   :  { %v4495_v34 = vadd.f32 1.0, %v7525_v33  ;;  %v7527_v27 = vpop.eup %7526 }
 0x93c   :  { %v7529_v50 = vpop.eup %7528  ;;  %v4468_v11 = vadd.f32 1.0, %v7527_v27 }
 0x93d   :  { %7534 = vrcp.f32 %v4495_v34  ;;  %v4496_v56 = vadd.f32 1.0, %v7529_v50  ;;  %v7531_v21 = vpop.eup %7530 }
 0x93e   :  { %7536 = vrcp.f32 %v4467_v32  ;;  %v4469_v33 = vadd.f32 1.0, %v7531_v21 }
 0x93f   :  { %7538 = vtanh.f32 %v4457_v59  ;;  %v4088_v59 = vadd.f32 %v10342_v54, %v10478_v31  ;;  %v12751_v31 = vld [vmem:[#allocation85_spill] sm:$0xff] }
 0x940   :  { %7540 = vrcp.f32 %v4468_v11  ;;  %v7533_v29 = vpop.eup %7532 }
 0x941   :  { %7542 = vrcp.f32 %v4496_v56  ;;  %v4484_v27 = vadd.f32 %v4449_v38, %v4088_v59  ;;  %v12740_v59 = vld [vmem:[#allocation66_spill] sm:$0xff] }
 0x942   :  { %7544 = vrcp.f32 %v4469_v33  ;;  %v12735_v33 = vld [vmem:[#allocation36_spill] sm:$0xff] }
 0x943   :  { %v7158_v50 = vmul.f32 -1.442695, %v4484_v27  ;;  %v12741_v27 = vld [vmem:[#allocation65_spill] sm:$0xff] }
 0x94a   :  { %v7535_v36 = vpop.eup %7534 }
 0x94b   :  { %v7537_v4 = vpop.eup %7536  ;;  %v4506_v2 = vmul.f32 %v7535_v36, %v7533_v29  ;;  %v12729_v29 = vld [vmem:[#allocation23_spill] sm:$0xff]  ;;  %v12730_v36 = vld [vmem:[#allocation58_spill] sm:$0xff] }
 0x94c   :  { %v7539_v58 = vpop.eup %7538 }
 0x94d   :  { %v7541_v52 = vpop.eup %7540  ;;  %v4478_v39 = vmul.f32 %v7539_v58, %v7537_v4  ;;  %v12731_v4 = vld [vmem:[#allocation34_spill] sm:$0xff]  ;;  %v12733_v58 = vld [vmem:[#allocation25_spill] sm:$0xff] }
 0x94e   :  { %v7543_v20 = vpop.eup %7542  ;;  %v4477_v26 = vmul.f32 0.0, %v7541_v52  ;;  %v12734_v52 = vld [vmem:[#allocation62_spill] sm:$0xff] }
 0x94f   :  { %v4505_v43 = vmul.f32 0.0, %v7543_v20  ;;  %v7545_v11 = vpop.eup %7544  ;;  %v12736_v20 = vld [vmem:[#allocation59_spill] sm:$0xff] }
 0x950   :  { %v10490_v34 = vadd.f32 %v4478_v39, %v4477_v26  ;;  %v12737_v26 = vld [vmem:[#allocation61_spill] sm:$0xff]  ;;  %v12738_v39 = vld [vmem:[#allocation82_spill] sm:$0xff] }
 0x951   :  { %v10492_v32 = vadd.f32 %v4506_v2, %v4505_v43  ;;  %v12732_v2 = vld [vmem:[#allocation76_spill] sm:$0xff]  ;;  %v12739_v43 = vld [vmem:[#allocation78_spill] sm:$0xff] }
 0x952   :  { %12727 = vst [vmem:[#allocation100_spill] sm:$0xff] %v10490_v34  ;;  %7546 = vtanh.f32 %v10490_v34  ;;  %v12749_v34 = vld [vmem:[#allocation70_spill] sm:$0xff] }
 0x953   :  { %12728 = vst [vmem:[#allocation101_spill] sm:$0xff] %v10492_v32  ;;  %7548 = vpow2.f32 %v7158_v50  ;;  %v12742_v50 = vld [vmem:[#allocation83_spill] sm:$0xff] }
 0x954   :  { %7550 = vtanh.f32 %v10492_v32 }
 0x95f   :  { %v7547_v56 = vpop.eup %7546 }
 0x960   :  { %v4481_v21 = vmul.f32 %v7547_v56, %v7545_v11  ;;  %v7549_v54 = vpop.eup %7548  ;;  %v12743_v11 = vld [vmem:[#allocation80_spill] sm:$0xff] }
 0x961   :  { %v4497_v38 = vadd.f32 1.0, %v7549_v54  ;;  %v12744_v56 = vld [vmem:[#allocation84_spill] sm:$0xff]  ;;  %v12745_v54 = vld [vmem:[#allocation50_spill] sm:$0xff] }
 0x962   :  { %4583 = vmatmul.mubr.f32.vlgmr.msra.gmra.mxu0 %v4481_v21  ;;  %4654 = vmatmul.mubr.f32.vlgmr.msra.gmra.mxu1 %v4481_v21  ;;  %v7551_v21 = vpop.eup %7550 }
 0x963   :  { %4689 = vmatpush1.msra.mxu0 %v10041_v49  ;;  %4760 = vmatpush1.msra.mxu1 %v10066_v30  ;;  %7552 = vrcp.f32 %v4497_v38  ;;  %v12746_v38 = vld [vmem:[#allocation73_spill] sm:$0xff] }
 0x964   :  { %4690 = vmatprep.subr.mxu0 %v10058_v48  ;;  %4761 = vmatprep.subr.mxu1 %v10069_v47 }
 0x965   :  { %4691 = vmatpush1.msra.mxu0 %v10071_v42  ;;  %4762 = vmatpush1.msra.mxu1 %v10074_v16 }
 0x966   :  { %4692 = vmatprep.subr.mxu0 %v10077_v51  ;;  %4763 = vmatprep.subr.mxu1 %v10080_v57 }
 0x967   :  { %4693 = vmatpush1.msra.mxu0 %v10083_v60  ;;  %4764 = vmatpush1.msra.mxu1 %v10086_v55 }
 0x968   :  { %4694 = vmatprep.subr.mxu0 %v10089_v5  ;;  %4765 = vmatprep.subr.mxu1 %v10092_v8 }
 0x969   :  { %4695 = vmatpush1.msra.mxu0 %v10095_v28  ;;  %4766 = vmatpush1.msra.mxu1 %v10098_v62 }
 0x96a   :  { %4696 = vmatprep.subr.mxu0 %v10101_v63  ;;  %4767 = vmatprep.subr.mxu1 %v10104_v25 }
 0x96b   :  { %4697 = vmatpush1.msra.mxu0 %v10107_v13  ;;  %4768 = vmatpush1.msra.mxu1 %v10123_v14 }
 0x96c   :  { %4698 = vmatprep.subr.mxu0 %v10109_v18  ;;  %4769 = vmatprep.subr.mxu1 %v10129_v17 }
 0x96d   :  { %4699 = vmatpush1.msra.mxu0 %v10111_v9  ;;  %4770 = vmatpush1.msra.mxu1 %v10131_v46 }
 0x96e   :  { %4700 = vmatprep.subr.mxu0 %v10115_v3  ;;  %4771 = vmatprep.subr.mxu1 %v10137_v22 }
 0x96f   :  { %4701 = vmatpush1.msra.mxu0 %v10118_v24  ;;  %4772 = vmatpush1.msra.mxu1 %v10139_v61 }
 0x970   :  { %4702 = vmatprep.subr.mxu0 %v10121_v44  ;;  %4773 = vmatprep.subr.mxu1 %v10145_v1  ;;  %v7553_v32 = vpop.eup %7552 }
 0x971   :  { %4703 = vmatpush1.msra.mxu0 %v10126_v7  ;;  %4774 = vmatpush1.msra.mxu1 %v10151_v12 }
 0x972   :  { %4704 = vmatprep.subr.mxu0 %v10134_v53  ;;  %4775 = vmatprep.subr.mxu1 %v10157_v0 }
 0x973   :  { %4705 = vmatpush1.msra.mxu0 %v10142_v19  ;;  %4776 = vmatpush1.msra.mxu1 %v10163_v40 }
 0x974   :  { %4706 = vmatprep.subr.mxu0 %v10148_v23  ;;  %4777 = vmatprep.subr.mxu1 %v10169_v15 }
 0x975   :  { %4707 = vmatpush1.msra.mxu0 %v10154_v6  ;;  %4778 = vmatpush1.msra.mxu1 %v10175_v10 }
 0x976   :  { %4708 = vmatprep.subr.mxu0 %v12729_v29  ;;  %4779 = vmatprep.subr.mxu1 %v12730_v36 }
 0x977   :  { %4709 = vmatpush1.msra.mxu0 %v12731_v4  ;;  %4780 = vmatpush1.msra.mxu1 %v12732_v2 }
 0x978   :  { %4710 = vmatprep.subr.mxu0 %v12733_v58  ;;  %4781 = vmatprep.subr.mxu1 %v12734_v52 }
 0x979   :  { %4711 = vmatpush1.msra.mxu0 %v12735_v33  ;;  %4782 = vmatpush1.msra.mxu1 %v12736_v20 }
 0x97a   :  { %4712 = vmatprep.subr.mxu0 %v12737_v26  ;;  %4783 = vmatprep.subr.mxu1 %v12738_v39 }
 0x97b   :  { %4713 = vmatpush1.msra.mxu0 %v12739_v43  ;;  %4784 = vmatpush1.msra.mxu1 %v12740_v59 }
 0x97c   :  { %4714 = vmatprep.subr.mxu0 %v12741_v27  ;;  %4785 = vmatprep.subr.mxu1 %v12742_v50 }
 0x97d   :  { %4715 = vmatpush1.msra.mxu0 %v12743_v11  ;;  %4786 = vmatpush1.msra.mxu1 %v12744_v56  ;;  %v4509_v11 = vmul.f32 %v7553_v32, %v7551_v21  ;;  %v12753_v56 = vld [vmem:[#allocation75_spill] sm:$0xff] }
 0x97e   :  { %4716 = vmatprep.subr.mxu0 %v12745_v54  ;;  %4787 = vmatprep.subr.mxu1 %v12746_v38  ;;  %v12754_v38 = vld [vmem:[#allocation15_spill] sm:$0xff] }
 0x97f   :  { %4717 = vmatpush1.msra.mxu0 %v12747_v45  ;;  %4788 = vmatpush1.msra.mxu1 %v12748_v41  ;;  %v12755_v45 = vld [vmem:[#allocation16_spill] sm:$0xff] }
 0x980   :  { %4718 = vmatprep.subr.mxu0 %v12749_v34  ;;  %4789 = vmatprep.subr.mxu1 %v12750_v35 }
 0x981   :  { %4719 = vmatpush1.msra.mxu0 %v12751_v31  ;;  %4752 = vmatprep.mubr.f32.mxu0 %v12752_v37 }
 0x982   :  { %4790 = vmatpush1.msra.mxu1 %v12753_v56  ;;  %4823 = vmatprep.mubr.f32.mxu1 %v12752_v37 }
 0x983   :  { %4753 = vmatmul.mubr.f32.vlgmr.msra.gmra.mxu0 %v4509_v11  ;;  %4824 = vmatmul.mubr.f32.vlgmr.msra.gmra.mxu1 %v4509_v11 }
 0x984   :  { %4866 = vmatprep.subr.mxu0 %v12754_v38  ;;  %4937 = vmatprep.subr.mxu1 %v12755_v45 }
 0x985   :  { %4867 = vmatpush1.msra.mxu0 %v10041_v49  ;;  %4938 = vmatpush1.msra.mxu1 %v10066_v30  ;;  %v12756_v49 = vld [vmem:[#allocation80_spill] sm:$0xff]  ;;  %v12758_v30 = vld [vmem:[#allocation73_spill] sm:$0xff] }
 0x986   :  { %4868 = vmatprep.subr.mxu0 %v10058_v48  ;;  %4939 = vmatprep.subr.mxu1 %v10069_v47  ;;  %v12757_v48 = vld [vmem:[#allocation84_spill] sm:$0xff]  ;;  %v12759_v47 = vld [vmem:[#allocation69_spill] sm:$0xff] }
 0x987   :  { %4869 = vmatpush1.msra.mxu0 %v10071_v42  ;;  %4940 = vmatpush1.msra.mxu1 %v10074_v16  ;;  %v10628_v42 = vld [vmem:[#allocation9 + $0x1e8] sm:$0xff]  ;;  %v10631_v16 = vld [vmem:[#allocation9 + $0x1f8] sm:$0xff] }
 0x988   :  { %4870 = vmatprep.subr.mxu0 %v10077_v51  ;;  %4941 = vmatprep.subr.mxu1 %v10080_v57  ;;  %12760 = vst [vmem:[#allocation23_spill] sm:$0xff] %v10628_v42  ;;  %12761 = vst [vmem:[#allocation58_spill] sm:$0xff] %v10631_v16  ;;  %v12762_v51 = vld [vmem:[#allocation27_spill] sm:$0xff]  ;;  %v12763_v57 = vld [vmem:[#allocation77_spill] sm:$0xff] }
 0x989   :  { %4871 = vmatpush1.msra.mxu0 %v10083_v60  ;;  %4942 = vmatpush1.msra.mxu1 %v10086_v55  ;;  %v3933_v60 = vadd.f32 %v12763_v57, %v12762_v51 }
 0x98a   :  { %4872 = vmatprep.subr.mxu0 %v10089_v5  ;;  %4943 = vmatprep.subr.mxu1 %v10092_v8  ;;  %v12764_v5 = vld [vmem:[#allocation95_spill] sm:$0xff] }
 0x98b   :  { %4873 = vmatpush1.msra.mxu0 %v10095_v28  ;;  %4944 = vmatpush1.msra.mxu1 %v10098_v62  ;;  %v12765_v8 = vld [vmem:[#allocation87_spill] sm:$0xff] }
 0x98c   :  { %4874 = vmatprep.subr.mxu0 %v10101_v63  ;;  %4945 = vmatprep.subr.mxu1 %v10104_v25  ;;  %v3935_v28 = vadd.f32 %v12765_v8, %v12764_v5  ;;  %v10660_v8 = vld [vmem:[#allocation9 + $0x1c8] sm:$0xff] }
 0x98d   :  { %4875 = vmatpush1.msra.mxu0 %v10107_v13  ;;  %4946 = vmatpush1.msra.mxu1 %v10123_v14 }
 0x98e   :  { %4876 = vmatprep.subr.mxu0 %v10109_v18  ;;  %4947 = vmatprep.subr.mxu1 %v10129_v17  ;;  %v12768_v17 = vld [vmem:[#allocation40_spill] sm:$0xff] }
 0x98f   :  { %4877 = vmatpush1.msra.mxu0 %v10111_v9  ;;  %4948 = vmatpush1.msra.mxu1 %v10131_v46  ;;  %v12769_v46 = vld [vmem:[#allocation81_spill] sm:$0xff] }
 0x990   :  { %4878 = vmatprep.subr.mxu0 %v10115_v3  ;;  %4949 = vmatprep.subr.mxu1 %v10137_v22  ;;  %v12766_v3 = vld [vmem:[#allocation98_spill] sm:$0xff] }
 0x991   :  { %4879 = vmatpush1.msra.mxu0 %v10118_v24  ;;  %4950 = vmatpush1.msra.mxu1 %v10139_v61  ;;  %v12767_v24 = vld [vmem:[#allocation88_spill] sm:$0xff] }
 0x992   :  { %4880 = vmatprep.subr.mxu0 %v10121_v44  ;;  %4951 = vmatprep.subr.mxu1 %v10145_v1  ;;  %v4094_v44 = vadd.f32 %v12767_v24, %v12766_v3  ;;  %v10684_v24 = vld [vmem:[#allocation9 + $0x188] sm:$0xff] }
 0x993   :  { %4881 = vmatpush1.msra.mxu0 %v10126_v7  ;;  %4952 = vmatpush1.msra.mxu1 %v10151_v12 }
 0x994   :  { %4882 = vmatprep.subr.mxu0 %v10134_v53  ;;  %4953 = vmatprep.subr.mxu1 %v10157_v0  ;;  %v4096_v53 = vadd.f32 %v12769_v46, %v12768_v17  ;;  %v12770_v0 = vld [vmem:[#allocation79_spill] sm:$0xff] }
 0x995   :  { %4883 = vmatpush1.msra.mxu0 %v10142_v19  ;;  %4954 = vmatpush1.msra.mxu1 %v10163_v40  ;;  %v3939_v45 = vadd.f32 %v12770_v0, %v12762_v51  ;;  %v10832_v51 = vld [vmem:[#allocation9 + $0x8] sm:$0xff] }
 0x996   :  { %4884 = vmatprep.subr.mxu0 %v10148_v23  ;;  %4955 = vmatprep.subr.mxu1 %v10169_v15  ;;  %12795 = vst [vmem:[#allocation16_spill] sm:$0xff] %v10832_v51 }
 0x997   :  { %4885 = vmatpush1.msra.mxu0 %v10154_v6  ;;  %4956 = vmatpush1.msra.mxu1 %v10175_v10 }
 0x998   :  { %4886 = vmatprep.subr.mxu0 %v12729_v29  ;;  %4957 = vmatprep.subr.mxu1 %v12730_v36 }
 0x999   :  { %4887 = vmatpush1.msra.mxu0 %v12731_v4  ;;  %4958 = vmatpush1.msra.mxu1 %v12732_v2 }
 0x99a   :  { %4888 = vmatprep.subr.mxu0 %v12733_v58  ;;  %4959 = vmatprep.subr.mxu1 %v12734_v52  ;;  %v12772_v58 = vld [vmem:[#allocation100_spill] sm:$0xff] }
 0x99b   :  { %4889 = vmatpush1.msra.mxu0 %v12735_v33  ;;  %4960 = vmatpush1.msra.mxu1 %v12736_v20 }
 0x99c   :  { %4890 = vmatprep.subr.mxu0 %v12737_v26  ;;  %4961 = vmatprep.subr.mxu1 %v12738_v39  ;;  %v12774_v39 = vld [vmem:[#allocation89_spill] sm:$0xff] }
 0x99d   :  { %4891 = vmatpush1.msra.mxu0 %v12739_v43  ;;  %4962 = vmatpush1.msra.mxu1 %v12740_v59  ;;  %v4100_v43 = vadd.f32 %v12774_v39, %v12766_v3  ;;  %v10754_v39 = vld [vmem:[#allocation9 + $0xe0] sm:$0xff]  ;;  %v10829_v3 = vld [vmem:[#allocation9 + $0x30] sm:$0xff] }
 0x99e   :  { %4892 = vmatprep.subr.mxu0 %v12741_v27  ;;  %4963 = vmatprep.subr.mxu1 %v12742_v50  ;;  %v12775_v50 = vld [vmem:[#allocation35_spill] sm:$0xff]  ;;  %12794 = vst [vmem:[#allocation15_spill] sm:$0xff] %v10829_v3 }
 0x99f   :  { %4893 = vmatpush1.msra.mxu0 %v12756_v49  ;;  %4964 = vmatpush1.msra.mxu1 %v12757_v48  ;;  %v4102_v11 = vadd.f32 %v12775_v50, %v12768_v17  ;;  %v10766_v50 = vld [vmem:[#allocation9 + $0xc0] sm:$0xff] }
 0x9a0   :  { %4894 = vmatprep.subr.mxu0 %v12745_v54  ;;  %4965 = vmatprep.subr.mxu1 %v12758_v30  ;;  %v10826_v17 = vld [vmem:[#allocation9 + $0x20] sm:$0xff] }
 0x9a1   :  { %4895 = vmatpush1.msra.mxu0 %v12759_v47  ;;  %4966 = vmatpush1.msra.mxu1 %v12748_v41  ;;  %12793 = vst [vmem:[#allocation75_spill] sm:$0xff] %v10826_v17 }
 0x9a2   :  { %4896 = vmatprep.subr.mxu0 %v12749_v34  ;;  %4967 = vmatprep.subr.mxu1 %v12750_v35 }
 0x9a3   :  { %4897 = vmatpush1.msra.mxu0 %v12751_v31  ;;  %4968 = vmatpush1.msra.mxu1 %v12753_v56  ;;  %v12771_v31 = vld [vmem:[#allocation33_spill] sm:$0xff] }
 0x9a4   :  { %4930 = vmatprep.mubr.f32.mxu0 %v12752_v37  ;;  %5001 = vmatprep.mubr.f32.mxu1 %v12752_v37  ;;  %v3941_v41 = vadd.f32 %v12771_v31, %v12764_v5  ;;  %v10720_v31 = vld [vmem:[#allocation9 + $0x128] sm:$0xff] }
 0x9a5   :  { %5036 = vmatprep.subr.mxu0 %v10628_v42  ;;  %5107 = vmatprep.subr.mxu1 %v10631_v16 }
 0xa22   :  { %v4584_v55 = vpop.f32.mrf.mxu0  ;;  %v4655_v9 = vpop.f32.mrf.mxu1 }
 0xa23   :  { %v4660_v62 = vadd.f32 %v4584_v55, %v3933_v60  ;;  %v4662_v14 = vadd.f32 %v4655_v9, %v4094_v44  ;;  %v10654_v60 = vld [vmem:[#allocation9 + $0x1e0] sm:$0xff]  ;;  %v10657_v55 = vld [vmem:[#allocation9 + $0x1f0] sm:$0xff]  ;;  %v10687_v44 = vld [vmem:[#allocation9 + $0x198] sm:$0xff] }
 0xa24   :  { %v4586_v63 = vpop.f32.mrf.mxu0  ;;  %v4657_v7 = vpop.f32.mrf.mxu1  ;;  %v10681_v9 = vld [vmem:[#allocation9 + $0x1b0] sm:$0xff] }
 0xa25   :  { %v7159_v25 = vmul.f32 -1.442695, %v4660_v62  ;;  %v4661_v13 = vadd.f32 %v4586_v63, %v3935_v28  ;;  %v7161_v22 = vmul.f32 -1.442695, %v4662_v14  ;;  %v4663_v61 = vadd.f32 %v4657_v7, %v4096_v53  ;;  %v10663_v28 = vld [vmem:[#allocation9 + $0x1d8] sm:$0xff]  ;;  %v10666_v62 = vld [vmem:[#allocation9 + $0x1c0] sm:$0xff] }
 0xa26   :  { %v10669_v63 = vld [vmem:[#allocation9 + $0x1d0] sm:$0xff]  ;;  %v10690_v14 = vld [vmem:[#allocation9 + $0x180] sm:$0xff]  ;;  %v10696_v53 = vld [vmem:[#allocation9 + $0x168] sm:$0xff] }
 0xa27   :  { %7554 = vpow2.f32 %v7159_v25  ;;  %v7160_v18 = vmul.f32 -1.442695, %v4661_v13  ;;  %v10672_v25 = vld [vmem:[#allocation9 + $0x1a8] sm:$0xff]  ;;  %v10675_v13 = vld [vmem:[#allocation9 + $0x1b8] sm:$0xff]  ;;  %v10693_v7 = vld [vmem:[#allocation9 + $0x190] sm:$0xff] }
 0xa29   :  { %7556 = vpow2.f32 %v7160_v18  ;;  %v10678_v18 = vld [vmem:[#allocation9 + $0x1a0] sm:$0xff] }
 0xa2a   :  { %7558 = vpow2.f32 %v7161_v22  ;;  %v10699_v22 = vld [vmem:[#allocation9 + $0x178] sm:$0xff] }
 0xa2b   :  { %7560 = vtanh.f32 %v4663_v61 }
 0xa34   :  { %v7555_v19 = vpop.eup %7554 }
 0xa35   :  { %v4673_v1 = vadd.f32 1.0, %v7555_v19  ;;  %v10702_v19 = vld [vmem:[#allocation9 + $0x160] sm:$0xff] }
 0xa36   :  { %v7557_v23 = vpop.eup %7556 }
 0xa37   :  { %7562 = vrcp.f32 %v4673_v1  ;;  %v4674_v12 = vadd.f32 1.0, %v7557_v23  ;;  %v7559_v6 = vpop.eup %7558  ;;  %v10705_v1 = vld [vmem:[#allocation9 + $0x170] sm:$0xff] }
 0xa38   :  { %v7561_v40 = vpop.eup %7560  ;;  %v4675_v34 = vadd.f32 1.0, %v7559_v6  ;;  %v10711_v6 = vld [vmem:[#allocation9 + $0x158] sm:$0xff] }
 0xa39   :  { %7564 = vrcp.f32 %v4674_v12  ;;  %v10708_v12 = vld [vmem:[#allocation9 + $0x148] sm:$0xff] }
 0xa43   :  { %v4754_v15 = vpop.f32.mrf.mxu0  ;;  %v4825_v26 = vpop.f32.mrf.mxu1 }
 0xa44   :  { %v7563_v10 = vpop.eup %7562  ;;  %v4830_v35 = vadd.f32 %v4754_v15, %v3939_v45  ;;  %v4832_v59 = vadd.f32 %v4825_v26, %v4100_v43  ;;  %v10714_v45 = vld [vmem:[#allocation9 + $0x140] sm:$0xff]  ;;  %v10750_v26 = vld [vmem:[#allocation9 + $0xf8] sm:$0xff]  ;;  %v10757_v43 = vld [vmem:[#allocation9 + $0xf0] sm:$0xff] }
 0xa45   :  { %v4684_v32 = vmul.f32 %v7563_v10, %v7561_v40  ;;  %v4756_v29 = vpop.f32.mrf.mxu0  ;;  %v4827_v27 = vpop.f32.mrf.mxu1  ;;  %v10717_v40 = vld [vmem:[#allocation9 + $0x150] sm:$0xff] }
 0xa46   :  { %v7565_v36 = vpop.eup %7564  ;;  %v7162_v4 = vmul.f32 -1.442695, %v4830_v35  ;;  %v4831_v2 = vadd.f32 %v4756_v29, %v3941_v41  ;;  %v7164_v56 = vmul.f32 -1.442695, %v4832_v59  ;;  %v4833_v21 = vadd.f32 %v4827_v27, %v4102_v11  ;;  %v10723_v41 = vld [vmem:[#allocation9 + $0x138] sm:$0xff]  ;;  %v10730_v29 = vld [vmem:[#allocation9 + $0x130] sm:$0xff] }
 0xa47   :  { %v4683_v52 = vmul.f32 %v7565_v36, %v12772_v58  ;;  %v12776_v35 = vld [vmem:[#allocation101_spill] sm:$0xff]  ;;  %v10733_v36 = vld [vmem:[#allocation9 + $0x108] sm:$0xff]  ;;  %v10741_v58 = vld [vmem:[#allocation9 + $0x100] sm:$0xff] }
 0xa48   :  { %7566 = vpow2.f32 %v7162_v4  ;;  %v7163_v33 = vmul.f32 -1.442695, %v4831_v2  ;;  %v10736_v4 = vld [vmem:[#allocation9 + $0x118] sm:$0xff]  ;;  %v10760_v59 = vld [vmem:[#allocation9 + $0xc8] sm:$0xff]  ;;  %v10769_v11 = vld [vmem:[#allocation9 + $0xd0] sm:$0xff] }
 0xa49   :  { %7568 = vrcp.f32 %v4675_v34  ;;  %v10647_v20 = vadd.f32 %v4684_v32, %v4683_v52  ;;  %v10727_v32 = vld [vmem:[#allocation9 + $0x120] sm:$0xff]  ;;  %v10744_v52 = vld [vmem:[#allocation9 + $0x110] sm:$0xff]  ;;  %v10763_v27 = vld [vmem:[#allocation9 + $0xd8] sm:$0xff] }
 0xa4a   :  { %7570 = vpow2.f32 %v7163_v33  ;;  %v10747_v33 = vld [vmem:[#allocation9 + $0xe8] sm:$0xff] }
 0xa4b   :  { %12773 = vst [vmem:[#allocation34_spill] sm:$0xff] %v10647_v20  ;;  %7572 = vtanh.f32 %v10647_v20 }
 0xa4c   :  { %7574 = vpow2.f32 %v7164_v56  ;;  %v10772_v56 = vld [vmem:[#allocation9 + $0xa8] sm:$0xff] }
 0xa4d   :  { %7576 = vtanh.f32 %v4833_v21  ;;  %v10775_v21 = vld [vmem:[#allocation9 + $0xb8] sm:$0xff] }
 0xa55   :  { %v7567_v54 = vpop.eup %7566 }
 0xa56   :  { %v7569_v38 = vpop.eup %7568  ;;  %v4843_v49 = vadd.f32 1.0, %v7567_v54  ;;  %v10778_v54 = vld [vmem:[#allocation9 + $0xa0] sm:$0xff] }
 0xa57   :  { %v7571_v48 = vpop.eup %7570 }
 0xa58   :  { %v7573_v30 = vpop.eup %7572  ;;  %7578 = vrcp.f32 %v4843_v49  ;;  %v4844_v47 = vadd.f32 1.0, %v7571_v48  ;;  %v10784_v49 = vld [vmem:[#allocation9 + $0x88] sm:$0xff]  ;;  %v10787_v48 = vld [vmem:[#allocation9 + $0x98] sm:$0xff] }
 0xa59   :  { %v4687_v57 = vmul.f32 %v7573_v30, %v7569_v38  ;;  %v7575_v46 = vpop.eup %7574  ;;  %v10781_v38 = vld [vmem:[#allocation9 + $0xb0] sm:$0xff]  ;;  %12779 = vst [vmem:[#allocation62_spill] sm:$0xff] %v10784_v49  ;;  %12780 = vst [vmem:[#allocation36_spill] sm:$0xff] %v10787_v48  ;;  %v10790_v30 = vld [vmem:[#allocation9 + $0x80] sm:$0xff] }
 0xa5a   :  { %7580 = vrcp.f32 %v4844_v47  ;;  %v7577_v61 = vpop.eup %7576  ;;  %v4845_v10 = vadd.f32 1.0, %v7575_v46  ;;  %12778 = vst [vmem:[#allocation25_spill] sm:$0xff] %v10781_v38  ;;  %12781 = vst [vmem:[#allocation59_spill] sm:$0xff] %v10790_v30  ;;  %v10793_v47 = vld [vmem:[#allocation9 + $0x90] sm:$0xff]  ;;  %v10799_v46 = vld [vmem:[#allocation9 + $0x78] sm:$0xff] }
 0xa5b   :  { %4931 = vmatmul.mubr.f32.vlgmr.msra.gmra.mxu0 %v4687_v57  ;;  %5002 = vmatmul.mubr.f32.vlgmr.msra.gmra.mxu1 %v4687_v57  ;;  %12782 = vst [vmem:[#allocation61_spill] sm:$0xff] %v10793_v47  ;;  %v10796_v57 = vld [vmem:[#allocation9 + $0x68] sm:$0xff]  ;;  %12784 = vst [vmem:[#allocation78_spill] sm:$0xff] %v10799_v46 }
 0xa5c   :  { %5037 = vmatpush1.msra.mxu0 %v10654_v60  ;;  %5108 = vmatpush1.msra.mxu1 %v10657_v55  ;;  %7582 = vrcp.f32 %v4845_v10  ;;  %12783 = vst [vmem:[#allocation82_spill] sm:$0xff] %v10796_v57  ;;  %v10814_v10 = vld [vmem:[#allocation9 + $0x40] sm:$0xff] }
 0xa5d   :  { %5038 = vmatprep.subr.mxu0 %v10660_v8  ;;  %5109 = vmatprep.subr.mxu1 %v10663_v28  ;;  %12789 = vst [vmem:[#allocation86_spill] sm:$0xff] %v10814_v10 }
 0xa5e   :  { %5039 = vmatpush1.msra.mxu0 %v10666_v62  ;;  %5110 = vmatpush1.msra.mxu1 %v10669_v63 }
 0xa5f   :  { %5040 = vmatprep.subr.mxu0 %v10672_v25  ;;  %5111 = vmatprep.subr.mxu1 %v10675_v13 }
 0xa60   :  { %5041 = vmatpush1.msra.mxu0 %v10678_v18  ;;  %5112 = vmatpush1.msra.mxu1 %v10681_v9 }
 0xa61   :  { %5042 = vmatprep.subr.mxu0 %v10684_v24  ;;  %5113 = vmatprep.subr.mxu1 %v10687_v44 }
 0xa62   :  { %5043 = vmatpush1.msra.mxu0 %v10690_v14  ;;  %5114 = vmatpush1.msra.mxu1 %v10693_v7 }
 0xa63   :  { %5044 = vmatprep.subr.mxu0 %v10696_v53  ;;  %5115 = vmatprep.subr.mxu1 %v10699_v22 }
 0xa64   :  { %5045 = vmatpush1.msra.mxu0 %v10702_v19  ;;  %5116 = vmatpush1.msra.mxu1 %v10705_v1 }
 0xa65   :  { %v7579_v23 = vpop.eup %7578  ;;  %5046 = vmatprep.subr.mxu0 %v10708_v12  ;;  %5117 = vmatprep.subr.mxu1 %v10711_v6 }
 0xa66   :  { %v4854_v0 = vmul.f32 %v7579_v23, %v7577_v61  ;;  %5047 = vmatpush1.msra.mxu0 %v10714_v45  ;;  %5118 = vmatpush1.msra.mxu1 %v10717_v40  ;;  %v10802_v61 = vld [vmem:[#allocation9 + $0x60] sm:$0xff]  ;;  %v10805_v23 = vld [vmem:[#allocation9 + $0x70] sm:$0xff] }
 0xa67   :  { %v7581_v15 = vpop.eup %7580  ;;  %5048 = vmatprep.subr.mxu0 %v10720_v31  ;;  %5119 = vmatprep.subr.mxu1 %v10723_v41  ;;  %12785 = vst [vmem:[#allocation66_spill] sm:$0xff] %v10802_v61  ;;  %12786 = vst [vmem:[#allocation65_spill] sm:$0xff] %v10805_v23 }
 0xa68   :  { %v4853_v34 = vmul.f32 %v7581_v15, %v12776_v35  ;;  %5049 = vmatpush1.msra.mxu0 %v10727_v32  ;;  %5120 = vmatpush1.msra.mxu1 %v10730_v29  ;;  %v10811_v15 = vld [vmem:[#allocation9 + $0x58] sm:$0xff]  ;;  %v10817_v35 = vld [vmem:[#allocation9 + $0x50] sm:$0xff] }
 0xa69   :  { %5050 = vmatprep.subr.mxu0 %v10733_v36  ;;  %5121 = vmatprep.subr.mxu1 %v10736_v4  ;;  %12788 = vst [vmem:[#allocation50_spill] sm:$0xff] %v10811_v15  ;;  %12790 = vst [vmem:[#allocation70_spill] sm:$0xff] %v10817_v35  ;;  %v7583_v20 = vpop.eup %7582 }
 0xa6a   :  { %v10739_v2 = vadd.f32 %v4854_v0, %v4853_v34  ;;  %5051 = vmatpush1.msra.mxu0 %v10741_v58  ;;  %5122 = vmatpush1.msra.mxu1 %v10744_v52  ;;  %v10808_v0 = vld [vmem:[#allocation9 + $0x48] sm:$0xff] }
 0xa6b   :  { %5052 = vmatprep.subr.mxu0 %v10747_v33  ;;  %5123 = vmatprep.subr.mxu1 %v10750_v26  ;;  %12787 = vst [vmem:[#allocation83_spill] sm:$0xff] %v10808_v0  ;;  %v10820_v34 = vld [vmem:[#allocation9 + $0x28] sm:$0xff] }
 0xa6c   :  { %12777 = vst [vmem:[#allocation76_spill] sm:$0xff] %v10739_v2  ;;  %7584 = vtanh.f32 %v10739_v2  ;;  %5053 = vmatpush1.msra.mxu0 %v10754_v39  ;;  %5124 = vmatpush1.msra.mxu1 %v10757_v43  ;;  %12791 = vst [vmem:[#allocation29_spill] sm:$0xff] %v10820_v34  ;;  %v10823_v2 = vld [vmem:[#allocation9 + $0x38] sm:$0xff] }
 0xa6d   :  { %5054 = vmatprep.subr.mxu0 %v10760_v59  ;;  %5125 = vmatprep.subr.mxu1 %v10763_v27  ;;  %12792 = vst [vmem:[#allocation85_spill] sm:$0xff] %v10823_v2 }
 0xa6e   :  { %5055 = vmatpush1.msra.mxu0 %v10766_v50  ;;  %5126 = vmatpush1.msra.mxu1 %v10769_v11 }
 0xa6f   :  { %5056 = vmatprep.subr.mxu0 %v10772_v56  ;;  %5127 = vmatprep.subr.mxu1 %v10775_v21 }
 0xa70   :  { %5057 = vmatpush1.msra.mxu0 %v10778_v54  ;;  %5128 = vmatpush1.msra.mxu1 %v10781_v38 }
 0xa71   :  { %5058 = vmatprep.subr.mxu0 %v10784_v49  ;;  %5129 = vmatprep.subr.mxu1 %v10787_v48 }
 0xa72   :  { %5059 = vmatpush1.msra.mxu0 %v10790_v30  ;;  %5130 = vmatpush1.msra.mxu1 %v10793_v47 }
 0xa73   :  { %5060 = vmatprep.subr.mxu0 %v10796_v57  ;;  %5131 = vmatprep.subr.mxu1 %v10799_v46 }
 0xa74   :  { %5061 = vmatpush1.msra.mxu0 %v10802_v61  ;;  %5132 = vmatpush1.msra.mxu1 %v10805_v23 }
 0xa75   :  { %5062 = vmatprep.subr.mxu0 %v10808_v0  ;;  %5133 = vmatprep.subr.mxu1 %v10811_v15 }
 0xa76   :  { %5063 = vmatpush1.msra.mxu0 %v10814_v10  ;;  %5134 = vmatpush1.msra.mxu1 %v10817_v35  ;;  %v10835_v35 = vld [vmem:[#allocation9 + $0x18] sm:$0xff] }
 0xa77   :  { %5064 = vmatprep.subr.mxu0 %v10820_v34  ;;  %5135 = vmatprep.subr.mxu1 %v10823_v2  ;;  %12796 = vst [vmem:[#allocation80_spill] sm:$0xff] %v10835_v35  ;;  %v10838_v34 = vld [vmem:[#allocation9] sm:$0xff]  ;;  %v10842_v2 = vld [vmem:[#allocation9 + $0x10] sm:$0xff] }
 0xa78   :  { %5065 = vmatpush1.msra.mxu0 %v10826_v17  ;;  %5136 = vmatpush1.msra.mxu1 %v10829_v3  ;;  %12797 = vst [vmem:[#allocation84_spill] sm:$0xff] %v10838_v34  ;;  %12798 = vst [vmem:[#allocation73_spill] sm:$0xff] %v10842_v2 }
 0xa79   :  { %v7585_v5 = vpop.eup %7584  ;;  %5066 = vmatprep.subr.mxu0 %v10832_v51  ;;  %5137 = vmatprep.subr.mxu1 %v10835_v35 }
 0xa7a   :  { %5067 = vmatpush1.msra.mxu0 %v10838_v34  ;;  %5100 = vmatprep.mubr.f32.mxu0 %v12752_v37  ;;  %v4857_v17 = vmul.f32 %v7585_v5, %v7583_v20  ;;  %v12799_v5 = vld [vmem:[#allocation70_spill] sm:$0xff]  ;;  %v12801_v20 = vld [vmem:[#allocation85_spill] sm:$0xff] }
 0xa7b   :  { %5138 = vmatpush1.msra.mxu1 %v10842_v2  ;;  %5171 = vmatprep.mubr.f32.mxu1 %v12752_v37 }
 0xa7c   :  { %5101 = vmatmul.mubr.f32.vlgmr.msra.gmra.mxu0 %v4857_v17  ;;  %5172 = vmatmul.mubr.f32.vlgmr.msra.gmra.mxu1 %v4857_v17  ;;  %v12800_v17 = vld [vmem:[#allocation29_spill] sm:$0xff] }
 0xa7d   :  { %5214 = vmatprep.subr.mxu0 %v10628_v42  ;;  %5285 = vmatprep.subr.mxu1 %v10631_v16 }
 0xa7e   :  { %5215 = vmatpush1.msra.mxu0 %v10654_v60  ;;  %5286 = vmatpush1.msra.mxu1 %v10657_v55 }
 0xa7f   :  { %5216 = vmatprep.subr.mxu0 %v10660_v8  ;;  %5287 = vmatprep.subr.mxu1 %v10663_v28 }
 0xa80   :  { %5217 = vmatpush1.msra.mxu0 %v10666_v62  ;;  %5288 = vmatpush1.msra.mxu1 %v10669_v63 }
 0xa81   :  { %5218 = vmatprep.subr.mxu0 %v10672_v25  ;;  %5289 = vmatprep.subr.mxu1 %v10675_v13 }
 0xa82   :  { %5219 = vmatpush1.msra.mxu0 %v10678_v18  ;;  %5290 = vmatpush1.msra.mxu1 %v10681_v9 }
 0xa83   :  { %5220 = vmatprep.subr.mxu0 %v10684_v24  ;;  %5291 = vmatprep.subr.mxu1 %v10687_v44 }
 0xa84   :  { %5221 = vmatpush1.msra.mxu0 %v10690_v14  ;;  %5292 = vmatpush1.msra.mxu1 %v10693_v7 }
 0xa85   :  { %5222 = vmatprep.subr.mxu0 %v10696_v53  ;;  %5293 = vmatprep.subr.mxu1 %v10699_v22 }
 0xa86   :  { %5223 = vmatpush1.msra.mxu0 %v10702_v19  ;;  %5294 = vmatpush1.msra.mxu1 %v10705_v1 }
 0xa87   :  { %5224 = vmatprep.subr.mxu0 %v10708_v12  ;;  %5295 = vmatprep.subr.mxu1 %v10711_v6 }
 0xa88   :  { %5225 = vmatpush1.msra.mxu0 %v10714_v45  ;;  %5296 = vmatpush1.msra.mxu1 %v10717_v40 }
 0xa89   :  { %5226 = vmatprep.subr.mxu0 %v10720_v31  ;;  %5297 = vmatprep.subr.mxu1 %v10723_v41 }
 0xa8a   :  { %5227 = vmatpush1.msra.mxu0 %v10727_v32  ;;  %5298 = vmatpush1.msra.mxu1 %v10730_v29 }
 0xa8b   :  { %5228 = vmatprep.subr.mxu0 %v10733_v36  ;;  %5299 = vmatprep.subr.mxu1 %v10736_v4 }
 0xa8c   :  { %5229 = vmatpush1.msra.mxu0 %v10741_v58  ;;  %5300 = vmatpush1.msra.mxu1 %v10744_v52 }
 0xa8d   :  { %5230 = vmatprep.subr.mxu0 %v10747_v33  ;;  %5301 = vmatprep.subr.mxu1 %v10750_v26 }
 0xa8e   :  { %5231 = vmatpush1.msra.mxu0 %v10754_v39  ;;  %5302 = vmatpush1.msra.mxu1 %v10757_v43 }
 0xa8f   :  { %5232 = vmatprep.subr.mxu0 %v10760_v59  ;;  %5303 = vmatprep.subr.mxu1 %v10763_v27 }
 0xa90   :  { %5233 = vmatpush1.msra.mxu0 %v10766_v50  ;;  %5304 = vmatpush1.msra.mxu1 %v10769_v11 }
 0xa91   :  { %5234 = vmatprep.subr.mxu0 %v10772_v56  ;;  %5305 = vmatprep.subr.mxu1 %v10775_v21 }
 0xa92   :  { %5235 = vmatpush1.msra.mxu0 %v10778_v54  ;;  %5306 = vmatpush1.msra.mxu1 %v10781_v38 }
 0xa93   :  { %5236 = vmatprep.subr.mxu0 %v10784_v49  ;;  %5307 = vmatprep.subr.mxu1 %v10787_v48 }
 0xa94   :  { %5237 = vmatpush1.msra.mxu0 %v10790_v30  ;;  %5308 = vmatpush1.msra.mxu1 %v10793_v47  ;;  %v12802_v47 = vld [vmem:[#allocation75_spill] sm:$0xff]  ;;  %v12810_v30 = vld [vmem:[#allocation74_spill] sm:$0xff] }
 0xa95   :  { %5238 = vmatprep.subr.mxu0 %v10796_v57  ;;  %5309 = vmatprep.subr.mxu1 %v10799_v46  ;;  %v12809_v57 = vld [vmem:[#allocation40_spill] sm:$0xff] }
 0xa96   :  { %5239 = vmatpush1.msra.mxu0 %v10802_v61  ;;  %5310 = vmatpush1.msra.mxu1 %v10805_v23  ;;  %v12808_v61 = vld [vmem:[#allocation55_spill] sm:$0xff] }
 0xa97   :  { %5240 = vmatprep.subr.mxu0 %v10808_v0  ;;  %5311 = vmatprep.subr.mxu1 %v10811_v15 }
 0xa98   :  { %5241 = vmatpush1.msra.mxu0 %v10814_v10  ;;  %5312 = vmatpush1.msra.mxu1 %v12799_v5  ;;  %v12805_v5 = vld [vmem:[#allocation95_spill] sm:$0xff] }
 0xa99   :  { %5242 = vmatprep.subr.mxu0 %v12800_v17  ;;  %5313 = vmatprep.subr.mxu1 %v12801_v20  ;;  %v12803_v20 = vld [vmem:[#allocation27_spill] sm:$0xff] }
 0xa9a   :  { %5243 = vmatpush1.msra.mxu0 %v12802_v47  ;;  %5314 = vmatpush1.msra.mxu1 %v10829_v3  ;;  %v12804_v47 = vld [vmem:[#allocation90_spill] sm:$0xff] }
 0xa9b   :  { %5244 = vmatprep.subr.mxu0 %v10832_v51  ;;  %5315 = vmatprep.subr.mxu1 %v10835_v35  ;;  %v3945_v17 = vadd.f32 %v12804_v47, %v12803_v20  ;;  %v12806_v51 = vld [vmem:[#allocation54_spill] sm:$0xff]  ;;  %v4108_v47 = vadd.f32 %v12810_v30, %v12809_v57 }
 0xa9c   :  { %5245 = vmatpush1.msra.mxu0 %v10838_v34  ;;  %5316 = vmatpush1.msra.mxu1 %v10842_v2  ;;  %v3947_v10 = vadd.f32 %v12806_v51, %v12805_v5 }
 0xa9d   :  { %5278 = vmatprep.mubr.f32.mxu0 %v12752_v37  ;;  %5349 = vmatprep.mubr.f32.mxu1 %v12752_v37  ;;  %v12807_v37 = vld [vmem:[#allocation98_spill] sm:$0xff] }
 0xa9e   :  { %5384 = vmatprep.subr.mxu0 %v10628_v42  ;;  %5455 = vmatprep.subr.mxu1 %v10631_v16  ;;  %v4106_v42 = vadd.f32 %v12808_v61, %v12807_v37 }
 0xb1b   :  { %v4932_v3 = vpop.f32.mrf.mxu0  ;;  %v5003_v23 = vpop.f32.mrf.mxu1 }
 0xb1c   :  { %v5008_v35 = vadd.f32 %v4932_v3, %v3945_v17  ;;  %v5010_v46 = vadd.f32 %v5003_v23, %v4106_v42 }
 0xb1d   :  { %v4934_v15 = vpop.f32.mrf.mxu0  ;;  %v5005_v16 = vpop.f32.mrf.mxu1 }
 0xb1e   :  { %v7165_v34 = vmul.f32 -1.442695, %v5008_v35  ;;  %v5009_v0 = vadd.f32 %v4934_v15, %v3947_v10  ;;  %v7167_v48 = vmul.f32 -1.442695, %v5010_v46  ;;  %v5011_v49 = vadd.f32 %v5005_v16, %v4108_v47  ;;  %v12812_v35 = vld [vmem:[#allocation68_spill] sm:$0xff]  ;;  %v12813_v47 = vld [vmem:[#allocation34_spill] sm:$0xff] }
 0xb1f   :  { %v3953_v30 = vadd.f32 %v12812_v35, %v12805_v5  ;;  %v12815_v35 = vld [vmem:[#allocation56_spill] sm:$0xff] }
 0xb20   :  { %7586 = vpow2.f32 %v7165_v34  ;;  %v7166_v2 = vmul.f32 -1.442695, %v5009_v0  ;;  %v12811_v0 = vld [vmem:[#allocation67_spill] sm:$0xff]  ;;  %v12838_v5 = vld [vmem:[#allocation84_spill] sm:$0xff] }
 0xb21   :  { %v3951_v10 = vadd.f32 %v12811_v0, %v12803_v20  ;;  %v12839_v20 = vmov 0.0  }
 0xb22   :  { %7588 = vpow2.f32 %v7166_v2 }
 0xb23   :  { %7590 = vpow2.f32 %v7167_v48 }
 0xb24   :  { %7592 = vtanh.f32 %v5011_v49 }
 0xb2d   :  { %v7587_v38 = vpop.eup %7586 }
 0xb2e   :  { %v5021_v51 = vadd.f32 1.0, %v7587_v38 }
 0xb2f   :  { %v7589_v3 = vpop.eup %7588 }
 0xb30   :  { %7594 = vrcp.f32 %v5021_v51  ;;  %v5022_v15 = vadd.f32 1.0, %v7589_v3  ;;  %v7591_v2 = vpop.eup %7590 }
 0xb31   :  { %v7593_v61 = vpop.eup %7592  ;;  %v5023_v16 = vadd.f32 1.0, %v7591_v2 }
 0xb32   :  { %7596 = vrcp.f32 %v5022_v15 }
 0xb3c   :  { %v5102_v42 = vpop.f32.mrf.mxu0  ;;  %v5173_v0 = vpop.f32.mrf.mxu1 }
 0xb3d   :  { %v7595_v23 = vpop.eup %7594  ;;  %v5178_v46 = vadd.f32 %v5102_v42, %v3951_v10  ;;  %v4112_v10 = vadd.f32 %v12815_v35, %v12807_v37  ;;  %v12816_v42 = vld [vmem:[#allocation28_spill] sm:$0xff] }
 0xb3e   :  { %v5032_v34 = vmul.f32 %v7595_v23, %v7593_v61  ;;  %v5104_v38 = vpop.f32.mrf.mxu0  ;;  %v5175_v61 = vpop.f32.mrf.mxu1  ;;  %v4114_v23 = vadd.f32 %v12816_v42, %v12809_v57  ;;  %v12836_v57 = vld [vmem:[#allocation16_spill] sm:$0xff] }
 0xb3f   :  { %v7597_v48 = vpop.eup %7596  ;;  %v7168_v17 = vmul.f32 -1.442695, %v5178_v46  ;;  %v5179_v49 = vadd.f32 %v5104_v38, %v3953_v30  ;;  %v5180_v2 = vadd.f32 %v5173_v0, %v4112_v10  ;;  %v12837_v37 = vld [vmem:[#allocation80_spill] sm:$0xff] }
 0xb40   :  { %v5031_v51 = vmul.f32 %v7597_v48, %v12813_v47  ;;  %v5181_v46 = vadd.f32 %v5175_v61, %v4114_v23  ;;  %v12817_v61 = vld [vmem:[#allocation76_spill] sm:$0xff] }
 0xb41   :  { %7598 = vpow2.f32 %v7168_v17  ;;  %v7169_v3 = vmul.f32 -1.442695, %v5179_v49  ;;  %v7170_v30 = vmul.f32 -1.442695, %v5180_v2 }
 0xb42   :  { %7600 = vrcp.f32 %v5023_v16  ;;  %v10927_v15 = vadd.f32 %v5032_v34, %v5031_v51 }
 0xb43   :  { %7602 = vpow2.f32 %v7169_v3 }
 0xb44   :  { %12814 = vst [vmem:[#allocation69_spill] sm:$0xff] %v10927_v15  ;;  %7604 = vtanh.f32 %v10927_v15 }
 0xb45   :  { %7606 = vpow2.f32 %v7170_v30  ;;  %v12819_v30 = vld [vmem:[#allocation25_spill] sm:$0xff] }
 0xb46   :  { %7608 = vtanh.f32 %v5181_v46  ;;  %v12820_v46 = vld [vmem:[#allocation62_spill] sm:$0xff] }
 0xb4e   :  { %v7599_v38 = vpop.eup %7598 }
 0xb4f   :  { %v7601_v48 = vpop.eup %7600  ;;  %v5191_v17 = vadd.f32 1.0, %v7599_v38  ;;  %v12821_v38 = vld [vmem:[#allocation36_spill] sm:$0xff] }
 0xb50   :  { %v7603_v16 = vpop.eup %7602 }
 0xb51   :  { %v7605_v34 = vpop.eup %7604  ;;  %7610 = vrcp.f32 %v5191_v17  ;;  %v5192_v49 = vadd.f32 1.0, %v7603_v16  ;;  %v12823_v17 = vld [vmem:[#allocation61_spill] sm:$0xff]  ;;  %v12824_v16 = vld [vmem:[#allocation82_spill] sm:$0xff] }
 0xb52   :  { %v5035_v47 = vmul.f32 %v7605_v34, %v7601_v48  ;;  %v7607_v51 = vpop.eup %7606  ;;  %v12822_v48 = vld [vmem:[#allocation59_spill] sm:$0xff]  ;;  %v12825_v34 = vld [vmem:[#allocation78_spill] sm:$0xff] }
 0xb53   :  { %7612 = vrcp.f32 %v5192_v49  ;;  %v7609_v3 = vpop.eup %7608  ;;  %v5193_v2 = vadd.f32 1.0, %v7607_v51  ;;  %v12826_v49 = vld [vmem:[#allocation66_spill] sm:$0xff]  ;;  %v12828_v51 = vld [vmem:[#allocation83_spill] sm:$0xff] }
 0xb54   :  { %5279 = vmatmul.mubr.f32.vlgmr.msra.gmra.mxu0 %v5035_v47  ;;  %5350 = vmatmul.mubr.f32.vlgmr.msra.gmra.mxu1 %v5035_v47  ;;  %v12827_v47 = vld [vmem:[#allocation65_spill] sm:$0xff] }
 0xb55   :  { %5385 = vmatpush1.msra.mxu0 %v10654_v60  ;;  %5456 = vmatpush1.msra.mxu1 %v10657_v55  ;;  %7614 = vrcp.f32 %v5193_v2  ;;  %v12833_v2 = vld [vmem:[#allocation85_spill] sm:$0xff] }
 0xb56   :  { %5386 = vmatprep.subr.mxu0 %v10660_v8  ;;  %5457 = vmatprep.subr.mxu1 %v10663_v28 }
 0xb57   :  { %5387 = vmatpush1.msra.mxu0 %v10666_v62  ;;  %5458 = vmatpush1.msra.mxu1 %v10669_v63 }
 0xb58   :  { %5388 = vmatprep.subr.mxu0 %v10672_v25  ;;  %5459 = vmatprep.subr.mxu1 %v10675_v13 }
 0xb59   :  { %5389 = vmatpush1.msra.mxu0 %v10678_v18  ;;  %5460 = vmatpush1.msra.mxu1 %v10681_v9 }
 0xb5a   :  { %5390 = vmatprep.subr.mxu0 %v10684_v24  ;;  %5461 = vmatprep.subr.mxu1 %v10687_v44 }
 0xb5b   :  { %5391 = vmatpush1.msra.mxu0 %v10690_v14  ;;  %5462 = vmatpush1.msra.mxu1 %v10693_v7 }
 0xb5c   :  { %5392 = vmatprep.subr.mxu0 %v10696_v53  ;;  %5463 = vmatprep.subr.mxu1 %v10699_v22 }
 0xb5d   :  { %5393 = vmatpush1.msra.mxu0 %v10702_v19  ;;  %5464 = vmatpush1.msra.mxu1 %v10705_v1 }
 0xb5e   :  { %v7611_v0 = vpop.eup %7610  ;;  %5394 = vmatprep.subr.mxu0 %v10708_v12  ;;  %5465 = vmatprep.subr.mxu1 %v10711_v6 }
 0xb5f   :  { %v5202_v35 = vmul.f32 %v7611_v0, %v7609_v3  ;;  %5395 = vmatpush1.msra.mxu0 %v10714_v45  ;;  %5466 = vmatpush1.msra.mxu1 %v10717_v40  ;;  %v12829_v3 = vld [vmem:[#allocation50_spill] sm:$0xff] }
 0xb60   :  { %v7613_v10 = vpop.eup %7612  ;;  %5396 = vmatprep.subr.mxu0 %v10720_v31  ;;  %5467 = vmatprep.subr.mxu1 %v10723_v41  ;;  %v12830_v0 = vld [vmem:[#allocation86_spill] sm:$0xff] }
 0xb61   :  { %v5201_v42 = vmul.f32 %v7613_v10, %v12817_v61  ;;  %5397 = vmatpush1.msra.mxu0 %v10727_v32  ;;  %5468 = vmatpush1.msra.mxu1 %v10730_v29  ;;  %v12832_v10 = vld [vmem:[#allocation29_spill] sm:$0xff] }
 0xb62   :  { %5398 = vmatprep.subr.mxu0 %v10733_v36  ;;  %5469 = vmatprep.subr.mxu1 %v10736_v4  ;;  %v7615_v61 = vpop.eup %7614 }
 0xb63   :  { %v10963_v23 = vadd.f32 %v5202_v35, %v5201_v42  ;;  %5399 = vmatpush1.msra.mxu0 %v10741_v58  ;;  %5470 = vmatpush1.msra.mxu1 %v10744_v52  ;;  %v12831_v35 = vld [vmem:[#allocation70_spill] sm:$0xff]  ;;  %v12834_v42 = vld [vmem:[#allocation75_spill] sm:$0xff] }
 0xb64   :  { %5400 = vmatprep.subr.mxu0 %v10747_v33  ;;  %5471 = vmatprep.subr.mxu1 %v10750_v26 }
 0xb65   :  { %12818 = vst [vmem:[#allocation77_spill] sm:$0xff] %v10963_v23  ;;  %7616 = vtanh.f32 %v10963_v23  ;;  %5401 = vmatpush1.msra.mxu0 %v10754_v39  ;;  %5472 = vmatpush1.msra.mxu1 %v10757_v43  ;;  %v12835_v23 = vld [vmem:[#allocation15_spill] sm:$0xff] }
 0xb66   :  { %5402 = vmatprep.subr.mxu0 %v10760_v59  ;;  %5473 = vmatprep.subr.mxu1 %v10763_v27 }
 0xb67   :  { %5403 = vmatpush1.msra.mxu0 %v10766_v50  ;;  %5474 = vmatpush1.msra.mxu1 %v10769_v11 }
 0xb68   :  { %5404 = vmatprep.subr.mxu0 %v10772_v56  ;;  %5475 = vmatprep.subr.mxu1 %v10775_v21 }
 0xb69   :  { %5405 = vmatpush1.msra.mxu0 %v10778_v54  ;;  %5476 = vmatpush1.msra.mxu1 %v12819_v30 }
 0xb6a   :  { %5406 = vmatprep.subr.mxu0 %v12820_v46  ;;  %5477 = vmatprep.subr.mxu1 %v12821_v38 }
 0xb6b   :  { %5407 = vmatpush1.msra.mxu0 %v12822_v48  ;;  %5478 = vmatpush1.msra.mxu1 %v12823_v17 }
 0xb6c   :  { %5408 = vmatprep.subr.mxu0 %v12824_v16  ;;  %5479 = vmatprep.subr.mxu1 %v12825_v34 }
 0xb6d   :  { %5409 = vmatpush1.msra.mxu0 %v12826_v49  ;;  %5480 = vmatpush1.msra.mxu1 %v12827_v47 }
 0xb6e   :  { %5410 = vmatprep.subr.mxu0 %v12828_v51  ;;  %5481 = vmatprep.subr.mxu1 %v12829_v3 }
 0xb6f   :  { %5411 = vmatpush1.msra.mxu0 %v12830_v0  ;;  %5482 = vmatpush1.msra.mxu1 %v12831_v35  ;;  %v12840_v35 = vld [vmem:[#allocation73_spill] sm:$0xff] }
 0xb70   :  { %5412 = vmatprep.subr.mxu0 %v12832_v10  ;;  %5483 = vmatprep.subr.mxu1 %v12833_v2  ;;  %v12841_v2 = vld [vmem:[#allocation23_spill] sm:$0xff] }
 0xb71   :  { %5413 = vmatpush1.msra.mxu0 %v12834_v42  ;;  %5484 = vmatpush1.msra.mxu1 %v12835_v23  ;;  %v12842_v42 = vld [vmem:[#allocation58_spill] sm:$0xff] }
 0xb72   :  { %v7617_v15 = vpop.eup %7616  ;;  %5414 = vmatprep.subr.mxu0 %v12836_v57  ;;  %5485 = vmatprep.subr.mxu1 %v12837_v37 }
 0xb73   :  { %5415 = vmatpush1.msra.mxu0 %v12838_v5  ;;  %5448 = vmatprep.mubr.f32.mxu0 %v12839_v20  ;;  %v5205_v0 = vmul.f32 %v7617_v15, %v7615_v61  ;;  %v12843_v15 = vld [vmem:[#allocation86_spill] sm:$0xff]  ;;  %v12845_v61 = vld [vmem:[#allocation85_spill] sm:$0xff] }
 0xb74   :  { %5486 = vmatpush1.msra.mxu1 %v12840_v35  ;;  %5519 = vmatprep.mubr.f32.mxu1 %v12839_v20 }
 0xb75   :  { %5449 = vmatmul.mubr.f32.vlgmr.msra.gmra.mxu0 %v5205_v0  ;;  %5520 = vmatmul.mubr.f32.vlgmr.msra.gmra.mxu1 %v5205_v0  ;;  %v12844_v0 = vld [vmem:[#allocation70_spill] sm:$0xff] }
 0xb76   :  { %5562 = vmatprep.subr.mxu0 %v12841_v2  ;;  %5633 = vmatprep.subr.mxu1 %v12842_v42 }
 0xb77   :  { %5563 = vmatpush1.msra.mxu0 %v10654_v60  ;;  %5634 = vmatpush1.msra.mxu1 %v10657_v55 }
 0xb78   :  { %5564 = vmatprep.subr.mxu0 %v10660_v8  ;;  %5635 = vmatprep.subr.mxu1 %v10663_v28 }
 0xb79   :  { %5565 = vmatpush1.msra.mxu0 %v10666_v62  ;;  %5636 = vmatpush1.msra.mxu1 %v10669_v63 }
 0xb7a   :  { %5566 = vmatprep.subr.mxu0 %v10672_v25  ;;  %5637 = vmatprep.subr.mxu1 %v10675_v13 }
 0xb7b   :  { %5567 = vmatpush1.msra.mxu0 %v10678_v18  ;;  %5638 = vmatpush1.msra.mxu1 %v10681_v9 }
 0xb7c   :  { %5568 = vmatprep.subr.mxu0 %v10684_v24  ;;  %5639 = vmatprep.subr.mxu1 %v10687_v44 }
 0xb7d   :  { %5569 = vmatpush1.msra.mxu0 %v10690_v14  ;;  %5640 = vmatpush1.msra.mxu1 %v10693_v7 }
 0xb7e   :  { %5570 = vmatprep.subr.mxu0 %v10696_v53  ;;  %5641 = vmatprep.subr.mxu1 %v10699_v22 }
 0xb7f   :  { %5571 = vmatpush1.msra.mxu0 %v10702_v19  ;;  %5642 = vmatpush1.msra.mxu1 %v10705_v1 }
 0xb80   :  { %5572 = vmatprep.subr.mxu0 %v10708_v12  ;;  %5643 = vmatprep.subr.mxu1 %v10711_v6 }
 0xb81   :  { %5573 = vmatpush1.msra.mxu0 %v10714_v45  ;;  %5644 = vmatpush1.msra.mxu1 %v10717_v40 }
 0xb82   :  { %5574 = vmatprep.subr.mxu0 %v10720_v31  ;;  %5645 = vmatprep.subr.mxu1 %v10723_v41 }
 0xb83   :  { %5575 = vmatpush1.msra.mxu0 %v10727_v32  ;;  %5646 = vmatpush1.msra.mxu1 %v10730_v29 }
 0xb84   :  { %5576 = vmatprep.subr.mxu0 %v10733_v36  ;;  %5647 = vmatprep.subr.mxu1 %v10736_v4 }
 0xb85   :  { %5577 = vmatpush1.msra.mxu0 %v10741_v58  ;;  %5648 = vmatpush1.msra.mxu1 %v10744_v52 }
 0xb86   :  { %5578 = vmatprep.subr.mxu0 %v10747_v33  ;;  %5649 = vmatprep.subr.mxu1 %v10750_v26 }
 0xb87   :  { %5579 = vmatpush1.msra.mxu0 %v10754_v39  ;;  %5650 = vmatpush1.msra.mxu1 %v10757_v43 }
 0xb88   :  { %5580 = vmatprep.subr.mxu0 %v10760_v59  ;;  %5651 = vmatprep.subr.mxu1 %v10763_v27 }
 0xb89   :  { %5581 = vmatpush1.msra.mxu0 %v10766_v50  ;;  %5652 = vmatpush1.msra.mxu1 %v10769_v11 }
 0xb8a   :  { %5582 = vmatprep.subr.mxu0 %v10772_v56  ;;  %5653 = vmatprep.subr.mxu1 %v10775_v21 }
 0xb8b   :  { %5583 = vmatpush1.msra.mxu0 %v10778_v54  ;;  %5654 = vmatpush1.msra.mxu1 %v12819_v30 }
 0xb8c   :  { %5584 = vmatprep.subr.mxu0 %v12820_v46  ;;  %5655 = vmatprep.subr.mxu1 %v12821_v38 }
 0xb8d   :  { %5585 = vmatpush1.msra.mxu0 %v12822_v48  ;;  %5656 = vmatpush1.msra.mxu1 %v12823_v17  ;;  %v12846_v17 = vld [vmem:[#allocation75_spill] sm:$0xff]  ;;  %v12854_v48 = vld [vmem:[#allocation21_spill] sm:$0xff] }
 0xb8e   :  { %5586 = vmatprep.subr.mxu0 %v12824_v16  ;;  %5657 = vmatprep.subr.mxu1 %v12825_v34  ;;  %v12853_v16 = vld [vmem:[#allocation40_spill] sm:$0xff] }
 0xb8f   :  { %5587 = vmatpush1.msra.mxu0 %v12826_v49  ;;  %5658 = vmatpush1.msra.mxu1 %v12827_v47  ;;  %v12852_v49 = vld [vmem:[#allocation19_spill] sm:$0xff] }
 0xb90   :  { %5588 = vmatprep.subr.mxu0 %v12828_v51  ;;  %5659 = vmatprep.subr.mxu1 %v12829_v3 }
 0xb91   :  { %5589 = vmatpush1.msra.mxu0 %v12843_v15  ;;  %5660 = vmatpush1.msra.mxu1 %v12844_v0  ;;  %v12849_v0 = vld [vmem:[#allocation95_spill] sm:$0xff] }
 0xb92   :  { %5590 = vmatprep.subr.mxu0 %v12832_v10  ;;  %5661 = vmatprep.subr.mxu1 %v12845_v61  ;;  %v12847_v61 = vld [vmem:[#allocation27_spill] sm:$0xff] }
 0xb93   :  { %5591 = vmatpush1.msra.mxu0 %v12846_v17  ;;  %5662 = vmatpush1.msra.mxu1 %v12835_v23  ;;  %v12848_v17 = vld [vmem:[#allocation57_spill] sm:$0xff] }
 0xb94   :  { %5592 = vmatprep.subr.mxu0 %v12836_v57  ;;  %5663 = vmatprep.subr.mxu1 %v12837_v37  ;;  %v3957_v10 = vadd.f32 %v12848_v17, %v12847_v61  ;;  %v12850_v57 = vld [vmem:[#allocation47_spill] sm:$0xff]  ;;  %v4120_v17 = vadd.f32 %v12854_v48, %v12853_v16 }
 0xb95   :  { %5593 = vmatpush1.msra.mxu0 %v12838_v5  ;;  %5664 = vmatpush1.msra.mxu1 %v12840_v35  ;;  %v3959_v15 = vadd.f32 %v12850_v57, %v12849_v0 }
 0xb96   :  { %5626 = vmatprep.mubr.f32.mxu0 %v12839_v20  ;;  %5697 = vmatprep.mubr.f32.mxu1 %v12839_v20  ;;  %v12851_v20 = vld [vmem:[#allocation98_spill] sm:$0xff] }
 0xb97   :  { %5732 = vmatprep.subr.mxu0 %v12841_v2  ;;  %5803 = vmatprep.subr.mxu1 %v12842_v42  ;;  %v4118_v2 = vadd.f32 %v12852_v49, %v12851_v20 }
 0xc14   :  { %v5280_v23 = vpop.f32.mrf.mxu0  ;;  %v5351_v47 = vpop.f32.mrf.mxu1 }
 0xc15   :  { %v5356_v37 = vadd.f32 %v5280_v23, %v3957_v10  ;;  %v5358_v34 = vadd.f32 %v5351_v47, %v4118_v2  ;;  %v12856_v10 = vld [vmem:[#allocation32_spill] sm:$0xff] }
 0xc16   :  { %v5282_v3 = vpop.f32.mrf.mxu0  ;;  %v5353_v42 = vpop.f32.mrf.mxu1  ;;  %v3965_v48 = vadd.f32 %v12856_v10, %v12849_v0  ;;  %v12859_v10 = vld [vmem:[#allocation22_spill] sm:$0xff]  ;;  %v12882_v0 = vld [vmem:[#allocation84_spill] sm:$0xff] }
 0xc17   :  { %v7171_v5 = vmul.f32 -1.442695, %v5356_v37  ;;  %v5357_v51 = vadd.f32 %v5282_v3, %v3959_v15  ;;  %v7173_v38 = vmul.f32 -1.442695, %v5358_v34  ;;  %v5359_v46 = vadd.f32 %v5353_v42, %v4120_v17  ;;  %v12857_v17 = vld [vmem:[#allocation69_spill] sm:$0xff] }
 0xc19   :  { %7618 = vpow2.f32 %v7171_v5  ;;  %v7172_v35 = vmul.f32 -1.442695, %v5357_v51  ;;  %v12855_v51 = vld [vmem:[#allocation31_spill] sm:$0xff] }
 0xc1a   :  { %v3963_v3 = vadd.f32 %v12855_v51, %v12847_v61  ;;  %v12883_v61 = vmov 0.0  }
 0xc1b   :  { %7620 = vpow2.f32 %v7172_v35 }
 0xc1c   :  { %7622 = vpow2.f32 %v7173_v38 }
 0xc1d   :  { %7624 = vtanh.f32 %v5359_v46 }
 0xc26   :  { %v7619_v30 = vpop.eup %7618 }
 0xc27   :  { %v5369_v57 = vadd.f32 1.0, %v7619_v30 }
 0xc28   :  { %v7621_v23 = vpop.eup %7620 }
 0xc29   :  { %7626 = vrcp.f32 %v5369_v57  ;;  %v5370_v37 = vadd.f32 1.0, %v7621_v23  ;;  %v7623_v5 = vpop.eup %7622 }
 0xc2a   :  { %v7625_v49 = vpop.eup %7624  ;;  %v5371_v15 = vadd.f32 1.0, %v7623_v5 }
 0xc2b   :  { %7628 = vrcp.f32 %v5370_v37 }
 0xc35   :  { %v5450_v47 = vpop.f32.mrf.mxu0  ;;  %v5521_v51 = vpop.f32.mrf.mxu1 }
 0xc36   :  { %v7627_v35 = vpop.eup %7626  ;;  %v5526_v34 = vadd.f32 %v5450_v47, %v3963_v3  ;;  %v4124_v3 = vadd.f32 %v12859_v10, %v12851_v20  ;;  %v12860_v47 = vld [vmem:[#allocation18_spill] sm:$0xff]  ;;  %v12881_v20 = vld [vmem:[#allocation80_spill] sm:$0xff] }
 0xc37   :  { %v5380_v2 = vmul.f32 %v7627_v35, %v7625_v49  ;;  %v5452_v30 = vpop.f32.mrf.mxu0  ;;  %v5523_v49 = vpop.f32.mrf.mxu1  ;;  %v4126_v35 = vadd.f32 %v12860_v47, %v12853_v16  ;;  %v12880_v16 = vld [vmem:[#allocation16_spill] sm:$0xff] }
 0xc38   :  { %v7629_v38 = vpop.eup %7628  ;;  %v7174_v42 = vmul.f32 -1.442695, %v5526_v34  ;;  %v5527_v46 = vadd.f32 %v5452_v30, %v3965_v48  ;;  %v5528_v5 = vadd.f32 %v5521_v51, %v4124_v3 }
 0xc39   :  { %v5379_v57 = vmul.f32 %v7629_v38, %v12857_v17  ;;  %v5529_v34 = vadd.f32 %v5523_v49, %v4126_v35  ;;  %v12861_v49 = vld [vmem:[#allocation77_spill] sm:$0xff] }
 0xc3a   :  { %7630 = vpow2.f32 %v7174_v42  ;;  %v7175_v23 = vmul.f32 -1.442695, %v5527_v46  ;;  %v7176_v48 = vmul.f32 -1.442695, %v5528_v5 }
 0xc3b   :  { %7632 = vrcp.f32 %v5371_v15  ;;  %v11083_v37 = vadd.f32 %v5380_v2, %v5379_v57 }
 0xc3c   :  { %7634 = vpow2.f32 %v7175_v23 }
 0xc3d   :  { %12858 = vst [vmem:[#allocation87_spill] sm:$0xff] %v11083_v37  ;;  %7636 = vtanh.f32 %v11083_v37 }
 0xc3e   :  { %7638 = vpow2.f32 %v7176_v48  ;;  %v12863_v48 = vld [vmem:[#allocation25_spill] sm:$0xff] }
 0xc3f   :  { %7640 = vtanh.f32 %v5529_v34  ;;  %v12864_v34 = vld [vmem:[#allocation62_spill] sm:$0xff] }
 0xc47   :  { %v7631_v30 = vpop.eup %7630 }
 0xc48   :  { %v7633_v38 = vpop.eup %7632  ;;  %v5539_v42 = vadd.f32 1.0, %v7631_v30  ;;  %v12865_v30 = vld [vmem:[#allocation36_spill] sm:$0xff] }
 0xc49   :  { %v7635_v15 = vpop.eup %7634 }
 0xc4a   :  { %v7637_v2 = vpop.eup %7636  ;;  %7642 = vrcp.f32 %v5539_v42  ;;  %v5540_v46 = vadd.f32 1.0, %v7635_v15  ;;  %v12867_v42 = vld [vmem:[#allocation61_spill] sm:$0xff]  ;;  %v12868_v15 = vld [vmem:[#allocation82_spill] sm:$0xff] }
 0xc4b   :  { %v5383_v17 = vmul.f32 %v7637_v2, %v7633_v38  ;;  %v7639_v57 = vpop.eup %7638  ;;  %v12866_v38 = vld [vmem:[#allocation59_spill] sm:$0xff]  ;;  %v12869_v2 = vld [vmem:[#allocation78_spill] sm:$0xff] }
 0xc4c   :  { %7644 = vrcp.f32 %v5540_v46  ;;  %v7641_v23 = vpop.eup %7640  ;;  %v5541_v5 = vadd.f32 1.0, %v7639_v57  ;;  %v12870_v46 = vld [vmem:[#allocation66_spill] sm:$0xff]  ;;  %v12872_v57 = vld [vmem:[#allocation83_spill] sm:$0xff] }
 0xc4d   :  { %5627 = vmatmul.mubr.f32.vlgmr.msra.gmra.mxu0 %v5383_v17  ;;  %5698 = vmatmul.mubr.f32.vlgmr.msra.gmra.mxu1 %v5383_v17  ;;  %v12871_v17 = vld [vmem:[#allocation65_spill] sm:$0xff] }
 0xc4e   :  { %5733 = vmatpush1.msra.mxu0 %v10654_v60  ;;  %5804 = vmatpush1.msra.mxu1 %v10657_v55  ;;  %7646 = vrcp.f32 %v5541_v5  ;;  %v12877_v5 = vld [vmem:[#allocation85_spill] sm:$0xff] }
 0xc4f   :  { %5734 = vmatprep.subr.mxu0 %v10660_v8  ;;  %5805 = vmatprep.subr.mxu1 %v10663_v28 }
 0xc50   :  { %5735 = vmatpush1.msra.mxu0 %v10666_v62  ;;  %5806 = vmatpush1.msra.mxu1 %v10669_v63 }
 0xc51   :  { %5736 = vmatprep.subr.mxu0 %v10672_v25  ;;  %5807 = vmatprep.subr.mxu1 %v10675_v13 }
 0xc52   :  { %5737 = vmatpush1.msra.mxu0 %v10678_v18  ;;  %5808 = vmatpush1.msra.mxu1 %v10681_v9 }
 0xc53   :  { %5738 = vmatprep.subr.mxu0 %v10684_v24  ;;  %5809 = vmatprep.subr.mxu1 %v10687_v44 }
 0xc54   :  { %5739 = vmatpush1.msra.mxu0 %v10690_v14  ;;  %5810 = vmatpush1.msra.mxu1 %v10693_v7 }
 0xc55   :  { %5740 = vmatprep.subr.mxu0 %v10696_v53  ;;  %5811 = vmatprep.subr.mxu1 %v10699_v22 }
 0xc56   :  { %5741 = vmatpush1.msra.mxu0 %v10702_v19  ;;  %5812 = vmatpush1.msra.mxu1 %v10705_v1 }
 0xc57   :  { %v7643_v51 = vpop.eup %7642  ;;  %5742 = vmatprep.subr.mxu0 %v10708_v12  ;;  %5813 = vmatprep.subr.mxu1 %v10711_v6 }
 0xc58   :  { %v5550_v10 = vmul.f32 %v7643_v51, %v7641_v23  ;;  %5743 = vmatpush1.msra.mxu0 %v10714_v45  ;;  %5814 = vmatpush1.msra.mxu1 %v10717_v40  ;;  %v12873_v23 = vld [vmem:[#allocation50_spill] sm:$0xff] }
 0xc59   :  { %v7645_v3 = vpop.eup %7644  ;;  %5744 = vmatprep.subr.mxu0 %v10720_v31  ;;  %5815 = vmatprep.subr.mxu1 %v10723_v41  ;;  %v12874_v51 = vld [vmem:[#allocation86_spill] sm:$0xff] }
 0xc5a   :  { %v5549_v47 = vmul.f32 %v7645_v3, %v12861_v49  ;;  %5745 = vmatpush1.msra.mxu0 %v10727_v32  ;;  %5816 = vmatpush1.msra.mxu1 %v10730_v29  ;;  %v12876_v3 = vld [vmem:[#allocation29_spill] sm:$0xff] }
 0xc5b   :  { %5746 = vmatprep.subr.mxu0 %v10733_v36  ;;  %5817 = vmatprep.subr.mxu1 %v10736_v4  ;;  %v7647_v49 = vpop.eup %7646 }
 0xc5c   :  { %v11119_v35 = vadd.f32 %v5550_v10, %v5549_v47  ;;  %5747 = vmatpush1.msra.mxu0 %v10741_v58  ;;  %5818 = vmatpush1.msra.mxu1 %v10744_v52  ;;  %v12875_v10 = vld [vmem:[#allocation70_spill] sm:$0xff]  ;;  %v12878_v47 = vld [vmem:[#allocation75_spill] sm:$0xff] }
 0xc5d   :  { %5748 = vmatprep.subr.mxu0 %v10747_v33  ;;  %5819 = vmatprep.subr.mxu1 %v10750_v26 }
 0xc5e   :  { %12862 = vst [vmem:[#allocation88_spill] sm:$0xff] %v11119_v35  ;;  %7648 = vtanh.f32 %v11119_v35  ;;  %5749 = vmatpush1.msra.mxu0 %v10754_v39  ;;  %5820 = vmatpush1.msra.mxu1 %v10757_v43  ;;  %v12879_v35 = vld [vmem:[#allocation15_spill] sm:$0xff] }
 0xc5f   :  { %5750 = vmatprep.subr.mxu0 %v10760_v59  ;;  %5821 = vmatprep.subr.mxu1 %v10763_v27 }
 0xc60   :  { %5751 = vmatpush1.msra.mxu0 %v10766_v50  ;;  %5822 = vmatpush1.msra.mxu1 %v10769_v11 }
 0xc61   :  { %5752 = vmatprep.subr.mxu0 %v10772_v56  ;;  %5823 = vmatprep.subr.mxu1 %v10775_v21 }
 0xc62   :  { %5753 = vmatpush1.msra.mxu0 %v10778_v54  ;;  %5824 = vmatpush1.msra.mxu1 %v12863_v48 }
 0xc63   :  { %5754 = vmatprep.subr.mxu0 %v12864_v34  ;;  %5825 = vmatprep.subr.mxu1 %v12865_v30 }
 0xc64   :  { %5755 = vmatpush1.msra.mxu0 %v12866_v38  ;;  %5826 = vmatpush1.msra.mxu1 %v12867_v42 }
 0xc65   :  { %5756 = vmatprep.subr.mxu0 %v12868_v15  ;;  %5827 = vmatprep.subr.mxu1 %v12869_v2 }
 0xc66   :  { %5757 = vmatpush1.msra.mxu0 %v12870_v46  ;;  %5828 = vmatpush1.msra.mxu1 %v12871_v17 }
 0xc67   :  { %5758 = vmatprep.subr.mxu0 %v12872_v57  ;;  %5829 = vmatprep.subr.mxu1 %v12873_v23 }
 0xc68   :  { %5759 = vmatpush1.msra.mxu0 %v12874_v51  ;;  %5830 = vmatpush1.msra.mxu1 %v12875_v10  ;;  %v12884_v10 = vld [vmem:[#allocation73_spill] sm:$0xff] }
 0xc69   :  { %5760 = vmatprep.subr.mxu0 %v12876_v3  ;;  %5831 = vmatprep.subr.mxu1 %v12877_v5  ;;  %v11158_v5 = vld [vmem:[#allocation9 + $0x1e8] sm:$0xff] }
 0xc6a   :  { %5761 = vmatpush1.msra.mxu0 %v12878_v47  ;;  %5832 = vmatpush1.msra.mxu1 %v12879_v35  ;;  %12885 = vst [vmem:[#allocation81_spill] sm:$0xff] %v11158_v5  ;;  %v11161_v35 = vld [vmem:[#allocation9 + $0x1f8] sm:$0xff] }
 0xc6b   :  { %v7649_v37 = vpop.eup %7648  ;;  %5762 = vmatprep.subr.mxu0 %v12880_v16  ;;  %5833 = vmatprep.subr.mxu1 %v12881_v20  ;;  %12886 = vst [vmem:[#allocation79_spill] sm:$0xff] %v11161_v35 }
 0xc6c   :  { %5763 = vmatpush1.msra.mxu0 %v12882_v0  ;;  %5796 = vmatprep.mubr.f32.mxu0 %v12883_v61  ;;  %v5553_v51 = vmul.f32 %v7649_v37, %v7647_v49 }
 0xc6d   :  { %5834 = vmatpush1.msra.mxu1 %v12884_v10  ;;  %5867 = vmatprep.mubr.f32.mxu1 %v12883_v61 }
 0xc6e   :  { %5797 = vmatmul.mubr.f32.vlgmr.msra.gmra.mxu0 %v5553_v51  ;;  %5868 = vmatmul.mubr.f32.vlgmr.msra.gmra.mxu1 %v5553_v51 }
 0xc6f   :  { %5910 = vmatprep.subr.mxu0 %v11158_v5  ;;  %5981 = vmatprep.subr.mxu1 %v11161_v35 }
 0xc70   :  { %5911 = vmatpush1.msra.mxu0 %v10654_v60  ;;  %5982 = vmatpush1.msra.mxu1 %v10657_v55  ;;  %v12887_v60 = vld [vmem:[#allocation86_spill] sm:$0xff] }
 0xc71   :  { %5912 = vmatprep.subr.mxu0 %v10660_v8  ;;  %5983 = vmatprep.subr.mxu1 %v10663_v28  ;;  %v12888_v55 = vld [vmem:[#allocation70_spill] sm:$0xff]  ;;  %v12889_v8 = vld [vmem:[#allocation85_spill] sm:$0xff]  ;;  %v12890_v28 = vld [vmem:[#allocation15_spill] sm:$0xff] }
 0xc72   :  { %5913 = vmatpush1.msra.mxu0 %v10666_v62  ;;  %5984 = vmatpush1.msra.mxu1 %v10669_v63  ;;  %v12891_v62 = vld [vmem:[#allocation27_spill] sm:$0xff]  ;;  %v12892_v63 = vld [vmem:[#allocation17_spill] sm:$0xff] }
 0xc73   :  { %5914 = vmatprep.subr.mxu0 %v10672_v25  ;;  %5985 = vmatprep.subr.mxu1 %v10675_v13  ;;  %v3969_v25 = vadd.f32 %v12892_v63, %v12891_v62 }
 0xc74   :  { %5915 = vmatpush1.msra.mxu0 %v10678_v18  ;;  %5986 = vmatpush1.msra.mxu1 %v10681_v9  ;;  %v12893_v18 = vld [vmem:[#allocation95_spill] sm:$0xff] }
 0xc75   :  { %5916 = vmatprep.subr.mxu0 %v10684_v24  ;;  %5987 = vmatprep.subr.mxu1 %v10687_v44  ;;  %v12894_v9 = vld [vmem:[#allocation71_spill] sm:$0xff] }
 0xc76   :  { %5917 = vmatpush1.msra.mxu0 %v10690_v14  ;;  %5988 = vmatpush1.msra.mxu1 %v10693_v7  ;;  %v3971_v24 = vadd.f32 %v12894_v9, %v12893_v18  ;;  %v11256_v9 = vld [vmem:[#allocation9 + $0x1c8] sm:$0xff] }
 0xc77   :  { %5918 = vmatprep.subr.mxu0 %v10696_v53  ;;  %5989 = vmatprep.subr.mxu1 %v10699_v22 }
 0xc78   :  { %5919 = vmatpush1.msra.mxu0 %v10702_v19  ;;  %5990 = vmatpush1.msra.mxu1 %v10705_v1  ;;  %v12895_v1 = vld [vmem:[#allocation98_spill] sm:$0xff] }
 0xc79   :  { %5920 = vmatprep.subr.mxu0 %v10708_v12  ;;  %5991 = vmatprep.subr.mxu1 %v10711_v6  ;;  %v12896_v12 = vld [vmem:[#allocation72_spill] sm:$0xff] }
 0xc7a   :  { %5921 = vmatpush1.msra.mxu0 %v10714_v45  ;;  %5992 = vmatpush1.msra.mxu1 %v10717_v40  ;;  %v4130_v6 = vadd.f32 %v12896_v12, %v12895_v1  ;;  %v11280_v12 = vld [vmem:[#allocation9 + $0x188] sm:$0xff] }
 0xc7b   :  { %5922 = vmatprep.subr.mxu0 %v10720_v31  ;;  %5993 = vmatprep.subr.mxu1 %v10723_v41  ;;  %v12897_v31 = vld [vmem:[#allocation40_spill] sm:$0xff] }
 0xc7c   :  { %5923 = vmatpush1.msra.mxu0 %v10727_v32  ;;  %5994 = vmatpush1.msra.mxu1 %v10730_v29  ;;  %v12898_v41 = vld [vmem:[#allocation20_spill] sm:$0xff] }
 0xc7d   :  { %5924 = vmatprep.subr.mxu0 %v10733_v36  ;;  %5995 = vmatprep.subr.mxu1 %v10736_v4  ;;  %v4132_v32 = vadd.f32 %v12898_v41, %v12897_v31 }
 0xc7e   :  { %5925 = vmatpush1.msra.mxu0 %v10741_v58  ;;  %5996 = vmatpush1.msra.mxu1 %v10744_v52 }
 0xc7f   :  { %5926 = vmatprep.subr.mxu0 %v10747_v33  ;;  %5997 = vmatprep.subr.mxu1 %v10750_v26 }
 0xc80   :  { %5927 = vmatpush1.msra.mxu0 %v10754_v39  ;;  %5998 = vmatpush1.msra.mxu1 %v10757_v43  ;;  %v12899_v39 = vld [vmem:[#allocation30_spill] sm:$0xff] }
 0xc81   :  { %5928 = vmatprep.subr.mxu0 %v10760_v59  ;;  %5999 = vmatprep.subr.mxu1 %v10763_v27  ;;  %v3975_v43 = vadd.f32 %v12899_v39, %v12891_v62  ;;  %v11428_v62 = vld [vmem:[#allocation9 + $0x8] sm:$0xff] }
 0xc82   :  { %5929 = vmatpush1.msra.mxu0 %v10766_v50  ;;  %6000 = vmatpush1.msra.mxu1 %v10769_v11  ;;  %v12900_v11 = vld [vmem:[#allocation49_spill] sm:$0xff]  ;;  %12924 = vst [vmem:[#allocation19_spill] sm:$0xff] %v11428_v62 }
 0xc83   :  { %5930 = vmatprep.subr.mxu0 %v10772_v56  ;;  %6001 = vmatprep.subr.mxu1 %v10775_v21  ;;  %v3977_v56 = vadd.f32 %v12900_v11, %v12893_v18  ;;  %v11316_v11 = vld [vmem:[#allocation9 + $0x128] sm:$0xff] }
 0xc84   :  { %5931 = vmatpush1.msra.mxu0 %v10778_v54  ;;  %6002 = vmatpush1.msra.mxu1 %v12863_v48 }
 0xc85   :  { %5932 = vmatprep.subr.mxu0 %v12864_v34  ;;  %6003 = vmatprep.subr.mxu1 %v12865_v30  ;;  %v12901_v34 = vld [vmem:[#allocation87_spill] sm:$0xff] }
 0xc86   :  { %5933 = vmatpush1.msra.mxu0 %v12866_v38  ;;  %6004 = vmatpush1.msra.mxu1 %v12867_v42 }
 0xc87   :  { %5934 = vmatprep.subr.mxu0 %v12868_v15  ;;  %6005 = vmatprep.subr.mxu1 %v12869_v2  ;;  %v12903_v2 = vld [vmem:[#allocation42_spill] sm:$0xff] }
 0xc88   :  { %5935 = vmatpush1.msra.mxu0 %v12870_v46  ;;  %6006 = vmatpush1.msra.mxu1 %v12871_v17  ;;  %v4136_v46 = vadd.f32 %v12903_v2, %v12895_v1  ;;  %v11350_v2 = vld [vmem:[#allocation9 + $0xe0] sm:$0xff]  ;;  %v11425_v1 = vld [vmem:[#allocation9 + $0x30] sm:$0xff] }
 0xc89   :  { %5936 = vmatprep.subr.mxu0 %v12872_v57  ;;  %6007 = vmatprep.subr.mxu1 %v12873_v23  ;;  %v12904_v23 = vld [vmem:[#allocation91_spill] sm:$0xff]  ;;  %12923 = vst [vmem:[#allocation47_spill] sm:$0xff] %v11425_v1 }
 0xc8a   :  { %5937 = vmatpush1.msra.mxu0 %v12887_v60  ;;  %6008 = vmatpush1.msra.mxu1 %v12888_v55  ;;  %v4138_v51 = vadd.f32 %v12904_v23, %v12897_v31  ;;  %v11362_v23 = vld [vmem:[#allocation9 + $0xc0] sm:$0xff] }
 0xc8b   :  { %5938 = vmatprep.subr.mxu0 %v12876_v3  ;;  %6009 = vmatprep.subr.mxu1 %v12889_v8  ;;  %v11422_v31 = vld [vmem:[#allocation9 + $0x20] sm:$0xff] }
 0xc8c   :  { %5939 = vmatpush1.msra.mxu0 %v12878_v47  ;;  %6010 = vmatpush1.msra.mxu1 %v12890_v28  ;;  %12922 = vst [vmem:[#allocation57_spill] sm:$0xff] %v11422_v31 }
 0xc8d   :  { %5940 = vmatprep.subr.mxu0 %v12880_v16  ;;  %6011 = vmatprep.subr.mxu1 %v12881_v20 }
 0xc8e   :  { %5941 = vmatpush1.msra.mxu0 %v12882_v0  ;;  %6012 = vmatpush1.msra.mxu1 %v12884_v10 }
 0xc8f   :  { %5974 = vmatprep.mubr.f32.mxu0 %v12883_v61  ;;  %6045 = vmatprep.mubr.f32.mxu1 %v12883_v61 }
 0xc90   :  { %6080 = vmatprep.subr.mxu0 %v11158_v5  ;;  %6151 = vmatprep.subr.mxu1 %v11161_v35 }
 0xd0d   :  { %v5628_v13 = vpop.f32.mrf.mxu0  ;;  %v5699_v19 = vpop.f32.mrf.mxu1 }
 0xd0e   :  { %v5704_v44 = vadd.f32 %v5628_v13, %v3969_v25  ;;  %v5706_v45 = vadd.f32 %v5699_v19, %v4130_v6  ;;  %v11250_v25 = vld [vmem:[#allocation9 + $0x1e0] sm:$0xff]  ;;  %v11253_v13 = vld [vmem:[#allocation9 + $0x1f0] sm:$0xff]  ;;  %v11283_v6 = vld [vmem:[#allocation9 + $0x198] sm:$0xff] }
 0xd0f   :  { %v5630_v14 = vpop.f32.mrf.mxu0  ;;  %v5701_v40 = vpop.f32.mrf.mxu1  ;;  %v11277_v19 = vld [vmem:[#allocation9 + $0x1b0] sm:$0xff] }
 0xd10   :  { %v7177_v7 = vmul.f32 -1.442695, %v5704_v44  ;;  %v5705_v53 = vadd.f32 %v5630_v14, %v3971_v24  ;;  %v7179_v29 = vmul.f32 -1.442695, %v5706_v45  ;;  %v5707_v36 = vadd.f32 %v5701_v40, %v4132_v32  ;;  %v11259_v24 = vld [vmem:[#allocation9 + $0x1d8] sm:$0xff]  ;;  %v11262_v44 = vld [vmem:[#allocation9 + $0x1c0] sm:$0xff] }
 0xd11   :  { %v11265_v14 = vld [vmem:[#allocation9 + $0x1d0] sm:$0xff]  ;;  %v11286_v45 = vld [vmem:[#allocation9 + $0x180] sm:$0xff]  ;;  %v11292_v32 = vld [vmem:[#allocation9 + $0x168] sm:$0xff] }
 0xd12   :  { %7650 = vpow2.f32 %v7177_v7  ;;  %v7178_v22 = vmul.f32 -1.442695, %v5705_v53  ;;  %v11268_v7 = vld [vmem:[#allocation9 + $0x1a8] sm:$0xff]  ;;  %v11271_v53 = vld [vmem:[#allocation9 + $0x1b8] sm:$0xff]  ;;  %v11289_v40 = vld [vmem:[#allocation9 + $0x190] sm:$0xff] }
 0xd14   :  { %7652 = vpow2.f32 %v7178_v22  ;;  %v11274_v22 = vld [vmem:[#allocation9 + $0x1a0] sm:$0xff] }
 0xd15   :  { %7654 = vpow2.f32 %v7179_v29  ;;  %v11295_v29 = vld [vmem:[#allocation9 + $0x178] sm:$0xff] }
 0xd16   :  { %7656 = vtanh.f32 %v5707_v36 }
 0xd1f   :  { %v7651_v4 = vpop.eup %7650 }
 0xd20   :  { %v5717_v58 = vadd.f32 1.0, %v7651_v4  ;;  %v11298_v4 = vld [vmem:[#allocation9 + $0x160] sm:$0xff] }
 0xd21   :  { %v7653_v52 = vpop.eup %7652 }
 0xd22   :  { %7658 = vrcp.f32 %v5717_v58  ;;  %v5718_v33 = vadd.f32 1.0, %v7653_v52  ;;  %v7655_v26 = vpop.eup %7654  ;;  %v11301_v58 = vld [vmem:[#allocation9 + $0x170] sm:$0xff] }
 0xd23   :  { %v7657_v59 = vpop.eup %7656  ;;  %v5719_v54 = vadd.f32 1.0, %v7655_v26  ;;  %v11307_v26 = vld [vmem:[#allocation9 + $0x158] sm:$0xff] }
 0xd24   :  { %7660 = vrcp.f32 %v5718_v33  ;;  %v11304_v33 = vld [vmem:[#allocation9 + $0x148] sm:$0xff] }
 0xd2e   :  { %v5798_v27 = vpop.f32.mrf.mxu0  ;;  %v5869_v15 = vpop.f32.mrf.mxu1 }
 0xd2f   :  { %v7659_v50 = vpop.eup %7658  ;;  %v5874_v21 = vadd.f32 %v5798_v27, %v3975_v43  ;;  %v5876_v17 = vadd.f32 %v5869_v15, %v4136_v46  ;;  %v11310_v43 = vld [vmem:[#allocation9 + $0x140] sm:$0xff]  ;;  %v11346_v15 = vld [vmem:[#allocation9 + $0xf8] sm:$0xff]  ;;  %v11353_v46 = vld [vmem:[#allocation9 + $0xf0] sm:$0xff] }
 0xd30   :  { %v5728_v20 = vmul.f32 %v7659_v50, %v7657_v59  ;;  %v5800_v16 = vpop.f32.mrf.mxu0  ;;  %v5871_v57 = vpop.f32.mrf.mxu1  ;;  %v11313_v59 = vld [vmem:[#allocation9 + $0x150] sm:$0xff] }
 0xd31   :  { %v7661_v0 = vpop.eup %7660  ;;  %v7180_v37 = vmul.f32 -1.442695, %v5874_v21  ;;  %v5875_v48 = vadd.f32 %v5800_v16, %v3977_v56  ;;  %v7182_v10 = vmul.f32 -1.442695, %v5876_v17  ;;  %v5877_v3 = vadd.f32 %v5871_v57, %v4138_v51  ;;  %v11319_v56 = vld [vmem:[#allocation9 + $0x138] sm:$0xff]  ;;  %v12905_v21 = vld [vmem:[#allocation88_spill] sm:$0xff] }
 0xd32   :  { %v5727_v30 = vmul.f32 %v7661_v0, %v12901_v34  ;;  %v11326_v16 = vld [vmem:[#allocation9 + $0x130] sm:$0xff]  ;;  %v11329_v0 = vld [vmem:[#allocation9 + $0x108] sm:$0xff]  ;;  %v11337_v34 = vld [vmem:[#allocation9 + $0x100] sm:$0xff] }
 0xd33   :  { %7662 = vpow2.f32 %v7180_v37  ;;  %v7181_v38 = vmul.f32 -1.442695, %v5875_v48  ;;  %v11332_v37 = vld [vmem:[#allocation9 + $0x118] sm:$0xff]  ;;  %v11356_v17 = vld [vmem:[#allocation9 + $0xc8] sm:$0xff]  ;;  %v11365_v51 = vld [vmem:[#allocation9 + $0xd0] sm:$0xff] }
 0xd34   :  { %7664 = vrcp.f32 %v5719_v54  ;;  %v11243_v42 = vadd.f32 %v5728_v20, %v5727_v30  ;;  %v11323_v20 = vld [vmem:[#allocation9 + $0x120] sm:$0xff]  ;;  %v11340_v30 = vld [vmem:[#allocation9 + $0x110] sm:$0xff]  ;;  %v11359_v57 = vld [vmem:[#allocation9 + $0xd8] sm:$0xff] }
 0xd35   :  { %7666 = vpow2.f32 %v7181_v38  ;;  %v11343_v38 = vld [vmem:[#allocation9 + $0xe8] sm:$0xff] }
 0xd36   :  { %12902 = vst [vmem:[#allocation33_spill] sm:$0xff] %v11243_v42  ;;  %7668 = vtanh.f32 %v11243_v42 }
 0xd37   :  { %7670 = vpow2.f32 %v7182_v10  ;;  %v11368_v10 = vld [vmem:[#allocation9 + $0xa8] sm:$0xff] }
 0xd38   :  { %7672 = vtanh.f32 %v5877_v3  ;;  %v11371_v3 = vld [vmem:[#allocation9 + $0xb8] sm:$0xff] }
 0xd40   :  { %v7663_v49 = vpop.eup %7662 }
 0xd41   :  { %v7665_v47 = vpop.eup %7664  ;;  %v5887_v60 = vadd.f32 1.0, %v7663_v49  ;;  %v11374_v49 = vld [vmem:[#allocation9 + $0xa0] sm:$0xff] }
 0xd42   :  { %v7667_v55 = vpop.eup %7666 }
 0xd43   :  { %v7669_v8 = vpop.eup %7668  ;;  %7674 = vrcp.f32 %v5887_v60  ;;  %v5888_v28 = vadd.f32 1.0, %v7667_v55  ;;  %v11380_v60 = vld [vmem:[#allocation9 + $0x88] sm:$0xff]  ;;  %v11383_v55 = vld [vmem:[#allocation9 + $0x98] sm:$0xff] }
 0xd44   :  { %v5731_v63 = vmul.f32 %v7669_v8, %v7665_v47  ;;  %v7671_v41 = vpop.eup %7670  ;;  %v11377_v47 = vld [vmem:[#allocation9 + $0xb0] sm:$0xff]  ;;  %12908 = vst [vmem:[#allocation35_spill] sm:$0xff] %v11380_v60  ;;  %12909 = vst [vmem:[#allocation101_spill] sm:$0xff] %v11383_v55  ;;  %v11386_v8 = vld [vmem:[#allocation9 + $0x80] sm:$0xff] }
 0xd45   :  { %7676 = vrcp.f32 %v5888_v28  ;;  %v7673_v36 = vpop.eup %7672  ;;  %v5889_v50 = vadd.f32 1.0, %v7671_v41  ;;  %12907 = vst [vmem:[#allocation89_spill] sm:$0xff] %v11377_v47  ;;  %12910 = vst [vmem:[#allocation90_spill] sm:$0xff] %v11386_v8  ;;  %v11389_v28 = vld [vmem:[#allocation9 + $0x90] sm:$0xff]  ;;  %v11395_v41 = vld [vmem:[#allocation9 + $0x78] sm:$0xff] }
 0xd46   :  { %5975 = vmatmul.mubr.f32.vlgmr.msra.gmra.mxu0 %v5731_v63  ;;  %6046 = vmatmul.mubr.f32.vlgmr.msra.gmra.mxu1 %v5731_v63  ;;  %12911 = vst [vmem:[#allocation54_spill] sm:$0xff] %v11389_v28  ;;  %v11392_v63 = vld [vmem:[#allocation9 + $0x68] sm:$0xff]  ;;  %12913 = vst [vmem:[#allocation74_spill] sm:$0xff] %v11395_v41 }
 0xd47   :  { %6081 = vmatpush1.msra.mxu0 %v11250_v25  ;;  %6152 = vmatpush1.msra.mxu1 %v11253_v13  ;;  %7678 = vrcp.f32 %v5889_v50  ;;  %12912 = vst [vmem:[#allocation55_spill] sm:$0xff] %v11392_v63  ;;  %v11410_v50 = vld [vmem:[#allocation9 + $0x40] sm:$0xff] }
 0xd48   :  { %6082 = vmatprep.subr.mxu0 %v11256_v9  ;;  %6153 = vmatprep.subr.mxu1 %v11259_v24  ;;  %12918 = vst [vmem:[#allocation28_spill] sm:$0xff] %v11410_v50 }
 0xd49   :  { %6083 = vmatpush1.msra.mxu0 %v11262_v44  ;;  %6154 = vmatpush1.msra.mxu1 %v11265_v14 }
 0xd4a   :  { %6084 = vmatprep.subr.mxu0 %v11268_v7  ;;  %6155 = vmatprep.subr.mxu1 %v11271_v53 }
 0xd4b   :  { %6085 = vmatpush1.msra.mxu0 %v11274_v22  ;;  %6156 = vmatpush1.msra.mxu1 %v11277_v19 }
 0xd4c   :  { %6086 = vmatprep.subr.mxu0 %v11280_v12  ;;  %6157 = vmatprep.subr.mxu1 %v11283_v6 }
 0xd4d   :  { %6087 = vmatpush1.msra.mxu0 %v11286_v45  ;;  %6158 = vmatpush1.msra.mxu1 %v11289_v40 }
 0xd4e   :  { %6088 = vmatprep.subr.mxu0 %v11292_v32  ;;  %6159 = vmatprep.subr.mxu1 %v11295_v29 }
 0xd4f   :  { %6089 = vmatpush1.msra.mxu0 %v11298_v4  ;;  %6160 = vmatpush1.msra.mxu1 %v11301_v58 }
 0xd50   :  { %v7675_v52 = vpop.eup %7674  ;;  %6090 = vmatprep.subr.mxu0 %v11304_v33  ;;  %6161 = vmatprep.subr.mxu1 %v11307_v26 }
 0xd51   :  { %v5898_v39 = vmul.f32 %v7675_v52, %v7673_v36  ;;  %6091 = vmatpush1.msra.mxu0 %v11310_v43  ;;  %6162 = vmatpush1.msra.mxu1 %v11313_v59  ;;  %v11398_v36 = vld [vmem:[#allocation9 + $0x60] sm:$0xff]  ;;  %v11401_v52 = vld [vmem:[#allocation9 + $0x70] sm:$0xff] }
 0xd52   :  { %v7677_v27 = vpop.eup %7676  ;;  %6092 = vmatprep.subr.mxu0 %v11316_v11  ;;  %6163 = vmatprep.subr.mxu1 %v11319_v56  ;;  %12914 = vst [vmem:[#allocation67_spill] sm:$0xff] %v11398_v36  ;;  %12915 = vst [vmem:[#allocation68_spill] sm:$0xff] %v11401_v52 }
 0xd53   :  { %v5897_v54 = vmul.f32 %v7677_v27, %v12905_v21  ;;  %6093 = vmatpush1.msra.mxu0 %v11323_v20  ;;  %6164 = vmatpush1.msra.mxu1 %v11326_v16  ;;  %v11407_v27 = vld [vmem:[#allocation9 + $0x58] sm:$0xff]  ;;  %v11413_v21 = vld [vmem:[#allocation9 + $0x50] sm:$0xff] }
 0xd54   :  { %6094 = vmatprep.subr.mxu0 %v11329_v0  ;;  %6165 = vmatprep.subr.mxu1 %v11332_v37  ;;  %12917 = vst [vmem:[#allocation56_spill] sm:$0xff] %v11407_v27  ;;  %12919 = vst [vmem:[#allocation76_spill] sm:$0xff] %v11413_v21  ;;  %v7679_v42 = vpop.eup %7678 }
 0xd55   :  { %v11335_v48 = vadd.f32 %v5898_v39, %v5897_v54  ;;  %6095 = vmatpush1.msra.mxu0 %v11337_v34  ;;  %6166 = vmatpush1.msra.mxu1 %v11340_v30  ;;  %v11404_v39 = vld [vmem:[#allocation9 + $0x48] sm:$0xff] }
 0xd56   :  { %6096 = vmatprep.subr.mxu0 %v11343_v38  ;;  %6167 = vmatprep.subr.mxu1 %v11346_v15  ;;  %12916 = vst [vmem:[#allocation34_spill] sm:$0xff] %v11404_v39  ;;  %v11416_v54 = vld [vmem:[#allocation9 + $0x28] sm:$0xff] }
 0xd57   :  { %12906 = vst [vmem:[#allocation100_spill] sm:$0xff] %v11335_v48  ;;  %7680 = vtanh.f32 %v11335_v48  ;;  %6097 = vmatpush1.msra.mxu0 %v11350_v2  ;;  %6168 = vmatpush1.msra.mxu1 %v11353_v46  ;;  %12920 = vst [vmem:[#allocation23_spill] sm:$0xff] %v11416_v54  ;;  %v11419_v48 = vld [vmem:[#allocation9 + $0x38] sm:$0xff] }
 0xd58   :  { %6098 = vmatprep.subr.mxu0 %v11356_v17  ;;  %6169 = vmatprep.subr.mxu1 %v11359_v57  ;;  %12921 = vst [vmem:[#allocation58_spill] sm:$0xff] %v11419_v48 }
 0xd59   :  { %6099 = vmatpush1.msra.mxu0 %v11362_v23  ;;  %6170 = vmatpush1.msra.mxu1 %v11365_v51 }
 0xd5a   :  { %6100 = vmatprep.subr.mxu0 %v11368_v10  ;;  %6171 = vmatprep.subr.mxu1 %v11371_v3 }
 0xd5b   :  { %6101 = vmatpush1.msra.mxu0 %v11374_v49  ;;  %6172 = vmatpush1.msra.mxu1 %v11377_v47 }
 0xd5c   :  { %6102 = vmatprep.subr.mxu0 %v11380_v60  ;;  %6173 = vmatprep.subr.mxu1 %v11383_v55 }
 0xd5d   :  { %6103 = vmatpush1.msra.mxu0 %v11386_v8  ;;  %6174 = vmatpush1.msra.mxu1 %v11389_v28 }
 0xd5e   :  { %6104 = vmatprep.subr.mxu0 %v11392_v63  ;;  %6175 = vmatprep.subr.mxu1 %v11395_v41 }
 0xd5f   :  { %6105 = vmatpush1.msra.mxu0 %v11398_v36  ;;  %6176 = vmatpush1.msra.mxu1 %v11401_v52 }
 0xd60   :  { %6106 = vmatprep.subr.mxu0 %v11404_v39  ;;  %6177 = vmatprep.subr.mxu1 %v11407_v27 }
 0xd61   :  { %6107 = vmatpush1.msra.mxu0 %v11410_v50  ;;  %6178 = vmatpush1.msra.mxu1 %v11413_v21  ;;  %v11431_v21 = vld [vmem:[#allocation9 + $0x18] sm:$0xff] }
 0xd62   :  { %6108 = vmatprep.subr.mxu0 %v11416_v54  ;;  %6179 = vmatprep.subr.mxu1 %v11419_v48  ;;  %12925 = vst [vmem:[#allocation21_spill] sm:$0xff] %v11431_v21  ;;  %v11434_v54 = vld [vmem:[#allocation9] sm:$0xff]  ;;  %v11438_v48 = vld [vmem:[#allocation9 + $0x10] sm:$0xff] }
 0xd63   :  { %6109 = vmatpush1.msra.mxu0 %v11422_v31  ;;  %6180 = vmatpush1.msra.mxu1 %v11425_v1  ;;  %12926 = vst [vmem:[#allocation31_spill] sm:$0xff] %v11434_v54  ;;  %12927 = vst [vmem:[#allocation32_spill] sm:$0xff] %v11438_v48 }
 0xd64   :  { %v7681_v18 = vpop.eup %7680  ;;  %6110 = vmatprep.subr.mxu0 %v11428_v62  ;;  %6181 = vmatprep.subr.mxu1 %v11431_v21 }
 0xd65   :  { %6111 = vmatpush1.msra.mxu0 %v11434_v54  ;;  %6144 = vmatprep.mubr.f32.mxu0 %v12883_v61  ;;  %v5901_v31 = vmul.f32 %v7681_v18, %v7679_v42  ;;  %v12928_v18 = vld [vmem:[#allocation76_spill] sm:$0xff]  ;;  %v12930_v42 = vld [vmem:[#allocation58_spill] sm:$0xff] }
 0xd66   :  { %6182 = vmatpush1.msra.mxu1 %v11438_v48  ;;  %6215 = vmatprep.mubr.f32.mxu1 %v12883_v61 }
 0xd67   :  { %6145 = vmatmul.mubr.f32.vlgmr.msra.gmra.mxu0 %v5901_v31  ;;  %6216 = vmatmul.mubr.f32.vlgmr.msra.gmra.mxu1 %v5901_v31  ;;  %v12929_v31 = vld [vmem:[#allocation23_spill] sm:$0xff] }
 0xd68   :  { %6258 = vmatprep.subr.mxu0 %v11158_v5  ;;  %6329 = vmatprep.subr.mxu1 %v11161_v35 }
 0xd69   :  { %6259 = vmatpush1.msra.mxu0 %v11250_v25  ;;  %6330 = vmatpush1.msra.mxu1 %v11253_v13 }
 0xd6a   :  { %6260 = vmatprep.subr.mxu0 %v11256_v9  ;;  %6331 = vmatprep.subr.mxu1 %v11259_v24 }
 0xd6b   :  { %6261 = vmatpush1.msra.mxu0 %v11262_v44  ;;  %6332 = vmatpush1.msra.mxu1 %v11265_v14 }
 0xd6c   :  { %6262 = vmatprep.subr.mxu0 %v11268_v7  ;;  %6333 = vmatprep.subr.mxu1 %v11271_v53 }
 0xd6d   :  { %6263 = vmatpush1.msra.mxu0 %v11274_v22  ;;  %6334 = vmatpush1.msra.mxu1 %v11277_v19 }
 0xd6e   :  { %6264 = vmatprep.subr.mxu0 %v11280_v12  ;;  %6335 = vmatprep.subr.mxu1 %v11283_v6 }
 0xd6f   :  { %6265 = vmatpush1.msra.mxu0 %v11286_v45  ;;  %6336 = vmatpush1.msra.mxu1 %v11289_v40 }
 0xd70   :  { %6266 = vmatprep.subr.mxu0 %v11292_v32  ;;  %6337 = vmatprep.subr.mxu1 %v11295_v29 }
 0xd71   :  { %6267 = vmatpush1.msra.mxu0 %v11298_v4  ;;  %6338 = vmatpush1.msra.mxu1 %v11301_v58 }
 0xd72   :  { %6268 = vmatprep.subr.mxu0 %v11304_v33  ;;  %6339 = vmatprep.subr.mxu1 %v11307_v26 }
 0xd73   :  { %6269 = vmatpush1.msra.mxu0 %v11310_v43  ;;  %6340 = vmatpush1.msra.mxu1 %v11313_v59 }
 0xd74   :  { %6270 = vmatprep.subr.mxu0 %v11316_v11  ;;  %6341 = vmatprep.subr.mxu1 %v11319_v56 }
 0xd75   :  { %6271 = vmatpush1.msra.mxu0 %v11323_v20  ;;  %6342 = vmatpush1.msra.mxu1 %v11326_v16 }
 0xd76   :  { %6272 = vmatprep.subr.mxu0 %v11329_v0  ;;  %6343 = vmatprep.subr.mxu1 %v11332_v37 }
 0xd77   :  { %6273 = vmatpush1.msra.mxu0 %v11337_v34  ;;  %6344 = vmatpush1.msra.mxu1 %v11340_v30 }
 0xd78   :  { %6274 = vmatprep.subr.mxu0 %v11343_v38  ;;  %6345 = vmatprep.subr.mxu1 %v11346_v15 }
 0xd79   :  { %6275 = vmatpush1.msra.mxu0 %v11350_v2  ;;  %6346 = vmatpush1.msra.mxu1 %v11353_v46 }
 0xd7a   :  { %6276 = vmatprep.subr.mxu0 %v11356_v17  ;;  %6347 = vmatprep.subr.mxu1 %v11359_v57 }
 0xd7b   :  { %6277 = vmatpush1.msra.mxu0 %v11362_v23  ;;  %6348 = vmatpush1.msra.mxu1 %v11365_v51 }
 0xd7c   :  { %6278 = vmatprep.subr.mxu0 %v11368_v10  ;;  %6349 = vmatprep.subr.mxu1 %v11371_v3 }
 0xd7d   :  { %6279 = vmatpush1.msra.mxu0 %v11374_v49  ;;  %6350 = vmatpush1.msra.mxu1 %v11377_v47 }
 0xd7e   :  { %6280 = vmatprep.subr.mxu0 %v11380_v60  ;;  %6351 = vmatprep.subr.mxu1 %v11383_v55 }
 0xd7f   :  { %6281 = vmatpush1.msra.mxu0 %v11386_v8  ;;  %6352 = vmatpush1.msra.mxu1 %v11389_v28  ;;  %v12931_v28 = vld [vmem:[#allocation57_spill] sm:$0xff] }
 0xd80   :  { %6282 = vmatprep.subr.mxu0 %v11392_v63  ;;  %6353 = vmatprep.subr.mxu1 %v11395_v41  ;;  %v12938_v63 = vld [vmem:[#allocation40_spill] sm:$0xff]  ;;  %v12939_v8 = vld [vmem:[#allocation37_spill] sm:$0xff] }
 0xd81   :  { %6283 = vmatpush1.msra.mxu0 %v11398_v36  ;;  %6354 = vmatpush1.msra.mxu1 %v11401_v52  ;;  %v12937_v36 = vld [vmem:[#allocation44_spill] sm:$0xff] }
 0xd82   :  { %6284 = vmatprep.subr.mxu0 %v11404_v39  ;;  %6355 = vmatprep.subr.mxu1 %v11407_v27 }
 0xd83   :  { %6285 = vmatpush1.msra.mxu0 %v11410_v50  ;;  %6356 = vmatpush1.msra.mxu1 %v12928_v18  ;;  %v12934_v18 = vld [vmem:[#allocation95_spill] sm:$0xff] }
 0xd84   :  { %6286 = vmatprep.subr.mxu0 %v12929_v31  ;;  %6357 = vmatprep.subr.mxu1 %v12930_v42  ;;  %v12932_v42 = vld [vmem:[#allocation27_spill] sm:$0xff] }
 0xd85   :  { %6287 = vmatpush1.msra.mxu0 %v12931_v28  ;;  %6358 = vmatpush1.msra.mxu1 %v11425_v1  ;;  %v12933_v28 = vld [vmem:[#allocation41_spill] sm:$0xff] }
 0xd86   :  { %6288 = vmatprep.subr.mxu0 %v11428_v62  ;;  %6359 = vmatprep.subr.mxu1 %v11431_v21  ;;  %v3981_v31 = vadd.f32 %v12933_v28, %v12932_v42  ;;  %v12935_v62 = vld [vmem:[#allocation92_spill] sm:$0xff]  ;;  %v4144_v28 = vadd.f32 %v12939_v8, %v12938_v63 }
 0xd87   :  { %6289 = vmatpush1.msra.mxu0 %v11434_v54  ;;  %6360 = vmatpush1.msra.mxu1 %v11438_v48  ;;  %v3983_v50 = vadd.f32 %v12935_v62, %v12934_v18 }
 0xd88   :  { %6322 = vmatprep.mubr.f32.mxu0 %v12883_v61  ;;  %6393 = vmatprep.mubr.f32.mxu1 %v12883_v61  ;;  %v12936_v61 = vld [vmem:[#allocation98_spill] sm:$0xff] }
 0xd89   :  { %6428 = vmatprep.subr.mxu0 %v11158_v5  ;;  %6499 = vmatprep.subr.mxu1 %v11161_v35  ;;  %v4142_v5 = vadd.f32 %v12937_v36, %v12936_v61 }
 0xe06   :  { %v5976_v1 = vpop.f32.mrf.mxu0  ;;  %v6047_v52 = vpop.f32.mrf.mxu1 }
 0xe07   :  { %v6052_v21 = vadd.f32 %v5976_v1, %v3981_v31  ;;  %v6054_v41 = vadd.f32 %v6047_v52, %v4142_v5 }
 0xe08   :  { %v5978_v27 = vpop.f32.mrf.mxu0  ;;  %v6049_v35 = vpop.f32.mrf.mxu1 }
 0xe09   :  { %v7183_v54 = vmul.f32 -1.442695, %v6052_v21  ;;  %v6053_v39 = vadd.f32 %v5978_v27, %v3983_v50  ;;  %v7185_v55 = vmul.f32 -1.442695, %v6054_v41  ;;  %v6055_v60 = vadd.f32 %v6049_v35, %v4144_v28  ;;  %v12941_v21 = vld [vmem:[#allocation93_spill] sm:$0xff] }
 0xe0a   :  { %v3989_v8 = vadd.f32 %v12941_v21, %v12934_v18  ;;  %v12942_v28 = vld [vmem:[#allocation33_spill] sm:$0xff]  ;;  %v12944_v21 = vld [vmem:[#allocation94_spill] sm:$0xff]  ;;  %v12967_v18 = vld [vmem:[#allocation31_spill] sm:$0xff] }
 0xe0b   :  { %7682 = vpow2.f32 %v7183_v54  ;;  %v7184_v48 = vmul.f32 -1.442695, %v6053_v39  ;;  %v12940_v39 = vld [vmem:[#allocation43_spill] sm:$0xff] }
 0xe0c   :  { %v3987_v50 = vadd.f32 %v12940_v39, %v12932_v42  ;;  %v12968_v42 = vmov 0.0  }
 0xe0d   :  { %7684 = vpow2.f32 %v7184_v48 }
 0xe0e   :  { %7686 = vpow2.f32 %v7185_v55 }
 0xe0f   :  { %7688 = vtanh.f32 %v6055_v60 }
 0xe18   :  { %v7683_v47 = vpop.eup %7682 }
 0xe19   :  { %v6065_v62 = vadd.f32 1.0, %v7683_v47 }
 0xe1a   :  { %v7685_v1 = vpop.eup %7684 }
 0xe1b   :  { %7690 = vrcp.f32 %v6065_v62  ;;  %v6066_v27 = vadd.f32 1.0, %v7685_v1  ;;  %v7687_v48 = vpop.eup %7686 }
 0xe1c   :  { %v7689_v36 = vpop.eup %7688  ;;  %v6067_v35 = vadd.f32 1.0, %v7687_v48 }
 0xe1d   :  { %7692 = vrcp.f32 %v6066_v27 }
 0xe27   :  { %v6146_v5 = vpop.f32.mrf.mxu0  ;;  %v6217_v39 = vpop.f32.mrf.mxu1 }
 0xe28   :  { %v7691_v52 = vpop.eup %7690  ;;  %v6222_v41 = vadd.f32 %v6146_v5, %v3987_v50  ;;  %v4148_v50 = vadd.f32 %v12944_v21, %v12936_v61  ;;  %v12945_v5 = vld [vmem:[#allocation99_spill] sm:$0xff]  ;;  %v12966_v61 = vld [vmem:[#allocation21_spill] sm:$0xff] }
 0xe29   :  { %v6076_v54 = vmul.f32 %v7691_v52, %v7689_v36  ;;  %v6148_v47 = vpop.f32.mrf.mxu0  ;;  %v6219_v36 = vpop.f32.mrf.mxu1  ;;  %v4150_v52 = vadd.f32 %v12945_v5, %v12938_v63  ;;  %v12965_v63 = vld [vmem:[#allocation19_spill] sm:$0xff] }
 0xe2a   :  { %v7693_v55 = vpop.eup %7692  ;;  %v7186_v31 = vmul.f32 -1.442695, %v6222_v41  ;;  %v6223_v60 = vadd.f32 %v6148_v47, %v3989_v8  ;;  %v6224_v48 = vadd.f32 %v6217_v39, %v4148_v50 }
 0xe2b   :  { %v6075_v62 = vmul.f32 %v7693_v55, %v12942_v28  ;;  %v6225_v41 = vadd.f32 %v6219_v36, %v4150_v52  ;;  %v12946_v36 = vld [vmem:[#allocation100_spill] sm:$0xff] }
 0xe2c   :  { %7694 = vpow2.f32 %v7186_v31  ;;  %v7187_v1 = vmul.f32 -1.442695, %v6223_v60  ;;  %v7188_v8 = vmul.f32 -1.442695, %v6224_v48 }
 0xe2d   :  { %7696 = vrcp.f32 %v6067_v35  ;;  %v11523_v27 = vadd.f32 %v6076_v54, %v6075_v62 }
 0xe2e   :  { %7698 = vpow2.f32 %v7187_v1 }
 0xe2f   :  { %12943 = vst [vmem:[#allocation69_spill] sm:$0xff] %v11523_v27  ;;  %7700 = vtanh.f32 %v11523_v27 }
 0xe30   :  { %7702 = vpow2.f32 %v7188_v8  ;;  %v12948_v8 = vld [vmem:[#allocation89_spill] sm:$0xff] }
 0xe31   :  { %7704 = vtanh.f32 %v6225_v41  ;;  %v12949_v41 = vld [vmem:[#allocation35_spill] sm:$0xff] }
 0xe39   :  { %v7695_v47 = vpop.eup %7694 }
 0xe3a   :  { %v7697_v55 = vpop.eup %7696  ;;  %v6235_v31 = vadd.f32 1.0, %v7695_v47  ;;  %v12950_v47 = vld [vmem:[#allocation101_spill] sm:$0xff] }
 0xe3b   :  { %v7699_v35 = vpop.eup %7698 }
 0xe3c   :  { %v7701_v54 = vpop.eup %7700  ;;  %7706 = vrcp.f32 %v6235_v31  ;;  %v6236_v60 = vadd.f32 1.0, %v7699_v35  ;;  %v12952_v31 = vld [vmem:[#allocation54_spill] sm:$0xff]  ;;  %v12953_v35 = vld [vmem:[#allocation55_spill] sm:$0xff] }
 0xe3d   :  { %v6079_v28 = vmul.f32 %v7701_v54, %v7697_v55  ;;  %v7703_v62 = vpop.eup %7702  ;;  %v12951_v55 = vld [vmem:[#allocation90_spill] sm:$0xff] }
 0xe3e   :  { %7708 = vrcp.f32 %v6236_v60  ;;  %v7705_v1 = vpop.eup %7704  ;;  %v6237_v48 = vadd.f32 1.0, %v7703_v62  ;;  %v12954_v54 = vld [vmem:[#allocation74_spill] sm:$0xff]  ;;  %v12955_v60 = vld [vmem:[#allocation67_spill] sm:$0xff] }
 0xe3f   :  { %6323 = vmatmul.mubr.f32.vlgmr.msra.gmra.mxu0 %v6079_v28  ;;  %6394 = vmatmul.mubr.f32.vlgmr.msra.gmra.mxu1 %v6079_v28  ;;  %v12956_v28 = vld [vmem:[#allocation68_spill] sm:$0xff]  ;;  %v12957_v62 = vld [vmem:[#allocation34_spill] sm:$0xff] }
 0xe40   :  { %6429 = vmatpush1.msra.mxu0 %v11250_v25  ;;  %6500 = vmatpush1.msra.mxu1 %v11253_v13  ;;  %7710 = vrcp.f32 %v6237_v48  ;;  %v12962_v48 = vld [vmem:[#allocation58_spill] sm:$0xff] }
 0xe41   :  { %6430 = vmatprep.subr.mxu0 %v11256_v9  ;;  %6501 = vmatprep.subr.mxu1 %v11259_v24 }
 0xe42   :  { %6431 = vmatpush1.msra.mxu0 %v11262_v44  ;;  %6502 = vmatpush1.msra.mxu1 %v11265_v14 }
 0xe43   :  { %6432 = vmatprep.subr.mxu0 %v11268_v7  ;;  %6503 = vmatprep.subr.mxu1 %v11271_v53 }
 0xe44   :  { %6433 = vmatpush1.msra.mxu0 %v11274_v22  ;;  %6504 = vmatpush1.msra.mxu1 %v11277_v19 }
 0xe45   :  { %6434 = vmatprep.subr.mxu0 %v11280_v12  ;;  %6505 = vmatprep.subr.mxu1 %v11283_v6 }
 0xe46   :  { %6435 = vmatpush1.msra.mxu0 %v11286_v45  ;;  %6506 = vmatpush1.msra.mxu1 %v11289_v40 }
 0xe47   :  { %6436 = vmatprep.subr.mxu0 %v11292_v32  ;;  %6507 = vmatprep.subr.mxu1 %v11295_v29 }
 0xe48   :  { %6437 = vmatpush1.msra.mxu0 %v11298_v4  ;;  %6508 = vmatpush1.msra.mxu1 %v11301_v58 }
 0xe49   :  { %v7707_v39 = vpop.eup %7706  ;;  %6438 = vmatprep.subr.mxu0 %v11304_v33  ;;  %6509 = vmatprep.subr.mxu1 %v11307_v26 }
 0xe4a   :  { %v6246_v21 = vmul.f32 %v7707_v39, %v7705_v1  ;;  %6439 = vmatpush1.msra.mxu0 %v11310_v43  ;;  %6510 = vmatpush1.msra.mxu1 %v11313_v59  ;;  %v12958_v1 = vld [vmem:[#allocation56_spill] sm:$0xff] }
 0xe4b   :  { %v7709_v50 = vpop.eup %7708  ;;  %6440 = vmatprep.subr.mxu0 %v11316_v11  ;;  %6511 = vmatprep.subr.mxu1 %v11319_v56  ;;  %v12959_v39 = vld [vmem:[#allocation28_spill] sm:$0xff] }
 0xe4c   :  { %v6245_v5 = vmul.f32 %v7709_v50, %v12946_v36  ;;  %6441 = vmatpush1.msra.mxu0 %v11323_v20  ;;  %6512 = vmatpush1.msra.mxu1 %v11326_v16  ;;  %v12961_v50 = vld [vmem:[#allocation23_spill] sm:$0xff] }
 0xe4d   :  { %6442 = vmatprep.subr.mxu0 %v11329_v0  ;;  %6513 = vmatprep.subr.mxu1 %v11332_v37  ;;  %v7711_v36 = vpop.eup %7710 }
 0xe4e   :  { %v11559_v52 = vadd.f32 %v6246_v21, %v6245_v5  ;;  %6443 = vmatpush1.msra.mxu0 %v11337_v34  ;;  %6514 = vmatpush1.msra.mxu1 %v11340_v30  ;;  %v12960_v21 = vld [vmem:[#allocation76_spill] sm:$0xff]  ;;  %v12963_v5 = vld [vmem:[#allocation57_spill] sm:$0xff] }
 0xe4f   :  { %6444 = vmatprep.subr.mxu0 %v11343_v38  ;;  %6515 = vmatprep.subr.mxu1 %v11346_v15 }
 0xe50   :  { %12947 = vst [vmem:[#allocation22_spill] sm:$0xff] %v11559_v52  ;;  %7712 = vtanh.f32 %v11559_v52  ;;  %6445 = vmatpush1.msra.mxu0 %v11350_v2  ;;  %6516 = vmatpush1.msra.mxu1 %v11353_v46  ;;  %v12964_v52 = vld [vmem:[#allocation47_spill] sm:$0xff] }
 0xe51   :  { %6446 = vmatprep.subr.mxu0 %v11356_v17  ;;  %6517 = vmatprep.subr.mxu1 %v11359_v57 }
 0xe52   :  { %6447 = vmatpush1.msra.mxu0 %v11362_v23  ;;  %6518 = vmatpush1.msra.mxu1 %v11365_v51 }
 0xe53   :  { %6448 = vmatprep.subr.mxu0 %v11368_v10  ;;  %6519 = vmatprep.subr.mxu1 %v11371_v3 }
 0xe54   :  { %6449 = vmatpush1.msra.mxu0 %v11374_v49  ;;  %6520 = vmatpush1.msra.mxu1 %v12948_v8 }
 0xe55   :  { %6450 = vmatprep.subr.mxu0 %v12949_v41  ;;  %6521 = vmatprep.subr.mxu1 %v12950_v47 }
 0xe56   :  { %6451 = vmatpush1.msra.mxu0 %v12951_v55  ;;  %6522 = vmatpush1.msra.mxu1 %v12952_v31 }
 0xe57   :  { %6452 = vmatprep.subr.mxu0 %v12953_v35  ;;  %6523 = vmatprep.subr.mxu1 %v12954_v54 }
 0xe58   :  { %6453 = vmatpush1.msra.mxu0 %v12955_v60  ;;  %6524 = vmatpush1.msra.mxu1 %v12956_v28 }
 0xe59   :  { %6454 = vmatprep.subr.mxu0 %v12957_v62  ;;  %6525 = vmatprep.subr.mxu1 %v12958_v1 }
 0xe5a   :  { %6455 = vmatpush1.msra.mxu0 %v12959_v39  ;;  %6526 = vmatpush1.msra.mxu1 %v12960_v21  ;;  %v12969_v21 = vld [vmem:[#allocation32_spill] sm:$0xff] }
 0xe5b   :  { %6456 = vmatprep.subr.mxu0 %v12961_v50  ;;  %6527 = vmatprep.subr.mxu1 %v12962_v48  ;;  %v12970_v48 = vld [vmem:[#allocation81_spill] sm:$0xff] }
 0xe5c   :  { %6457 = vmatpush1.msra.mxu0 %v12963_v5  ;;  %6528 = vmatpush1.msra.mxu1 %v12964_v52  ;;  %v12971_v5 = vld [vmem:[#allocation79_spill] sm:$0xff] }
 0xe5d   :  { %v7713_v27 = vpop.eup %7712  ;;  %6458 = vmatprep.subr.mxu0 %v12965_v63  ;;  %6529 = vmatprep.subr.mxu1 %v12966_v61 }
 0xe5e   :  { %6459 = vmatpush1.msra.mxu0 %v12967_v18  ;;  %6492 = vmatprep.mubr.f32.mxu0 %v12968_v42  ;;  %v6249_v39 = vmul.f32 %v7713_v27, %v7711_v36  ;;  %v12972_v27 = vld [vmem:[#allocation28_spill] sm:$0xff]  ;;  %v12974_v36 = vld [vmem:[#allocation58_spill] sm:$0xff] }
 0xe5f   :  { %6530 = vmatpush1.msra.mxu1 %v12969_v21  ;;  %6563 = vmatprep.mubr.f32.mxu1 %v12968_v42 }
 0xe60   :  { %6493 = vmatmul.mubr.f32.vlgmr.msra.gmra.mxu0 %v6249_v39  ;;  %6564 = vmatmul.mubr.f32.vlgmr.msra.gmra.mxu1 %v6249_v39  ;;  %v12973_v39 = vld [vmem:[#allocation76_spill] sm:$0xff] }
 0xe61   :  { %6606 = vmatprep.subr.mxu0 %v12970_v48  ;;  %6677 = vmatprep.subr.mxu1 %v12971_v5 }
 0xe62   :  { %6607 = vmatpush1.msra.mxu0 %v11250_v25  ;;  %6678 = vmatpush1.msra.mxu1 %v11253_v13 }
 0xe63   :  { %6608 = vmatprep.subr.mxu0 %v11256_v9  ;;  %6679 = vmatprep.subr.mxu1 %v11259_v24 }
 0xe64   :  { %6609 = vmatpush1.msra.mxu0 %v11262_v44  ;;  %6680 = vmatpush1.msra.mxu1 %v11265_v14 }
 0xe65   :  { %6610 = vmatprep.subr.mxu0 %v11268_v7  ;;  %6681 = vmatprep.subr.mxu1 %v11271_v53 }
 0xe66   :  { %6611 = vmatpush1.msra.mxu0 %v11274_v22  ;;  %6682 = vmatpush1.msra.mxu1 %v11277_v19 }
 0xe67   :  { %6612 = vmatprep.subr.mxu0 %v11280_v12  ;;  %6683 = vmatprep.subr.mxu1 %v11283_v6 }
 0xe68   :  { %6613 = vmatpush1.msra.mxu0 %v11286_v45  ;;  %6684 = vmatpush1.msra.mxu1 %v11289_v40 }
 0xe69   :  { %6614 = vmatprep.subr.mxu0 %v11292_v32  ;;  %6685 = vmatprep.subr.mxu1 %v11295_v29 }
 0xe6a   :  { %6615 = vmatpush1.msra.mxu0 %v11298_v4  ;;  %6686 = vmatpush1.msra.mxu1 %v11301_v58 }
 0xe6b   :  { %6616 = vmatprep.subr.mxu0 %v11304_v33  ;;  %6687 = vmatprep.subr.mxu1 %v11307_v26 }
 0xe6c   :  { %6617 = vmatpush1.msra.mxu0 %v11310_v43  ;;  %6688 = vmatpush1.msra.mxu1 %v11313_v59 }
 0xe6d   :  { %6618 = vmatprep.subr.mxu0 %v11316_v11  ;;  %6689 = vmatprep.subr.mxu1 %v11319_v56 }
 0xe6e   :  { %6619 = vmatpush1.msra.mxu0 %v11323_v20  ;;  %6690 = vmatpush1.msra.mxu1 %v11326_v16 }
 0xe6f   :  { %6620 = vmatprep.subr.mxu0 %v11329_v0  ;;  %6691 = vmatprep.subr.mxu1 %v11332_v37 }
 0xe70   :  { %6621 = vmatpush1.msra.mxu0 %v11337_v34  ;;  %6692 = vmatpush1.msra.mxu1 %v11340_v30 }
 0xe71   :  { %6622 = vmatprep.subr.mxu0 %v11343_v38  ;;  %6693 = vmatprep.subr.mxu1 %v11346_v15 }
 0xe72   :  { %6623 = vmatpush1.msra.mxu0 %v11350_v2  ;;  %6694 = vmatpush1.msra.mxu1 %v11353_v46 }
 0xe73   :  { %6624 = vmatprep.subr.mxu0 %v11356_v17  ;;  %6695 = vmatprep.subr.mxu1 %v11359_v57 }
 0xe74   :  { %6625 = vmatpush1.msra.mxu0 %v11362_v23  ;;  %6696 = vmatpush1.msra.mxu1 %v11365_v51 }
 0xe75   :  { %6626 = vmatprep.subr.mxu0 %v11368_v10  ;;  %6697 = vmatprep.subr.mxu1 %v11371_v3 }
 0xe76   :  { %6627 = vmatpush1.msra.mxu0 %v11374_v49  ;;  %6698 = vmatpush1.msra.mxu1 %v12948_v8 }
 0xe77   :  { %6628 = vmatprep.subr.mxu0 %v12949_v41  ;;  %6699 = vmatprep.subr.mxu1 %v12950_v47 }
 0xe78   :  { %6629 = vmatpush1.msra.mxu0 %v12951_v55  ;;  %6700 = vmatpush1.msra.mxu1 %v12952_v31  ;;  %v12975_v31 = vld [vmem:[#allocation57_spill] sm:$0xff]  ;;  %v12983_v55 = vld [vmem:[#allocation60_spill] sm:$0xff] }
 0xe79   :  { %6630 = vmatprep.subr.mxu0 %v12953_v35  ;;  %6701 = vmatprep.subr.mxu1 %v12954_v54  ;;  %v12982_v35 = vld [vmem:[#allocation40_spill] sm:$0xff] }
 0xe7a   :  { %6631 = vmatpush1.msra.mxu0 %v12955_v60  ;;  %6702 = vmatpush1.msra.mxu1 %v12956_v28  ;;  %v12981_v60 = vld [vmem:[#allocation39_spill] sm:$0xff] }
 0xe7b   :  { %6632 = vmatprep.subr.mxu0 %v12957_v62  ;;  %6703 = vmatprep.subr.mxu1 %v12958_v1 }
 0xe7c   :  { %6633 = vmatpush1.msra.mxu0 %v12972_v27  ;;  %6704 = vmatpush1.msra.mxu1 %v12973_v39  ;;  %v12978_v39 = vld [vmem:[#allocation95_spill] sm:$0xff] }
 0xe7d   :  { %6634 = vmatprep.subr.mxu0 %v12961_v50  ;;  %6705 = vmatprep.subr.mxu1 %v12974_v36  ;;  %v12976_v36 = vld [vmem:[#allocation27_spill] sm:$0xff] }
 0xe7e   :  { %6635 = vmatpush1.msra.mxu0 %v12975_v31  ;;  %6706 = vmatpush1.msra.mxu1 %v12964_v52  ;;  %v12977_v31 = vld [vmem:[#allocation38_spill] sm:$0xff] }
 0xe7f   :  { %6636 = vmatprep.subr.mxu0 %v12965_v63  ;;  %6707 = vmatprep.subr.mxu1 %v12966_v61  ;;  %v3993_v50 = vadd.f32 %v12977_v31, %v12976_v36  ;;  %v12979_v63 = vld [vmem:[#allocation14_spill] sm:$0xff]  ;;  %v4156_v31 = vadd.f32 %v12983_v55, %v12982_v35 }
 0xe80   :  { %6637 = vmatpush1.msra.mxu0 %v12967_v18  ;;  %6708 = vmatpush1.msra.mxu1 %v12969_v21  ;;  %v3995_v27 = vadd.f32 %v12979_v63, %v12978_v39 }
 0xe81   :  { %6670 = vmatprep.mubr.f32.mxu0 %v12968_v42  ;;  %6741 = vmatprep.mubr.f32.mxu1 %v12968_v42  ;;  %v12980_v42 = vld [vmem:[#allocation98_spill] sm:$0xff] }
 0xe82   :  { %6776 = vmatprep.subr.mxu0 %v12970_v48  ;;  %6847 = vmatprep.subr.mxu1 %v12971_v5  ;;  %v4154_v48 = vadd.f32 %v12981_v60, %v12980_v42 }
 0xeff   :  { %v6324_v52 = vpop.f32.mrf.mxu0  ;;  %v6395_v28 = vpop.f32.mrf.mxu1 }
 0xf00   :  { %v6400_v61 = vadd.f32 %v6324_v52, %v3993_v50  ;;  %v6402_v54 = vadd.f32 %v6395_v28, %v4154_v48  ;;  %v12985_v50 = vld [vmem:[#allocation53_spill] sm:$0xff] }
 0xf01   :  { %v6326_v1 = vpop.f32.mrf.mxu0  ;;  %v6397_v5 = vpop.f32.mrf.mxu1  ;;  %v4001_v55 = vadd.f32 %v12985_v50, %v12978_v39  ;;  %v12987_v50 = vld [vmem:[#allocation63_spill] sm:$0xff] }
 0xf02   :  { %v7189_v18 = vmul.f32 -1.442695, %v6400_v61  ;;  %v6401_v62 = vadd.f32 %v6326_v1, %v3995_v27  ;;  %v7191_v47 = vmul.f32 -1.442695, %v6402_v54  ;;  %v6403_v41 = vadd.f32 %v6397_v5, %v4156_v31  ;;  %v12986_v31 = vld [vmem:[#allocation69_spill] sm:$0xff] }
 0xf04   :  { %7714 = vpow2.f32 %v7189_v18  ;;  %v7190_v21 = vmul.f32 -1.442695, %v6401_v62  ;;  %v12984_v62 = vld [vmem:[#allocation45_spill] sm:$0xff] }
 0xf05   :  { %v3999_v1 = vadd.f32 %v12984_v62, %v12976_v36 }
 0xf06   :  { %7716 = vpow2.f32 %v7190_v21 }
 0xf07   :  { %7718 = vpow2.f32 %v7191_v47 }
 0xf08   :  { %7720 = vtanh.f32 %v6403_v41 }
 0xf11   :  { %v7715_v8 = vpop.eup %7714 }
 0xf12   :  { %v6413_v63 = vadd.f32 1.0, %v7715_v8 }
 0xf13   :  { %v7717_v52 = vpop.eup %7716 }
 0xf14   :  { %7722 = vrcp.f32 %v6413_v63  ;;  %v6414_v61 = vadd.f32 1.0, %v7717_v52  ;;  %v7719_v18 = vpop.eup %7718 }
 0xf15   :  { %v7721_v60 = vpop.eup %7720  ;;  %v6415_v27 = vadd.f32 1.0, %v7719_v18 }
 0xf16   :  { %7724 = vrcp.f32 %v6414_v61 }
 0xf20   :  { %v6494_v28 = vpop.f32.mrf.mxu0  ;;  %v6565_v62 = vpop.f32.mrf.mxu1 }
 0xf21   :  { %v7723_v21 = vpop.eup %7722  ;;  %v6570_v54 = vadd.f32 %v6494_v28, %v3999_v1  ;;  %v4160_v1 = vadd.f32 %v12987_v50, %v12980_v42  ;;  %v12988_v28 = vld [vmem:[#allocation24_spill] sm:$0xff]  ;;  %v6951_v50 = vld [vmem:[%s11836_s7 + $0x28] sm:$0xff] }
 0xf22   :  { %v6424_v48 = vmul.f32 %v7723_v21, %v7721_v60  ;;  %v6496_v8 = vpop.f32.mrf.mxu0  ;;  %v6567_v60 = vpop.f32.mrf.mxu1  ;;  %v4162_v21 = vadd.f32 %v12988_v28, %v12982_v35  ;;  %v6947_v28 = vld [vmem:[%s11836_s7 + $0x8] sm:$0xff] }
 0xf23   :  { %v7725_v47 = vpop.eup %7724  ;;  %v7192_v5 = vmul.f32 -1.442695, %v6570_v54  ;;  %v6571_v41 = vadd.f32 %v6496_v8, %v4001_v55  ;;  %v6572_v18 = vadd.f32 %v6565_v62, %v4160_v1  ;;  %v6952_v62 = vld [vmem:[%s11836_s7 + $0x30] sm:$0xff]  ;;  %v6950_v1 = vld [vmem:[%s11836_s7 + $0x20] sm:$0xff] }
 0xf24   :  { %v6423_v63 = vmul.f32 %v7725_v47, %v12986_v31  ;;  %v6573_v8 = vadd.f32 %v6567_v60, %v4162_v21  ;;  %v6948_v60 = vld [vmem:[%s11836_s7 + $0x10] sm:$0xff]  ;;  %v6946_v21 = vld [vmem:[%s11836_s7] sm:$0xff] }
 0xf25   :  { %7726 = vpow2.f32 %v7192_v5  ;;  %v7193_v52 = vmul.f32 -1.442695, %v6571_v41  ;;  %v7194_v55 = vmul.f32 -1.442695, %v6572_v18  ;;  %v6949_v18 = vld [vmem:[%s11836_s7 + $0x18] sm:$0xff] }
 0xf26   :  { %7728 = vrcp.f32 %v6415_v27  ;;  %v11679_v61 = vadd.f32 %v6424_v48, %v6423_v63  ;;  %v6954_v63 = vld [vmem:[%s11836_s7 + $0x40] sm:$0xff] }
 0xf27   :  { %7730 = vpow2.f32 %v7193_v52  ;;  %v6953_v52 = vld [vmem:[%s11836_s7 + $0x38] sm:$0xff] }
 0xf28   :  { %7732 = vtanh.f32 %v11679_v61 }
 0xf29   :  { %7734 = vpow2.f32 %v7194_v55  ;;  %v13012_v55 = vld [vmem:[#allocation64_spill] sm:$0xff] }
 0xf32   :  { %v7727_v54 = vpop.eup %7726 }
 0xf33   :  { %v7729_v47 = vpop.eup %7728  ;;  %v6583_v5 = vadd.f32 1.0, %v7727_v54  ;;  %v4005_v54 = vadd.f32 %v13012_v55, %v12976_v36 }
 0xf34   :  { %v7731_v27 = vpop.eup %7730 }
 0xf35   :  { %v7733_v48 = vpop.eup %7732  ;;  %7736 = vrcp.f32 %v6583_v5  ;;  %v6584_v41 = vadd.f32 1.0, %v7731_v27 }
 0xf36   :  { %7738 = vtanh.f32 %v6573_v8  ;;  %v6427_v31 = vmul.f32 %v7733_v48, %v7729_v47  ;;  %v13013_v47 = vld [vmem:[#allocation26_spill] sm:$0xff] }
 0xf37   :  { %7740 = vrcp.f32 %v6584_v41  ;;  %v4007_v5 = vadd.f32 %v13013_v47, %v12978_v39 }
 0xf38   :  { %6671 = vmatmul.mubr.f32.vlgmr.msra.gmra.mxu0 %v6427_v31  ;;  %6742 = vmatmul.mubr.f32.vlgmr.msra.gmra.mxu1 %v6427_v31 }
 0xf39   :  { %6777 = vmatpush1.msra.mxu0 %v11250_v25  ;;  %6848 = vmatpush1.msra.mxu1 %v11253_v13  ;;  %v7735_v25 = vpop.eup %7734 }
 0xf3a   :  { %6778 = vmatprep.subr.mxu0 %v11256_v9  ;;  %6849 = vmatprep.subr.mxu1 %v11259_v24 }
 0xf3b   :  { %6779 = vmatpush1.msra.mxu0 %v11262_v44  ;;  %6850 = vmatpush1.msra.mxu1 %v11265_v14  ;;  %v6585_v44 = vadd.f32 1.0, %v7735_v25  ;;  %v12989_v14 = vld [vmem:[#allocation22_spill] sm:$0xff] }
 0xf3c   :  { %6780 = vmatprep.subr.mxu0 %v11268_v7  ;;  %6851 = vmatprep.subr.mxu1 %v11271_v53 }
 0xf3d   :  { %6781 = vmatpush1.msra.mxu0 %v11274_v22  ;;  %6852 = vmatpush1.msra.mxu1 %v11277_v19  ;;  %7742 = vrcp.f32 %v6585_v44  ;;  %v12990_v19 = vld [vmem:[#allocation89_spill] sm:$0xff] }
 0xf3e   :  { %6782 = vmatprep.subr.mxu0 %v11280_v12  ;;  %6853 = vmatprep.subr.mxu1 %v11283_v6  ;;  %v12991_v12 = vld [vmem:[#allocation35_spill] sm:$0xff]  ;;  %v12992_v6 = vld [vmem:[#allocation101_spill] sm:$0xff] }
 0xf3f   :  { %6783 = vmatpush1.msra.mxu0 %v11286_v45  ;;  %6854 = vmatpush1.msra.mxu1 %v11289_v40  ;;  %v12993_v45 = vld [vmem:[#allocation90_spill] sm:$0xff] }
 0xf40   :  { %6784 = vmatprep.subr.mxu0 %v11292_v32  ;;  %6855 = vmatprep.subr.mxu1 %v11295_v29  ;;  %v12994_v40 = vld [vmem:[#allocation54_spill] sm:$0xff]  ;;  %v12995_v32 = vld [vmem:[#allocation55_spill] sm:$0xff] }
 0xf41   :  { %6785 = vmatpush1.msra.mxu0 %v11298_v4  ;;  %6856 = vmatpush1.msra.mxu1 %v11301_v58  ;;  %v12996_v29 = vld [vmem:[#allocation74_spill] sm:$0xff]  ;;  %v12997_v4 = vld [vmem:[#allocation67_spill] sm:$0xff]  ;;  %v12998_v58 = vld [vmem:[#allocation68_spill] sm:$0xff] }
 0xf42   :  { %v7737_v13 = vpop.eup %7736  ;;  %6786 = vmatprep.subr.mxu0 %v11304_v33  ;;  %6857 = vmatprep.subr.mxu1 %v11307_v26  ;;  %v12999_v33 = vld [vmem:[#allocation34_spill] sm:$0xff]  ;;  %v13000_v26 = vld [vmem:[#allocation56_spill] sm:$0xff] }
 0xf43   :  { %v7739_v9 = vpop.eup %7738  ;;  %6787 = vmatpush1.msra.mxu0 %v11310_v43  ;;  %6858 = vmatpush1.msra.mxu1 %v11313_v59  ;;  %v13001_v43 = vld [vmem:[#allocation28_spill] sm:$0xff] }
 0xf44   :  { %v7741_v24 = vpop.eup %7740  ;;  %6788 = vmatprep.subr.mxu0 %v11316_v11  ;;  %6859 = vmatprep.subr.mxu1 %v11319_v56  ;;  %v6594_v53 = vmul.f32 %v7739_v9, %v7737_v13  ;;  %v13002_v59 = vld [vmem:[#allocation76_spill] sm:$0xff]  ;;  %v13003_v11 = vld [vmem:[#allocation23_spill] sm:$0xff]  ;;  %v13004_v56 = vld [vmem:[#allocation58_spill] sm:$0xff] }
 0xf45   :  { %v6593_v7 = vmul.f32 %v7741_v24, %v12989_v14  ;;  %6789 = vmatpush1.msra.mxu0 %v11323_v20  ;;  %6860 = vmatpush1.msra.mxu1 %v11326_v16  ;;  %v13005_v16 = vld [vmem:[#allocation57_spill] sm:$0xff]  ;;  %v13014_v9 = vld [vmem:[#allocation48_spill] sm:$0xff] }
 0xf46   :  { %6790 = vmatprep.subr.mxu0 %v11329_v0  ;;  %6861 = vmatprep.subr.mxu1 %v11332_v37  ;;  %v13006_v0 = vld [vmem:[#allocation47_spill] sm:$0xff]  ;;  %v4166_v24 = vadd.f32 %v13014_v9, %v12980_v42 }
 0xf47   :  { %v11715_v22 = vadd.f32 %v6594_v53, %v6593_v7  ;;  %6791 = vmatpush1.msra.mxu0 %v11337_v34  ;;  %6862 = vmatpush1.msra.mxu1 %v11340_v30  ;;  %v13007_v34 = vld [vmem:[#allocation19_spill] sm:$0xff]  ;;  %v13008_v30 = vld [vmem:[#allocation21_spill] sm:$0xff]  ;;  %v13015_v7 = vld [vmem:[#allocation52_spill] sm:$0xff] }
 0xf48   :  { %6792 = vmatprep.subr.mxu0 %v11343_v38  ;;  %6863 = vmatprep.subr.mxu1 %v11346_v15  ;;  %v13009_v38 = vld [vmem:[#allocation31_spill] sm:$0xff]  ;;  %v13010_v15 = vmov 0.0   ;;  %v4168_v53 = vadd.f32 %v13015_v7, %v12982_v35 }
 0xf49   :  { %7744 = vtanh.f32 %v11715_v22  ;;  %6793 = vmatpush1.msra.mxu0 %v11350_v2  ;;  %6864 = vmatpush1.msra.mxu1 %v11353_v46  ;;  %v13011_v46 = vld [vmem:[#allocation32_spill] sm:$0xff] }
 0xf4a   :  { %6794 = vmatprep.subr.mxu0 %v11356_v17  ;;  %6865 = vmatprep.subr.mxu1 %v11359_v57  ;;  %v7743_v20 = vpop.eup %7742  ;;  %v6961_v17 = vld [vmem:[%s11836_s7 + $0x78] sm:$0xff]  ;;  %v6960_v57 = vld [vmem:[%s11836_s7 + $0x70] sm:$0xff] }
 0xf4b   :  { %6795 = vmatpush1.msra.mxu0 %v11362_v23  ;;  %6866 = vmatpush1.msra.mxu1 %v11365_v51  ;;  %v6959_v23 = vld [vmem:[%s11836_s7 + $0x68] sm:$0xff]  ;;  %v6958_v51 = vld [vmem:[%s11836_s7 + $0x60] sm:$0xff] }
 0xf4c   :  { %6796 = vmatprep.subr.mxu0 %v11368_v10  ;;  %6867 = vmatprep.subr.mxu1 %v11371_v3  ;;  %v6957_v10 = vld [vmem:[%s11836_s7 + $0x58] sm:$0xff]  ;;  %v6956_v3 = vld [vmem:[%s11836_s7 + $0x50] sm:$0xff] }
 0xf4d   :  { %6797 = vmatpush1.msra.mxu0 %v11374_v49  ;;  %6868 = vmatpush1.msra.mxu1 %v12990_v19  ;;  %v6955_v49 = vld [vmem:[%s11836_s7 + $0x48] sm:$0xff] }
 0xf4e   :  { %6798 = vmatprep.subr.mxu0 %v12991_v12  ;;  %6869 = vmatprep.subr.mxu1 %v12992_v6 }
 0xf4f   :  { %6799 = vmatpush1.msra.mxu0 %v12993_v45  ;;  %6870 = vmatpush1.msra.mxu1 %v12994_v40 }
 0xf50   :  { %6800 = vmatprep.subr.mxu0 %v12995_v32  ;;  %6871 = vmatprep.subr.mxu1 %v12996_v29 }
 0xf51   :  { %6801 = vmatpush1.msra.mxu0 %v12997_v4  ;;  %6872 = vmatpush1.msra.mxu1 %v12998_v58  ;;  %v13016_v4 = vld [vmem:[#allocation46_spill] sm:$0xff] }
 0xf52   :  { %6802 = vmatprep.subr.mxu0 %v12999_v33  ;;  %6873 = vmatprep.subr.mxu1 %v13000_v26  ;;  %v4011_v58 = vadd.f32 %v13016_v4, %v12976_v36 }
 0xf53   :  { %6803 = vmatpush1.msra.mxu0 %v13001_v43  ;;  %6874 = vmatpush1.msra.mxu1 %v13002_v59  ;;  %v13017_v59 = vld [vmem:[#allocation96_spill] sm:$0xff] }
 0xf54   :  { %6804 = vmatprep.subr.mxu0 %v13003_v11  ;;  %6875 = vmatprep.subr.mxu1 %v13004_v56  ;;  %v4013_v11 = vadd.f32 %v13017_v59, %v12978_v39 }
 0xf55   :  { %6805 = vmatpush1.msra.mxu0 %v13005_v16  ;;  %6876 = vmatpush1.msra.mxu1 %v13006_v0 }
 0xf56   :  { %v7745_v37 = vpop.eup %7744  ;;  %6806 = vmatprep.subr.mxu0 %v13007_v34  ;;  %6877 = vmatprep.subr.mxu1 %v13008_v30 }
 0xf57   :  { %6807 = vmatpush1.msra.mxu0 %v13009_v38  ;;  %6840 = vmatprep.mubr.f32.mxu0 %v13010_v15  ;;  %v6597_v2 = vmul.f32 %v7745_v37, %v7743_v20 }
 0xf58   :  { %6878 = vmatpush1.msra.mxu1 %v13011_v46  ;;  %6911 = vmatprep.mubr.f32.mxu1 %v13010_v15  ;;  %v13018_v46 = vld [vmem:[#allocation51_spill] sm:$0xff] }
 0xf59   :  { %6841 = vmatmul.mubr.f32.vlgmr.msra.gmra.mxu0 %v6597_v2  ;;  %6912 = vmatmul.mubr.f32.vlgmr.msra.gmra.mxu1 %v6597_v2 }
 0xf5a   :  { %7220 = vmatprep.subr.mxu0 %v6961_v17 }
 0xf5b   :  { %7221 = vmatpush3.msra.mxu0 %v6961_v17  ;;  %v4172_v17 = vadd.f32 %v13018_v46, %v12980_v42 }
 0xf5c   :  { %7222 = vmatprep.subr.mxu0 %v6960_v57 }
 0xf5d   :  { %7223 = vmatpush3.msra.mxu0 %v6960_v57 }
 0xf5e   :  { %7224 = vmatprep.subr.mxu0 %v6959_v23 }
 0xf5f   :  { %7225 = vmatpush3.msra.mxu0 %v6959_v23  ;;  %v13019_v23 = vld [vmem:[#allocation97_spill] sm:$0xff] }
 0xf60   :  { %7226 = vmatprep.subr.mxu0 %v6958_v51 }
 0xf61   :  { %7227 = vmatpush3.msra.mxu0 %v6958_v51  ;;  %v4174_v51 = vadd.f32 %v13019_v23, %v12982_v35 }
 0xf62   :  { %7228 = vmatprep.subr.mxu0 %v6957_v10 }
 0xf63   :  { %7229 = vmatpush3.msra.mxu0 %v6957_v10 }
 0xf64   :  { %7230 = vmatprep.subr.mxu0 %v6956_v3 }
 0xf65   :  { %7231 = vmatpush3.msra.mxu0 %v6956_v3 }
 0xf66   :  { %7232 = vmatprep.subr.mxu0 %v6955_v49 }
 0xf67   :  { %7233 = vmatpush3.msra.mxu0 %v6955_v49 }
 0xf68   :  { %7234 = vmatprep.subr.mxu0 %v6954_v63 }
 0xf69   :  { %7235 = vmatpush3.msra.mxu0 %v6954_v63 }
 0xf6a   :  { %7236 = vmatprep.subr.mxu0 %v6953_v52 }
 0xf6b   :  { %7237 = vmatpush3.msra.mxu0 %v6953_v52 }
 0xf6c   :  { %7238 = vmatprep.subr.mxu0 %v6952_v62 }
 0xf6d   :  { %7239 = vmatpush3.msra.mxu0 %v6952_v62 }
 0xf6e   :  { %7240 = vmatprep.subr.mxu0 %v6951_v50 }
 0xf6f   :  { %7241 = vmatpush3.msra.mxu0 %v6951_v50 }
 0xf70   :  { %7242 = vmatprep.subr.mxu0 %v6950_v1 }
 0xf71   :  { %7243 = vmatpush3.msra.mxu0 %v6950_v1 }
 0xf72   :  { %7244 = vmatprep.subr.mxu0 %v6949_v18 }
 0xf73   :  { %7245 = vmatpush3.msra.mxu0 %v6949_v18 }
 0xf74   :  { %7246 = vmatprep.subr.mxu0 %v6948_v60 }
 0xf75   :  { %7247 = vmatpush3.msra.mxu0 %v6948_v60 }
 0xf76   :  { %7248 = vmatprep.subr.mxu0 %v6947_v28 }
 0xf77   :  { %7249 = vmatpush3.msra.mxu0 %v6947_v28 }
 0xf78   :  { %7250 = vmatprep.subr.mxu0 %v6946_v21 }
 0xf79   :  { %7251 = vmatpush3.msra.mxu0 %v6946_v21 }
 0xff8   :  { %v6672_v8 = vpop.f32.mrf.mxu0  ;;  %v6743_v13 = vpop.f32.mrf.mxu1 }
 0xff9   :  { %v6748_v27 = vadd.f32 %v6672_v8, %v4005_v54  ;;  %v6750_v44 = vadd.f32 %v6743_v13, %v4166_v24 }
 0xffa   :  { %v6674_v48 = vpop.f32.mrf.mxu0  ;;  %v6745_v14 = vpop.f32.mrf.mxu1 }
 0xffb   :  { %v7195_v41 = vmul.f32 -1.442695, %v6748_v27  ;;  %v6749_v31 = vadd.f32 %v6674_v48, %v4007_v5  ;;  %v7197_v19 = vmul.f32 -1.442695, %v6750_v44  ;;  %v6751_v12 = vadd.f32 %v6745_v14, %v4168_v53  ;;  %v7201_v48 = vld [vmem:[%s11837_s8] ss:$0 sm:$0xff] }
 0xffd   :  { %7746 = vpow2.f32 %v7195_v41  ;;  %v7196_v25 = vmul.f32 -1.442695, %v6749_v31 }
 0xfff   :  { %7748 = vpow2.f32 %v7196_v25 }
0x1000   :  { %7750 = vpow2.f32 %v7197_v19 }
0x1001   :  { %7752 = vtanh.f32 %v6751_v12 }
0x100a   :  { %v7747_v6 = vpop.eup %7746 }
0x100b   :  { %v6761_v45 = vadd.f32 1.0, %v7747_v6 }
0x100c   :  { %v7749_v40 = vpop.eup %7748 }
0x100d   :  { %7754 = vrcp.f32 %v6761_v45  ;;  %v6762_v32 = vadd.f32 1.0, %v7749_v40  ;;  %v7751_v29 = vpop.eup %7750 }
0x100e   :  { %v7753_v33 = vpop.eup %7752  ;;  %v6763_v20 = vadd.f32 1.0, %v7751_v29 }
0x100f   :  { %7756 = vrcp.f32 %v6762_v32 }
0x1019   :  { %v6842_v26 = vpop.f32.mrf.mxu0  ;;  %v6913_v36 = vpop.f32.mrf.mxu1 }
0x101a   :  { %v7755_v43 = vpop.eup %7754  ;;  %v6918_v56 = vadd.f32 %v6842_v26, %v4011_v58  ;;  %v6920_v39 = vadd.f32 %v6913_v36, %v4172_v17 }
0x101b   :  { %v6772_v16 = vmul.f32 %v7755_v43, %v7753_v33  ;;  %v6844_v0 = vpop.f32.mrf.mxu0  ;;  %v6915_v57 = vpop.f32.mrf.mxu1 }
0x101c   :  { %v7757_v37 = vpop.eup %7756  ;;  %v7198_v34 = vmul.f32 -1.442695, %v6918_v56  ;;  %v6919_v30 = vadd.f32 %v6844_v0, %v4013_v11  ;;  %v7200_v10 = vmul.f32 -1.442695, %v6920_v39  ;;  %v6921_v3 = vadd.f32 %v6915_v57, %v4174_v51 }
0x101d   :  { %v6771_v38 = vmul.f32 %v7757_v37, %v11679_v61 }
0x101e   :  { %7758 = vpow2.f32 %v7198_v34  ;;  %v7199_v15 = vmul.f32 -1.442695, %v6919_v30 }
0x101f   :  { %7760 = vrcp.f32 %v6763_v20  ;;  %v6773_v2 = vadd.f32 %v6772_v16, %v6771_v38 }
0x1020   :  { %7762 = vpow2.f32 %v7199_v15 }
0x1021   :  { %7764 = vtanh.f32 %v6773_v2 }
0x1022   :  { %7766 = vpow2.f32 %v7200_v10 }
0x1023   :  { %7768 = vtanh.f32 %v6921_v3 }
0x102b   :  { %v7759_v49 = vpop.eup %7758 }
0x102c   :  { %v7761_v63 = vpop.eup %7760  ;;  %v6931_v61 = vadd.f32 1.0, %v7759_v49 }
0x102d   :  { %v7763_v52 = vpop.eup %7762 }
0x102e   :  { %v7765_v62 = vpop.eup %7764  ;;  %7770 = vrcp.f32 %v6931_v61  ;;  %v6932_v50 = vadd.f32 1.0, %v7763_v52 }
0x102f   :  { %v6775_v1 = vmul.f32 %v7765_v62, %v7761_v63  ;;  %v7767_v42 = vpop.eup %7766 }
0x1030   :  { %7772 = vrcp.f32 %v6932_v50  ;;  %v7769_v18 = vpop.eup %7768  ;;  %v6933_v35 = vadd.f32 1.0, %v7767_v42 }
0x1031   :  { %7252 = vmatprep.mubr.f32.mxu0 %v6775_v1 }
0x1032   :  { %7774 = vrcp.f32 %v6933_v35 }
0x103b   :  { %v7771_v60 = vpop.eup %7770 }
0x103c   :  { %v6942_v28 = vmul.f32 %v7771_v60, %v7769_v18 }
0x103d   :  { %v7773_v21 = vpop.eup %7772 }
0x103e   :  { %v6941_v55 = vmul.f32 %v7773_v21, %v11715_v22 }
0x103f   :  { %v7775_v8 = vpop.eup %7774 }
0x1040   :  { %v6943_v54 = vadd.f32 %v6942_v28, %v6941_v55 }
0x1042   :  { %7776 = vtanh.f32 %v6943_v54 }
0x104f   :  { %v7777_v47 = vpop.eup %7776 }
0x1050   :  { %v6945_v5 = vmul.f32 %v7777_v47, %v7775_v8 }
0x1052   :  { %7253 = vmatmul.mubr.f32.vlgmr.msra.gmra.mxu0 %v6945_v5 }
0x1112   :  { %v7254_v27 = vpop.f32.mrf.mxu0 }
0x1113   :  { %v7041_v25 = vadd.f32 %v7254_v27, %v7201_v48 }
0x1114   :  { %v7035_v41 = vpop.f32.mrf.mxu0 }
0x1115   :  { %v7036_v31 = vadd.f32 %v7201_v48, %v7035_v41 }
0x1117   :  { %7044 = vmax.xlane.f32.xlu0 %v7036_v31 }
0x111b   :  { %7046 = vmax.xlane.f32.xlu0 %v7041_v25 }
0x11a0   :  { %v7045_v13 = vpop.xlane.xlu0 %7044 }
0x11a1   :  { %v7048_v9 = vsub.f32 %v7036_v31, %v7045_v13 }
0x11a3   :  { %v7050_v22 = vmul.f32 1.442695, %v7048_v9 }
0x11a4   :  { %v7047_v24 = vpop.xlane.xlu0 %7046 }
0x11a5   :  { %v7049_v44 = vsub.f32 %v7041_v25, %v7047_v24  ;;  %7778 = vpow2.f32 %v7050_v22 }
0x11a7   :  { %v7052_v14 = vmul.f32 1.442695, %v7049_v44 }
0x11a9   :  { %7780 = vpow2.f32 %v7052_v14 }
0x11b2   :  { %v7779_v7 = vpop.eup %7778 }
0x11b3   :  { %7054 = vadd.xlane.f32.xlu1 %v7779_v7 }
0x11b6   :  { %v7781_v53 = vpop.eup %7780 }
0x11b7   :  { %7056 = vadd.xlane.f32.xlu1 %v7781_v53 }
0x123c   :  { %v7055_v19 = vpop.xlane.xlu1 %7054 }
0x123d   :  { %7782 = vlog2.f32 %v7055_v19 }
0x1240   :  { %v7057_v12 = vpop.xlane.xlu1 %7056 }
0x1241   :  { %7784 = vlog2.f32 %v7057_v12 }
0x124a   :  { %v7783_v6 = vpop.eup %7782 }
0x124b   :  { %v7059_v45 = vmul.f32 0.6931472, %v7783_v6 }
0x124d   :  { %v7062_v40 = vsub.f32 %v7048_v9, %v7059_v45 }
0x124e   :  { %v7785_v32 = vpop.eup %7784 }
0x124f   :  { %7064 = vst [vmem:[%s11838_s9] sm:$0xff] %v7062_v40  ;;  %v7061_v29 = vmul.f32 0.6931472, %v7785_v32 }
0x1251   :  { %v7063_v4 = vsub.f32 %v7049_v44, %v7061_v29 }
0x1253   :  { %7065 = vst [vmem:[%s11838_s9 + $0x8] sm:$0xff] %v7063_v4 }
0x1254   :  { %7070 = vsyncpa [#allocation5], 1 }
0x1255   :  { %7071 = vsyncpa [#allocation7], 1 }
0x1256   :  { %7072 = vsyncpa [#allocation10], 1 }

</bundles_post_ra>
